<compile_context>
chip_gen: v7x
topology: tpu7x:2x2x1
jax: 0.10.0
libtpu: 0.0.40
codegen_flags: <defaults>
</compile_context>

<pallas_src>
import functools
import math

import jax
import jax.numpy as jnp
from jax.experimental import pallas as pl
from jax.experimental.pallas import tpu as pltpu


# ----------------------------------------------------------------------------
# Fused kernel: whole ScoreWidgetsLoss forward for one image (grid over batch)
# ----------------------------------------------------------------------------

def _score_widgets_loss_kernel(
    # --- inputs -------------------------------------------------------------
    x_ref, t_ref, cw_ref, masks_ref,
    mw1, mb1, mw2, mb2, mw3, mb3, mw4, mb4, mw5s, mw5u, mb5, mw6, mb6, mwf, mbf,
    bw1x, bw1m, bb1, bw2, bb2, bw3, bb3, bw4, bb4, bw5s, bw5u, bb5, bw6, bb6,
    bwf, bbf,
    # --- outputs ------------------------------------------------------------
    pred_ref, loss_ref,
    # --- VMEM scratch (per-image activations, lane-dense flat pixel axis) ----
    x_pad, m_pad, pA, pS, pP, pB, pD, up_pad, pU,
    *, H, W, GUARD,
):
    HW = H * W

    # precomputed (1, HW) masks over the flat pixel (lane) axis
    keep_l1 = masks_ref[0:1, :]      # 0 where w == 0        (full-res left)
    keep_r1 = masks_ref[1:2, :]      # 0 where w == W-1      (full-res right)
    keep_l2 = masks_ref[2:3, :]      # 0 where w <  2        (half-res left)
    keep_r2 = masks_ref[3:4, :]      # 0 where w >= W-2      (half-res right)
    w_odd = masks_ref[4:5, :] > 0.5
    h_odd = masks_ref[5:6, :] > 0.5
    keep_clip = masks_ref[6:7, :]    # 1 inside [clip_margin, W - clip_margin)

    # zero ONLY the guard lanes; interiors are always overwritten before reads
    for ref in (x_pad, m_pad, pA, pS, pP, pB, pD, up_pad, pU):
        ref[:, 0:GUARD] = jnp.zeros((ref.shape[0], GUARD), ref.dtype)
        ref[:, GUARD + HW:] = jnp.zeros((ref.shape[0], GUARD), ref.dtype)

    # stage the network input: one dense (Cin, H*W) store
    x_pad[:, GUARD:GUARD + HW] = x_ref[0].astype(x_pad.dtype)

    # ---------------- fused building blocks (all VMEM-resident) --------------
    def conv3x3(groups, b_ref, dil):
        """'same' 3x3 conv.  groups: [(field_ref (Cin_g, R) bf16,
        w_ref (9*Cout, Cin_g) bf16)].  One MXU matmul per group over the whole
        padded field, then 9 shifted lane-window f32 adds.  dil=2 runs the
        conv on the dilated (even-lane) half-resolution grid."""
        cout = b_ref.shape[0]
        y = None
        for src_ref, w_ref in groups:
            part = jnp.dot(w_ref[...], src_ref[...],
                           preferred_element_type=jnp.float32)   # (9*Cout, R)
            y = part if y is None else y + part
        keep_l = keep_l1 if dil == 1 else keep_l2
        keep_r = keep_r1 if dil == 1 else keep_r2
        acc = None
        for ky in range(3):
            for kx in range(3):
                tap = 3 * ky + kx
                off = GUARD + dil * ((ky - 1) * W + (kx - 1))
                win = y[tap * cout:(tap + 1) * cout, off:off + HW]
                if kx == 0:
                    win = win * keep_l        # row wrap-around -> zero
                elif kx == 2:
                    win = win * keep_r
                acc = win if acc is None else acc + win
        return jnp.maximum(acc + b_ref[...], 0.0)              # (Cout, HW) f32

    def conv1x1(val, w_ref, b_ref, sigmoid):
        a = jnp.dot(w_ref[...], val.astype(jnp.bfloat16),
                    preferred_element_type=jnp.float32) + b_ref[...]
        return jax.nn.sigmoid(a) if sigmoid else a

    def store(dst, val):
        dst[:, GUARD:GUARD + HW] = val.astype(dst.dtype)

    def pool2x2(src, dst):
        """2x2 max-pool onto the dilated half-res grid (valid at even (h,w))."""
        a = src[:, GUARD:GUARD + HW]
        b = src[:, GUARD + 1:GUARD + 1 + HW]
        c = src[:, GUARD + W:GUARD + W + HW]
        d = src[:, GUARD + W + 1:GUARD + W + 1 + HW]
        dst[:, GUARD:GUARD + HW] = jnp.maximum(jnp.maximum(a, b),
                                               jnp.maximum(c, d))

    def upsample2x2(src, dst):
        """nearest 2x upsample from the dilated grid: up[h,w] = src[h&~1, w&~1]
        via whole-field shifted loads + parity selects (no loops/gathers)."""
        ee = src[:, GUARD:GUARD + HW]
        eo = src[:, GUARD - 1:GUARD - 1 + HW]
        oe = src[:, GUARD - W:GUARD - W + HW]
        oo = src[:, GUARD - W - 1:GUARD - W - 1 + HW]
        row_h = jnp.where(w_odd, eo, ee)
        row_hm1 = jnp.where(w_odd, oo, oe)
        dst[:, GUARD:GUARD + HW] = jnp.where(h_odd, row_hm1, row_h)

    def unet(in_groups, b1, w2, b2, w3, b3, w4, b4, w5s, w5u, b5, w6, b6):
        """Depth-2 double-conv UNet; every intermediate stays in VMEM."""
        store(pA, conv3x3(in_groups, b1, dil=1))                   # conv1
        store(pS, conv3x3([(pA, w2)], b2, dil=1))                  # conv2 skip
        pool2x2(pS, pP)
        store(pB, conv3x3([(pP, w3)], b3, dil=2))                  # conv3
        store(pD, conv3x3([(pB, w4)], b4, dil=2))                  # conv4
        upsample2x2(pD, up_pad)
        # concat([skip, upsample]) realized as split-weight accumulation
        store(pU, conv3x3([(pS, w5s), (up_pad, w5u)], b5, dil=1))  # conv5
        return conv3x3([(pU, w6)], b6, dil=1)                      # conv6

    # ---------------- mask UNet ----------------------------------------------
    ym = unet([(x_pad, mw1)], mb1, mw2, mb2, mw3, mb3, mw4, mb4,
              mw5s, mw5u, mb5, mw6, mb6)
    store(m_pad, conv1x1(ym, mwf, mbf, sigmoid=False))

    # ---------------- backbone UNet on concat([x, mask]) ---------------------
    yb = unet([(x_pad, bw1x), (m_pad, bw1m)], bb1, bw2, bb2, bw3, bb3,
              bw4, bb4, bw5s, bw5u, bb5, bw6, bb6)
    pred = conv1x1(yb, bwf, bbf, sigmoid=True)                     # (Cout, HW)
    pred_ref[0] = pred

    # ---------------- fused loss head: clipped, channel-weighted BCE ---------
    # (per-image partial sum; torch-style mean normalization in the wrapper)
    p = jnp.clip(pred, 1e-7, 1.0 - 1e-7)
    t = t_ref[0]
    bce = -(t * jnp.log(p) + (1.0 - t) * jnp.log(1.0 - p))
    w_bce = bce * cw_ref[...] * keep_clip
    s = jnp.sum(w_bce, axis=1, keepdims=True)
    s = jnp.sum(s, axis=0, keepdims=True)                          # (1, 1)
    loss_ref[0] = s


# ----------------------------------------------------------------------------
# Parameter init (kaiming-uniform-like, nn.Conv2d defaults; f32 master copies)
# ----------------------------------------------------------------------------

def _uniform(key, shape, bound):
    return jax.random.uniform(key, shape, jnp.float32, -bound, bound)


def init_unet_params(key, in_groups, out_ch, init_width):
    """Depth-2 double-conv UNet parameters.

    3x3 conv weights are stacked as (9*Cout, Cin): row index = tap*Cout + co
    with tap = 3*ky + kx, i.e. W9[(3*ky+kx)*Cout + co, ci] ==
    torch_conv.weight[co, ci, ky, kx].  The concat convs (conv1 of the
    backbone, conv5) keep per-group splits so the kernel never materializes a
    channel concat; the split order must match the torch.cat order when
    porting trained weights.
    """
    w0, w1 = init_width, 2 * init_width
    keys = iter(jax.random.split(key, 24))
    p = {}
    bnd = 1.0 / math.sqrt(9 * sum(in_groups))
    p["w1"] = tuple(_uniform(next(keys), (9 * w0, g), bnd) for g in in_groups)
    p["b1"] = _uniform(next(keys), (w0, 1), bnd)
    bnd = 1.0 / math.sqrt(9 * w0)
    p["w2"] = _uniform(next(keys), (9 * w0, w0), bnd)
    p["b2"] = _uniform(next(keys), (w0, 1), bnd)
    p["w3"] = _uniform(next(keys), (9 * w1, w0), bnd)
    p["b3"] = _uniform(next(keys), (w1, 1), bnd)
    bnd = 1.0 / math.sqrt(9 * w1)
    p["w4"] = _uniform(next(keys), (9 * w1, w1), bnd)
    p["b4"] = _uniform(next(keys), (w1, 1), bnd)
    bnd = 1.0 / math.sqrt(9 * (w0 + w1))        # fan_in of the concat conv
    p["w5_skip"] = _uniform(next(keys), (9 * w0, w0), bnd)
    p["w5_up"] = _uniform(next(keys), (9 * w0, w1), bnd)
    p["b5"] = _uniform(next(keys), (w0, 1), bnd)
    bnd = 1.0 / math.sqrt(9 * w0)
    p["w6"] = _uniform(next(keys), (9 * w0, w0), bnd)
    p["b6"] = _uniform(next(keys), (w0, 1), bnd)
    bnd = 1.0 / math.sqrt(w0)
    p["wf"] = _uniform(next(keys), (out_ch, w0), bnd)
    p["bf"] = _uniform(next(keys), (out_ch, 1), bnd)
    return p


def init_score_widgets(key, in_channels, out_channels, mask_cfg, backbone_cfg,
                       mask_channels=2):
    assert mask_cfg["type"] == "unet" and backbone_cfg["type"] == "unet"
    assert mask_cfg["unet_depth"] == 2 and backbone_cfg["unet_depth"] == 2
    assert mask_cfg["unet_init_width"] == backbone_cfg["unet_init_width"]
    k_mask, k_bb = jax.random.split(key)
    mask_params = init_unet_params(k_mask, (in_channels,), mask_channels,
                                   mask_cfg["unet_init_width"])
    bb_params = init_unet_params(k_bb, (in_channels, mask_channels),
                                 out_channels, backbone_cfg["unet_init_width"])
    return {"mask": mask_params, "backbone": bb_params}


# ----------------------------------------------------------------------------
# Forward wrapper (one pallas_call, grid over batch)
# ----------------------------------------------------------------------------

def score_widgets_loss_forward(params, x_nchw, target_nchw, channel_weights,
                               *, clip_margin):
    """Returns (loss, pred_nchw): pred = sigmoid(backbone(cat([x, mask(x)])));
    loss = mean(channel_weights * BCE(pred, target)) on the W-clipped region."""
    N, cin, H, W = x_nchw.shape
    cout = target_nchw.shape[1]
    assert H % 2 == 0 and W % 2 == 0
    assert 0 < clip_margin < W // 2

    mp, bp = params["mask"], params["backbone"]
    w0 = mp["b1"].shape[0]
    w1 = 2 * w0
    cmask = mp["bf"].shape[0]
    HW = H * W
    GUARD = -(-(2 * W + 2) // 128) * 128   # >= max tap shift, 128-lane aligned
    R = HW + 2 * GUARD

    # lane-dense HBM boundary: plain NCHW reshapes, innermost dim = H*W
    x = x_nchw.reshape(N, cin, HW).astype(jnp.float32)
    t = target_nchw.reshape(N, cout, HW).astype(jnp.float32)
    cw = channel_weights.reshape(cout, 1).astype(jnp.float32)

    # packed (8, H*W) masks over the flat pixel axis (keeps integer div/mod
    # and iota bookkeeping out of the kernel)
    wcol = jnp.arange(HW, dtype=jnp.int32) % W
    hrow = jnp.arange(HW, dtype=jnp.int32) // W
    masks = jnp.stack([
        wcol != 0, wcol != W - 1,                     # full-res edge keeps
        wcol >= 2, wcol < W - 2,                      # half-res edge keeps
        (wcol % 2) == 1, (hrow % 2) == 1,             # parity (upsample)
        (wcol >= clip_margin) & (wcol < W - clip_margin),  # BCE clip region
        jnp.zeros((HW,), jnp.bool_),                  # pad row
    ]).astype(jnp.float32)

    b16 = lambda a: a.astype(jnp.bfloat16)
    flat_inputs = (
        x, t, cw, masks,
        b16(mp["w1"][0]), mp["b1"], b16(mp["w2"]), mp["b2"], b16(mp["w3"]),
        mp["b3"], b16(mp["w4"]), mp["b4"], b16(mp["w5_skip"]),
        b16(mp["w5_up"]), mp["b5"], b16(mp["w6"]), mp["b6"], b16(mp["wf"]),
        mp["bf"],
        b16(bp["w1"][0]), b16(bp["w1"][1]), bp["b1"], b16(bp["w2"]), bp["b2"],
        b16(bp["w3"]), bp["b3"], b16(bp["w4"]), bp["b4"], b16(bp["w5_skip"]),
        b16(bp["w5_up"]), bp["b5"], b16(bp["w6"]), bp["b6"], b16(bp["wf"]),
        bp["bf"],
    )

    def batch_spec(c):
        return pl.BlockSpec((1, c, HW), lambda n: (n, 0, 0))

    def full_spec(a):
        nd = a.ndim
        return pl.BlockSpec(a.shape, lambda n: (0,) * nd)

    in_specs = [batch_spec(cin), batch_spec(cout)] + \
               [full_spec(a) for a in flat_inputs[2:]]
    out_specs = (pl.BlockSpec((1, cout, HW), lambda n: (n, 0, 0)),
                 pl.BlockSpec((1, 1, 1), lambda n: (n, 0, 0)))
    out_shape = (jax.ShapeDtypeStruct((N, cout, HW), jnp.float32),
                 jax.ShapeDtypeStruct((N, 1, 1), jnp.float32))

    scratch_shapes = [
        pltpu.VMEM((cin, R), jnp.bfloat16),     # x_pad
        pltpu.VMEM((cmask, R), jnp.bfloat16),   # m_pad
        pltpu.VMEM((w0, R), jnp.bfloat16),      # pA   (conv1 out)
        pltpu.VMEM((w0, R), jnp.bfloat16),      # pS   (skip)
        pltpu.VMEM((w0, R), jnp.bfloat16),      # pP   (pooled, dilated)
        pltpu.VMEM((w1, R), jnp.bfloat16),      # pB   (conv3 out, dilated)
        pltpu.VMEM((w1, R), jnp.bfloat16),      # pD   (conv4 out, dilated)
        pltpu.VMEM((w1, R), jnp.bfloat16),      # up_pad
        pltpu.VMEM((w0, R), jnp.bfloat16),      # pU   (conv5 out)
    ]

    kernel = functools.partial(_score_widgets_loss_kernel, H=H, W=W,
                               GUARD=GUARD)

    # advisory cost hint for XLA's scheduler (flops = 2 * MACs, no extra x2)
    macs_full = 9 * HW * (cin * w0 + 2 * w0 * w0 + (w0 + w1) * w0) \
        + 9 * HW * ((cin + cmask) * w0 + 2 * w0 * w0 + (w0 + w1) * w0)
    macs_half = 2 * 9 * HW * (w0 * w1 + w1 * w1)   # dilated (4x redundant)
    macs_head = HW * (w0 * cmask + w0 * cout)
    macs = N * (macs_full + macs_half + macs_head)
    in_bytes = sum(int(a.size) * a.dtype.itemsize for a in flat_inputs)
    cost = pl.CostEstimate(flops=int(2 * macs),
                           transcendentals=int(3 * N * HW * cout),
                           bytes_accessed=int(in_bytes + 4 * (N * cout * HW + N)))

    pred_flat, loss_part = pl.pallas_call(
        kernel,
        out_shape=out_shape,
        grid_spec=pltpu.PrefetchScalarGridSpec(
            num_scalar_prefetch=0,
            grid=(N,),
            in_specs=in_specs,
            out_specs=out_specs,
            scratch_shapes=scratch_shapes),
        compiler_params=pltpu.CompilerParams(
            dimension_semantics=("parallel",),
            vmem_limit_bytes=32 * 1024 * 1024),
        cost_estimate=cost,
    )(*flat_inputs)

    # torch F.binary_cross_entropy(..., weight) with reduction='mean' divides
    # by the numel of the clipped tensor.
    denom = float(N * cout * H * (W - 2 * clip_margin))
    loss = jnp.sum(loss_part) / denom
    pred = pred_flat.reshape(N, cout, H, W)      # back to NCHW (free relabel)
    return loss, pred


# ----------------------------------------------------------------------------
# main
# ----------------------------------------------------------------------------

if __name__ == "__main__":
    key = jax.random.PRNGKey(0)
    k_x, k_t, k_p = jax.random.split(key, 3)

    # small shapes consistent with the module: batch=2, in_channels=4,
    # spatial 16x16, out_channels=4.  clip_margin must be < W/2, so the demo
    # uses 2 (the module's default of 12 assumes much wider score images).
    N, C_in, H, W = 2, 4, 16, 16
    out_channels = 4
    clip_margin = 2
    mask_cfg = {"type": "unet", "unet_depth": 2, "unet_init_width": 8}
    backbone_cfg = {"type": "unet", "unet_depth": 2, "unet_init_width": 8}

    x_nchw = jax.random.normal(k_x, (N, C_in, H, W), jnp.float32)
    target_nchw = jax.random.uniform(k_t, (N, out_channels, H, W), jnp.float32)
    channel_weights = jnp.ones((out_channels,), jnp.float32)  # registered buffer

    params = init_score_widgets(k_p, C_in, out_channels, mask_cfg, backbone_cfg,
                                mask_channels=2)

    fwd = jax.jit(score_widgets_loss_forward, static_argnames=("clip_margin",))
    loss, pred = fwd(params, x_nchw, target_nchw, channel_weights,
                     clip_margin=clip_margin)
    jax.block_until_ready((loss, pred))

    assert pred.shape == (N, out_channels, H, W), pred.shape
    assert bool(jnp.all(jnp.isfinite(pred)))
    assert bool(jnp.all((pred >= 0.0) & (pred <= 1.0)))        # sigmoid range
    assert bool(jnp.isfinite(loss)) and float(loss) > 0.0      # valid BCE
    print("KERNEL_OK")
</pallas_src>

<mosaic_0001>
module attributes {stable_mosaic.version = 11 : i64} {
  func.func @_score_widgets_loss_kernel(%arg0: i32, %arg1: memref<1x4x256xf32, #tpu.memory_space<vmem>>, %arg2: memref<1x4x256xf32, #tpu.memory_space<vmem>>, %arg3: memref<4x1xf32, #tpu.memory_space<vmem>>, %arg4: memref<8x256xf32, #tpu.memory_space<vmem>>, %arg5: memref<72x4xbf16, #tpu.memory_space<vmem>>, %arg6: memref<8x1xf32, #tpu.memory_space<vmem>>, %arg7: memref<72x8xbf16, #tpu.memory_space<vmem>>, %arg8: memref<8x1xf32, #tpu.memory_space<vmem>>, %arg9: memref<144x8xbf16, #tpu.memory_space<vmem>>, %arg10: memref<16x1xf32, #tpu.memory_space<vmem>>, %arg11: memref<144x16xbf16, #tpu.memory_space<vmem>>, %arg12: memref<16x1xf32, #tpu.memory_space<vmem>>, %arg13: memref<72x8xbf16, #tpu.memory_space<vmem>>, %arg14: memref<72x16xbf16, #tpu.memory_space<vmem>>, %arg15: memref<8x1xf32, #tpu.memory_space<vmem>>, %arg16: memref<72x8xbf16, #tpu.memory_space<vmem>>, %arg17: memref<8x1xf32, #tpu.memory_space<vmem>>, %arg18: memref<2x8xbf16, #tpu.memory_space<vmem>>, %arg19: memref<2x1xf32, #tpu.memory_space<vmem>>, %arg20: memref<72x4xbf16, #tpu.memory_space<vmem>>, %arg21: memref<72x2xbf16, #tpu.memory_space<vmem>>, %arg22: memref<8x1xf32, #tpu.memory_space<vmem>>, %arg23: memref<72x8xbf16, #tpu.memory_space<vmem>>, %arg24: memref<8x1xf32, #tpu.memory_space<vmem>>, %arg25: memref<144x8xbf16, #tpu.memory_space<vmem>>, %arg26: memref<16x1xf32, #tpu.memory_space<vmem>>, %arg27: memref<144x16xbf16, #tpu.memory_space<vmem>>, %arg28: memref<16x1xf32, #tpu.memory_space<vmem>>, %arg29: memref<72x8xbf16, #tpu.memory_space<vmem>>, %arg30: memref<72x16xbf16, #tpu.memory_space<vmem>>, %arg31: memref<8x1xf32, #tpu.memory_space<vmem>>, %arg32: memref<72x8xbf16, #tpu.memory_space<vmem>>, %arg33: memref<8x1xf32, #tpu.memory_space<vmem>>, %arg34: memref<4x8xbf16, #tpu.memory_space<vmem>>, %arg35: memref<4x1xf32, #tpu.memory_space<vmem>>, %arg36: memref<1x4x256xf32, #tpu.memory_space<vmem>>, %arg37: memref<1x1x1xf32, #tpu.memory_space<vmem>>, %arg38: memref<4x512xbf16, #tpu.memory_space<vmem>>, %arg39: memref<2x512xbf16, #tpu.memory_space<vmem>>, %arg40: memref<8x512xbf16, #tpu.memory_space<vmem>>, %arg41: memref<8x512xbf16, #tpu.memory_space<vmem>>, %arg42: memref<8x512xbf16, #tpu.memory_space<vmem>>, %arg43: memref<16x512xbf16, #tpu.memory_space<vmem>>, %arg44: memref<16x512xbf16, #tpu.memory_space<vmem>>, %arg45: memref<16x512xbf16, #tpu.memory_space<vmem>>, %arg46: memref<8x512xbf16, #tpu.memory_space<vmem>>) attributes {dimension_semantics = [#tpu.dimension_semantics<parallel>], iteration_bounds = array<i64: 2>, scalar_prefetch = 0 : i64, scratch_operands = 9 : i64, tpu.core_type = #tpu.core_type<tc>, window_params = [{transform_indices = @transform_0, window_bounds = array<i64: 1, 4, 256>}, {transform_indices = @transform_1, window_bounds = array<i64: 1, 4, 256>}, {pipeline_mode = #tpu.pipeline_mode<synchronous>, transform_indices = @transform_2, window_bounds = array<i64: 4, 1>}, {pipeline_mode = #tpu.pipeline_mode<synchronous>, transform_indices = @transform_3, window_bounds = array<i64: 8, 256>}, {pipeline_mode = #tpu.pipeline_mode<synchronous>, transform_indices = @transform_4, window_bounds = array<i64: 72, 4>}, {pipeline_mode = #tpu.pipeline_mode<synchronous>, transform_indices = @transform_5, window_bounds = array<i64: 8, 1>}, {pipeline_mode = #tpu.pipeline_mode<synchronous>, transform_indices = @transform_6, window_bounds = array<i64: 72, 8>}, {pipeline_mode = #tpu.pipeline_mode<synchronous>, transform_indices = @transform_7, window_bounds = array<i64: 8, 1>}, {pipeline_mode = #tpu.pipeline_mode<synchronous>, transform_indices = @transform_8, window_bounds = array<i64: 144, 8>}, {pipeline_mode = #tpu.pipeline_mode<synchronous>, transform_indices = @transform_9, window_bounds = array<i64: 16, 1>}, {pipeline_mode = #tpu.pipeline_mode<synchronous>, transform_indices = @transform_10, window_bounds = array<i64: 144, 16>}, {pipeline_mode = #tpu.pipeline_mode<synchronous>, transform_indices = @transform_11, window_bounds = array<i64: 16, 1>}, {pipeline_mode = #tpu.pipeline_mode<synchronous>, transform_indices = @transform_12, window_bounds = array<i64: 72, 8>}, {pipeline_mode = #tpu.pipeline_mode<synchronous>, transform_indices = @transform_13, window_bounds = array<i64: 72, 16>}, {pipeline_mode = #tpu.pipeline_mode<synchronous>, transform_indices = @transform_14, window_bounds = array<i64: 8, 1>}, {pipeline_mode = #tpu.pipeline_mode<synchronous>, transform_indices = @transform_15, window_bounds = array<i64: 72, 8>}, {pipeline_mode = #tpu.pipeline_mode<synchronous>, transform_indices = @transform_16, window_bounds = array<i64: 8, 1>}, {pipeline_mode = #tpu.pipeline_mode<synchronous>, transform_indices = @transform_17, window_bounds = array<i64: 2, 8>}, {pipeline_mode = #tpu.pipeline_mode<synchronous>, transform_indices = @transform_18, window_bounds = array<i64: 2, 1>}, {pipeline_mode = #tpu.pipeline_mode<synchronous>, transform_indices = @transform_19, window_bounds = array<i64: 72, 4>}, {pipeline_mode = #tpu.pipeline_mode<synchronous>, transform_indices = @transform_20, window_bounds = array<i64: 72, 2>}, {pipeline_mode = #tpu.pipeline_mode<synchronous>, transform_indices = @transform_21, window_bounds = array<i64: 8, 1>}, {pipeline_mode = #tpu.pipeline_mode<synchronous>, transform_indices = @transform_22, window_bounds = array<i64: 72, 8>}, {pipeline_mode = #tpu.pipeline_mode<synchronous>, transform_indices = @transform_23, window_bounds = array<i64: 8, 1>}, {pipeline_mode = #tpu.pipeline_mode<synchronous>, transform_indices = @transform_24, window_bounds = array<i64: 144, 8>}, {pipeline_mode = #tpu.pipeline_mode<synchronous>, transform_indices = @transform_25, window_bounds = array<i64: 16, 1>}, {pipeline_mode = #tpu.pipeline_mode<synchronous>, transform_indices = @transform_26, window_bounds = array<i64: 144, 16>}, {pipeline_mode = #tpu.pipeline_mode<synchronous>, transform_indices = @transform_27, window_bounds = array<i64: 16, 1>}, {pipeline_mode = #tpu.pipeline_mode<synchronous>, transform_indices = @transform_28, window_bounds = array<i64: 72, 8>}, {pipeline_mode = #tpu.pipeline_mode<synchronous>, transform_indices = @transform_29, window_bounds = array<i64: 72, 16>}, {pipeline_mode = #tpu.pipeline_mode<synchronous>, transform_indices = @transform_30, window_bounds = array<i64: 8, 1>}, {pipeline_mode = #tpu.pipeline_mode<synchronous>, transform_indices = @transform_31, window_bounds = array<i64: 72, 8>}, {pipeline_mode = #tpu.pipeline_mode<synchronous>, transform_indices = @transform_32, window_bounds = array<i64: 8, 1>}, {pipeline_mode = #tpu.pipeline_mode<synchronous>, transform_indices = @transform_33, window_bounds = array<i64: 4, 8>}, {pipeline_mode = #tpu.pipeline_mode<synchronous>, transform_indices = @transform_34, window_bounds = array<i64: 4, 1>}, {transform_indices = @transform_35, window_bounds = array<i64: 1, 4, 256>}, {transform_indices = @transform_36, window_bounds = array<i64: 1, 1, 1>}]} {
    %c0 = arith.constant 0 : index
    %c0_0 = arith.constant 0 : index
    %0 = vector.load %arg4[%c0, %c0_0] : memref<8x256xf32, #tpu.memory_space<vmem>>, vector<1x256xf32>
    %c1 = arith.constant 1 : index
    %c0_1 = arith.constant 0 : index
    %1 = vector.load %arg4[%c1, %c0_1] : memref<8x256xf32, #tpu.memory_space<vmem>>, vector<1x256xf32>
    %c2 = arith.constant 2 : index
    %c0_2 = arith.constant 0 : index
    %2 = vector.load %arg4[%c2, %c0_2] : memref<8x256xf32, #tpu.memory_space<vmem>>, vector<1x256xf32>
    %c3 = arith.constant 3 : index
    %c0_3 = arith.constant 0 : index
    %3 = vector.load %arg4[%c3, %c0_3] : memref<8x256xf32, #tpu.memory_space<vmem>>, vector<1x256xf32>
    %c4 = arith.constant 4 : index
    %c0_4 = arith.constant 0 : index
    %4 = vector.load %arg4[%c4, %c0_4] : memref<8x256xf32, #tpu.memory_space<vmem>>, vector<1x256xf32>
    %cst = arith.constant 5.000000e-01 : f32
    %5 = vector.broadcast %cst : f32 to vector<1x256xf32>
    %6 = arith.cmpf ogt, %4, %5 : vector<1x256xf32>
    %c5 = arith.constant 5 : index
    %c0_5 = arith.constant 0 : index
    %7 = vector.load %arg4[%c5, %c0_5] : memref<8x256xf32, #tpu.memory_space<vmem>>, vector<1x256xf32>
    %cst_6 = arith.constant 5.000000e-01 : f32
    %8 = vector.broadcast %cst_6 : f32 to vector<1x256xf32>
    %9 = arith.cmpf ogt, %7, %8 : vector<1x256xf32>
    %c6 = arith.constant 6 : index
    %c0_7 = arith.constant 0 : index
    %10 = vector.load %arg4[%c6, %c0_7] : memref<8x256xf32, #tpu.memory_space<vmem>>, vector<1x256xf32>
    %cst_8 = arith.constant 0.000000e+00 : bf16
    %11 = vector.broadcast %cst_8 : bf16 to vector<4x128xbf16>
    %c0_9 = arith.constant 0 : index
    %c0_10 = arith.constant 0 : index
    %12 = vector.load %arg38[%c0_9, %c0_10] : memref<4x512xbf16, #tpu.memory_space<vmem>>, vector<4x128xbf16>
    tpu.vector_store %arg38[%c0_9, %c0_10], %11 {strides = array<i32>} : memref<4x512xbf16, #tpu.memory_space<vmem>>, vector<4x128xbf16>,
    %cst_11 = arith.constant 0.000000e+00 : bf16
    %13 = vector.broadcast %cst_11 : bf16 to vector<4x128xbf16>
    %c0_12 = arith.constant 0 : index
    %c384 = arith.constant 384 : index
    %14 = vector.load %arg38[%c0_12, %c384] : memref<4x512xbf16, #tpu.memory_space<vmem>>, vector<4x128xbf16>
    tpu.vector_store %arg38[%c0_12, %c384], %13 {strides = array<i32>} : memref<4x512xbf16, #tpu.memory_space<vmem>>, vector<4x128xbf16>,
    %cst_13 = arith.constant 0.000000e+00 : bf16
    %15 = vector.broadcast %cst_13 : bf16 to vector<2x128xbf16>
    %c0_14 = arith.constant 0 : index
    %c0_15 = arith.constant 0 : index
    %16 = vector.load %arg39[%c0_14, %c0_15] : memref<2x512xbf16, #tpu.memory_space<vmem>>, vector<2x128xbf16>
    tpu.vector_store %arg39[%c0_14, %c0_15], %15 {strides = array<i32>} : memref<2x512xbf16, #tpu.memory_space<vmem>>, vector<2x128xbf16>,
    %cst_16 = arith.constant 0.000000e+00 : bf16
    %17 = vector.broadcast %cst_16 : bf16 to vector<2x128xbf16>
    %c0_17 = arith.constant 0 : index
    %c384_18 = arith.constant 384 : index
    %18 = vector.load %arg39[%c0_17, %c384_18] : memref<2x512xbf16, #tpu.memory_space<vmem>>, vector<2x128xbf16>
    tpu.vector_store %arg39[%c0_17, %c384_18], %17 {strides = array<i32>} : memref<2x512xbf16, #tpu.memory_space<vmem>>, vector<2x128xbf16>,
    %cst_19 = arith.constant 0.000000e+00 : bf16
    %19 = vector.broadcast %cst_19 : bf16 to vector<8x128xbf16>
    %c0_20 = arith.constant 0 : index
    %c0_21 = arith.constant 0 : index
    %20 = vector.load %arg40[%c0_20, %c0_21] : memref<8x512xbf16, #tpu.memory_space<vmem>>, vector<8x128xbf16>
    tpu.vector_store %arg40[%c0_20, %c0_21], %19 {strides = array<i32>} : memref<8x512xbf16, #tpu.memory_space<vmem>>, vector<8x128xbf16>,
    %cst_22 = arith.constant 0.000000e+00 : bf16
    %21 = vector.broadcast %cst_22 : bf16 to vector<8x128xbf16>
    %c0_23 = arith.constant 0 : index
    %c384_24 = arith.constant 384 : index
    %22 = vector.load %arg40[%c0_23, %c384_24] : memref<8x512xbf16, #tpu.memory_space<vmem>>, vector<8x128xbf16>
    tpu.vector_store %arg40[%c0_23, %c384_24], %21 {strides = array<i32>} : memref<8x512xbf16, #tpu.memory_space<vmem>>, vector<8x128xbf16>,
    %cst_25 = arith.constant 0.000000e+00 : bf16
    %23 = vector.broadcast %cst_25 : bf16 to vector<8x128xbf16>
    %c0_26 = arith.constant 0 : index
    %c0_27 = arith.constant 0 : index
    %24 = vector.load %arg41[%c0_26, %c0_27] : memref<8x512xbf16, #tpu.memory_space<vmem>>, vector<8x128xbf16>
    tpu.vector_store %arg41[%c0_26, %c0_27], %23 {strides = array<i32>} : memref<8x512xbf16, #tpu.memory_space<vmem>>, vector<8x128xbf16>,
    %cst_28 = arith.constant 0.000000e+00 : bf16
    %25 = vector.broadcast %cst_28 : bf16 to vector<8x128xbf16>
    %c0_29 = arith.constant 0 : index
    %c384_30 = arith.constant 384 : index
    %26 = vector.load %arg41[%c0_29, %c384_30] : memref<8x512xbf16, #tpu.memory_space<vmem>>, vector<8x128xbf16>
    tpu.vector_store %arg41[%c0_29, %c384_30], %25 {strides = array<i32>} : memref<8x512xbf16, #tpu.memory_space<vmem>>, vector<8x128xbf16>,
    %cst_31 = arith.constant 0.000000e+00 : bf16
    %27 = vector.broadcast %cst_31 : bf16 to vector<8x128xbf16>
    %c0_32 = arith.constant 0 : index
    %c0_33 = arith.constant 0 : index
    %28 = vector.load %arg42[%c0_32, %c0_33] : memref<8x512xbf16, #tpu.memory_space<vmem>>, vector<8x128xbf16>
    tpu.vector_store %arg42[%c0_32, %c0_33], %27 {strides = array<i32>} : memref<8x512xbf16, #tpu.memory_space<vmem>>, vector<8x128xbf16>,
    %cst_34 = arith.constant 0.000000e+00 : bf16
    %29 = vector.broadcast %cst_34 : bf16 to vector<8x128xbf16>
    %c0_35 = arith.constant 0 : index
    %c384_36 = arith.constant 384 : index
    %30 = vector.load %arg42[%c0_35, %c384_36] : memref<8x512xbf16, #tpu.memory_space<vmem>>, vector<8x128xbf16>
    tpu.vector_store %arg42[%c0_35, %c384_36], %29 {strides = array<i32>} : memref<8x512xbf16, #tpu.memory_space<vmem>>, vector<8x128xbf16>,
    %cst_37 = arith.constant 0.000000e+00 : bf16
    %31 = vector.broadcast %cst_37 : bf16 to vector<16x128xbf16>
    %c0_38 = arith.constant 0 : index
    %c0_39 = arith.constant 0 : index
    %32 = vector.load %arg43[%c0_38, %c0_39] : memref<16x512xbf16, #tpu.memory_space<vmem>>, vector<16x128xbf16>
    tpu.vector_store %arg43[%c0_38, %c0_39], %31 {strides = array<i32>} : memref<16x512xbf16, #tpu.memory_space<vmem>>, vector<16x128xbf16>,
    %cst_40 = arith.constant 0.000000e+00 : bf16
    %33 = vector.broadcast %cst_40 : bf16 to vector<16x128xbf16>
    %c0_41 = arith.constant 0 : index
    %c384_42 = arith.constant 384 : index
    %34 = vector.load %arg43[%c0_41, %c384_42] : memref<16x512xbf16, #tpu.memory_space<vmem>>, vector<16x128xbf16>
    tpu.vector_store %arg43[%c0_41, %c384_42], %33 {strides = array<i32>} : memref<16x512xbf16, #tpu.memory_space<vmem>>, vector<16x128xbf16>,
    %cst_43 = arith.constant 0.000000e+00 : bf16
    %35 = vector.broadcast %cst_43 : bf16 to vector<16x128xbf16>
    %c0_44 = arith.constant 0 : index
    %c0_45 = arith.constant 0 : index
    %36 = vector.load %arg44[%c0_44, %c0_45] : memref<16x512xbf16, #tpu.memory_space<vmem>>, vector<16x128xbf16>
    tpu.vector_store %arg44[%c0_44, %c0_45], %35 {strides = array<i32>} : memref<16x512xbf16, #tpu.memory_space<vmem>>, vector<16x128xbf16>,
    %cst_46 = arith.constant 0.000000e+00 : bf16
    %37 = vector.broadcast %cst_46 : bf16 to vector<16x128xbf16>
    %c0_47 = arith.constant 0 : index
    %c384_48 = arith.constant 384 : index
    %38 = vector.load %arg44[%c0_47, %c384_48] : memref<16x512xbf16, #tpu.memory_space<vmem>>, vector<16x128xbf16>
    tpu.vector_store %arg44[%c0_47, %c384_48], %37 {strides = array<i32>} : memref<16x512xbf16, #tpu.memory_space<vmem>>, vector<16x128xbf16>,
    %cst_49 = arith.constant 0.000000e+00 : bf16
    %39 = vector.broadcast %cst_49 : bf16 to vector<16x128xbf16>
    %c0_50 = arith.constant 0 : index
    %c0_51 = arith.constant 0 : index
    %40 = vector.load %arg45[%c0_50, %c0_51] : memref<16x512xbf16, #tpu.memory_space<vmem>>, vector<16x128xbf16>
    tpu.vector_store %arg45[%c0_50, %c0_51], %39 {strides = array<i32>} : memref<16x512xbf16, #tpu.memory_space<vmem>>, vector<16x128xbf16>,
    %cst_52 = arith.constant 0.000000e+00 : bf16
    %41 = vector.broadcast %cst_52 : bf16 to vector<16x128xbf16>
    %c0_53 = arith.constant 0 : index
    %c384_54 = arith.constant 384 : index
    %42 = vector.load %arg45[%c0_53, %c384_54] : memref<16x512xbf16, #tpu.memory_space<vmem>>, vector<16x128xbf16>
    tpu.vector_store %arg45[%c0_53, %c384_54], %41 {strides = array<i32>} : memref<16x512xbf16, #tpu.memory_space<vmem>>, vector<16x128xbf16>,
    %cst_55 = arith.constant 0.000000e+00 : bf16
    %43 = vector.broadcast %cst_55 : bf16 to vector<8x128xbf16>
    %c0_56 = arith.constant 0 : index
    %c0_57 = arith.constant 0 : index
    %44 = vector.load %arg46[%c0_56, %c0_57] : memref<8x512xbf16, #tpu.memory_space<vmem>>, vector<8x128xbf16>
    tpu.vector_store %arg46[%c0_56, %c0_57], %43 {strides = array<i32>} : memref<8x512xbf16, #tpu.memory_space<vmem>>, vector<8x128xbf16>,
    %cst_58 = arith.constant 0.000000e+00 : bf16
    %45 = vector.broadcast %cst_58 : bf16 to vector<8x128xbf16>
    %c0_59 = arith.constant 0 : index
    %c384_60 = arith.constant 384 : index
    %46 = vector.load %arg46[%c0_59, %c384_60] : memref<8x512xbf16, #tpu.memory_space<vmem>>, vector<8x128xbf16>
    tpu.vector_store %arg46[%c0_59, %c384_60], %45 {strides = array<i32>} : memref<8x512xbf16, #tpu.memory_space<vmem>>, vector<8x128xbf16>,
    %c0_61 = arith.constant 0 : index
    %c0_62 = arith.constant 0 : index
    %c0_63 = arith.constant 0 : index
    %47 = vector.load %arg1[%c0_61, %c0_62, %c0_63] : memref<1x4x256xf32, #tpu.memory_space<vmem>>, vector<1x4x256xf32>
    %48 = vector.shape_cast %47 : vector<1x4x256xf32> to vector<4x256xf32>
    %49 = arith.truncf %48 : vector<4x256xf32> to vector<4x256xbf16>
    %c0_64 = arith.constant 0 : index
    %c128 = arith.constant 128 : index
    %50 = vector.load %arg38[%c0_64, %c128] : memref<4x512xbf16, #tpu.memory_space<vmem>>, vector<4x256xbf16>
    tpu.vector_store %arg38[%c0_64, %c128], %49 {strides = array<i32>} : memref<4x512xbf16, #tpu.memory_space<vmem>>, vector<4x256xbf16>,
    %c0_65 = arith.constant 0 : index
    %c0_66 = arith.constant 0 : index
    %51 = vector.load %arg5[%c0_65, %c0_66] : memref<72x4xbf16, #tpu.memory_space<vmem>>, vector<72x4xbf16>
    %c0_67 = arith.constant 0 : index
    %c0_68 = arith.constant 0 : index
    %52 = vector.load %arg38[%c0_67, %c0_68] : memref<4x512xbf16, #tpu.memory_space<vmem>>, vector<4x512xbf16>
    %cst_69 = arith.constant dense<0.000000e+00> : vector<72x512xf32>
    %53 = tpu.matmul %51, %52, %cst_69 {dimension_numbers = #tpu.dot_dimension_numbers<[1], [0], [0], [1], [0, 0, 1, 1], [], []>} : vector<72x4xbf16>, vector<4x512xbf16>, vector<72x512xf32> -> vector<72x512xf32>
    %54 = vector.extract_strided_slice %53 {offsets = [0, 111], sizes = [8, 256], strides = [1, 1]} : vector<72x512xf32> to vector<8x256xf32>
    %55 = vector.broadcast %0 : vector<1x256xf32> to vector<8x256xf32>
    %56 = arith.mulf %54, %55 : vector<8x256xf32>
    %57 = vector.extract_strided_slice %53 {offsets = [8, 112], sizes = [8, 256], strides = [1, 1]} : vector<72x512xf32> to vector<8x256xf32>
    %58 = arith.addf %56, %57 : vector<8x256xf32>
    %59 = vector.extract_strided_slice %53 {offsets = [16, 113], sizes = [8, 256], strides = [1, 1]} : vector<72x512xf32> to vector<8x256xf32>
    %60 = vector.broadcast %1 : vector<1x256xf32> to vector<8x256xf32>
    %61 = arith.mulf %59, %60 : vector<8x256xf32>
    %62 = arith.addf %58, %61 : vector<8x256xf32>
    %63 = vector.extract_strided_slice %53 {offsets = [24, 127], sizes = [8, 256], strides = [1, 1]} : vector<72x512xf32> to vector<8x256xf32>
    %64 = vector.broadcast %0 : vector<1x256xf32> to vector<8x256xf32>
    %65 = arith.mulf %63, %64 : vector<8x256xf32>
    %66 = arith.addf %62, %65 : vector<8x256xf32>
    %67 = vector.extract_strided_slice %53 {offsets = [32, 128], sizes = [8, 256], strides = [1, 1]} : vector<72x512xf32> to vector<8x256xf32>
    %68 = arith.addf %66, %67 : vector<8x256xf32>
    %69 = vector.extract_strided_slice %53 {offsets = [40, 129], sizes = [8, 256], strides = [1, 1]} : vector<72x512xf32> to vector<8x256xf32>
    %70 = vector.broadcast %1 : vector<1x256xf32> to vector<8x256xf32>
    %71 = arith.mulf %69, %70 : vector<8x256xf32>
    %72 = arith.addf %68, %71 : vector<8x256xf32>
    %73 = vector.extract_strided_slice %53 {offsets = [48, 143], sizes = [8, 256], strides = [1, 1]} : vector<72x512xf32> to vector<8x256xf32>
    %74 = vector.broadcast %0 : vector<1x256xf32> to vector<8x256xf32>
    %75 = arith.mulf %73, %74 : vector<8x256xf32>
    %76 = arith.addf %72, %75 : vector<8x256xf32>
    %77 = vector.extract_strided_slice %53 {offsets = [56, 144], sizes = [8, 256], strides = [1, 1]} : vector<72x512xf32> to vector<8x256xf32>
    %78 = arith.addf %76, %77 : vector<8x256xf32>
    %79 = vector.extract_strided_slice %53 {offsets = [64, 145], sizes = [8, 256], strides = [1, 1]} : vector<72x512xf32> to vector<8x256xf32>
    %80 = vector.broadcast %1 : vector<1x256xf32> to vector<8x256xf32>
    %81 = arith.mulf %79, %80 : vector<8x256xf32>
    %82 = arith.addf %78, %81 : vector<8x256xf32>
    %c0_70 = arith.constant 0 : index
    %c0_71 = arith.constant 0 : index
    %83 = vector.load %arg6[%c0_70, %c0_71] : memref<8x1xf32, #tpu.memory_space<vmem>>, vector<8x1xf32>
    %84 = vector.broadcast %83 : vector<8x1xf32> to vector<8x256xf32>
    %85 = arith.addf %82, %84 : vector<8x256xf32>
    %cst_72 = arith.constant 0.000000e+00 : f32
    %86 = vector.broadcast %cst_72 : f32 to vector<8x256xf32>
    %87 = arith.maximumf %85, %86 : vector<8x256xf32>
    %88 = arith.truncf %87 : vector<8x256xf32> to vector<8x256xbf16>
    %c0_73 = arith.constant 0 : index
    %c128_74 = arith.constant 128 : index
    %89 = vector.load %arg40[%c0_73, %c128_74] : memref<8x512xbf16, #tpu.memory_space<vmem>>, vector<8x256xbf16>
    tpu.vector_store %arg40[%c0_73, %c128_74], %88 {strides = array<i32>} : memref<8x512xbf16, #tpu.memory_space<vmem>>, vector<8x256xbf16>,
    %c0_75 = arith.constant 0 : index
    %c0_76 = arith.constant 0 : index
    %90 = vector.load %arg7[%c0_75, %c0_76] : memref<72x8xbf16, #tpu.memory_space<vmem>>, vector<72x8xbf16>
    %c0_77 = arith.constant 0 : index
    %c0_78 = arith.constant 0 : index
    %91 = vector.load %arg40[%c0_77, %c0_78] : memref<8x512xbf16, #tpu.memory_space<vmem>>, vector<8x512xbf16>
    %cst_79 = arith.constant dense<0.000000e+00> : vector<72x512xf32>
    %92 = tpu.matmul %90, %91, %cst_79 {dimension_numbers = #tpu.dot_dimension_numbers<[1], [0], [0], [1], [0, 0, 1, 1], [], []>} : vector<72x8xbf16>, vector<8x512xbf16>, vector<72x512xf32> -> vector<72x512xf32>
    %93 = vector.extract_strided_slice %92 {offsets = [0, 111], sizes = [8, 256], strides = [1, 1]} : vector<72x512xf32> to vector<8x256xf32>
    %94 = vector.broadcast %0 : vector<1x256xf32> to vector<8x256xf32>
    %95 = arith.mulf %93, %94 : vector<8x256xf32>
    %96 = vector.extract_strided_slice %92 {offsets = [8, 112], sizes = [8, 256], strides = [1, 1]} : vector<72x512xf32> to vector<8x256xf32>
    %97 = arith.addf %95, %96 : vector<8x256xf32>
    %98 = vector.extract_strided_slice %92 {offsets = [16, 113], sizes = [8, 256], strides = [1, 1]} : vector<72x512xf32> to vector<8x256xf32>
    %99 = vector.broadcast %1 : vector<1x256xf32> to vector<8x256xf32>
    %100 = arith.mulf %98, %99 : vector<8x256xf32>
    %101 = arith.addf %97, %100 : vector<8x256xf32>
    %102 = vector.extract_strided_slice %92 {offsets = [24, 127], sizes = [8, 256], strides = [1, 1]} : vector<72x512xf32> to vector<8x256xf32>
    %103 = vector.broadcast %0 : vector<1x256xf32> to vector<8x256xf32>
    %104 = arith.mulf %102, %103 : vector<8x256xf32>
    %105 = arith.addf %101, %104 : vector<8x256xf32>
    %106 = vector.extract_strided_slice %92 {offsets = [32, 128], sizes = [8, 256], strides = [1, 1]} : vector<72x512xf32> to vector<8x256xf32>
    %107 = arith.addf %105, %106 : vector<8x256xf32>
    %108 = vector.extract_strided_slice %92 {offsets = [40, 129], sizes = [8, 256], strides = [1, 1]} : vector<72x512xf32> to vector<8x256xf32>
    %109 = vector.broadcast %1 : vector<1x256xf32> to vector<8x256xf32>
    %110 = arith.mulf %108, %109 : vector<8x256xf32>
    %111 = arith.addf %107, %110 : vector<8x256xf32>
    %112 = vector.extract_strided_slice %92 {offsets = [48, 143], sizes = [8, 256], strides = [1, 1]} : vector<72x512xf32> to vector<8x256xf32>
    %113 = vector.broadcast %0 : vector<1x256xf32> to vector<8x256xf32>
    %114 = arith.mulf %112, %113 : vector<8x256xf32>
    %115 = arith.addf %111, %114 : vector<8x256xf32>
    %116 = vector.extract_strided_slice %92 {offsets = [56, 144], sizes = [8, 256], strides = [1, 1]} : vector<72x512xf32> to vector<8x256xf32>
    %117 = arith.addf %115, %116 : vector<8x256xf32>
    %118 = vector.extract_strided_slice %92 {offsets = [64, 145], sizes = [8, 256], strides = [1, 1]} : vector<72x512xf32> to vector<8x256xf32>
    %119 = vector.broadcast %1 : vector<1x256xf32> to vector<8x256xf32>
    %120 = arith.mulf %118, %119 : vector<8x256xf32>
    %121 = arith.addf %117, %120 : vector<8x256xf32>
    %c0_80 = arith.constant 0 : index
    %c0_81 = arith.constant 0 : index
    %122 = vector.load %arg8[%c0_80, %c0_81] : memref<8x1xf32, #tpu.memory_space<vmem>>, vector<8x1xf32>
    %123 = vector.broadcast %122 : vector<8x1xf32> to vector<8x256xf32>
    %124 = arith.addf %121, %123 : vector<8x256xf32>
    %cst_82 = arith.constant 0.000000e+00 : f32
    %125 = vector.broadcast %cst_82 : f32 to vector<8x256xf32>
    %126 = arith.maximumf %124, %125 : vector<8x256xf32>
    %127 = arith.truncf %126 : vector<8x256xf32> to vector<8x256xbf16>
    %c0_83 = arith.constant 0 : index
    %c128_84 = arith.constant 128 : index
    %128 = vector.load %arg41[%c0_83, %c128_84] : memref<8x512xbf16, #tpu.memory_space<vmem>>, vector<8x256xbf16>
    tpu.vector_store %arg41[%c0_83, %c128_84], %127 {strides = array<i32>} : memref<8x512xbf16, #tpu.memory_space<vmem>>, vector<8x256xbf16>,
    %c0_85 = arith.constant 0 : index
    %c128_86 = arith.constant 128 : index
    %129 = vector.load %arg41[%c0_85, %c128_86] : memref<8x512xbf16, #tpu.memory_space<vmem>>, vector<8x256xbf16>
    %c0_87 = arith.constant 0 : index
    %c129 = arith.constant 129 : index
    %130 = vector.load %arg41[%c0_87, %c129] : memref<8x512xbf16, #tpu.memory_space<vmem>>, vector<8x256xbf16>
    %c0_88 = arith.constant 0 : index
    %c144 = arith.constant 144 : index
    %131 = vector.load %arg41[%c0_88, %c144] : memref<8x512xbf16, #tpu.memory_space<vmem>>, vector<8x256xbf16>
    %c0_89 = arith.constant 0 : index
    %c145 = arith.constant 145 : index
    %132 = vector.load %arg41[%c0_89, %c145] : memref<8x512xbf16, #tpu.memory_space<vmem>>, vector<8x256xbf16>
    %133 = arith.maximumf %129, %130 : vector<8x256xbf16>
    %134 = arith.maximumf %131, %132 : vector<8x256xbf16>
    %135 = arith.maximumf %133, %134 : vector<8x256xbf16>
    %c0_90 = arith.constant 0 : index
    %c128_91 = arith.constant 128 : index
    %136 = vector.load %arg42[%c0_90, %c128_91] : memref<8x512xbf16, #tpu.memory_space<vmem>>, vector<8x256xbf16>
    tpu.vector_store %arg42[%c0_90, %c128_91], %135 {strides = array<i32>} : memref<8x512xbf16, #tpu.memory_space<vmem>>, vector<8x256xbf16>,
    %c0_92 = arith.constant 0 : index
    %c0_93 = arith.constant 0 : index
    %137 = vector.load %arg9[%c0_92, %c0_93] : memref<144x8xbf16, #tpu.memory_space<vmem>>, vector<144x8xbf16>
    %c0_94 = arith.constant 0 : index
    %c0_95 = arith.constant 0 : index
    %138 = vector.load %arg42[%c0_94, %c0_95] : memref<8x512xbf16, #tpu.memory_space<vmem>>, vector<8x512xbf16>
    %cst_96 = arith.constant dense<0.000000e+00> : vector<144x512xf32>
    %139 = tpu.matmul %137, %138, %cst_96 {dimension_numbers = #tpu.dot_dimension_numbers<[1], [0], [0], [1], [0, 0, 1, 1], [], []>} : vector<144x8xbf16>, vector<8x512xbf16>, vector<144x512xf32> -> vector<144x512xf32>
    %140 = vector.extract_strided_slice %139 {offsets = [0, 94], sizes = [16, 256], strides = [1, 1]} : vector<144x512xf32> to vector<16x256xf32>
    %141 = vector.broadcast %2 : vector<1x256xf32> to vector<16x256xf32>
    %142 = arith.mulf %140, %141 : vector<16x256xf32>
    %143 = vector.extract_strided_slice %139 {offsets = [16, 96], sizes = [16, 256], strides = [1, 1]} : vector<144x512xf32> to vector<16x256xf32>
    %144 = arith.addf %142, %143 : vector<16x256xf32>
    %145 = vector.extract_strided_slice %139 {offsets = [32, 98], sizes = [16, 256], strides = [1, 1]} : vector<144x512xf32> to vector<16x256xf32>
    %146 = vector.broadcast %3 : vector<1x256xf32> to vector<16x256xf32>
    %147 = arith.mulf %145, %146 : vector<16x256xf32>
    %148 = arith.addf %144, %147 : vector<16x256xf32>
    %149 = vector.extract_strided_slice %139 {offsets = [48, 126], sizes = [16, 256], strides = [1, 1]} : vector<144x512xf32> to vector<16x256xf32>
    %150 = vector.broadcast %2 : vector<1x256xf32> to vector<16x256xf32>
    %151 = arith.mulf %149, %150 : vector<16x256xf32>
    %152 = arith.addf %148, %151 : vector<16x256xf32>
    %153 = vector.extract_strided_slice %139 {offsets = [64, 128], sizes = [16, 256], strides = [1, 1]} : vector<144x512xf32> to vector<16x256xf32>
    %154 = arith.addf %152, %153 : vector<16x256xf32>
    %155 = vector.extract_strided_slice %139 {offsets = [80, 130], sizes = [16, 256], strides = [1, 1]} : vector<144x512xf32> to vector<16x256xf32>
    %156 = vector.broadcast %3 : vector<1x256xf32> to vector<16x256xf32>
    %157 = arith.mulf %155, %156 : vector<16x256xf32>
    %158 = arith.addf %154, %157 : vector<16x256xf32>
    %159 = vector.extract_strided_slice %139 {offsets = [96, 158], sizes = [16, 256], strides = [1, 1]} : vector<144x512xf32> to vector<16x256xf32>
    %160 = vector.broadcast %2 : vector<1x256xf32> to vector<16x256xf32>
    %161 = arith.mulf %159, %160 : vector<16x256xf32>
    %162 = arith.addf %158, %161 : vector<16x256xf32>
    %163 = vector.extract_strided_slice %139 {offsets = [112, 160], sizes = [16, 256], strides = [1, 1]} : vector<144x512xf32> to vector<16x256xf32>
    %164 = arith.addf %162, %163 : vector<16x256xf32>
    %165 = vector.extract_strided_slice %139 {offsets = [128, 162], sizes = [16, 256], strides = [1, 1]} : vector<144x512xf32> to vector<16x256xf32>
    %166 = vector.broadcast %3 : vector<1x256xf32> to vector<16x256xf32>
    %167 = arith.mulf %165, %166 : vector<16x256xf32>
    %168 = arith.addf %164, %167 : vector<16x256xf32>
    %c0_97 = arith.constant 0 : index
    %c0_98 = arith.constant 0 : index
    %169 = vector.load %arg10[%c0_97, %c0_98] : memref<16x1xf32, #tpu.memory_space<vmem>>, vector<16x1xf32>
    %170 = vector.broadcast %169 : vector<16x1xf32> to vector<16x256xf32>
    %171 = arith.addf %168, %170 : vector<16x256xf32>
    %cst_99 = arith.constant 0.000000e+00 : f32
    %172 = vector.broadcast %cst_99 : f32 to vector<16x256xf32>
    %173 = arith.maximumf %171, %172 : vector<16x256xf32>
    %174 = arith.truncf %173 : vector<16x256xf32> to vector<16x256xbf16>
    %c0_100 = arith.constant 0 : index
    %c128_101 = arith.constant 128 : index
    %175 = vector.load %arg43[%c0_100, %c128_101] : memref<16x512xbf16, #tpu.memory_space<vmem>>, vector<16x256xbf16>
    tpu.vector_store %arg43[%c0_100, %c128_101], %174 {strides = array<i32>} : memref<16x512xbf16, #tpu.memory_space<vmem>>, vector<16x256xbf16>,
    %c0_102 = arith.constant 0 : index
    %c0_103 = arith.constant 0 : index
    %176 = vector.load %arg11[%c0_102, %c0_103] : memref<144x16xbf16, #tpu.memory_space<vmem>>, vector<144x16xbf16>
    %c0_104 = arith.constant 0 : index
    %c0_105 = arith.constant 0 : index
    %177 = vector.load %arg43[%c0_104, %c0_105] : memref<16x512xbf16, #tpu.memory_space<vmem>>, vector<16x512xbf16>
    %cst_106 = arith.constant dense<0.000000e+00> : vector<144x512xf32>
    %178 = tpu.matmul %176, %177, %cst_106 {dimension_numbers = #tpu.dot_dimension_numbers<[1], [0], [0], [1], [0, 0, 1, 1], [], []>} : vector<144x16xbf16>, vector<16x512xbf16>, vector<144x512xf32> -> vector<144x512xf32>
    %179 = vector.extract_strided_slice %178 {offsets = [0, 94], sizes = [16, 256], strides = [1, 1]} : vector<144x512xf32> to vector<16x256xf32>
    %180 = vector.broadcast %2 : vector<1x256xf32> to vector<16x256xf32>
    %181 = arith.mulf %179, %180 : vector<16x256xf32>
    %182 = vector.extract_strided_slice %178 {offsets = [16, 96], sizes = [16, 256], strides = [1, 1]} : vector<144x512xf32> to vector<16x256xf32>
    %183 = arith.addf %181, %182 : vector<16x256xf32>
    %184 = vector.extract_strided_slice %178 {offsets = [32, 98], sizes = [16, 256], strides = [1, 1]} : vector<144x512xf32> to vector<16x256xf32>
    %185 = vector.broadcast %3 : vector<1x256xf32> to vector<16x256xf32>
    %186 = arith.mulf %184, %185 : vector<16x256xf32>
    %187 = arith.addf %183, %186 : vector<16x256xf32>
    %188 = vector.extract_strided_slice %178 {offsets = [48, 126], sizes = [16, 256], strides = [1, 1]} : vector<144x512xf32> to vector<16x256xf32>
    %189 = vector.broadcast %2 : vector<1x256xf32> to vector<16x256xf32>
    %190 = arith.mulf %188, %189 : vector<16x256xf32>
    %191 = arith.addf %187, %190 : vector<16x256xf32>
    %192 = vector.extract_strided_slice %178 {offsets = [64, 128], sizes = [16, 256], strides = [1, 1]} : vector<144x512xf32> to vector<16x256xf32>
    %193 = arith.addf %191, %192 : vector<16x256xf32>
    %194 = vector.extract_strided_slice %178 {offsets = [80, 130], sizes = [16, 256], strides = [1, 1]} : vector<144x512xf32> to vector<16x256xf32>
    %195 = vector.broadcast %3 : vector<1x256xf32> to vector<16x256xf32>
    %196 = arith.mulf %194, %195 : vector<16x256xf32>
    %197 = arith.addf %193, %196 : vector<16x256xf32>
    %198 = vector.extract_strided_slice %178 {offsets = [96, 158], sizes = [16, 256], strides = [1, 1]} : vector<144x512xf32> to vector<16x256xf32>
    %199 = vector.broadcast %2 : vector<1x256xf32> to vector<16x256xf32>
    %200 = arith.mulf %198, %199 : vector<16x256xf32>
    %201 = arith.addf %197, %200 : vector<16x256xf32>
    %202 = vector.extract_strided_slice %178 {offsets = [112, 160], sizes = [16, 256], strides = [1, 1]} : vector<144x512xf32> to vector<16x256xf32>
    %203 = arith.addf %201, %202 : vector<16x256xf32>
    %204 = vector.extract_strided_slice %178 {offsets = [128, 162], sizes = [16, 256], strides = [1, 1]} : vector<144x512xf32> to vector<16x256xf32>
    %205 = vector.broadcast %3 : vector<1x256xf32> to vector<16x256xf32>
    %206 = arith.mulf %204, %205 : vector<16x256xf32>
    %207 = arith.addf %203, %206 : vector<16x256xf32>
    %c0_107 = arith.constant 0 : index
    %c0_108 = arith.constant 0 : index
    %208 = vector.load %arg12[%c0_107, %c0_108] : memref<16x1xf32, #tpu.memory_space<vmem>>, vector<16x1xf32>
    %209 = vector.broadcast %208 : vector<16x1xf32> to vector<16x256xf32>
    %210 = arith.addf %207, %209 : vector<16x256xf32>
    %cst_109 = arith.constant 0.000000e+00 : f32
    %211 = vector.broadcast %cst_109 : f32 to vector<16x256xf32>
    %212 = arith.maximumf %210, %211 : vector<16x256xf32>
    %213 = arith.truncf %212 : vector<16x256xf32> to vector<16x256xbf16>
    %c0_110 = arith.constant 0 : index
    %c128_111 = arith.constant 128 : index
    %214 = vector.load %arg44[%c0_110, %c128_111] : memref<16x512xbf16, #tpu.memory_space<vmem>>, vector<16x256xbf16>
    tpu.vector_store %arg44[%c0_110, %c128_111], %213 {strides = array<i32>} : memref<16x512xbf16, #tpu.memory_space<vmem>>, vector<16x256xbf16>,
    %c0_112 = arith.constant 0 : index
    %c128_113 = arith.constant 128 : index
    %215 = vector.load %arg44[%c0_112, %c128_113] : memref<16x512xbf16, #tpu.memory_space<vmem>>, vector<16x256xbf16>
    %c0_114 = arith.constant 0 : index
    %c127 = arith.constant 127 : index
    %216 = vector.load %arg44[%c0_114, %c127] : memref<16x512xbf16, #tpu.memory_space<vmem>>, vector<16x256xbf16>
    %c0_115 = arith.constant 0 : index
    %c112 = arith.constant 112 : index
    %217 = vector.load %arg44[%c0_115, %c112] : memref<16x512xbf16, #tpu.memory_space<vmem>>, vector<16x256xbf16>
    %c0_116 = arith.constant 0 : index
    %c111 = arith.constant 111 : index
    %218 = vector.load %arg44[%c0_116, %c111] : memref<16x512xbf16, #tpu.memory_space<vmem>>, vector<16x256xbf16>
    %219 = vector.shape_cast %6 : vector<1x256xi1> to vector<1x256xi1>
    %220 = vector.broadcast %219 : vector<1x256xi1> to vector<16x256xi1>
    %221 = arith.select %220, %216, %215 : vector<16x256xi1>, vector<16x256xbf16>
    %222 = vector.shape_cast %6 : vector<1x256xi1> to vector<1x256xi1>
    %223 = vector.broadcast %222 : vector<1x256xi1> to vector<16x256xi1>
    %224 = arith.select %223, %218, %217 : vector<16x256xi1>, vector<16x256xbf16>
    %225 = vector.shape_cast %9 : vector<1x256xi1> to vector<1x256xi1>
    %226 = vector.broadcast %225 : vector<1x256xi1> to vector<16x256xi1>
    %227 = arith.select %226, %224, %221 : vector<16x256xi1>, vector<16x256xbf16>
    %c0_117 = arith.constant 0 : index
    %c128_118 = arith.constant 128 : index
    %228 = vector.load %arg45[%c0_117, %c128_118] : memref<16x512xbf16, #tpu.memory_space<vmem>>, vector<16x256xbf16>
    tpu.vector_store %arg45[%c0_117, %c128_118], %227 {strides = array<i32>} : memref<16x512xbf16, #tpu.memory_space<vmem>>, vector<16x256xbf16>,
    %c0_119 = arith.constant 0 : index
    %c0_120 = arith.constant 0 : index
    %229 = vector.load %arg13[%c0_119, %c0_120] : memref<72x8xbf16, #tpu.memory_space<vmem>>, vector<72x8xbf16>
    %c0_121 = arith.constant 0 : index
    %c0_122 = arith.constant 0 : index
    %230 = vector.load %arg41[%c0_121, %c0_122] : memref<8x512xbf16, #tpu.memory_space<vmem>>, vector<8x512xbf16>
    %cst_123 = arith.constant dense<0.000000e+00> : vector<72x512xf32>
    %231 = tpu.matmul %229, %230, %cst_123 {dimension_numbers = #tpu.dot_dimension_numbers<[1], [0], [0], [1], [0, 0, 1, 1], [], []>} : vector<72x8xbf16>, vector<8x512xbf16>, vector<72x512xf32> -> vector<72x512xf32>
    %c0_124 = arith.constant 0 : index
    %c0_125 = arith.constant 0 : index
    %232 = vector.load %arg14[%c0_124, %c0_125] : memref<72x16xbf16, #tpu.memory_space<vmem>>, vector<72x16xbf16>
    %c0_126 = arith.constant 0 : index
    %c0_127 = arith.constant 0 : index
    %233 = vector.load %arg45[%c0_126, %c0_127] : memref<16x512xbf16, #tpu.memory_space<vmem>>, vector<16x512xbf16>
    %cst_128 = arith.constant dense<0.000000e+00> : vector<72x512xf32>
    %234 = tpu.matmul %232, %233, %cst_128 {dimension_numbers = #tpu.dot_dimension_numbers<[1], [0], [0], [1], [0, 0, 1, 1], [], []>} : vector<72x16xbf16>, vector<16x512xbf16>, vector<72x512xf32> -> vector<72x512xf32>
    %235 = arith.addf %231, %234 : vector<72x512xf32>
    %236 = vector.extract_strided_slice %235 {offsets = [0, 111], sizes = [8, 256], strides = [1, 1]} : vector<72x512xf32> to vector<8x256xf32>
    %237 = vector.broadcast %0 : vector<1x256xf32> to vector<8x256xf32>
    %238 = arith.mulf %236, %237 : vector<8x256xf32>
    %239 = vector.extract_strided_slice %235 {offsets = [8, 112], sizes = [8, 256], strides = [1, 1]} : vector<72x512xf32> to vector<8x256xf32>
    %240 = arith.addf %238, %239 : vector<8x256xf32>
    %241 = vector.extract_strided_slice %235 {offsets = [16, 113], sizes = [8, 256], strides = [1, 1]} : vector<72x512xf32> to vector<8x256xf32>
    %242 = vector.broadcast %1 : vector<1x256xf32> to vector<8x256xf32>
    %243 = arith.mulf %241, %242 : vector<8x256xf32>
    %244 = arith.addf %240, %243 : vector<8x256xf32>
    %245 = vector.extract_strided_slice %235 {offsets = [24, 127], sizes = [8, 256], strides = [1, 1]} : vector<72x512xf32> to vector<8x256xf32>
    %246 = vector.broadcast %0 : vector<1x256xf32> to vector<8x256xf32>
    %247 = arith.mulf %245, %246 : vector<8x256xf32>
    %248 = arith.addf %244, %247 : vector<8x256xf32>
    %249 = vector.extract_strided_slice %235 {offsets = [32, 128], sizes = [8, 256], strides = [1, 1]} : vector<72x512xf32> to vector<8x256xf32>
    %250 = arith.addf %248, %249 : vector<8x256xf32>
    %251 = vector.extract_strided_slice %235 {offsets = [40, 129], sizes = [8, 256], strides = [1, 1]} : vector<72x512xf32> to vector<8x256xf32>
    %252 = vector.broadcast %1 : vector<1x256xf32> to vector<8x256xf32>
    %253 = arith.mulf %251, %252 : vector<8x256xf32>
    %254 = arith.addf %250, %253 : vector<8x256xf32>
    %255 = vector.extract_strided_slice %235 {offsets = [48, 143], sizes = [8, 256], strides = [1, 1]} : vector<72x512xf32> to vector<8x256xf32>
    %256 = vector.broadcast %0 : vector<1x256xf32> to vector<8x256xf32>
    %257 = arith.mulf %255, %256 : vector<8x256xf32>
    %258 = arith.addf %254, %257 : vector<8x256xf32>
    %259 = vector.extract_strided_slice %235 {offsets = [56, 144], sizes = [8, 256], strides = [1, 1]} : vector<72x512xf32> to vector<8x256xf32>
    %260 = arith.addf %258, %259 : vector<8x256xf32>
    %261 = vector.extract_strided_slice %235 {offsets = [64, 145], sizes = [8, 256], strides = [1, 1]} : vector<72x512xf32> to vector<8x256xf32>
    %262 = vector.broadcast %1 : vector<1x256xf32> to vector<8x256xf32>
    %263 = arith.mulf %261, %262 : vector<8x256xf32>
    %264 = arith.addf %260, %263 : vector<8x256xf32>
    %c0_129 = arith.constant 0 : index
    %c0_130 = arith.constant 0 : index
    %265 = vector.load %arg15[%c0_129, %c0_130] : memref<8x1xf32, #tpu.memory_space<vmem>>, vector<8x1xf32>
    %266 = vector.broadcast %265 : vector<8x1xf32> to vector<8x256xf32>
    %267 = arith.addf %264, %266 : vector<8x256xf32>
    %cst_131 = arith.constant 0.000000e+00 : f32
    %268 = vector.broadcast %cst_131 : f32 to vector<8x256xf32>
    %269 = arith.maximumf %267, %268 : vector<8x256xf32>
    %270 = arith.truncf %269 : vector<8x256xf32> to vector<8x256xbf16>
    %c0_132 = arith.constant 0 : index
    %c128_133 = arith.constant 128 : index
    %271 = vector.load %arg46[%c0_132, %c128_133] : memref<8x512xbf16, #tpu.memory_space<vmem>>, vector<8x256xbf16>
    tpu.vector_store %arg46[%c0_132, %c128_133], %270 {strides = array<i32>} : memref<8x512xbf16, #tpu.memory_space<vmem>>, vector<8x256xbf16>,
    %c0_134 = arith.constant 0 : index
    %c0_135 = arith.constant 0 : index
    %272 = vector.load %arg16[%c0_134, %c0_135] : memref<72x8xbf16, #tpu.memory_space<vmem>>, vector<72x8xbf16>
    %c0_136 = arith.constant 0 : index
    %c0_137 = arith.constant 0 : index
    %273 = vector.load %arg46[%c0_136, %c0_137] : memref<8x512xbf16, #tpu.memory_space<vmem>>, vector<8x512xbf16>
    %cst_138 = arith.constant dense<0.000000e+00> : vector<72x512xf32>
    %274 = tpu.matmul %272, %273, %cst_138 {dimension_numbers = #tpu.dot_dimension_numbers<[1], [0], [0], [1], [0, 0, 1, 1], [], []>} : vector<72x8xbf16>, vector<8x512xbf16>, vector<72x512xf32> -> vector<72x512xf32>
    %275 = vector.extract_strided_slice %274 {offsets = [0, 111], sizes = [8, 256], strides = [1, 1]} : vector<72x512xf32> to vector<8x256xf32>
    %276 = vector.broadcast %0 : vector<1x256xf32> to vector<8x256xf32>
    %277 = arith.mulf %275, %276 : vector<8x256xf32>
    %278 = vector.extract_strided_slice %274 {offsets = [8, 112], sizes = [8, 256], strides = [1, 1]} : vector<72x512xf32> to vector<8x256xf32>
    %279 = arith.addf %277, %278 : vector<8x256xf32>
    %280 = vector.extract_strided_slice %274 {offsets = [16, 113], sizes = [8, 256], strides = [1, 1]} : vector<72x512xf32> to vector<8x256xf32>
    %281 = vector.broadcast %1 : vector<1x256xf32> to vector<8x256xf32>
    %282 = arith.mulf %280, %281 : vector<8x256xf32>
    %283 = arith.addf %279, %282 : vector<8x256xf32>
    %284 = vector.extract_strided_slice %274 {offsets = [24, 127], sizes = [8, 256], strides = [1, 1]} : vector<72x512xf32> to vector<8x256xf32>
    %285 = vector.broadcast %0 : vector<1x256xf32> to vector<8x256xf32>
    %286 = arith.mulf %284, %285 : vector<8x256xf32>
    %287 = arith.addf %283, %286 : vector<8x256xf32>
    %288 = vector.extract_strided_slice %274 {offsets = [32, 128], sizes = [8, 256], strides = [1, 1]} : vector<72x512xf32> to vector<8x256xf32>
    %289 = arith.addf %287, %288 : vector<8x256xf32>
    %290 = vector.extract_strided_slice %274 {offsets = [40, 129], sizes = [8, 256], strides = [1, 1]} : vector<72x512xf32> to vector<8x256xf32>
    %291 = vector.broadcast %1 : vector<1x256xf32> to vector<8x256xf32>
    %292 = arith.mulf %290, %291 : vector<8x256xf32>
    %293 = arith.addf %289, %292 : vector<8x256xf32>
    %294 = vector.extract_strided_slice %274 {offsets = [48, 143], sizes = [8, 256], strides = [1, 1]} : vector<72x512xf32> to vector<8x256xf32>
    %295 = vector.broadcast %0 : vector<1x256xf32> to vector<8x256xf32>
    %296 = arith.mulf %294, %295 : vector<8x256xf32>
    %297 = arith.addf %293, %296 : vector<8x256xf32>
    %298 = vector.extract_strided_slice %274 {offsets = [56, 144], sizes = [8, 256], strides = [1, 1]} : vector<72x512xf32> to vector<8x256xf32>
    %299 = arith.addf %297, %298 : vector<8x256xf32>
    %300 = vector.extract_strided_slice %274 {offsets = [64, 145], sizes = [8, 256], strides = [1, 1]} : vector<72x512xf32> to vector<8x256xf32>
    %301 = vector.broadcast %1 : vector<1x256xf32> to vector<8x256xf32>
    %302 = arith.mulf %300, %301 : vector<8x256xf32>
    %303 = arith.addf %299, %302 : vector<8x256xf32>
    %c0_139 = arith.constant 0 : index
    %c0_140 = arith.constant 0 : index
    %304 = vector.load %arg17[%c0_139, %c0_140] : memref<8x1xf32, #tpu.memory_space<vmem>>, vector<8x1xf32>
    %305 = vector.broadcast %304 : vector<8x1xf32> to vector<8x256xf32>
    %306 = arith.addf %303, %305 : vector<8x256xf32>
    %cst_141 = arith.constant 0.000000e+00 : f32
    %307 = vector.broadcast %cst_141 : f32 to vector<8x256xf32>
    %308 = arith.maximumf %306, %307 : vector<8x256xf32>
    %c0_142 = arith.constant 0 : index
    %c0_143 = arith.constant 0 : index
    %309 = vector.load %arg18[%c0_142, %c0_143] : memref<2x8xbf16, #tpu.memory_space<vmem>>, vector<2x8xbf16>
    %310 = arith.truncf %308 : vector<8x256xf32> to vector<8x256xbf16>
    %cst_144 = arith.constant dense<0.000000e+00> : vector<2x256xf32>
    %311 = tpu.matmul %309, %310, %cst_144 {dimension_numbers = #tpu.dot_dimension_numbers<[1], [0], [0], [1], [0, 0, 1, 1], [], []>} : vector<2x8xbf16>, vector<8x256xbf16>, vector<2x256xf32> -> vector<2x256xf32>
    %c0_145 = arith.constant 0 : index
    %c0_146 = arith.constant 0 : index
    %312 = vector.load %arg19[%c0_145, %c0_146] : memref<2x1xf32, #tpu.memory_space<vmem>>, vector<2x1xf32>
    %313 = vector.broadcast %312 : vector<2x1xf32> to vector<2x256xf32>
    %314 = arith.addf %311, %313 : vector<2x256xf32>
    %315 = arith.truncf %314 : vector<2x256xf32> to vector<2x256xbf16>
    %c0_147 = arith.constant 0 : index
    %c128_148 = arith.constant 128 : index
    %316 = vector.load %arg39[%c0_147, %c128_148] : memref<2x512xbf16, #tpu.memory_space<vmem>>, vector<2x256xbf16>
    tpu.vector_store %arg39[%c0_147, %c128_148], %315 {strides = array<i32>} : memref<2x512xbf16, #tpu.memory_space<vmem>>, vector<2x256xbf16>,
    %c0_149 = arith.constant 0 : index
    %c0_150 = arith.constant 0 : index
    %317 = vector.load %arg20[%c0_149, %c0_150] : memref<72x4xbf16, #tpu.memory_space<vmem>>, vector<72x4xbf16>
    %c0_151 = arith.constant 0 : index
    %c0_152 = arith.constant 0 : index
    %318 = vector.load %arg38[%c0_151, %c0_152] : memref<4x512xbf16, #tpu.memory_space<vmem>>, vector<4x512xbf16>
    %cst_153 = arith.constant dense<0.000000e+00> : vector<72x512xf32>
    %319 = tpu.matmul %317, %318, %cst_153 {dimension_numbers = #tpu.dot_dimension_numbers<[1], [0], [0], [1], [0, 0, 1, 1], [], []>} : vector<72x4xbf16>, vector<4x512xbf16>, vector<72x512xf32> -> vector<72x512xf32>
    %c0_154 = arith.constant 0 : index
    %c0_155 = arith.constant 0 : index
    %320 = vector.load %arg21[%c0_154, %c0_155] : memref<72x2xbf16, #tpu.memory_space<vmem>>, vector<72x2xbf16>
    %c0_156 = arith.constant 0 : index
    %c0_157 = arith.constant 0 : index
    %321 = vector.load %arg39[%c0_156, %c0_157] : memref<2x512xbf16, #tpu.memory_space<vmem>>, vector<2x512xbf16>
    %cst_158 = arith.constant dense<0.000000e+00> : vector<72x512xf32>
    %322 = tpu.matmul %320, %321, %cst_158 {dimension_numbers = #tpu.dot_dimension_numbers<[1], [0], [0], [1], [0, 0, 1, 1], [], []>} : vector<72x2xbf16>, vector<2x512xbf16>, vector<72x512xf32> -> vector<72x512xf32>
    %323 = arith.addf %319, %322 : vector<72x512xf32>
    %324 = vector.extract_strided_slice %323 {offsets = [0, 111], sizes = [8, 256], strides = [1, 1]} : vector<72x512xf32> to vector<8x256xf32>
    %325 = vector.broadcast %0 : vector<1x256xf32> to vector<8x256xf32>
    %326 = arith.mulf %324, %325 : vector<8x256xf32>
    %327 = vector.extract_strided_slice %323 {offsets = [8, 112], sizes = [8, 256], strides = [1, 1]} : vector<72x512xf32> to vector<8x256xf32>
    %328 = arith.addf %326, %327 : vector<8x256xf32>
    %329 = vector.extract_strided_slice %323 {offsets = [16, 113], sizes = [8, 256], strides = [1, 1]} : vector<72x512xf32> to vector<8x256xf32>
    %330 = vector.broadcast %1 : vector<1x256xf32> to vector<8x256xf32>
    %331 = arith.mulf %329, %330 : vector<8x256xf32>
    %332 = arith.addf %328, %331 : vector<8x256xf32>
    %333 = vector.extract_strided_slice %323 {offsets = [24, 127], sizes = [8, 256], strides = [1, 1]} : vector<72x512xf32> to vector<8x256xf32>
    %334 = vector.broadcast %0 : vector<1x256xf32> to vector<8x256xf32>
    %335 = arith.mulf %333, %334 : vector<8x256xf32>
    %336 = arith.addf %332, %335 : vector<8x256xf32>
    %337 = vector.extract_strided_slice %323 {offsets = [32, 128], sizes = [8, 256], strides = [1, 1]} : vector<72x512xf32> to vector<8x256xf32>
    %338 = arith.addf %336, %337 : vector<8x256xf32>
    %339 = vector.extract_strided_slice %323 {offsets = [40, 129], sizes = [8, 256], strides = [1, 1]} : vector<72x512xf32> to vector<8x256xf32>
    %340 = vector.broadcast %1 : vector<1x256xf32> to vector<8x256xf32>
    %341 = arith.mulf %339, %340 : vector<8x256xf32>
    %342 = arith.addf %338, %341 : vector<8x256xf32>
    %343 = vector.extract_strided_slice %323 {offsets = [48, 143], sizes = [8, 256], strides = [1, 1]} : vector<72x512xf32> to vector<8x256xf32>
    %344 = vector.broadcast %0 : vector<1x256xf32> to vector<8x256xf32>
    %345 = arith.mulf %343, %344 : vector<8x256xf32>
    %346 = arith.addf %342, %345 : vector<8x256xf32>
    %347 = vector.extract_strided_slice %323 {offsets = [56, 144], sizes = [8, 256], strides = [1, 1]} : vector<72x512xf32> to vector<8x256xf32>
    %348 = arith.addf %346, %347 : vector<8x256xf32>
    %349 = vector.extract_strided_slice %323 {offsets = [64, 145], sizes = [8, 256], strides = [1, 1]} : vector<72x512xf32> to vector<8x256xf32>
    %350 = vector.broadcast %1 : vector<1x256xf32> to vector<8x256xf32>
    %351 = arith.mulf %349, %350 : vector<8x256xf32>
    %352 = arith.addf %348, %351 : vector<8x256xf32>
    %c0_159 = arith.constant 0 : index
    %c0_160 = arith.constant 0 : index
    %353 = vector.load %arg22[%c0_159, %c0_160] : memref<8x1xf32, #tpu.memory_space<vmem>>, vector<8x1xf32>
    %354 = vector.broadcast %353 : vector<8x1xf32> to vector<8x256xf32>
    %355 = arith.addf %352, %354 : vector<8x256xf32>
    %cst_161 = arith.constant 0.000000e+00 : f32
    %356 = vector.broadcast %cst_161 : f32 to vector<8x256xf32>
    %357 = arith.maximumf %355, %356 : vector<8x256xf32>
    %358 = arith.truncf %357 : vector<8x256xf32> to vector<8x256xbf16>
    %c0_162 = arith.constant 0 : index
    %c128_163 = arith.constant 128 : index
    %359 = vector.load %arg40[%c0_162, %c128_163] : memref<8x512xbf16, #tpu.memory_space<vmem>>, vector<8x256xbf16>
    tpu.vector_store %arg40[%c0_162, %c128_163], %358 {strides = array<i32>} : memref<8x512xbf16, #tpu.memory_space<vmem>>, vector<8x256xbf16>,
    %c0_164 = arith.constant 0 : index
    %c0_165 = arith.constant 0 : index
    %360 = vector.load %arg23[%c0_164, %c0_165] : memref<72x8xbf16, #tpu.memory_space<vmem>>, vector<72x8xbf16>
    %c0_166 = arith.constant 0 : index
    %c0_167 = arith.constant 0 : index
    %361 = vector.load %arg40[%c0_166, %c0_167] : memref<8x512xbf16, #tpu.memory_space<vmem>>, vector<8x512xbf16>
    %cst_168 = arith.constant dense<0.000000e+00> : vector<72x512xf32>
    %362 = tpu.matmul %360, %361, %cst_168 {dimension_numbers = #tpu.dot_dimension_numbers<[1], [0], [0], [1], [0, 0, 1, 1], [], []>} : vector<72x8xbf16>, vector<8x512xbf16>, vector<72x512xf32> -> vector<72x512xf32>
    %363 = vector.extract_strided_slice %362 {offsets = [0, 111], sizes = [8, 256], strides = [1, 1]} : vector<72x512xf32> to vector<8x256xf32>
    %364 = vector.broadcast %0 : vector<1x256xf32> to vector<8x256xf32>
    %365 = arith.mulf %363, %364 : vector<8x256xf32>
    %366 = vector.extract_strided_slice %362 {offsets = [8, 112], sizes = [8, 256], strides = [1, 1]} : vector<72x512xf32> to vector<8x256xf32>
    %367 = arith.addf %365, %366 : vector<8x256xf32>
    %368 = vector.extract_strided_slice %362 {offsets = [16, 113], sizes = [8, 256], strides = [1, 1]} : vector<72x512xf32> to vector<8x256xf32>
    %369 = vector.broadcast %1 : vector<1x256xf32> to vector<8x256xf32>
    %370 = arith.mulf %368, %369 : vector<8x256xf32>
    %371 = arith.addf %367, %370 : vector<8x256xf32>
    %372 = vector.extract_strided_slice %362 {offsets = [24, 127], sizes = [8, 256], strides = [1, 1]} : vector<72x512xf32> to vector<8x256xf32>
    %373 = vector.broadcast %0 : vector<1x256xf32> to vector<8x256xf32>
    %374 = arith.mulf %372, %373 : vector<8x256xf32>
    %375 = arith.addf %371, %374 : vector<8x256xf32>
    %376 = vector.extract_strided_slice %362 {offsets = [32, 128], sizes = [8, 256], strides = [1, 1]} : vector<72x512xf32> to vector<8x256xf32>
    %377 = arith.addf %375, %376 : vector<8x256xf32>
    %378 = vector.extract_strided_slice %362 {offsets = [40, 129], sizes = [8, 256], strides = [1, 1]} : vector<72x512xf32> to vector<8x256xf32>
    %379 = vector.broadcast %1 : vector<1x256xf32> to vector<8x256xf32>
    %380 = arith.mulf %378, %379 : vector<8x256xf32>
    %381 = arith.addf %377, %380 : vector<8x256xf32>
    %382 = vector.extract_strided_slice %362 {offsets = [48, 143], sizes = [8, 256], strides = [1, 1]} : vector<72x512xf32> to vector<8x256xf32>
    %383 = vector.broadcast %0 : vector<1x256xf32> to vector<8x256xf32>
    %384 = arith.mulf %382, %383 : vector<8x256xf32>
    %385 = arith.addf %381, %384 : vector<8x256xf32>
    %386 = vector.extract_strided_slice %362 {offsets = [56, 144], sizes = [8, 256], strides = [1, 1]} : vector<72x512xf32> to vector<8x256xf32>
    %387 = arith.addf %385, %386 : vector<8x256xf32>
    %388 = vector.extract_strided_slice %362 {offsets = [64, 145], sizes = [8, 256], strides = [1, 1]} : vector<72x512xf32> to vector<8x256xf32>
    %389 = vector.broadcast %1 : vector<1x256xf32> to vector<8x256xf32>
    %390 = arith.mulf %388, %389 : vector<8x256xf32>
    %391 = arith.addf %387, %390 : vector<8x256xf32>
    %c0_169 = arith.constant 0 : index
    %c0_170 = arith.constant 0 : index
    %392 = vector.load %arg24[%c0_169, %c0_170] : memref<8x1xf32, #tpu.memory_space<vmem>>, vector<8x1xf32>
    %393 = vector.broadcast %392 : vector<8x1xf32> to vector<8x256xf32>
    %394 = arith.addf %391, %393 : vector<8x256xf32>
    %cst_171 = arith.constant 0.000000e+00 : f32
    %395 = vector.broadcast %cst_171 : f32 to vector<8x256xf32>
    %396 = arith.maximumf %394, %395 : vector<8x256xf32>
    %397 = arith.truncf %396 : vector<8x256xf32> to vector<8x256xbf16>
    %c0_172 = arith.constant 0 : index
    %c128_173 = arith.constant 128 : index
    %398 = vector.load %arg41[%c0_172, %c128_173] : memref<8x512xbf16, #tpu.memory_space<vmem>>, vector<8x256xbf16>
    tpu.vector_store %arg41[%c0_172, %c128_173], %397 {strides = array<i32>} : memref<8x512xbf16, #tpu.memory_space<vmem>>, vector<8x256xbf16>,
    %c0_174 = arith.constant 0 : index
    %c128_175 = arith.constant 128 : index
    %399 = vector.load %arg41[%c0_174, %c128_175] : memref<8x512xbf16, #tpu.memory_space<vmem>>, vector<8x256xbf16>
    %c0_176 = arith.constant 0 : index
    %c129_177 = arith.constant 129 : index
    %400 = vector.load %arg41[%c0_176, %c129_177] : memref<8x512xbf16, #tpu.memory_space<vmem>>, vector<8x256xbf16>
    %c0_178 = arith.constant 0 : index
    %c144_179 = arith.constant 144 : index
    %401 = vector.load %arg41[%c0_178, %c144_179] : memref<8x512xbf16, #tpu.memory_space<vmem>>, vector<8x256xbf16>
    %c0_180 = arith.constant 0 : index
    %c145_181 = arith.constant 145 : index
    %402 = vector.load %arg41[%c0_180, %c145_181] : memref<8x512xbf16, #tpu.memory_space<vmem>>, vector<8x256xbf16>
    %403 = arith.maximumf %399, %400 : vector<8x256xbf16>
    %404 = arith.maximumf %401, %402 : vector<8x256xbf16>
    %405 = arith.maximumf %403, %404 : vector<8x256xbf16>
    %c0_182 = arith.constant 0 : index
    %c128_183 = arith.constant 128 : index
    %406 = vector.load %arg42[%c0_182, %c128_183] : memref<8x512xbf16, #tpu.memory_space<vmem>>, vector<8x256xbf16>
    tpu.vector_store %arg42[%c0_182, %c128_183], %405 {strides = array<i32>} : memref<8x512xbf16, #tpu.memory_space<vmem>>, vector<8x256xbf16>,
    %c0_184 = arith.constant 0 : index
    %c0_185 = arith.constant 0 : index
    %407 = vector.load %arg25[%c0_184, %c0_185] : memref<144x8xbf16, #tpu.memory_space<vmem>>, vector<144x8xbf16>
    %c0_186 = arith.constant 0 : index
    %c0_187 = arith.constant 0 : index
    %408 = vector.load %arg42[%c0_186, %c0_187] : memref<8x512xbf16, #tpu.memory_space<vmem>>, vector<8x512xbf16>
    %cst_188 = arith.constant dense<0.000000e+00> : vector<144x512xf32>
    %409 = tpu.matmul %407, %408, %cst_188 {dimension_numbers = #tpu.dot_dimension_numbers<[1], [0], [0], [1], [0, 0, 1, 1], [], []>} : vector<144x8xbf16>, vector<8x512xbf16>, vector<144x512xf32> -> vector<144x512xf32>
    %410 = vector.extract_strided_slice %409 {offsets = [0, 94], sizes = [16, 256], strides = [1, 1]} : vector<144x512xf32> to vector<16x256xf32>
    %411 = vector.broadcast %2 : vector<1x256xf32> to vector<16x256xf32>
    %412 = arith.mulf %410, %411 : vector<16x256xf32>
    %413 = vector.extract_strided_slice %409 {offsets = [16, 96], sizes = [16, 256], strides = [1, 1]} : vector<144x512xf32> to vector<16x256xf32>
    %414 = arith.addf %412, %413 : vector<16x256xf32>
    %415 = vector.extract_strided_slice %409 {offsets = [32, 98], sizes = [16, 256], strides = [1, 1]} : vector<144x512xf32> to vector<16x256xf32>
    %416 = vector.broadcast %3 : vector<1x256xf32> to vector<16x256xf32>
    %417 = arith.mulf %415, %416 : vector<16x256xf32>
    %418 = arith.addf %414, %417 : vector<16x256xf32>
    %419 = vector.extract_strided_slice %409 {offsets = [48, 126], sizes = [16, 256], strides = [1, 1]} : vector<144x512xf32> to vector<16x256xf32>
    %420 = vector.broadcast %2 : vector<1x256xf32> to vector<16x256xf32>
    %421 = arith.mulf %419, %420 : vector<16x256xf32>
    %422 = arith.addf %418, %421 : vector<16x256xf32>
    %423 = vector.extract_strided_slice %409 {offsets = [64, 128], sizes = [16, 256], strides = [1, 1]} : vector<144x512xf32> to vector<16x256xf32>
    %424 = arith.addf %422, %423 : vector<16x256xf32>
    %425 = vector.extract_strided_slice %409 {offsets = [80, 130], sizes = [16, 256], strides = [1, 1]} : vector<144x512xf32> to vector<16x256xf32>
    %426 = vector.broadcast %3 : vector<1x256xf32> to vector<16x256xf32>
    %427 = arith.mulf %425, %426 : vector<16x256xf32>
    %428 = arith.addf %424, %427 : vector<16x256xf32>
    %429 = vector.extract_strided_slice %409 {offsets = [96, 158], sizes = [16, 256], strides = [1, 1]} : vector<144x512xf32> to vector<16x256xf32>
    %430 = vector.broadcast %2 : vector<1x256xf32> to vector<16x256xf32>
    %431 = arith.mulf %429, %430 : vector<16x256xf32>
    %432 = arith.addf %428, %431 : vector<16x256xf32>
    %433 = vector.extract_strided_slice %409 {offsets = [112, 160], sizes = [16, 256], strides = [1, 1]} : vector<144x512xf32> to vector<16x256xf32>
    %434 = arith.addf %432, %433 : vector<16x256xf32>
    %435 = vector.extract_strided_slice %409 {offsets = [128, 162], sizes = [16, 256], strides = [1, 1]} : vector<144x512xf32> to vector<16x256xf32>
    %436 = vector.broadcast %3 : vector<1x256xf32> to vector<16x256xf32>
    %437 = arith.mulf %435, %436 : vector<16x256xf32>
    %438 = arith.addf %434, %437 : vector<16x256xf32>
    %c0_189 = arith.constant 0 : index
    %c0_190 = arith.constant 0 : index
    %439 = vector.load %arg26[%c0_189, %c0_190] : memref<16x1xf32, #tpu.memory_space<vmem>>, vector<16x1xf32>
    %440 = vector.broadcast %439 : vector<16x1xf32> to vector<16x256xf32>
    %441 = arith.addf %438, %440 : vector<16x256xf32>
    %cst_191 = arith.constant 0.000000e+00 : f32
    %442 = vector.broadcast %cst_191 : f32 to vector<16x256xf32>
    %443 = arith.maximumf %441, %442 : vector<16x256xf32>
    %444 = arith.truncf %443 : vector<16x256xf32> to vector<16x256xbf16>
    %c0_192 = arith.constant 0 : index
    %c128_193 = arith.constant 128 : index
    %445 = vector.load %arg43[%c0_192, %c128_193] : memref<16x512xbf16, #tpu.memory_space<vmem>>, vector<16x256xbf16>
    tpu.vector_store %arg43[%c0_192, %c128_193], %444 {strides = array<i32>} : memref<16x512xbf16, #tpu.memory_space<vmem>>, vector<16x256xbf16>,
    %c0_194 = arith.constant 0 : index
    %c0_195 = arith.constant 0 : index
    %446 = vector.load %arg27[%c0_194, %c0_195] : memref<144x16xbf16, #tpu.memory_space<vmem>>, vector<144x16xbf16>
    %c0_196 = arith.constant 0 : index
    %c0_197 = arith.constant 0 : index
    %447 = vector.load %arg43[%c0_196, %c0_197] : memref<16x512xbf16, #tpu.memory_space<vmem>>, vector<16x512xbf16>
    %cst_198 = arith.constant dense<0.000000e+00> : vector<144x512xf32>
    %448 = tpu.matmul %446, %447, %cst_198 {dimension_numbers = #tpu.dot_dimension_numbers<[1], [0], [0], [1], [0, 0, 1, 1], [], []>} : vector<144x16xbf16>, vector<16x512xbf16>, vector<144x512xf32> -> vector<144x512xf32>
    %449 = vector.extract_strided_slice %448 {offsets = [0, 94], sizes = [16, 256], strides = [1, 1]} : vector<144x512xf32> to vector<16x256xf32>
    %450 = vector.broadcast %2 : vector<1x256xf32> to vector<16x256xf32>
    %451 = arith.mulf %449, %450 : vector<16x256xf32>
    %452 = vector.extract_strided_slice %448 {offsets = [16, 96], sizes = [16, 256], strides = [1, 1]} : vector<144x512xf32> to vector<16x256xf32>
    %453 = arith.addf %451, %452 : vector<16x256xf32>
    %454 = vector.extract_strided_slice %448 {offsets = [32, 98], sizes = [16, 256], strides = [1, 1]} : vector<144x512xf32> to vector<16x256xf32>
    %455 = vector.broadcast %3 : vector<1x256xf32> to vector<16x256xf32>
    %456 = arith.mulf %454, %455 : vector<16x256xf32>
    %457 = arith.addf %453, %456 : vector<16x256xf32>
    %458 = vector.extract_strided_slice %448 {offsets = [48, 126], sizes = [16, 256], strides = [1, 1]} : vector<144x512xf32> to vector<16x256xf32>
    %459 = vector.broadcast %2 : vector<1x256xf32> to vector<16x256xf32>
    %460 = arith.mulf %458, %459 : vector<16x256xf32>
    %461 = arith.addf %457, %460 : vector<16x256xf32>
    %462 = vector.extract_strided_slice %448 {offsets = [64, 128], sizes = [16, 256], strides = [1, 1]} : vector<144x512xf32> to vector<16x256xf32>
    %463 = arith.addf %461, %462 : vector<16x256xf32>
    %464 = vector.extract_strided_slice %448 {offsets = [80, 130], sizes = [16, 256], strides = [1, 1]} : vector<144x512xf32> to vector<16x256xf32>
    %465 = vector.broadcast %3 : vector<1x256xf32> to vector<16x256xf32>
    %466 = arith.mulf %464, %465 : vector<16x256xf32>
    %467 = arith.addf %463, %466 : vector<16x256xf32>
    %468 = vector.extract_strided_slice %448 {offsets = [96, 158], sizes = [16, 256], strides = [1, 1]} : vector<144x512xf32> to vector<16x256xf32>
    %469 = vector.broadcast %2 : vector<1x256xf32> to vector<16x256xf32>
    %470 = arith.mulf %468, %469 : vector<16x256xf32>
    %471 = arith.addf %467, %470 : vector<16x256xf32>
    %472 = vector.extract_strided_slice %448 {offsets = [112, 160], sizes = [16, 256], strides = [1, 1]} : vector<144x512xf32> to vector<16x256xf32>
    %473 = arith.addf %471, %472 : vector<16x256xf32>
    %474 = vector.extract_strided_slice %448 {offsets = [128, 162], sizes = [16, 256], strides = [1, 1]} : vector<144x512xf32> to vector<16x256xf32>
    %475 = vector.broadcast %3 : vector<1x256xf32> to vector<16x256xf32>
    %476 = arith.mulf %474, %475 : vector<16x256xf32>
    %477 = arith.addf %473, %476 : vector<16x256xf32>
    %c0_199 = arith.constant 0 : index
    %c0_200 = arith.constant 0 : index
    %478 = vector.load %arg28[%c0_199, %c0_200] : memref<16x1xf32, #tpu.memory_space<vmem>>, vector<16x1xf32>
    %479 = vector.broadcast %478 : vector<16x1xf32> to vector<16x256xf32>
    %480 = arith.addf %477, %479 : vector<16x256xf32>
    %cst_201 = arith.constant 0.000000e+00 : f32
    %481 = vector.broadcast %cst_201 : f32 to vector<16x256xf32>
    %482 = arith.maximumf %480, %481 : vector<16x256xf32>
    %483 = arith.truncf %482 : vector<16x256xf32> to vector<16x256xbf16>
    %c0_202 = arith.constant 0 : index
    %c128_203 = arith.constant 128 : index
    %484 = vector.load %arg44[%c0_202, %c128_203] : memref<16x512xbf16, #tpu.memory_space<vmem>>, vector<16x256xbf16>
    tpu.vector_store %arg44[%c0_202, %c128_203], %483 {strides = array<i32>} : memref<16x512xbf16, #tpu.memory_space<vmem>>, vector<16x256xbf16>,
    %c0_204 = arith.constant 0 : index
    %c128_205 = arith.constant 128 : index
    %485 = vector.load %arg44[%c0_204, %c128_205] : memref<16x512xbf16, #tpu.memory_space<vmem>>, vector<16x256xbf16>
    %c0_206 = arith.constant 0 : index
    %c127_207 = arith.constant 127 : index
    %486 = vector.load %arg44[%c0_206, %c127_207] : memref<16x512xbf16, #tpu.memory_space<vmem>>, vector<16x256xbf16>
    %c0_208 = arith.constant 0 : index
    %c112_209 = arith.constant 112 : index
    %487 = vector.load %arg44[%c0_208, %c112_209] : memref<16x512xbf16, #tpu.memory_space<vmem>>, vector<16x256xbf16>
    %c0_210 = arith.constant 0 : index
    %c111_211 = arith.constant 111 : index
    %488 = vector.load %arg44[%c0_210, %c111_211] : memref<16x512xbf16, #tpu.memory_space<vmem>>, vector<16x256xbf16>
    %489 = vector.shape_cast %6 : vector<1x256xi1> to vector<1x256xi1>
    %490 = vector.broadcast %489 : vector<1x256xi1> to vector<16x256xi1>
    %491 = arith.select %490, %486, %485 : vector<16x256xi1>, vector<16x256xbf16>
    %492 = vector.shape_cast %6 : vector<1x256xi1> to vector<1x256xi1>
    %493 = vector.broadcast %492 : vector<1x256xi1> to vector<16x256xi1>
    %494 = arith.select %493, %488, %487 : vector<16x256xi1>, vector<16x256xbf16>
    %495 = vector.shape_cast %9 : vector<1x256xi1> to vector<1x256xi1>
    %496 = vector.broadcast %495 : vector<1x256xi1> to vector<16x256xi1>
    %497 = arith.select %496, %494, %491 : vector<16x256xi1>, vector<16x256xbf16>
    %c0_212 = arith.constant 0 : index
    %c128_213 = arith.constant 128 : index
    %498 = vector.load %arg45[%c0_212, %c128_213] : memref<16x512xbf16, #tpu.memory_space<vmem>>, vector<16x256xbf16>
    tpu.vector_store %arg45[%c0_212, %c128_213], %497 {strides = array<i32>} : memref<16x512xbf16, #tpu.memory_space<vmem>>, vector<16x256xbf16>,
    %c0_214 = arith.constant 0 : index
    %c0_215 = arith.constant 0 : index
    %499 = vector.load %arg29[%c0_214, %c0_215] : memref<72x8xbf16, #tpu.memory_space<vmem>>, vector<72x8xbf16>
    %c0_216 = arith.constant 0 : index
    %c0_217 = arith.constant 0 : index
    %500 = vector.load %arg41[%c0_216, %c0_217] : memref<8x512xbf16, #tpu.memory_space<vmem>>, vector<8x512xbf16>
    %cst_218 = arith.constant dense<0.000000e+00> : vector<72x512xf32>
    %501 = tpu.matmul %499, %500, %cst_218 {dimension_numbers = #tpu.dot_dimension_numbers<[1], [0], [0], [1], [0, 0, 1, 1], [], []>} : vector<72x8xbf16>, vector<8x512xbf16>, vector<72x512xf32> -> vector<72x512xf32>
    %c0_219 = arith.constant 0 : index
    %c0_220 = arith.constant 0 : index
    %502 = vector.load %arg30[%c0_219, %c0_220] : memref<72x16xbf16, #tpu.memory_space<vmem>>, vector<72x16xbf16>
    %c0_221 = arith.constant 0 : index
    %c0_222 = arith.constant 0 : index
    %503 = vector.load %arg45[%c0_221, %c0_222] : memref<16x512xbf16, #tpu.memory_space<vmem>>, vector<16x512xbf16>
    %cst_223 = arith.constant dense<0.000000e+00> : vector<72x512xf32>
    %504 = tpu.matmul %502, %503, %cst_223 {dimension_numbers = #tpu.dot_dimension_numbers<[1], [0], [0], [1], [0, 0, 1, 1], [], []>} : vector<72x16xbf16>, vector<16x512xbf16>, vector<72x512xf32> -> vector<72x512xf32>
    %505 = arith.addf %501, %504 : vector<72x512xf32>
    %506 = vector.extract_strided_slice %505 {offsets = [0, 111], sizes = [8, 256], strides = [1, 1]} : vector<72x512xf32> to vector<8x256xf32>
    %507 = vector.broadcast %0 : vector<1x256xf32> to vector<8x256xf32>
    %508 = arith.mulf %506, %507 : vector<8x256xf32>
    %509 = vector.extract_strided_slice %505 {offsets = [8, 112], sizes = [8, 256], strides = [1, 1]} : vector<72x512xf32> to vector<8x256xf32>
    %510 = arith.addf %508, %509 : vector<8x256xf32>
    %511 = vector.extract_strided_slice %505 {offsets = [16, 113], sizes = [8, 256], strides = [1, 1]} : vector<72x512xf32> to vector<8x256xf32>
    %512 = vector.broadcast %1 : vector<1x256xf32> to vector<8x256xf32>
    %513 = arith.mulf %511, %512 : vector<8x256xf32>
    %514 = arith.addf %510, %513 : vector<8x256xf32>
    %515 = vector.extract_strided_slice %505 {offsets = [24, 127], sizes = [8, 256], strides = [1, 1]} : vector<72x512xf32> to vector<8x256xf32>
    %516 = vector.broadcast %0 : vector<1x256xf32> to vector<8x256xf32>
    %517 = arith.mulf %515, %516 : vector<8x256xf32>
    %518 = arith.addf %514, %517 : vector<8x256xf32>
    %519 = vector.extract_strided_slice %505 {offsets = [32, 128], sizes = [8, 256], strides = [1, 1]} : vector<72x512xf32> to vector<8x256xf32>
    %520 = arith.addf %518, %519 : vector<8x256xf32>
    %521 = vector.extract_strided_slice %505 {offsets = [40, 129], sizes = [8, 256], strides = [1, 1]} : vector<72x512xf32> to vector<8x256xf32>
    %522 = vector.broadcast %1 : vector<1x256xf32> to vector<8x256xf32>
    %523 = arith.mulf %521, %522 : vector<8x256xf32>
    %524 = arith.addf %520, %523 : vector<8x256xf32>
    %525 = vector.extract_strided_slice %505 {offsets = [48, 143], sizes = [8, 256], strides = [1, 1]} : vector<72x512xf32> to vector<8x256xf32>
    %526 = vector.broadcast %0 : vector<1x256xf32> to vector<8x256xf32>
    %527 = arith.mulf %525, %526 : vector<8x256xf32>
    %528 = arith.addf %524, %527 : vector<8x256xf32>
    %529 = vector.extract_strided_slice %505 {offsets = [56, 144], sizes = [8, 256], strides = [1, 1]} : vector<72x512xf32> to vector<8x256xf32>
    %530 = arith.addf %528, %529 : vector<8x256xf32>
    %531 = vector.extract_strided_slice %505 {offsets = [64, 145], sizes = [8, 256], strides = [1, 1]} : vector<72x512xf32> to vector<8x256xf32>
    %532 = vector.broadcast %1 : vector<1x256xf32> to vector<8x256xf32>
    %533 = arith.mulf %531, %532 : vector<8x256xf32>
    %534 = arith.addf %530, %533 : vector<8x256xf32>
    %c0_224 = arith.constant 0 : index
    %c0_225 = arith.constant 0 : index
    %535 = vector.load %arg31[%c0_224, %c0_225] : memref<8x1xf32, #tpu.memory_space<vmem>>, vector<8x1xf32>
    %536 = vector.broadcast %535 : vector<8x1xf32> to vector<8x256xf32>
    %537 = arith.addf %534, %536 : vector<8x256xf32>
    %cst_226 = arith.constant 0.000000e+00 : f32
    %538 = vector.broadcast %cst_226 : f32 to vector<8x256xf32>
    %539 = arith.maximumf %537, %538 : vector<8x256xf32>
    %540 = arith.truncf %539 : vector<8x256xf32> to vector<8x256xbf16>
    %c0_227 = arith.constant 0 : index
    %c128_228 = arith.constant 128 : index
    %541 = vector.load %arg46[%c0_227, %c128_228] : memref<8x512xbf16, #tpu.memory_space<vmem>>, vector<8x256xbf16>
    tpu.vector_store %arg46[%c0_227, %c128_228], %540 {strides = array<i32>} : memref<8x512xbf16, #tpu.memory_space<vmem>>, vector<8x256xbf16>,
    %c0_229 = arith.constant 0 : index
    %c0_230 = arith.constant 0 : index
    %542 = vector.load %arg32[%c0_229, %c0_230] : memref<72x8xbf16, #tpu.memory_space<vmem>>, vector<72x8xbf16>
    %c0_231 = arith.constant 0 : index
    %c0_232 = arith.constant 0 : index
    %543 = vector.load %arg46[%c0_231, %c0_232] : memref<8x512xbf16, #tpu.memory_space<vmem>>, vector<8x512xbf16>
    %cst_233 = arith.constant dense<0.000000e+00> : vector<72x512xf32>
    %544 = tpu.matmul %542, %543, %cst_233 {dimension_numbers = #tpu.dot_dimension_numbers<[1], [0], [0], [1], [0, 0, 1, 1], [], []>} : vector<72x8xbf16>, vector<8x512xbf16>, vector<72x512xf32> -> vector<72x512xf32>
    %545 = vector.extract_strided_slice %544 {offsets = [0, 111], sizes = [8, 256], strides = [1, 1]} : vector<72x512xf32> to vector<8x256xf32>
    %546 = vector.broadcast %0 : vector<1x256xf32> to vector<8x256xf32>
    %547 = arith.mulf %545, %546 : vector<8x256xf32>
    %548 = vector.extract_strided_slice %544 {offsets = [8, 112], sizes = [8, 256], strides = [1, 1]} : vector<72x512xf32> to vector<8x256xf32>
    %549 = arith.addf %547, %548 : vector<8x256xf32>
    %550 = vector.extract_strided_slice %544 {offsets = [16, 113], sizes = [8, 256], strides = [1, 1]} : vector<72x512xf32> to vector<8x256xf32>
    %551 = vector.broadcast %1 : vector<1x256xf32> to vector<8x256xf32>
    %552 = arith.mulf %550, %551 : vector<8x256xf32>
    %553 = arith.addf %549, %552 : vector<8x256xf32>
    %554 = vector.extract_strided_slice %544 {offsets = [24, 127], sizes = [8, 256], strides = [1, 1]} : vector<72x512xf32> to vector<8x256xf32>
    %555 = vector.broadcast %0 : vector<1x256xf32> to vector<8x256xf32>
    %556 = arith.mulf %554, %555 : vector<8x256xf32>
    %557 = arith.addf %553, %556 : vector<8x256xf32>
    %558 = vector.extract_strided_slice %544 {offsets = [32, 128], sizes = [8, 256], strides = [1, 1]} : vector<72x512xf32> to vector<8x256xf32>
    %559 = arith.addf %557, %558 : vector<8x256xf32>
    %560 = vector.extract_strided_slice %544 {offsets = [40, 129], sizes = [8, 256], strides = [1, 1]} : vector<72x512xf32> to vector<8x256xf32>
    %561 = vector.broadcast %1 : vector<1x256xf32> to vector<8x256xf32>
    %562 = arith.mulf %560, %561 : vector<8x256xf32>
    %563 = arith.addf %559, %562 : vector<8x256xf32>
    %564 = vector.extract_strided_slice %544 {offsets = [48, 143], sizes = [8, 256], strides = [1, 1]} : vector<72x512xf32> to vector<8x256xf32>
    %565 = vector.broadcast %0 : vector<1x256xf32> to vector<8x256xf32>
    %566 = arith.mulf %564, %565 : vector<8x256xf32>
    %567 = arith.addf %563, %566 : vector<8x256xf32>
    %568 = vector.extract_strided_slice %544 {offsets = [56, 144], sizes = [8, 256], strides = [1, 1]} : vector<72x512xf32> to vector<8x256xf32>
    %569 = arith.addf %567, %568 : vector<8x256xf32>
    %570 = vector.extract_strided_slice %544 {offsets = [64, 145], sizes = [8, 256], strides = [1, 1]} : vector<72x512xf32> to vector<8x256xf32>
    %571 = vector.broadcast %1 : vector<1x256xf32> to vector<8x256xf32>
    %572 = arith.mulf %570, %571 : vector<8x256xf32>
    %573 = arith.addf %569, %572 : vector<8x256xf32>
    %c0_234 = arith.constant 0 : index
    %c0_235 = arith.constant 0 : index
    %574 = vector.load %arg33[%c0_234, %c0_235] : memref<8x1xf32, #tpu.memory_space<vmem>>, vector<8x1xf32>
    %575 = vector.broadcast %574 : vector<8x1xf32> to vector<8x256xf32>
    %576 = arith.addf %573, %575 : vector<8x256xf32>
    %cst_236 = arith.constant 0.000000e+00 : f32
    %577 = vector.broadcast %cst_236 : f32 to vector<8x256xf32>
    %578 = arith.maximumf %576, %577 : vector<8x256xf32>
    %c0_237 = arith.constant 0 : index
    %c0_238 = arith.constant 0 : index
    %579 = vector.load %arg34[%c0_237, %c0_238] : memref<4x8xbf16, #tpu.memory_space<vmem>>, vector<4x8xbf16>
    %580 = arith.truncf %578 : vector<8x256xf32> to vector<8x256xbf16>
    %cst_239 = arith.constant dense<0.000000e+00> : vector<4x256xf32>
    %581 = tpu.matmul %579, %580, %cst_239 {dimension_numbers = #tpu.dot_dimension_numbers<[1], [0], [0], [1], [0, 0, 1, 1], [], []>} : vector<4x8xbf16>, vector<8x256xbf16>, vector<4x256xf32> -> vector<4x256xf32>
    %c0_240 = arith.constant 0 : index
    %c0_241 = arith.constant 0 : index
    %582 = vector.load %arg35[%c0_240, %c0_241] : memref<4x1xf32, #tpu.memory_space<vmem>>, vector<4x1xf32>
    %583 = vector.broadcast %582 : vector<4x1xf32> to vector<4x256xf32>
    %584 = arith.addf %581, %583 : vector<4x256xf32>
    %585 = arith.negf %584 : vector<4x256xf32>
    %586 = math.exp %585 : vector<4x256xf32>
    %cst_242 = arith.constant 1.000000e+00 : f32
    %587 = vector.broadcast %cst_242 : f32 to vector<4x256xf32>
    %588 = arith.addf %587, %586 : vector<4x256xf32>
    %589 = arith.divf %587, %588 : vector<4x256xf32>
    %c0_243 = arith.constant 0 : index
    %c0_244 = arith.constant 0 : index
    %c0_245 = arith.constant 0 : index
    %590 = vector.load %arg36[%c0_243, %c0_244, %c0_245] : memref<1x4x256xf32, #tpu.memory_space<vmem>>, vector<1x4x256xf32>
    %591 = vector.shape_cast %590 : vector<1x4x256xf32> to vector<4x256xf32>
    %592 = vector.shape_cast %589 : vector<4x256xf32> to vector<1x4x256xf32>
    tpu.vector_store %arg36[%c0_243, %c0_244, %c0_245], %592 {strides = array<i32>} : memref<1x4x256xf32, #tpu.memory_space<vmem>>, vector<1x4x256xf32>,
    %cst_246 = arith.constant 1.000000e-07 : f32
    %cst_247 = arith.constant 0.99999988 : f32
    %593 = vector.broadcast %cst_246 : f32 to vector<4x256xf32>
    %594 = arith.maximumf %593, %589 : vector<4x256xf32>
    %595 = vector.broadcast %cst_247 : f32 to vector<4x256xf32>
    %596 = arith.minimumf %595, %594 : vector<4x256xf32>
    %c0_248 = arith.constant 0 : index
    %c0_249 = arith.constant 0 : index
    %c0_250 = arith.constant 0 : index
    %597 = vector.load %arg2[%c0_248, %c0_249, %c0_250] : memref<1x4x256xf32, #tpu.memory_space<vmem>>, vector<1x4x256xf32>
    %598 = vector.shape_cast %597 : vector<1x4x256xf32> to vector<4x256xf32>
    %599 = math.log %596 : vector<4x256xf32>
    %600 = arith.mulf %598, %599 : vector<4x256xf32>
    %cst_251 = arith.constant 1.000000e+00 : f32
    %601 = vector.broadcast %cst_251 : f32 to vector<4x256xf32>
    %602 = arith.subf %601, %598 : vector<4x256xf32>
    %cst_252 = arith.constant 1.000000e+00 : f32
    %603 = vector.broadcast %cst_252 : f32 to vector<4x256xf32>
    %604 = arith.subf %603, %596 : vector<4x256xf32>
    %605 = math.log %604 : vector<4x256xf32>
    %606 = arith.mulf %602, %605 : vector<4x256xf32>
    %607 = arith.addf %600, %606 : vector<4x256xf32>
    %cst_253 = arith.constant 0.000000e+00 : f32
    %608 = vector.broadcast %cst_253 : f32 to vector<4x256xf32>
    %609 = arith.subf %608, %607 : vector<4x256xf32>
    %c0_254 = arith.constant 0 : index
    %c0_255 = arith.constant 0 : index
    %610 = vector.load %arg3[%c0_254, %c0_255] : memref<4x1xf32, #tpu.memory_space<vmem>>, vector<4x1xf32>
    %611 = vector.broadcast %610 : vector<4x1xf32> to vector<4x256xf32>
    %612 = arith.mulf %609, %611 : vector<4x256xf32>
    %613 = vector.broadcast %10 : vector<1x256xf32> to vector<4x256xf32>
    %614 = arith.mulf %612, %613 : vector<4x256xf32>
    %cst_256 = arith.constant dense<0.000000e+00> : vector<4xf32>
    %615 = vector.multi_reduction <add>, %614, %cst_256 [1] : vector<4x256xf32> to vector<4xf32>
    %616 = vector.shape_cast %615 : vector<4xf32> to vector<4x1xf32>
    %cst_257 = arith.constant dense<0.000000e+00> : vector<1xf32>
    %617 = vector.multi_reduction <add>, %616, %cst_257 [0] : vector<4x1xf32> to vector<1xf32>
    %618 = vector.shape_cast %617 : vector<1xf32> to vector<1x1xf32>
    %c0_258 = arith.constant 0 : index
    %c0_259 = arith.constant 0 : index
    %c0_260 = arith.constant 0 : index
    %619 = vector.load %arg37[%c0_258, %c0_259, %c0_260] : memref<1x1x1xf32, #tpu.memory_space<vmem>>, vector<1x1x1xf32>
    %620 = vector.shape_cast %619 : vector<1x1x1xf32> to vector<1x1xf32>
    %621 = vector.shape_cast %618 : vector<1x1xf32> to vector<1x1x1xf32>
    tpu.vector_store %arg37[%c0_258, %c0_259, %c0_260], %621 {strides = array<i32>} : memref<1x1x1xf32, #tpu.memory_space<vmem>>, vector<1x1x1xf32>,
    return
  }
  func.func @transform_0(%arg0: i32) -> (i32, i32, i32) {
    %c0_i32 = arith.constant 0 : i32
    %c0_i32_0 = arith.constant 0 : i32
    %c0_i32_1 = arith.constant 0 : i32
    return %arg0, %c0_i32, %c0_i32_0 : i32, i32, i32
  }
  func.func @transform_1(%arg0: i32) -> (i32, i32, i32) {
    %c0_i32 = arith.constant 0 : i32
    %c0_i32_0 = arith.constant 0 : i32
    %c0_i32_1 = arith.constant 0 : i32
    return %arg0, %c0_i32, %c0_i32_0 : i32, i32, i32
  }
  func.func @transform_2(%arg0: i32) -> (i32, i32) {
    %c0_i32 = arith.constant 0 : i32
    %c0_i32_0 = arith.constant 0 : i32
    %c0_i32_1 = arith.constant 0 : i32
    return %c0_i32, %c0_i32_0 : i32, i32
  }
  func.func @transform_3(%arg0: i32) -> (i32, i32) {
    %c0_i32 = arith.constant 0 : i32
    %c0_i32_0 = arith.constant 0 : i32
    %c0_i32_1 = arith.constant 0 : i32
    return %c0_i32, %c0_i32_0 : i32, i32
  }
  func.func @transform_4(%arg0: i32) -> (i32, i32) {
    %c0_i32 = arith.constant 0 : i32
    %c0_i32_0 = arith.constant 0 : i32
    %c0_i32_1 = arith.constant 0 : i32
    return %c0_i32, %c0_i32_0 : i32, i32
  }
  func.func @transform_5(%arg0: i32) -> (i32, i32) {
    %c0_i32 = arith.constant 0 : i32
    %c0_i32_0 = arith.constant 0 : i32
    %c0_i32_1 = arith.constant 0 : i32
    return %c0_i32, %c0_i32_0 : i32, i32
  }
  func.func @transform_6(%arg0: i32) -> (i32, i32) {
    %c0_i32 = arith.constant 0 : i32
    %c0_i32_0 = arith.constant 0 : i32
    %c0_i32_1 = arith.constant 0 : i32
    return %c0_i32, %c0_i32_0 : i32, i32
  }
  func.func @transform_7(%arg0: i32) -> (i32, i32) {
    %c0_i32 = arith.constant 0 : i32
    %c0_i32_0 = arith.constant 0 : i32
    %c0_i32_1 = arith.constant 0 : i32
    return %c0_i32, %c0_i32_0 : i32, i32
  }
  func.func @transform_8(%arg0: i32) -> (i32, i32) {
    %c0_i32 = arith.constant 0 : i32
    %c0_i32_0 = arith.constant 0 : i32
    %c0_i32_1 = arith.constant 0 : i32
    return %c0_i32, %c0_i32_0 : i32, i32
  }
  func.func @transform_9(%arg0: i32) -> (i32, i32) {
    %c0_i32 = arith.constant 0 : i32
    %c0_i32_0 = arith.constant 0 : i32
    %c0_i32_1 = arith.constant 0 : i32
    return %c0_i32, %c0_i32_0 : i32, i32
  }
  func.func @transform_10(%arg0: i32) -> (i32, i32) {
    %c0_i32 = arith.constant 0 : i32
    %c0_i32_0 = arith.constant 0 : i32
    %c0_i32_1 = arith.constant 0 : i32
    return %c0_i32, %c0_i32_0 : i32, i32
  }
  func.func @transform_11(%arg0: i32) -> (i32, i32) {
    %c0_i32 = arith.constant 0 : i32
    %c0_i32_0 = arith.constant 0 : i32
    %c0_i32_1 = arith.constant 0 : i32
    return %c0_i32, %c0_i32_0 : i32, i32
  }
  func.func @transform_12(%arg0: i32) -> (i32, i32) {
    %c0_i32 = arith.constant 0 : i32
    %c0_i32_0 = arith.constant 0 : i32
    %c0_i32_1 = arith.constant 0 : i32
    return %c0_i32, %c0_i32_0 : i32, i32
  }
  func.func @transform_13(%arg0: i32) -> (i32, i32) {
    %c0_i32 = arith.constant 0 : i32
    %c0_i32_0 = arith.constant 0 : i32
    %c0_i32_1 = arith.constant 0 : i32
    return %c0_i32, %c0_i32_0 : i32, i32
  }
  func.func @transform_14(%arg0: i32) -> (i32, i32) {
    %c0_i32 = arith.constant 0 : i32
    %c0_i32_0 = arith.constant 0 : i32
    %c0_i32_1 = arith.constant 0 : i32
    return %c0_i32, %c0_i32_0 : i32, i32
  }
  func.func @transform_15(%arg0: i32) -> (i32, i32) {
    %c0_i32 = arith.constant 0 : i32
    %c0_i32_0 = arith.constant 0 : i32
    %c0_i32_1 = arith.constant 0 : i32
    return %c0_i32, %c0_i32_0 : i32, i32
  }
  func.func @transform_16(%arg0: i32) -> (i32, i32) {
    %c0_i32 = arith.constant 0 : i32
    %c0_i32_0 = arith.constant 0 : i32
    %c0_i32_1 = arith.constant 0 : i32
    return %c0_i32, %c0_i32_0 : i32, i32
  }
  func.func @transform_17(%arg0: i32) -> (i32, i32) {
    %c0_i32 = arith.constant 0 : i32
    %c0_i32_0 = arith.constant 0 : i32
    %c0_i32_1 = arith.constant 0 : i32
    return %c0_i32, %c0_i32_0 : i32, i32
  }
  func.func @transform_18(%arg0: i32) -> (i32, i32) {
    %c0_i32 = arith.constant 0 : i32
    %c0_i32_0 = arith.constant 0 : i32
    %c0_i32_1 = arith.constant 0 : i32
    return %c0_i32, %c0_i32_0 : i32, i32
  }
  func.func @transform_19(%arg0: i32) -> (i32, i32) {
    %c0_i32 = arith.constant 0 : i32
    %c0_i32_0 = arith.constant 0 : i32
    %c0_i32_1 = arith.constant 0 : i32
    return %c0_i32, %c0_i32_0 : i32, i32
  }
  func.func @transform_20(%arg0: i32) -> (i32, i32) {
    %c0_i32 = arith.constant 0 : i32
    %c0_i32_0 = arith.constant 0 : i32
    %c0_i32_1 = arith.constant 0 : i32
    return %c0_i32, %c0_i32_0 : i32, i32
  }
  func.func @transform_21(%arg0: i32) -> (i32, i32) {
    %c0_i32 = arith.constant 0 : i32
    %c0_i32_0 = arith.constant 0 : i32
    %c0_i32_1 = arith.constant 0 : i32
    return %c0_i32, %c0_i32_0 : i32, i32
  }
  func.func @transform_22(%arg0: i32) -> (i32, i32) {
    %c0_i32 = arith.constant 0 : i32
    %c0_i32_0 = arith.constant 0 : i32
    %c0_i32_1 = arith.constant 0 : i32
    return %c0_i32, %c0_i32_0 : i32, i32
  }
  func.func @transform_23(%arg0: i32) -> (i32, i32) {
    %c0_i32 = arith.constant 0 : i32
    %c0_i32_0 = arith.constant 0 : i32
    %c0_i32_1 = arith.constant 0 : i32
    return %c0_i32, %c0_i32_0 : i32, i32
  }
  func.func @transform_24(%arg0: i32) -> (i32, i32) {
    %c0_i32 = arith.constant 0 : i32
    %c0_i32_0 = arith.constant 0 : i32
    %c0_i32_1 = arith.constant 0 : i32
    return %c0_i32, %c0_i32_0 : i32, i32
  }
  func.func @transform_25(%arg0: i32) -> (i32, i32) {
    %c0_i32 = arith.constant 0 : i32
    %c0_i32_0 = arith.constant 0 : i32
    %c0_i32_1 = arith.constant 0 : i32
    return %c0_i32, %c0_i32_0 : i32, i32
  }
  func.func @transform_26(%arg0: i32) -> (i32, i32) {
    %c0_i32 = arith.constant 0 : i32
    %c0_i32_0 = arith.constant 0 : i32
    %c0_i32_1 = arith.constant 0 : i32
    return %c0_i32, %c0_i32_0 : i32, i32
  }
  func.func @transform_27(%arg0: i32) -> (i32, i32) {
    %c0_i32 = arith.constant 0 : i32
    %c0_i32_0 = arith.constant 0 : i32
    %c0_i32_1 = arith.constant 0 : i32
    return %c0_i32, %c0_i32_0 : i32, i32
  }
  func.func @transform_28(%arg0: i32) -> (i32, i32) {
    %c0_i32 = arith.constant 0 : i32
    %c0_i32_0 = arith.constant 0 : i32
    %c0_i32_1 = arith.constant 0 : i32
    return %c0_i32, %c0_i32_0 : i32, i32
  }
  func.func @transform_29(%arg0: i32) -> (i32, i32) {
    %c0_i32 = arith.constant 0 : i32
    %c0_i32_0 = arith.constant 0 : i32
    %c0_i32_1 = arith.constant 0 : i32
    return %c0_i32, %c0_i32_0 : i32, i32
  }
  func.func @transform_30(%arg0: i32) -> (i32, i32) {
    %c0_i32 = arith.constant 0 : i32
    %c0_i32_0 = arith.constant 0 : i32
    %c0_i32_1 = arith.constant 0 : i32
    return %c0_i32, %c0_i32_0 : i32, i32
  }
  func.func @transform_31(%arg0: i32) -> (i32, i32) {
    %c0_i32 = arith.constant 0 : i32
    %c0_i32_0 = arith.constant 0 : i32
    %c0_i32_1 = arith.constant 0 : i32
    return %c0_i32, %c0_i32_0 : i32, i32
  }
  func.func @transform_32(%arg0: i32) -> (i32, i32) {
    %c0_i32 = arith.constant 0 : i32
    %c0_i32_0 = arith.constant 0 : i32
    %c0_i32_1 = arith.constant 0 : i32
    return %c0_i32, %c0_i32_0 : i32, i32
  }
  func.func @transform_33(%arg0: i32) -> (i32, i32) {
    %c0_i32 = arith.constant 0 : i32
    %c0_i32_0 = arith.constant 0 : i32
    %c0_i32_1 = arith.constant 0 : i32
    return %c0_i32, %c0_i32_0 : i32, i32
  }
  func.func @transform_34(%arg0: i32) -> (i32, i32) {
    %c0_i32 = arith.constant 0 : i32
    %c0_i32_0 = arith.constant 0 : i32
    %c0_i32_1 = arith.constant 0 : i32
    return %c0_i32, %c0_i32_0 : i32, i32
  }
  func.func @transform_35(%arg0: i32) -> (i32, i32, i32) {
    %c0_i32 = arith.constant 0 : i32
    %c0_i32_0 = arith.constant 0 : i32
    %c0_i32_1 = arith.constant 0 : i32
    return %arg0, %c0_i32, %c0_i32_0 : i32, i32, i32
  }
  func.func @transform_36(%arg0: i32) -> (i32, i32, i32) {
    %c0_i32 = arith.constant 0 : i32
    %c0_i32_0 = arith.constant 0 : i32
    %c0_i32_1 = arith.constant 0 : i32
    return %arg0, %c0_i32, %c0_i32_0 : i32, i32, i32
  }
}

</mosaic_0001>

<bundles_post_ra>
// kernel: score_widgets_loss_forward.1
= control target key start
LH: loop header
LB: loop body
LE: loop exit
PB: predicated region body
PF: predicated region fallthrough
CT: control target
= control target key end

     0   :  { %s9382_s6 = smov 1   ;;  %s9383_s10 = smov 2   ;;  %s11988_s0 = inlined_call_operand.smem [shape: u32[37], index: -1, kind: input, shape index: {}] }
   0x1   :  { %s9453_s5 = sld [smem:[%s11988_s0]]   ;;  %s9384_s14 = smov 3  }
   0x2   :  { %s9458_s9 = sld [smem:[%s11988_s0 + %s9382_s6]]   ;;  %s9385_s18 = smov 4  }
   0x3   :  { %s9463_s13 = sld [smem:[%s11988_s0 + %s9383_s10]]   ;;  %s9386_s22 = smov 5  }
   0x4   :  { %s9468_s17 = sld [smem:[%s11988_s0 + %s9384_s14]]   ;;  %s9387_s26 = smov 6  }
   0x5   :  { %s9473_s21 = sld [smem:[%s11988_s0 + %s9385_s18]]   ;;  %s9388_s30 = smov 7  }
   0x6   :  { %s9478_s25 = sld [smem:[%s11988_s0 + %s9386_s22]]   ;;  %s9389_s4 = smov 8  }
   0x7   :  { %12187 = sst [smem:[#allocation11_spill]] %s9453_s5  ;;  %s9390_s10 = smov 9  }
   0x8   :  { %12188 = sst [smem:[#allocation12_spill]] %s9458_s9  ;;  %s9391_s15 = smov 10  }
   0x9   :  { %12189 = sst [smem:[#allocation13_spill]] %s9463_s13  ;;  %s9392_s20 = smov 11  }
   0xa   :  { %s9483_s29 = sld [smem:[%s11988_s0 + %s9387_s26]]   ;;  %s9393_s26 = smov 12  }
   0xb   :  { %12190 = sst [smem:[#allocation14_spill]] %s9473_s21  ;;  %s9394_s1 = smov 13  }
   0xc   :  { %s9488_s3 = sld [smem:[%s11988_s0 + %s9388_s30]]   ;;  %s9395_s7 = smov 14  }
   0xd   :  { %s9493_s8 = sld [smem:[%s11988_s0 + %s9389_s4]]   ;;  %s9397_s22 = smov 16  }
   0xe   :  { %s9498_s14 = sld [smem:[%s11988_s0 + %s9390_s10]]   ;;  %s9398_s28 = smov 17  }
   0xf   :  { %s9503_s19 = sld [smem:[%s11988_s0 + %s9391_s15]]   ;;  %s9396_s15 = smov 15  }
  0x10   :  { %s9508_s24 = sld [smem:[%s11988_s0 + %s9392_s20]]  }
  0x11   :  { %s9513_s30 = sld [smem:[%s11988_s0 + %s9393_s26]]  }
  0x12   :  { %12191 = sst [smem:[#allocation15_spill]] %s9488_s3 }
  0x13   :  { %12192 = sst [smem:[#allocation16_spill]] %s9493_s8 }
  0x14   :  { %12193 = sst [smem:[#allocation17_spill]] %s9498_s14 }
  0x15   :  { %12194 = sst [smem:[#allocation18_spill]] %s9503_s19 }
  0x16   :  { %s9518_s6 = sld [smem:[%s11988_s0 + %s9394_s1]]  }
  0x17   :  { %s9523_s12 = sld [smem:[%s11988_s0 + %s9395_s7]]   ;;  %s9399_s7 = smov 18  }
  0x18   :  { %s9528_s20 = sld [smem:[%s11988_s0 + %s9396_s15]]   ;;  %s9400_s15 = smov 19  }
  0x19   :  { %s9533_s27 = sld [smem:[%s11988_s0 + %s9397_s22]]   ;;  %s9401_s22 = smov 20  }
  0x1a   :  { %s9538_s4 = sld [smem:[%s11988_s0 + %s9398_s28]]   ;;  %s9402_s28 = smov 21  }
  0x1b   :  { %s9543_s9 = sld [smem:[%s11988_s0 + %s9399_s7]]   ;;  %s9403_s7 = smov 22  }
  0x1c   :  { %12195 = sst [smem:[#allocation19_spill]] %s9518_s6 }
  0x1d   :  { %12196 = sst [smem:[#allocation20_spill]] %s9523_s12 }
  0x1e   :  { %12197 = sst [smem:[#allocation21_spill]] %s9528_s20 }
  0x1f   :  { %s9548_s13 = sld [smem:[%s11988_s0 + %s9400_s15]]   ;;  %s9404_s15 = smov 23  }
  0x20   :  { %12198 = sst [smem:[#allocation22_spill]] %s9538_s4 }
  0x21   :  { %12199 = sst [smem:[#allocation23_spill]] %s9543_s9 }
  0x22   :  { %s9553_s20 = sld [smem:[%s11988_s0 + %s9401_s22]]   ;;  %s9405_s22 = smov 24  }
  0x23   :  { %s9558_s4 = sld [smem:[%s11988_s0 + %s9402_s28]]   ;;  %s9406_s28 = smov 25  }
  0x24   :  { %s9563_s9 = sld [smem:[%s11988_s0 + %s9403_s7]]   ;;  %s9407_s7 = smov 26  }
  0x25   :  { %12200 = sst [smem:[#allocation24_spill]] %s9548_s13 }
  0x26   :  { %s9568_s13 = sld [smem:[%s11988_s0 + %s9404_s15]]   ;;  %s9408_s15 = smov 27  }
  0x28   :  { %12201 = sst [smem:[#allocation25_spill]] %s9553_s20 }
  0x29   :  { %12202 = sst [smem:[#allocation26_spill]] %s9558_s4 }
  0x2a   :  { %12203 = sst [smem:[#allocation27_spill]] %s9563_s9 }
  0x2b   :  { %s9573_s20 = sld [smem:[%s11988_s0 + %s9405_s22]]   ;;  %s9409_s22 = smov 28  }
  0x2c   :  { %12204 = sst [smem:[#allocation28_spill]] %s9568_s13 }
  0x2d   :  { %s9578_s4 = sld [smem:[%s11988_s0 + %s9406_s28]]   ;;  %s9410_s28 = smov 29  }
  0x2e   :  { %s9583_s9 = sld [smem:[%s11988_s0 + %s9407_s7]]   ;;  %s9411_s7 = smov 30  }
  0x2f   :  { %s9588_s13 = sld [smem:[%s11988_s0 + %s9408_s15]]   ;;  %s9412_s15 = smov 31  }
  0x31   :  { %12205 = sst [smem:[#allocation29_spill]] %s9573_s20 }
  0x32   :  { %s9593_s20 = sld [smem:[%s11988_s0 + %s9409_s22]]   ;;  %s9413_s22 = smov 32  }
  0x33   :  { %12206 = sst [smem:[#allocation30_spill]] %s9578_s4 }
  0x34   :  { %12207 = sst [smem:[#allocation31_spill]] %s9583_s9 }
  0x35   :  { %12208 = sst [smem:[#allocation32_spill]] %s9588_s13 }
  0x36   :  { %s9598_s4 = sld [smem:[%s11988_s0 + %s9410_s28]]   ;;  %s9414_s28 = smov 33  }
  0x37   :  { %s9603_s9 = sld [smem:[%s11988_s0 + %s9411_s7]]   ;;  %s9415_s7 = smov 34  }
  0x38   :  { %12209 = sst [smem:[#allocation33_spill]] %s9593_s20 }
  0x39   :  { %s9608_s13 = sld [smem:[%s11988_s0 + %s9412_s15]]   ;;  %s9416_s15 = smov 35  }
  0x3a   :  { %s9613_s20 = sld [smem:[%s11988_s0 + %s9413_s22]]   ;;  %s9417_s22 = smov 36  }
  0x3c   :  { %12210 = sst [smem:[#allocation34_spill]] %s9598_s4 }
  0x3d   :  { %12211 = sst [smem:[#allocation35_spill]] %s9603_s9 }
  0x3e   :  { %s9618_s4 = sld [smem:[%s11988_s0 + %s9414_s28]]   ;;  %s9635_s28 = smov 0  }
  0x3f   :  { %12212 = sst [smem:[#allocation36_spill]] %s9608_s13 }
  0x40   :  { %12213 = sst [smem:[#allocation37_spill]] %s9613_s20 }
  0x41   :  { %s9623_s9 = sld [smem:[%s11988_s0 + %s9415_s7]]  }
  0x42   :  { %s9628_s13 = sld [smem:[%s11988_s0 + %s9416_s15]]  }
  0x43   :  { %s9633_s20 = sld [smem:[%s11988_s0 + %s9417_s22]]  }
  0x44 LB: > { %s12214_s21 = sld [smem:[#allocation14_spill]]  ;;  %s12215_s19 = sld [smem:[#allocation18_spill]]  ;;  %s9380_s28 = sphi %s9635_s28, %s84_s28  }
  0x45   : > { %s12216_s14 = sld [smem:[#allocation17_spill]]  ;;  %s12217_s8 = sld [smem:[#allocation16_spill]] }
  0x46   : > { %s12218_s6 = sld [smem:[#allocation19_spill]]  ;;  %s8517_s1 = sadd.s32 4294967295, %s9380_s28  }
  0x47   : > { %p8521_p0 = scmp.ge.s32.totalorder %s9380_s28, 1  ;;  %p1012_p1 = scmp.lt.s32.totalorder %s9380_s28, 3 }
  0x49   : > { %p1013_p2 = pnand %p8521_p0, %p1012_p1 }
  0x4b   : > { %1016 = sbr.rel (%p1013_p2) target bundleno = 8372 (0x20b4), region = 160 }
  0x52   : > { %p9643_p3 = scmp.lt.s32.totalorder %s8517_s1, 1  ;;  %v1220_v0 = vlaneseq  ;;  %v12006_v1 = vmov 0   ;;  %s12220_s5 = sld [smem:[#allocation11_spill]]  ;;  %v8528_v5 = vld [vmem:[%s9468_s17 + $0x1] ss:$8 sm:$0x3] }
  0x53   : > { %1146 = vst [vmem:[#allocation2] sm:$0x3] %v12006_v1  ;;  %1147 = vst [vmem:[#allocation2 + $0x6] sm:$0x3] %v12006_v1  ;;  %1294 = vmatprep.mubr.bf16.mxu0 %v12006_v1  ;;  %1370 = vmatprep.mubr.bf16.mxu1 %v12006_v1  ;;  %v9419_v8 = vmov 1983009808  }
  0x54   : > { %1148 = vst [vmem:[#allocation3] sm:$0x1] %v12006_v1  ;;  %1149 = vst [vmem:[#allocation3 + $0x3] sm:$0x1] %v12006_v1  ;;  %s12585_s1 = smov (!%p9643_p3, %s8517_s1), 1  ;;  %9220 = vset.pattern.permute.xlu1 %v12006_v1  ;;  %9221 = vset.pattern.permute.xlu0 %v12006_v1  ;;  %v9667_v2 = vshrl.u32 %v1220_v0, 7  ;;  %v1218_v9 = vunpack.c.l.s4 %v9419_v8 }
  0x55   : > { %1150 = vst [vmem:[#allocation4] sm:$0xf] %v12006_v1  ;;  %1151 = vst [vmem:[#allocation4 + $0xc] sm:$0xf] %v12006_v1  ;;  %s9670_s0 = sshll.u32 %s12585_s1, 3  ;;  %s9420_s10 = smov 113  }
  0x56   : > { %1152 = vst [vmem:[#allocation5] sm:$0xf] %v12006_v1  ;;  %1153 = vst [vmem:[#allocation5 + $0xc] sm:$0xf] %v12006_v1  ;;  %v9675_v3 = vsub.s32 0, %v9667_v2  ;;  %v9679_v6 = vsub.s32 1, %v9667_v2  ;;  %v1219_v16 = vunpack.c.0.s8 %v1218_v9 }
  0x57   : > { %1154 = vst [vmem:[#allocation6] sm:$0xf] %v12006_v1  ;;  %1155 = vst [vmem:[#allocation6 + $0xc] sm:$0xf] %v12006_v1  ;;  %vm12070_vm0 = vcmask 1041408   ;;  %s12145_s11 = smov 127  }
  0x58   : > { %1162 = vst [vmem:[#allocation10] sm:$0xf] %v12006_v1  ;;  %1163 = vst [vmem:[#allocation10 + $0xc] sm:$0xf] %v12006_v1  ;;  %s1114_s7 = scalar_lea.vmem %s12220_s5, %s9670_s0  ;;  %v1457_v10 = vrot.slane %v8528_v5, %v9675_v3  ;;  %v1461_v14 = vrot.slane %v8528_v5, %v9679_v6  ;;  %v9689_v17 = vsub.s32 %v1219_v16, %v9667_v2  ;;  %vm12068_vm1 = vcmask 31744   ;;  %s9422_s15 = smov 1  }
  0x59   : > { %12221 = vst [vmem:[#allocation38_spill] sm:$0xff] %v9667_v2  ;;  %12222 = vst [vmem:[#allocation39_spill] sm:$0xff] %v9675_v3  ;;  %v1164_v4 = vld [vmem:[%s1114_s7] sm:$0xff]  ;;  %s9423_s16 = smov 15   ;;  %s12004_s18 = smov 17   ;;  %v9235_v27 = vld [vmem:[%s12214_s21 + $0x8] sm:$0xff]  }
  0x5a   : > { %12223 = vst [vmem:[#allocation40_spill] sm:$0xff] %v9679_v6  ;;  %v1166_v7 = vcombine.high %v1164_v4, %v1164_v4  ;;  %v1131_v11 = vld [vmem:[%s9468_s17] ss:$8 sm:$0x3]  ;;  %1462 = vrot.lane.b32.xlu0 %v1457_v10, %s9420_s10  ;;  %12224 = vst [vmem:[#allocation41_spill] sm:$0xff] %v9689_v17  ;;  %s12010_s22 = smov 111  }
  0x5b   : > { %v1418_v12 = vrot.slane %v1131_v11, %v9675_v3  ;;  %v1422_v15 = vrot.slane %v1131_v11, %v9679_v6  ;;  %v9234_v24 = vld [vmem:[%s12214_s21] sm:$0xff]   ;;  %v9236_v29 = vld [vmem:[%s12214_s21 + $0x10] sm:$0xff]   ;;  %v9237_v30 = vld [vmem:[%s12214_s21 + $0x18] sm:$0xff]   ;;  %vm1466_vm2 = vcmask 924672   ;;  %s12142_s23 = smov 126   ;;  %vm1444_vm3 = vcmask 1039360  }
  0x5c   : > { %v8534_v13 = vpack.c.bf16 %v1166_v7, %v1164_v4  ;;  %v1642_v28 = vld [vmem:[%s9478_s25] sm:$0xff]  ;;  %s12008_s26 = smov 112   ;;  %vm1538_vm4 = vcmask 7168   ;;  %s12002_s2 = smov 110   ;;  %vm1568_vm5 = vcmask 121856   ;;  %vm1616_vm6 = vcmask 138240  }
  0x5d   : > { %1492 = vrot.lane.b32.xlu1 %v1418_v12, %s12145_s11  ;;  %v9238_v31 = vld [vmem:[%s12214_s21 + $0x20] ss:$0 sps:$4 sm:$0xff]   ;;  %s12140_s7 = smov 96   ;;  %vm1483_vm7 = vcmask 1031168   ;;  %vm1427_vm8 = vcmask 908288   ;;  %vm1512_vm9 = vcmask 916480  }
  0x5e   : > { %8535 = vst.sshfl [vmem:[#allocation2 + $0x2] sm:$0x33 pattern:$0x76325410] %v8534_v13  ;;  %1464 = vrot.lane.b32.xlu0 %v1461_v14, %s9420_s10  ;;  %s12000_s10 = smov 95   ;;  %vm12074_vm10 = vcmask 900096  }
  0x5f   : > { %vm1585_vm11 = vcmask 785408   ;;  %vm12071_vm12 = vcmask 777216   ;;  %vm1633_vm13 = vcmask 769024   ;;  %s12243_s3 = sld [smem:[#allocation15_spill]]  ;;  %vm1671_vm14 = vcmask 1043456   ;;  %s12289_s12 = sld [smem:[#allocation20_spill]] }
  0x60   : > { %vm12075_vm15 = vcmask 64512   ;;  %s12377_s5 = sld [smem:[#allocation27_spill]]  ;;  %s12451_s21 = sld [smem:[#allocation31_spill]] }
  0x61   : > { %1494 = vrot.lane.b32.xlu1 %v1422_v15, %s12145_s11 }
  0x62   : > { %1534 = vrot.lane.b32.xlu0 %v1457_v10, %s9422_s15 }
  0x65   : > { %v1191_v18 = vld [vmem:[#allocation2] sm:$0xff]  ;;  %1536 = vrot.lane.b32.xlu1 %v1461_v14, %s9422_s15  ;;  %s12138_s15 = smov 94  }
  0x66   : > { %v1223_v19 = vrot.slane %v1191_v18, %v9689_v17  ;;  %v1216_v20 = vcombine.high %v1191_v18, %v1191_v18  ;;  %1564 = vrot.lane.b32.xlu0 %v1418_v12, %s9423_s16 }
  0x68   : > { %v1231_v21 = vcombine.high %v1223_v19, %v1223_v19  ;;  %v1251_v22 = vsel %vm12070_vm0, %v1223_v19, 0  ;;  %v1230_v23 = vrot.slane %v1216_v20, %v9689_v17 }
  0x69   : > { %1566 = vrot.lane.b32.xlu1 %v1422_v15, %s9423_s16  ;;  %s9432_s16 = smov 98  }
  0x6a   : > { %8541 = vmatprep.subr.msk.bf16.mxu0 %vm12070_vm0, %v1231_v21  ;;  %v1232_v25 = vcombine.high %v1230_v23, %v1230_v23  ;;  %v1257_v26 = vsel %vm12070_vm0, %v1230_v23, 0  ;;  %1612 = vrot.lane.b32.xlu0 %v1457_v10, %s12004_s18 }
  0x6b   : > { %1263 = vmatpush1.bf16.msra.mxu0 %v1251_v22 }
  0x6c   : > { %8547 = vmatprep.subr.msk.bf16.mxu1 %vm12070_vm0, %v1232_v25  ;;  %vm12106_vm0 = vcmask 506880  }
  0x6d   : > { %1339 = vmatpush1.bf16.msra.mxu1 %v1257_v26  ;;  %1614 = vrot.lane.b32.xlu1 %v1461_v14, %s12004_s18 }
  0x6e   : > { %8542 = vmatmul.mubr.msk.bf16.vlgmr.msra.gmra.mrb[0].mxu0 %vm12068_vm1, %v9234_v24  ;;  %1423 = vrot.lane.b32.xlu0 %v1418_v12, %s12010_s22 }
  0x6f   : > { %1304 = vmatprep.mubr.bf16.mxu0 %v12006_v1 }
  0x70   : > { %8548 = vmatmul.mubr.msk.bf16.vlgmr.msra.gmra.mrb[0].mxu1 %vm12068_vm1, %v9234_v24 }
  0x71   : > { %1378 = vmatprep.mubr.bf16.mxu1 %v12006_v1  ;;  %1425 = vrot.lane.b32.xlu1 %v1422_v15, %s12010_s22 }
  0x75   : > { %1645 = vperm.xlu1 %9220, %v1642_v28  }
  0x76   : > { %8543 = vmatmul.mubr.msk.bf16.gmra.mrb[4].mxu0 %vm12068_vm1, %v9235_v27 }
  0x77   : > { %1314 = vmatprep.mubr.bf16.mxu0 %v12006_v1 }
  0x78   : > { %8549 = vmatmul.mubr.msk.bf16.gmra.mrb[4].mxu1 %vm12068_vm1, %v9235_v27 }
  0x79   : > { %1386 = vmatprep.mubr.bf16.mxu1 %v12006_v1 }
  0x7e   : > { %8544 = vmatmul.mubr.msk.bf16.gmra.mrb[8].mxu0 %vm12068_vm1, %v9236_v29 }
  0x7f   : > { %1322 = vmatprep.mubr.bf16.mxu0 %v12006_v1 }
  0x80   : > { %8550 = vmatmul.mubr.msk.bf16.gmra.mrb[8].mxu1 %vm12068_vm1, %v9236_v29 }
  0x81   : > { %1395 = vmatprep.mubr.bf16.mxu1 %v12006_v1 }
  0x86   : > { %8545 = vmatmul.mubr.msk.bf16.gmra.mrb[12].mxu0 %vm12068_vm1, %v9237_v30 }
  0x87   : > { %1330 = vmatprep.mubr.bf16.mxu0 %v12006_v1 }
  0x88   : > { %8551 = vmatmul.mubr.msk.bf16.gmra.mrb[12].mxu1 %vm12068_vm1, %v9237_v30 }
  0x89   : > { %1405 = vmatprep.mubr.bf16.mxu1 %v12006_v1 }
  0x8e   : > { %8546 = vmatmul.mubr.msk.bf16.gmra.mrb[16].mxu0 %vm12068_vm1, %v9238_v31 }
  0x8f   : > { %1782 = vmatprep.mubr.bf16.mxu0 %v12006_v1 }
  0x90   : > { %8552 = vmatmul.mubr.msk.bf16.gmra.mrb[16].mxu1 %vm12068_vm1, %v9238_v31  ;;  %vm12105_vm1 = vcmask 752640  }
  0x91   : > { %1858 = vmatprep.mubr.bf16.mxu1 %v12006_v1 }
  0xcc   : > { %v9729_v33 = vpop.permute.xlu0 %1462 }
  0xcd   : > { %12225 = vst [vmem:[#allocation42_spill] sm:$0xff] %v9729_v33 }
  0xcf   : > { %v9737_v41 = vpop.permute.xlu1 %1492 }
  0xd0   : > { %12226 = vst [vmem:[#allocation43_spill] sm:$0xff] %v9737_v41  ;;  %v9740_v42 = vpop.permute.xlu0 %1464 }
  0xd1   : > { %12227 = vst [vmem:[#allocation44_spill] sm:$0xff] %v9740_v42  ;;  %v9745_v46 = vsel %vm1466_vm2, %v9729_v33, %v9740_v42  ;;  %vm2528_vm2 = vcmask 801792  }
  0xd2   : > { %12228 = vst [vmem:[#allocation45_spill] sm:$0xff] %v9745_v46 }
  0xd3   : > { %v9750_v53 = vpop.permute.xlu1 %1494 }
  0xd4   : > { %12229 = vst [vmem:[#allocation46_spill] sm:$0xff] %v9750_v53  ;;  %v9757_v57 = vsel %vm1444_vm3, %v9737_v41, %v9750_v53  ;;  %v9761_v59 = vpop.permute.xlu0 %1534 }
  0xd5   : > { %12230 = vst [vmem:[#allocation47_spill] sm:$0xff] %v9757_v57  ;;  %12231 = vst [vmem:[#allocation48_spill] sm:$0xff] %v9761_v59 }
  0xd7   : > { %v9767_v9 = vpop.permute.xlu1 %1536 }
  0xd8   : > { %12232 = vst [vmem:[#allocation49_spill] sm:$0xff] %v9767_v9  ;;  %v9771_v10 = vsel %vm1538_vm4, %v9761_v59, %v9767_v9  ;;  %v9775_v12 = vpop.permute.xlu0 %1564  ;;  %vm12069_vm4 = vcmask 15360  }
  0xd9   : > { %12233 = vst [vmem:[#allocation50_spill] sm:$0xff] %v9771_v10  ;;  %12234 = vst [vmem:[#allocation51_spill] sm:$0xff] %v9775_v12 }
  0xdb   : > { %v9782_v23 = vpop.permute.xlu1 %1566 }
  0xdc   : > { %12235 = vst [vmem:[#allocation52_spill] sm:$0xff] %v9782_v23  ;;  %v9787_v26 = vsel %vm1568_vm5, %v9775_v12, %v9782_v23  ;;  %vm2702_vm5 = vcmask 244736  }
  0xdd   : > { %12236 = vst [vmem:[#allocation53_spill] sm:$0xff] %v9787_v26 }
 0x141   : > { %v9727_v32 = vpop.f32.mrb[0].mxu0 }
 0x142   : > { %v9731_v34 = vpop.f32.mrb[1].mxu0 }
 0x143   : > { %v1300_v35 = vpop.f32.mrb[2].mxu0  ;;  %v9733_v36 = vpop.f32.mrb[0].mxu1 }
 0x144   : > { %1438 = vrot.lane.b32.xlu0 %v1300_v35, %s12145_s11  ;;  %v1302_v37 = vpop.f32.mrb[3].mxu0  ;;  %v1374_v38 = vpop.f32.mrb[1].mxu1 }
 0x145   : > { %1440 = vrot.lane.b32.xlu1 %v1302_v37, %s12145_s11  ;;  %v1375_v39 = vpop.f32.mrb[2].mxu1 }
 0x146   : > { %v1377_v40 = vpop.f32.mrb[3].mxu1 }
 0x147   : > { %v9794_v40 = vpop.permute.xlu0 %1612 }
 0x148   : > { %1442 = vrot.lane.b32.xlu0 %v1375_v39, %s12145_s11  ;;  %12237 = vst [vmem:[#allocation54_spill] sm:$0xff] %v9794_v40 }
 0x149   : > { %v1306_v43 = vpop.f32.mrb[4].mxu0 }
 0x14a   : > { %v1471_v44 = vmul.f32 %v9729_v33, %v1306_v43  ;;  %v1308_v45 = vpop.f32.mrb[5].mxu0 }
 0x14b   : > { %v1472_v47 = vmul.f32 %v9745_v46, %v1308_v45  ;;  %v1310_v48 = vpop.f32.mrb[6].mxu0  ;;  %v1380_v49 = vpop.f32.mrb[4].mxu1 }
 0x14c   : > { %1477 = vrot.lane.b32.xlu1 %v1471_v44, %s12142_s23  ;;  %v1312_v50 = vpop.f32.mrb[7].mxu0  ;;  %v1382_v51 = vpop.f32.mrb[5].mxu1  ;;  %v1473_v54 = vmul.f32 %v9740_v42, %v1380_v49  ;;  %v1500_v56 = vmul.f32 %v9737_v41, %v1310_v48 }
 0x14d   : > { %1479 = vrot.lane.b32.xlu0 %v1472_v47, %s12142_s23  ;;  %v1383_v52 = vpop.f32.mrb[6].mxu1  ;;  %v1501_v60 = vmul.f32 %v9757_v57, %v1312_v50  ;;  %v9800_v45 = vpop.permute.xlu1 %1614 }
 0x14e   : > { %v1385_v55 = vpop.f32.mrb[7].mxu1  ;;  %v1502_v62 = vmul.f32 %v9750_v53, %v1383_v52  ;;  %12238 = vst [vmem:[#allocation55_spill] sm:$0xff] %v9800_v45  ;;  %v9805_v47 = vsel %vm1616_vm6, %v9794_v40, %v9800_v45  ;;  %v9815_v51 = vpop.permute.xlu0 %1423 }
 0x14f   : > { %12239 = vst [vmem:[#allocation56_spill] sm:$0xff] %v9805_v47  ;;  %12241 = vst [vmem:[#allocation58_spill] sm:$0xff] %v9815_v51 }
 0x150   : > { %1481 = vrot.lane.b32.xlu1 %v1473_v54, %s12142_s23 }
 0x151   : > { %1506 = vrot.lane.b32.xlu0 %v1500_v56, %s12008_s26  ;;  %v1316_v58 = vpop.f32.mrb[8].mxu0  ;;  %v9813_v50 = vpop.permute.xlu1 %1425 }
 0x152   : > { %v1317_v61 = vpop.f32.mrb[9].mxu0  ;;  %12240 = vst [vmem:[#allocation57_spill] sm:$0xff] %v9813_v50 }
 0x153   : > { %v1319_v63 = vpop.f32.mrb[10].mxu0  ;;  %v1388_v0 = vpop.f32.mrb[8].mxu1 }
 0x154   : > { %1508 = vrot.lane.b32.xlu1 %v1501_v60, %s12008_s26  ;;  %v1320_v4 = vpop.f32.mrb[11].mxu0  ;;  %v1390_v5 = vpop.f32.mrb[9].mxu1 }
 0x155   : > { %1510 = vrot.lane.b32.xlu0 %v1502_v62, %s12008_s26  ;;  %v1391_v7 = vpop.f32.mrb[10].mxu1  ;;  %v1543_v13 = vmul.f32 %v9761_v59, %v1320_v4  ;;  %v9817_v52 = vpop.permute.xlu1 %1645 }
 0x156   : > { %v1393_v8 = vpop.f32.mrb[11].mxu1  ;;  %v1544_v15 = vmul.f32 %v9771_v10, %v1391_v7 }
 0x157   : > { %v1545_v24 = vmul.f32 %v9767_v9, %v1393_v8 }
 0x158   : > { %1523 = vrot.lane.b32.xlu1 %v1317_v61, %s12010_s22 }
 0x159   : > { %1525 = vrot.lane.b32.xlu0 %v1388_v0, %s12010_s22  ;;  %v1324_v11 = vpop.f32.mrb[12].mxu0 }
 0x15a   : > { %v1325_v14 = vpop.f32.mrb[13].mxu0  ;;  %v1432_v11 = vmul.f32 %v9815_v51, %v9727_v32 }
 0x15b   : > { %v1327_v16 = vpop.f32.mrb[14].mxu0  ;;  %v1397_v18 = vpop.f32.mrb[12].mxu1  ;;  %v1573_v21 = vmul.f32 %v9775_v12, %v1325_v14 }
 0x15c   : > { %1549 = vrot.lane.b32.xlu1 %v1543_v13, %s12002_s2  ;;  %v1328_v19 = vpop.f32.mrb[15].mxu0  ;;  %v1399_v20 = vpop.f32.mrb[13].mxu1  ;;  %v1574_v28 = vmul.f32 %v9787_v26, %v1397_v18  ;;  %v9826_v16 = vsel %vm1427_vm8, %v9815_v51, %v9813_v50 }
 0x15d   : > { %1551 = vrot.lane.b32.xlu0 %v1544_v15, %s12002_s2  ;;  %v1401_v22 = vpop.f32.mrb[14].mxu1  ;;  %v1575_v43 = vmul.f32 %v9782_v23, %v1399_v20  ;;  %12242 = vst [vmem:[#allocation59_spill] sm:$0xff] %v9826_v16  ;;  %v1433_v32 = vmul.f32 %v9826_v16, %v9731_v34 }
 0x15e   : > { %v1403_v25 = vpop.f32.mrb[15].mxu1 }
 0x160   : > { %1553 = vrot.lane.b32.xlu1 %v1545_v24, %s12002_s2  ;;  %v1434_v24 = vmul.f32 %v9813_v50, %v9733_v36 }
 0x161   : > { %1579 = vrot.lane.b32.xlu0 %v1573_v21, %s12140_s7  ;;  %v1332_v27 = vpop.f32.mrb[16].mxu0 }
 0x162   : > { %v1333_v29 = vpop.f32.mrb[17].mxu0 }
 0x163   : > { %v1335_v30 = vpop.f32.mrb[18].mxu0  ;;  %v1407_v31 = vpop.f32.mrb[16].mxu1  ;;  %v1621_v44 = vmul.f32 %v9794_v40, %v1333_v29 }
 0x164   : > { %1581 = vrot.lane.b32.xlu1 %v1574_v28, %s12140_s7  ;;  %v1336_v35 = vpop.f32.mrb[19].mxu0  ;;  %v1409_v37 = vpop.f32.mrb[17].mxu1  ;;  %v1622_v49 = vmul.f32 %v9805_v47, %v1407_v31 }
 0x165   : > { %1597 = vrot.lane.b32.xlu0 %v1328_v19, %s12000_s10  ;;  %v1411_v38 = vpop.f32.mrb[18].mxu1  ;;  %v1623_v48 = vmul.f32 %v9800_v45, %v1409_v37 }
 0x166   : > { %v1412_v39 = vpop.f32.mrb[19].mxu1 }
 0x168   : > { %1599 = vrot.lane.b32.xlu1 %v1401_v22, %s12000_s10 }
 0x169   : > { %1583 = vrot.lane.b32.xlu0 %v1575_v43, %s12140_s7 }
 0x16c   : > { %1627 = vrot.lane.b32.xlu1 %v1621_v44, %s12138_s15 }
 0x16d   : > { %1601 = vrot.lane.b32.xlu0 %v1403_v25, %s12000_s10 }
 0x170   : > { %1631 = vrot.lane.b32.xlu1 %v1623_v48, %s12138_s15 }
 0x171   : > { %1629 = vrot.lane.b32.xlu0 %v1622_v49, %s12138_s15 }
 0x1b6   : > { %v1439_v54 = vpop.permute.xlu0 %1438 }
 0x1b7   : > { %v1441_v55 = vpop.permute.xlu1 %1440 }
 0x1b8   : > { %v1445_v7 = vsel %vm1444_vm3, %v1439_v54, %v1441_v55 }
 0x1b9   : > { %v1450_v15 = vadd.f32 %v1445_v7, %v1432_v11 }
 0x1ba   : > { %v1443_v56 = vpop.permute.xlu0 %1442 }
 0x1bb   : > { %v1446_v22 = vsel %vm1444_vm3, %v1441_v55, %v1443_v56  ;;  %v1452_v30 = vadd.f32 %v1443_v56, %v1434_v24 }
 0x1bc   : > { %v1451_v29 = vadd.f32 %v1446_v22, %v1433_v32 }
 0x1be   : > { %v1478_v58 = vpop.permute.xlu1 %1477 }
 0x1bf   : > { %v1480_v60 = vpop.permute.xlu0 %1479 }
 0x1c0   : > { %v1484_v14 = vsel %vm1483_vm7, %v1478_v58, %v1480_v60 }
 0x1c1   : > { %v1489_v20 = vadd.f32 %v1484_v14, %v1450_v15 }
 0x1c2   : > { %v1482_v61 = vpop.permute.xlu1 %1481 }
 0x1c3   : > { %v1507_v62 = vpop.permute.xlu0 %1506  ;;  %v1485_v27 = vsel %vm1483_vm7, %v1480_v60, %v1482_v61  ;;  %v1491_v38 = vadd.f32 %v1482_v61, %v1452_v30 }
 0x1c4   : > { %v1490_v37 = vadd.f32 %v1485_v27, %v1451_v29 }
 0x1c6   : > { %v1509_v63 = vpop.permute.xlu1 %1508 }
 0x1c7   : > { %v1511_v0 = vpop.permute.xlu0 %1510  ;;  %v1513_v18 = vsel %vm1512_vm9, %v1507_v62, %v1509_v63 }
 0x1c8   : > { %v1518_v25 = vadd.f32 %v1513_v18, %v1489_v20  ;;  %v1514_v35 = vsel %vm1512_vm9, %v1509_v63, %v1511_v0  ;;  %v1520_v48 = vadd.f32 %v1511_v0, %v1491_v38 }
 0x1c9   : > { %v1519_v34 = vadd.f32 %v1514_v35, %v1490_v37 }
 0x1ca   : > { %v1524_v4 = vpop.permute.xlu1 %1523 }
 0x1cb   : > { %v1526_v5 = vpop.permute.xlu0 %1525  ;;  %v1531_v39 = vadd.f32 %v1524_v4, %v1518_v25 }
 0x1cc   : > { %v1527_v43 = vsel %vm1427_vm8, %v1524_v4, %v1526_v5  ;;  %v1533_v58 = vadd.f32 %v1526_v5, %v1520_v48 }
 0x1cd   : > { %v1532_v56 = vadd.f32 %v1527_v43, %v1519_v34 }
 0x1ce   : > { %v1550_v8 = vpop.permute.xlu1 %1549 }
 0x1cf   : > { %v1552_v13 = vpop.permute.xlu0 %1551  ;;  %v1561_v49 = vadd.f32 %v1550_v8, %v1531_v39  ;;  %v2052_v39 = vld [vmem:[%s12243_s3] sm:$0xff]  ;;  %s12376_s3 = sld [smem:[#allocation28_spill]] }
 0x1d0   : > { %v1556_v54 = vsel %vm12074_vm10, %v1550_v8, %v1552_v13 }
 0x1d1   : > { %v1562_v4 = vadd.f32 %v1556_v54, %v1532_v56 }
 0x1d2   : > { %v1554_v19 = vpop.permute.xlu1 %1553 }
 0x1d3   : > { %v1580_v21 = vpop.permute.xlu0 %1579  ;;  %v1557_v55 = vsel %vm12074_vm10, %v1552_v13, %v1554_v19 }
 0x1d4   : > { %v1591_v60 = vadd.f32 %v1580_v21, %v1561_v49  ;;  %v1563_v7 = vadd.f32 %v1557_v55, %v1533_v58 }
 0x1d6   : > { %v1582_v28 = vpop.permute.xlu1 %1581 }
 0x1d7   : > { %v1598_v31 = vpop.permute.xlu0 %1597  ;;  %v1586_v61 = vsel %vm1585_vm11, %v1580_v21, %v1582_v28 }
 0x1d8   : > { %v1609_v11 = vadd.f32 %v1598_v31, %v1591_v60  ;;  %v1592_v8 = vadd.f32 %v1586_v61, %v1562_v4  ;;  %v9244_v4 = vld [vmem:[%s9483_s29 + $0x8] sm:$0xff]  }
 0x1da   : > { %v1600_v44 = vpop.permute.xlu1 %1599 }
 0x1db   : > { %v1584_v36 = vpop.permute.xlu0 %1583  ;;  %v1604_v14 = vsel %vm12071_vm12, %v1598_v31, %v1600_v44 }
 0x1dc   : > { %v1587_v62 = vsel %vm1585_vm11, %v1582_v28, %v1584_v36  ;;  %v1610_v19 = vadd.f32 %v1604_v14, %v1592_v8 }
 0x1dd   : > { %v1593_v18 = vadd.f32 %v1587_v62, %v1563_v7  ;;  %v9245_v7 = vld [vmem:[%s9483_s29 + $0x10] sm:$0xff]  }
 0x1de   : > { %v1628_v63 = vpop.permute.xlu1 %1627 }
 0x1df   : > { %v1602_v0 = vpop.permute.xlu0 %1601  ;;  %v1639_v13 = vadd.f32 %v1628_v63, %v1609_v11  ;;  %v9246_v11 = vld [vmem:[%s9483_s29 + $0x18] sm:$0xff]  }
 0x1e0   : > { %v1605_v15 = vsel %vm12071_vm12, %v1600_v44, %v1602_v0  ;;  %v9247_v0 = vld [vmem:[%s9483_s29 + $0x20] ss:$0 sps:$4 sm:$0xff]  }
 0x1e1   : > { %v1611_v20 = vadd.f32 %v1605_v15, %v1593_v18  ;;  %v1648_v24 = vadd.f32 %v9817_v52, %v1639_v13 }
 0x1e2   : > { %v1632_v5 = vpop.permute.xlu1 %1631 }
 0x1e3   : > { %v1630_v21 = vpop.permute.xlu0 %1629  ;;  %v1651_v30 = vmax.f32 %v1648_v24, 0.0 }
 0x1e4   : > { %v1634_v22 = vsel %vm1633_vm13, %v1628_v63, %v1630_v21  ;;  %v1635_v32 = vsel %vm1633_vm13, %v1630_v21, %v1632_v5  ;;  %v9243_v63 = vld [vmem:[%s9483_s29] sm:$0xff]  }
 0x1e5   : > { %v1640_v25 = vadd.f32 %v1634_v22, %v1610_v19  ;;  %v1641_v27 = vadd.f32 %v1635_v32, %v1611_v20 }
 0x1e7   : > { %v1649_v28 = vadd.f32 %v9817_v52, %v1640_v25  ;;  %v1650_v29 = vadd.f32 %v9817_v52, %v1641_v27 }
 0x1e9   : > { %v1652_v31 = vmax.f32 %v1649_v28, 0.0  ;;  %v1653_v35 = vmax.f32 %v1650_v29, 0.0 }
 0x1eb   : > { %v8889_v37 = vpack.c.bf16 %v1652_v31, %v1651_v30  ;;  %v8890_v38 = vpack.c.bf16 %v1653_v35, %v1653_v35 }
 0x1ed   : > { %1665 = vrot.lane.b32.xlu0 %v8889_v37, %s12004_s18  ;;  %1667 = vrot.lane.b32.xlu1 %v8890_v38, %s12004_s18 }
 0x1f1   : > { %2055 = vperm.xlu1 %9220, %v2052_v39  }
 0x25f   : > { %v1666_v43 = vpop.permute.xlu0 %1665  ;;  %v1668_v44 = vpop.permute.xlu1 %1667 }
 0x260   : > { %v1669_v34 = vrot.slane %v1666_v43, 4  ;;  %v1670_v48 = vrot.slane %v1668_v44, 4 }
 0x262   : > { %v1672_v49 = vsel %vm1671_vm14, %v1669_v34, %v1670_v48 }
 0x263   : > { %v1674_v52 = vsel %vm1616_vm6, %v1666_v43, %v1672_v49 }
 0x264   : > { %1676 = vst [vmem:[#allocation4 + $0x4] sm:$0xff] %v1674_v52 }
 0x26b   : > { %v1686_v36 = vld [vmem:[#allocation4] sm:$0xff]  ;;  %v1687_v54 = vld [vmem:[#allocation4 + $0x8] sm:$0xff] }
 0x26c   : > { %v8561_v55 = vcombine.high %v1686_v36, %v1686_v36  ;;  %v8563_v56 = vcombine.high %v1687_v54, %v1687_v54  ;;  %v8560_v58 = vcombine.low %v1686_v36, %v1686_v36  ;;  %v8562_v60 = vcombine.low %v1687_v54, %v1687_v54 }
 0x26e   : > { %8564 = vmatprep.subr.msk.bf16.mxu0 %vm1671_vm14, %v8561_v55  ;;  %8570 = vmatprep.subr.msk.bf16.mxu1 %vm1671_vm14, %v8563_v56  ;;  %v1739_v61 = vsel %vm1671_vm14, %v8560_v58, 0  ;;  %v1745_v62 = vsel %vm1671_vm14, %v8562_v60, 0 }
 0x26f   : > { %1751 = vmatpush1.bf16.msra.mxu0 %v1739_v61  ;;  %1827 = vmatpush1.bf16.msra.mxu1 %v1745_v62 }
 0x272   : > { %8565 = vmatmul.mubr.msk.bf16.vlgmr.msra.gmra.mrb[20].mxu0 %vm12075_vm15, %v9243_v63  ;;  %8571 = vmatmul.mubr.msk.bf16.vlgmr.msra.gmra.mrb[20].mxu1 %vm12075_vm15, %v9243_v63 }
 0x273   : > { %1792 = vmatprep.mubr.bf16.mxu0 %v12006_v1  ;;  %1866 = vmatprep.mubr.bf16.mxu1 %v12006_v1 }
 0x27a   : > { %8566 = vmatmul.mubr.msk.bf16.gmra.mrb[24].mxu0 %vm12075_vm15, %v9244_v4  ;;  %8572 = vmatmul.mubr.msk.bf16.gmra.mrb[24].mxu1 %vm12075_vm15, %v9244_v4 }
 0x27b   : > { %1802 = vmatprep.mubr.bf16.mxu0 %v12006_v1  ;;  %1874 = vmatprep.mubr.bf16.mxu1 %v12006_v1 }
 0x282   : > { %8567 = vmatmul.mubr.msk.bf16.gmra.mrb[28].mxu0 %vm12075_vm15, %v9245_v7  ;;  %8573 = vmatmul.mubr.msk.bf16.gmra.mrb[28].mxu1 %vm12075_vm15, %v9245_v7 }
 0x283   : > { %1810 = vmatprep.mubr.bf16.mxu0 %v12006_v1  ;;  %1883 = vmatprep.mubr.bf16.mxu1 %v12006_v1 }
 0x28a   : > { %8568 = vmatmul.mubr.msk.bf16.gmra.mrb[32].mxu0 %vm12075_vm15, %v9246_v11  ;;  %8574 = vmatmul.mubr.msk.bf16.gmra.mrb[32].mxu1 %vm12075_vm15, %v9246_v11 }
 0x28b   : > { %1818 = vmatprep.mubr.bf16.mxu0 %v12006_v1  ;;  %1893 = vmatprep.mubr.bf16.mxu1 %v12006_v1 }
 0x292   : > { %8569 = vmatmul.mubr.msk.bf16.gmra.mrb[36].mxu0 %vm12075_vm15, %v9247_v0  ;;  %8575 = vmatmul.mubr.msk.bf16.gmra.mrb[36].mxu1 %vm12075_vm15, %v9247_v0 }
 0x293   : > { %2264 = vmatprep.mubr.bf16.mxu0 %v12006_v1  ;;  %2377 = vmatprep.mubr.bf16.mxu1 %v12006_v1 }
 0x345   : > { %v9882_v14 = vpop.f32.mrb[20].mxu0  ;;  %v9884_v15 = vpop.f32.mrb[20].mxu1 }
 0x346   : > { %v9886_v8 = vpop.f32.mrb[21].mxu0  ;;  %v1862_v18 = vpop.f32.mrb[21].mxu1 }
 0x347   : > { %v1788_v13 = vpop.f32.mrb[22].mxu0  ;;  %v1863_v5 = vpop.f32.mrb[22].mxu1 }
 0x348   : > { %1908 = vrot.lane.b32.xlu0 %v1788_v13, %s12145_s11  ;;  %v1790_v19 = vpop.f32.mrb[23].mxu0  ;;  %v1865_v20 = vpop.f32.mrb[23].mxu1 }
 0x349   : > { %1910 = vrot.lane.b32.xlu1 %v1790_v19, %s12145_s11 }
 0x34c   : > { %1912 = vrot.lane.b32.xlu0 %v1863_v5, %s12145_s11 }
 0x34d   : > { %v1794_v21 = vpop.f32.mrb[24].mxu0  ;;  %v1868_v22 = vpop.f32.mrb[24].mxu1 }
 0x34e   : > { %v1922_v32 = vmul.f32 %v1794_v21, %v9729_v33  ;;  %v1796_v24 = vpop.f32.mrb[25].mxu0  ;;  %v1870_v25 = vpop.f32.mrb[25].mxu1  ;;  %v1924_v35 = vmul.f32 %v1868_v22, %v9740_v42 }
 0x34f   : > { %v1923_v27 = vmul.f32 %v1796_v24, %v9745_v46  ;;  %v1798_v28 = vpop.f32.mrb[26].mxu0  ;;  %v1871_v29 = vpop.f32.mrb[26].mxu1 }
 0x350   : > { %1928 = vrot.lane.b32.xlu1 %v1922_v32, %s12142_s23  ;;  %v1800_v30 = vpop.f32.mrb[27].mxu0  ;;  %v1873_v31 = vpop.f32.mrb[27].mxu1  ;;  %v1942_v37 = vmul.f32 %v1798_v28, %v9737_v41  ;;  %v1944_v52 = vmul.f32 %v1871_v29, %v9750_v53 }
 0x351   : > { %1930 = vrot.lane.b32.xlu0 %v1923_v27, %s12142_s23  ;;  %v1943_v43 = vmul.f32 %v1800_v30, %v9757_v57  ;;  %v9926_v31 = vpop.permute.xlu1 %2055 }
 0x354   : > { %1932 = vrot.lane.b32.xlu1 %v1924_v35, %s12142_s23 }
 0x355   : > { %v1804_v38 = vpop.f32.mrb[28].mxu0  ;;  %1948 = vrot.lane.b32.xlu0 %v1942_v37, %s12008_s26  ;;  %v1876_v39 = vpop.f32.mrb[28].mxu1 }
 0x356   : > { %v1805_v44 = vpop.f32.mrb[29].mxu0  ;;  %v1878_v34 = vpop.f32.mrb[29].mxu1 }
 0x357   : > { %v1807_v48 = vpop.f32.mrb[30].mxu0  ;;  %v1879_v49 = vpop.f32.mrb[30].mxu1 }
 0x358   : > { %v1808_v36 = vpop.f32.mrb[31].mxu0  ;;  %1950 = vrot.lane.b32.xlu1 %v1943_v43, %s12008_s26  ;;  %v1881_v54 = vpop.f32.mrb[31].mxu1  ;;  %v1976_v63 = vmul.f32 %v1879_v49, %v9771_v10 }
 0x359   : > { %1952 = vrot.lane.b32.xlu0 %v1944_v52, %s12008_s26  ;;  %v1975_v58 = vmul.f32 %v1808_v36, %v9761_v59  ;;  %v1977_v0 = vmul.f32 %v1881_v54, %v9767_v9 }
 0x35c   : > { %1964 = vrot.lane.b32.xlu1 %v1805_v44, %s12010_s22 }
 0x35d   : > { %v1812_v55 = vpop.f32.mrb[32].mxu0  ;;  %1966 = vrot.lane.b32.xlu0 %v1876_v39, %s12010_s22  ;;  %v1885_v56 = vpop.f32.mrb[32].mxu1  ;;  %s12110_s22 = smov 60  }
 0x35e   : > { %v1813_v60 = vpop.f32.mrb[33].mxu0  ;;  %v1887_v61 = vpop.f32.mrb[33].mxu1  ;;  %v1996_v21 = vmul.f32 %v1885_v56, %v9787_v26  ;;  %v1902_v55 = vmul.f32 %v9882_v14, %v9815_v51 }
 0x35f   : > { %v1815_v62 = vpop.f32.mrb[34].mxu0  ;;  %v1889_v4 = vpop.f32.mrb[34].mxu1  ;;  %v1995_v18 = vmul.f32 %v1813_v60, %v9775_v12  ;;  %v1997_v22 = vmul.f32 %v1887_v61, %v9782_v23 }
 0x360   : > { %1981 = vrot.lane.b32.xlu1 %v1975_v58, %s12002_s2  ;;  %v1816_v7 = vpop.f32.mrb[35].mxu0  ;;  %v1891_v11 = vpop.f32.mrb[35].mxu1 }
 0x361   : > { %1983 = vrot.lane.b32.xlu0 %v1976_v63, %s12002_s2 }
 0x364   : > { %1985 = vrot.lane.b32.xlu1 %v1977_v0, %s12002_s2  ;;  %s9434_s2 = smov 30  }
 0x365   : > { %v1820_v13 = vpop.f32.mrb[36].mxu0  ;;  %2001 = vrot.lane.b32.xlu0 %v1995_v18, %s12140_s7  ;;  %v1895_v5 = vpop.f32.mrb[36].mxu1  ;;  %v1903_v18 = vmul.f32 %v9886_v8, %v9826_v16 }
 0x366   : > { %v1821_v19 = vpop.f32.mrb[37].mxu0  ;;  %v1897_v20 = vpop.f32.mrb[37].mxu1  ;;  %v2033_v30 = vmul.f32 %v1895_v5, %v9805_v47  ;;  %v1904_v13 = vmul.f32 %v9884_v15, %v9813_v50 }
 0x367   : > { %v1823_v32 = vpop.f32.mrb[38].mxu0  ;;  %v1899_v24 = vpop.f32.mrb[38].mxu1  ;;  %v2032_v28 = vmul.f32 %v1821_v19, %v9794_v40  ;;  %v2034_v29 = vmul.f32 %v1897_v20, %v9800_v45 }
 0x368   : > { %2003 = vrot.lane.b32.xlu1 %v1996_v21, %s12140_s7  ;;  %v1824_v25 = vpop.f32.mrb[39].mxu0  ;;  %v1900_v27 = vpop.f32.mrb[39].mxu1 }
 0x369   : > { %2005 = vrot.lane.b32.xlu0 %v1997_v22, %s12140_s7 }
 0x36c   : > { %2020 = vrot.lane.b32.xlu1 %v1889_v4, %s12000_s10 }
 0x36d   : > { %2018 = vrot.lane.b32.xlu0 %v1816_v7, %s12000_s10 }
 0x370   : > { %2038 = vrot.lane.b32.xlu1 %v2032_v28, %s12138_s15 }
 0x371   : > { %2022 = vrot.lane.b32.xlu0 %v1891_v11, %s12000_s10  ;;  %s9433_s10 = smov 2  }
 0x374   : > { %2042 = vrot.lane.b32.xlu1 %v2034_v29, %s12138_s15 }
 0x375   : > { %2040 = vrot.lane.b32.xlu0 %v2033_v30, %s12138_s15 }
 0x3ba   : > { %v1909_v35 = vpop.permute.xlu0 %1908 }
 0x3bb   : > { %v1911_v37 = vpop.permute.xlu1 %1910 }
 0x3bc   : > { %v1914_v54 = vsel %vm1444_vm3, %v1909_v35, %v1911_v37 }
 0x3bd   : > { %v1919_v60 = vadd.f32 %v1914_v54, %v1902_v55 }
 0x3be   : > { %v1913_v38 = vpop.permute.xlu0 %1912 }
 0x3bf   : > { %v1915_v0 = vsel %vm1444_vm3, %v1911_v37, %v1913_v38  ;;  %v1921_v20 = vadd.f32 %v1913_v38, %v1904_v13 }
 0x3c0   : > { %v1920_v19 = vadd.f32 %v1915_v0, %v1903_v18 }
 0x3c2   : > { %v1929_v39 = vpop.permute.xlu1 %1928 }
 0x3c3   : > { %v1931_v43 = vpop.permute.xlu0 %1930 }
 0x3c4   : > { %v1934_v56 = vsel %vm1483_vm7, %v1929_v39, %v1931_v43 }
 0x3c5   : > { %v1939_v63 = vadd.f32 %v1934_v56, %v1919_v60 }
 0x3c6   : > { %v1933_v44 = vpop.permute.xlu1 %1932 }
 0x3c7   : > { %v1949_v34 = vpop.permute.xlu0 %1948  ;;  %v1935_v14 = vsel %vm1483_vm7, %v1931_v43, %v1933_v44  ;;  %v1941_v25 = vadd.f32 %v1933_v44, %v1921_v20 }
 0x3c8   : > { %v1940_v24 = vadd.f32 %v1935_v14, %v1920_v19 }
 0x3ca   : > { %v1951_v48 = vpop.permute.xlu1 %1950 }
 0x3cb   : > { %v1953_v49 = vpop.permute.xlu0 %1952  ;;  %v1954_v62 = vsel %vm1512_vm9, %v1949_v34, %v1951_v48 }
 0x3cc   : > { %v1959_v7 = vadd.f32 %v1954_v62, %v1939_v63  ;;  %v1955_v32 = vsel %vm1512_vm9, %v1951_v48, %v1953_v49  ;;  %v1961_v8 = vadd.f32 %v1953_v49, %v1941_v25  ;;  %v2087_v25 = vld [vmem:[#allocation5 + $0xc] sm:$0xf] }
 0x3cd   : > { %v1960_v30 = vadd.f32 %v1955_v32, %v1940_v24 }
 0x3ce   : > { %v1965_v52 = vpop.permute.xlu1 %1964 }
 0x3cf   : > { %v1967_v36 = vpop.permute.xlu0 %1966  ;;  %v1972_v21 = vadd.f32 %v1965_v52, %v1959_v7 }
 0x3d0   : > { %v1968_v28 = vsel %vm1427_vm8, %v1965_v52, %v1967_v36  ;;  %v1974_v38 = vadd.f32 %v1967_v36, %v1961_v8 }
 0x3d1   : > { %v1973_v43 = vadd.f32 %v1968_v28, %v1960_v30 }
 0x3d2   : > { %v1982_v58 = vpop.permute.xlu1 %1981 }
 0x3d3   : > { %v1984_v61 = vpop.permute.xlu0 %1983  ;;  %v1992_v27 = vadd.f32 %v1982_v58, %v1972_v21 }
 0x3d4   : > { %v1987_v15 = vsel %vm12074_vm10, %v1982_v58, %v1984_v61 }
 0x3d5   : > { %v1993_v55 = vadd.f32 %v1987_v15, %v1973_v43  ;;  %v8529_v43 = vld [vmem:[%s9468_s17 + $0x2] ss:$8 sm:$0x3] }
 0x3d6   : > { %v1986_v4 = vpop.permute.xlu1 %1985 }
 0x3d7   : > { %v2002_v11 = vpop.permute.xlu0 %2001  ;;  %v1988_v39 = vsel %vm12074_vm10, %v1984_v61, %v1986_v4  ;;  %vm12076_vm10 = vmmov 0  }
 0x3d8   : > { %v2012_v35 = vadd.f32 %v2002_v11, %v1992_v27  ;;  %v1994_v56 = vadd.f32 %v1988_v39, %v1974_v38  ;;  %v2466_v38 = vrot.slane %v8529_v43, %v9679_v6 }
 0x3da   : > { %v2004_v5 = vpop.permute.xlu1 %2003 }
 0x3db   : > { %v2006_v22 = vpop.permute.xlu0 %2005  ;;  %v2007_v54 = vsel %vm1585_vm11, %v2002_v11, %v2004_v5 }
 0x3dc   : > { %v2008_v48 = vsel %vm1585_vm11, %v2004_v5, %v2006_v22  ;;  %v2013_v62 = vadd.f32 %v2007_v54, %v1993_v55 }
 0x3dd   : > { %v2014_v63 = vadd.f32 %v2008_v48, %v1994_v56 }
 0x3de   : > { %v2021_v29 = vpop.permute.xlu1 %2020 }
 0x3df   : > { %v2019_v37 = vpop.permute.xlu0 %2018 }
 0x3e0   : > { %v2029_v34 = vadd.f32 %v2019_v37, %v2012_v35  ;;  %v2024_v60 = vsel %vm12071_vm12, %v2019_v37, %v2021_v29  ;;  %v8530_v37 = vld [vmem:[%s9468_s17 + $0x3] ss:$8 sm:$0x3] }
 0x3e1   : > { %v2030_v61 = vadd.f32 %v2024_v60, %v2013_v62  ;;  %v2523_v39 = vrot.slane %v8530_v37, %v9679_v6  ;;  %v2519_v60 = vrot.slane %v8530_v37, %v9675_v3  ;;  %v2833_v62 = vld [vmem:[%s12216_s14] sm:$0xff] }
 0x3e2   : > { %v2039_v44 = vpop.permute.xlu1 %2038 }
 0x3e3   : > { %v2023_v52 = vpop.permute.xlu0 %2022  ;;  %v2049_v58 = vadd.f32 %v2039_v44, %v2029_v34  ;;  %v2834_v34 = vld [vmem:[%s12216_s14 + $0x8] sm:$0xff]  ;;  %s12449_s14 = sld [smem:[#allocation32_spill]] }
 0x3e4   : > { %v2025_v49 = vsel %vm12071_vm12, %v2021_v29, %v2023_v52  ;;  %vm12107_vm12 = vcmask 490496  }
 0x3e5   : > { %v2031_v4 = vadd.f32 %v2025_v49, %v2014_v63  ;;  %v2058_v18 = vadd.f32 %v9926_v31, %v2049_v58  ;;  %v2462_v49 = vrot.slane %v8529_v43, %v9675_v3 }
 0x3e6   : > { %v2043_v7 = vpop.permute.xlu1 %2042 }
 0x3e7   : > { %v2041_v36 = vpop.permute.xlu0 %2040  ;;  %v2061_v20 = vmax.f32 %v2058_v18, 0.0 }
 0x3e8   : > { %v2044_v0 = vsel %vm1633_vm13, %v2039_v44, %v2041_v36  ;;  %v2045_v11 = vsel %vm1633_vm13, %v2041_v36, %v2043_v7 }
 0x3e9   : > { %v2050_v13 = vadd.f32 %v2044_v0, %v2030_v61  ;;  %v2051_v14 = vadd.f32 %v2045_v11, %v2031_v4 }
 0x3eb   : > { %v2059_v5 = vadd.f32 %v9926_v31, %v2050_v13  ;;  %v2060_v19 = vadd.f32 %v9926_v31, %v2051_v14 }
 0x3ed   : > { %v2062_v21 = vmax.f32 %v2059_v5, 0.0  ;;  %v2063_v22 = vmax.f32 %v2060_v19, 0.0 }
 0x3ef   : > { %v8891_v32 = vpack.c.bf16 %v2062_v21, %v2061_v20  ;;  %v8892_v24 = vpack.c.bf16 %v2063_v22, %v2063_v22  ;;  %v9252_v22 = vld [vmem:[%s12217_s8] sm:$0xff]  }
 0x3f1   : > { %2075 = vrot.lane.b32.xlu0 %v8891_v32, %s12004_s18  ;;  %2077 = vrot.lane.b32.xlu1 %v8892_v24, %s12004_s18  ;;  %s12108_s18 = smov 34   ;;  %v9253_v32 = vld [vmem:[%s12217_s8 + $0x8] sm:$0xff]   ;;  %v9254_v24 = vld [vmem:[%s12217_s8 + $0x10] sm:$0xff]  }
 0x3f5   : > { %2092 = vrot.lane.b32.xlu1 %v2087_v25, %s12145_s11 }
 0x463   : > { %v2076_v27 = vpop.permute.xlu0 %2075  ;;  %v2078_v28 = vpop.permute.xlu1 %2077 }
 0x464   : > { %v2079_v29 = vrot.slane %v2076_v27, 4  ;;  %v2080_v30 = vrot.slane %v2078_v28, 4  ;;  %v9257_v28 = vld [vmem:[%s12217_s8 + $0x28] sm:$0xff]  }
 0x466   : > { %v2081_v31 = vsel %vm1671_vm14, %v2079_v29, %v2080_v30  ;;  %v9258_v29 = vld [vmem:[%s12217_s8 + $0x30] sm:$0xff]   ;;  %v9259_v30 = vld [vmem:[%s12217_s8 + $0x38] sm:$0xff]  }
 0x467   : > { %v2082_v8 = vsel %vm1616_vm6, %v2076_v27, %v2081_v31  ;;  %v2093_v35 = vpop.permute.xlu1 %2092  ;;  %v9256_v27 = vld [vmem:[%s12217_s8 + $0x20] sm:$0xff]  }
 0x468   : > { %2084 = vst [vmem:[#allocation5 + $0x4] sm:$0xff] %v2082_v8  ;;  %v2103_v15 = vmax.bf16 %v2093_v35, %v2087_v25  ;;  %2090 = vrot.lane.b32.xlu0 %v2082_v8, %s12145_s11  ;;  %v2095_v54 = vrot.slane %v2093_v35, 4  ;;  %v9255_v25 = vld [vmem:[%s12217_s8 + $0x18] sm:$0xff]   ;;  %v9260_v31 = vld [vmem:[%s12217_s8 + $0x40] sm:$0xff]   ;;  %s12421_s8 = smov 62  }
 0x46a   : > { %2108 = vrot.lane.b32.xlu1 %v2103_v15, %s12008_s26 }
 0x46e   : > { %2526 = vrot.lane.b32.xlu1 %v2523_v39, %s9432_s16 }
 0x472   : > { %2576 = vrot.lane.b32.xlu1 %v2466_v38, %s12142_s23 }
 0x476   : > { %2650 = vrot.lane.b32.xlu1 %v2523_v39, %s9433_s10 }
 0x47a   : > { %2700 = vrot.lane.b32.xlu1 %v2466_v38, %s9434_s2 }
 0x47e   : > { %2785 = vrot.lane.b32.xlu1 %v2523_v39, %s12108_s18 }
 0x482   : > { %2469 = vrot.lane.b32.xlu1 %v2466_v38, %s12138_s15 }
 0x486   : > { %2842 = vperm.xlu1 %9220, %v2834_v34  }
 0x4da   : > { %v2091_v48 = vpop.permute.xlu0 %2090 }
 0x4db   : > { %v2094_v44 = vrot.slane %v2091_v48, 4 }
 0x4dc   : > { %v2109_v63 = vpop.permute.xlu1 %2108 }
 0x4dd   : > { %v2096_v55 = vsel %vm1671_vm14, %v2094_v44, %v2095_v54  ;;  %v2111_v7 = vrot.slane %v2109_v63, 4 }
 0x4de   : > { %v2098_v56 = vsel %vm1444_vm3, %v2091_v48, %v2096_v55 }
 0x4df   : > { %v2100_v52 = vmax.bf16 %v2098_v56, %v2082_v8 }
 0x4e1   : > { %2106 = vrot.lane.b32.xlu0 %v2100_v52, %s12008_s26  ;;  %s12116_s26 = smov 62  }
 0x4e5   : > { %2524 = vrot.lane.b32.xlu0 %v2519_v60, %s9432_s16  ;;  %s12125_s16 = smov 64  }
 0x4e9   : > { %2574 = vrot.lane.b32.xlu0 %v2462_v49, %s12142_s23 }
 0x4ed   : > { %2648 = vrot.lane.b32.xlu0 %v2519_v60, %s9433_s10  ;;  %s12127_s10 = smov 92  }
 0x4f1   : > { %2698 = vrot.lane.b32.xlu0 %v2462_v49, %s9434_s2  ;;  %s12135_s2 = smov 124  }
 0x4f5   : > { %2783 = vrot.lane.b32.xlu0 %v2519_v60, %s12108_s18 }
 0x4f9   : > { %2467 = vrot.lane.b32.xlu0 %v2462_v49, %s12138_s15 }
 0x4fd   : > { %2837 = vperm.xlu0 %9221, %v2833_v62   ;;  %v10041_v62 = vpop.permute.xlu1 %2526 }
 0x553   : > { %v2107_v58 = vpop.permute.xlu0 %2106 }
 0x554   : > { %v2110_v61 = vrot.slane %v2107_v58, 4 }
 0x556   : > { %v2112_v4 = vsel %vm1671_vm14, %v2110_v61, %v2111_v7 }
 0x557   : > { %v2114_v36 = vsel %vm1512_vm9, %v2107_v58, %v2112_v4  ;;  %v10043_v63 = vpop.permute.xlu0 %2524 }
 0x558   : > { %v2116_v0 = vmax.bf16 %v2114_v36, %v2100_v52  ;;  %v10048_v58 = vsel %vm2528_vm2, %v10043_v63, %v10041_v62  ;;  %vm12115_vm2 = vcmask 277504  }
 0x55a   : > { %2117 = vst [vmem:[#allocation6 + $0x4] sm:$0xff] %v2116_v0 }
 0x561   : > { %v2136_v11 = vld [vmem:[#allocation6] sm:$0xff]  ;;  %v2137_v18 = vld [vmem:[#allocation6 + $0x8] sm:$0xff] }
 0x562   : > { %v8588_v13 = vcombine.high %v2136_v11, %v2136_v11  ;;  %v8590_v14 = vcombine.high %v2137_v18, %v2137_v18  ;;  %v8587_v5 = vcombine.low %v2136_v11, %v2136_v11  ;;  %v8589_v19 = vcombine.low %v2137_v18, %v2137_v18 }
 0x564   : > { %8591 = vmatprep.subr.msk.bf16.mxu0 %vm1671_vm14, %v8588_v13  ;;  %8601 = vmatprep.subr.msk.bf16.mxu1 %vm1671_vm14, %v8590_v14  ;;  %v2221_v20 = vsel %vm1671_vm14, %v8587_v5, 0  ;;  %v2227_v21 = vsel %vm1671_vm14, %v8589_v19, 0  ;;  %v10056_v19 = vpop.permute.xlu1 %2576 }
 0x565   : > { %2233 = vmatpush1.bf16.msra.mxu0 %v2221_v20  ;;  %2346 = vmatpush1.bf16.msra.mxu1 %v2227_v21  ;;  %12244 = vst [vmem:[#allocation60_spill] sm:$0xff] %v10056_v19  ;;  %v10058_v20 = vpop.permute.xlu0 %2574 }
 0x568   : > { %8592 = vmatmul.mubr.msk.bf16.vlgmr.msra.gmra.mrb[40].mxu0 %vm12075_vm15, %v9252_v22  ;;  %8602 = vmatmul.mubr.msk.bf16.vlgmr.msra.gmra.mrb[40].mxu1 %vm12075_vm15, %v9252_v22 }
 0x569   : > { %2274 = vmatprep.mubr.bf16.mxu0 %v12006_v1  ;;  %2385 = vmatprep.mubr.bf16.mxu1 %v12006_v1 }
 0x570   : > { %8593 = vmatmul.mubr.msk.bf16.gmra.mrb[44].mxu0 %vm12075_vm15, %v9253_v32  ;;  %8603 = vmatmul.mubr.msk.bf16.gmra.mrb[44].mxu1 %vm12075_vm15, %v9253_v32 }
 0x571   : > { %2284 = vmatprep.mubr.bf16.mxu0 %v12006_v1  ;;  %2393 = vmatprep.mubr.bf16.mxu1 %v12006_v1 }
 0x578   : > { %8594 = vmatmul.mubr.msk.bf16.gmra.mrb[48].mxu0 %vm12075_vm15, %v9254_v24  ;;  %8604 = vmatmul.mubr.msk.bf16.gmra.mrb[48].mxu1 %vm12075_vm15, %v9254_v24 }
 0x579   : > { %2294 = vmatprep.mubr.bf16.mxu0 %v12006_v1  ;;  %2401 = vmatprep.mubr.bf16.mxu1 %v12006_v1 }
 0x580   : > { %8595 = vmatmul.mubr.msk.bf16.gmra.mrb[52].mxu0 %vm12075_vm15, %v9255_v25  ;;  %8605 = vmatmul.mubr.msk.bf16.gmra.mrb[52].mxu1 %vm12075_vm15, %v9255_v25 }
 0x581   : > { %2304 = vmatprep.mubr.bf16.mxu0 %v12006_v1  ;;  %2409 = vmatprep.mubr.bf16.mxu1 %v12006_v1 }
 0x588   : > { %8596 = vmatmul.mubr.msk.bf16.gmra.mrb[56].mxu0 %vm12075_vm15, %v9256_v27  ;;  %8606 = vmatmul.mubr.msk.bf16.gmra.mrb[56].mxu1 %vm12075_vm15, %v9256_v27 }
 0x589   : > { %2312 = vmatprep.mubr.bf16.mxu0 %v12006_v1  ;;  %2417 = vmatprep.mubr.bf16.mxu1 %v12006_v1 }
 0x590   : > { %8597 = vmatmul.mubr.msk.bf16.gmra.mrb[60].mxu0 %vm12075_vm15, %v9257_v28  ;;  %8607 = vmatmul.mubr.msk.bf16.gmra.mrb[60].mxu1 %vm12075_vm15, %v9257_v28 }
 0x591   : > { %2320 = vmatprep.mubr.bf16.mxu0 %v12006_v1  ;;  %2427 = vmatprep.mubr.bf16.mxu1 %v12006_v1 }
 0x598   : > { %8598 = vmatmul.mubr.msk.bf16.gmra.mrb[64].mxu0 %vm12075_vm15, %v9258_v29  ;;  %8608 = vmatmul.mubr.msk.bf16.gmra.mrb[64].mxu1 %vm12075_vm15, %v9258_v29 }
 0x599   : > { %2328 = vmatprep.mubr.bf16.mxu0 %v12006_v1  ;;  %2437 = vmatprep.mubr.bf16.mxu1 %v12006_v1 }
 0x5a0   : > { %8599 = vmatmul.mubr.msk.bf16.gmra.mrb[68].mxu0 %vm12075_vm15, %v9259_v30  ;;  %8609 = vmatmul.mubr.msk.bf16.gmra.mrb[68].mxu1 %vm12075_vm15, %v9259_v30 }
 0x5a1   : > { %2336 = vmatprep.mubr.bf16.mxu0 %v12006_v1  ;;  %2447 = vmatprep.mubr.bf16.mxu1 %v12006_v1 }
 0x5a8   : > { %8600 = vmatmul.mubr.msk.bf16.gmra.mrb[72].mxu0 %vm12075_vm15, %v9260_v31  ;;  %8610 = vmatmul.mubr.msk.bf16.gmra.mrb[72].mxu1 %vm12075_vm15, %v9260_v31  ;;  %v10068_v31 = vsel %vm1483_vm7, %v10058_v20, %v10056_v19  ;;  %vm12124_vm15 = vcmask 130048  }
 0x5a9   : > { %3003 = vmatprep.mubr.bf16.mxu0 %v12006_v1 }
 0x63b   : > { %v10026_v8 = vpop.f32.mrb[40].mxu0  ;;  %v10028_v35 = vpop.f32.mrb[40].mxu1 }
 0x63c   : > { %v10030_v37 = vpop.f32.mrb[41].mxu0  ;;  %v2381_v15 = vpop.f32.mrb[41].mxu1 }
 0x63d   : > { %v10032_v39 = vpop.f32.mrb[42].mxu0  ;;  %v10034_v43 = vpop.f32.mrb[42].mxu1 }
 0x63e   : > { %v10036_v38 = vpop.f32.mrb[43].mxu0  ;;  %v2384_v34 = vpop.f32.mrb[43].mxu1 }
 0x643   : > { %v2276_v54 = vpop.f32.mrb[44].mxu0  ;;  %v2387_v48 = vpop.f32.mrb[44].mxu1 }
 0x644   : > { %2487 = vrot.lane.b32.xlu0 %v2276_v54, %s12142_s23  ;;  %v2278_v44 = vpop.f32.mrb[45].mxu0  ;;  %v2389_v55 = vpop.f32.mrb[45].mxu1 }
 0x645   : > { %2489 = vrot.lane.b32.xlu1 %v2278_v44, %s12142_s23  ;;  %v2280_v56 = vpop.f32.mrb[46].mxu0  ;;  %v2390_v52 = vpop.f32.mrb[46].mxu1 }
 0x646   : > { %v2282_v60 = vpop.f32.mrb[47].mxu0  ;;  %v2392_v49 = vpop.f32.mrb[47].mxu1 }
 0x648   : > { %2491 = vrot.lane.b32.xlu0 %v2387_v48, %s12142_s23 }
 0x649   : > { %2493 = vrot.lane.b32.xlu1 %v2280_v56, %s12142_s23 }
 0x64b   : > { %v2286_v7 = vpop.f32.mrb[48].mxu0  ;;  %v2395_v61 = vpop.f32.mrb[48].mxu1 }
 0x64c   : > { %v2533_v4 = vmul.f32 %v10043_v63, %v2286_v7  ;;  %v2288_v36 = vpop.f32.mrb[49].mxu0  ;;  %2495 = vrot.lane.b32.xlu0 %v2282_v60, %s12142_s23  ;;  %v2397_v0 = vpop.f32.mrb[49].mxu1  ;;  %v2535_v21 = vmul.f32 %v10041_v62, %v2395_v61 }
 0x64d   : > { %v2534_v11 = vmul.f32 %v10048_v58, %v2288_v36  ;;  %v2290_v18 = vpop.f32.mrb[50].mxu0  ;;  %2497 = vrot.lane.b32.xlu1 %v2390_v52, %s12142_s23  ;;  %v2398_v13 = vpop.f32.mrb[50].mxu1 }
 0x64e   : > { %v2292_v14 = vpop.f32.mrb[51].mxu0  ;;  %v2400_v5 = vpop.f32.mrb[51].mxu1  ;;  %v2536_v22 = vmul.f32 %v10043_v63, %v2290_v18  ;;  %v2538_v54 = vmul.f32 %v10041_v62, %v2398_v13 }
 0x64f   : > { %v2537_v30 = vmul.f32 %v10048_v58, %v2292_v14 }
 0x650   : > { %2545 = vrot.lane.b32.xlu0 %v2533_v4, %s12135_s2 }
 0x651   : > { %2547 = vrot.lane.b32.xlu1 %v2534_v11, %s12135_s2 }
 0x653   : > { %v2296_v32 = vpop.f32.mrb[52].mxu0  ;;  %v2403_v24 = vpop.f32.mrb[52].mxu1 }
 0x654   : > { %2549 = vrot.lane.b32.xlu0 %v2535_v21, %s12135_s2  ;;  %v2298_v25 = vpop.f32.mrb[53].mxu0  ;;  %v2405_v27 = vpop.f32.mrb[53].mxu1  ;;  %v2582_v48 = vmul.f32 %v10058_v20, %v2296_v32  ;;  %v2584_v61 = vmul.f32 %v10056_v19, %v2403_v24 }
 0x655   : > { %2551 = vrot.lane.b32.xlu1 %v2536_v22, %s12135_s2  ;;  %v2300_v28 = vpop.f32.mrb[54].mxu0  ;;  %v2406_v29 = vpop.f32.mrb[54].mxu1  ;;  %v2583_v44 = vmul.f32 %v10068_v31, %v2298_v25 }
 0x656   : > { %v2302_v15 = vpop.f32.mrb[55].mxu0  ;;  %v2408_v34 = vpop.f32.mrb[55].mxu1  ;;  %v2585_v0 = vmul.f32 %v10058_v20, %v2300_v28  ;;  %v2587_v18 = vmul.f32 %v10056_v19, %v2406_v29 }
 0x657   : > { %v2586_v11 = vmul.f32 %v10068_v31, %v2302_v15  ;;  %v10086_v27 = vpop.permute.xlu1 %2650  ;;  %v10088_v28 = vpop.permute.xlu0 %2648 }
 0x658   : > { %2553 = vrot.lane.b32.xlu0 %v2537_v30, %s12135_s2  ;;  %12245 = vst [vmem:[#allocation61_spill] sm:$0xff] %v10086_v27  ;;  %12246 = vst [vmem:[#allocation62_spill] sm:$0xff] %v10088_v28  ;;  %v10094_v29 = vsel %vm12069_vm4, %v10088_v28, %v10086_v27  ;;  %vm12137_vm4 = vcmask 523264  }
 0x659   : > { %2555 = vrot.lane.b32.xlu1 %v2538_v54, %s12135_s2  ;;  %12247 = vst [vmem:[#allocation63_spill] sm:$0xff] %v10094_v29 }
 0x65b   : > { %v2306_v55 = vpop.f32.mrb[56].mxu0  ;;  %v2411_v56 = vpop.f32.mrb[56].mxu1 }
 0x65c   : > { %2594 = vrot.lane.b32.xlu0 %v2582_v48, %s12140_s7  ;;  %v2307_v52 = vpop.f32.mrb[57].mxu0  ;;  %v2413_v60 = vpop.f32.mrb[57].mxu1 }
 0x65d   : > { %2596 = vrot.lane.b32.xlu1 %v2583_v44, %s12140_s7  ;;  %v2309_v49 = vpop.f32.mrb[58].mxu0  ;;  %v2414_v7 = vpop.f32.mrb[58].mxu1 }
 0x65e   : > { %v2310_v4 = vpop.f32.mrb[59].mxu0  ;;  %v2416_v36 = vpop.f32.mrb[59].mxu1 }
 0x65f   : > { %v10102_v49 = vpop.permute.xlu1 %2700 }
 0x660   : > { %2598 = vrot.lane.b32.xlu0 %v2584_v61, %s12140_s7  ;;  %12248 = vst [vmem:[#allocation64_spill] sm:$0xff] %v10102_v49  ;;  %v10104_v61 = vpop.permute.xlu0 %2698 }
 0x661   : > { %2600 = vrot.lane.b32.xlu1 %v2585_v0, %s12140_s7  ;;  %12249 = vst [vmem:[#allocation65_spill] sm:$0xff] %v10104_v61 }
 0x663   : > { %v2314_v13 = vpop.f32.mrb[60].mxu0  ;;  %v2419_v14 = vpop.f32.mrb[60].mxu1 }
 0x664   : > { %2602 = vrot.lane.b32.xlu0 %v2586_v11, %s12140_s7  ;;  %v2315_v5 = vpop.f32.mrb[61].mxu0  ;;  %v2421_v21 = vpop.f32.mrb[61].mxu1  ;;  %v2658_v44 = vmul.f32 %v10094_v29, %v2419_v14 }
 0x665   : > { %2604 = vrot.lane.b32.xlu1 %v2587_v18, %s12140_s7  ;;  %v2317_v22 = vpop.f32.mrb[62].mxu0  ;;  %v2423_v32 = vpop.f32.mrb[62].mxu1  ;;  %v2657_v34 = vmul.f32 %v10088_v28, %v2315_v5 }
 0x666   : > { %v2318_v24 = vpop.f32.mrb[63].mxu0  ;;  %v2425_v25 = vpop.f32.mrb[63].mxu1  ;;  %v2661_v36 = vmul.f32 %v10094_v29, %v2423_v32  ;;  %v10113_v22 = vsel %vm2702_vm5, %v10104_v61, %v10102_v49  ;;  %vm12144_vm5 = vcmask 1014784  }
 0x667   : > { %v2660_v5 = vmul.f32 %v10088_v28, %v2318_v24  ;;  %12250 = vst [vmem:[#allocation66_spill] sm:$0xff] %v10113_v22  ;;  %v2662_v32 = vmul.f32 %v10086_v27, %v2425_v25 }
 0x668   : > { %2626 = vrot.lane.b32.xlu0 %v2307_v52, %s12138_s15 }
 0x669   : > { %2628 = vrot.lane.b32.xlu1 %v2411_v56, %s12138_s15 }
 0x66b   : > { %v2322_v30 = vpop.f32.mrb[64].mxu0  ;;  %v2429_v15 = vpop.f32.mrb[64].mxu1 }
 0x66c   : > { %2630 = vrot.lane.b32.xlu0 %v2310_v4, %s12138_s15  ;;  %v2323_v54 = vpop.f32.mrb[65].mxu0  ;;  %v2431_v48 = vpop.f32.mrb[65].mxu1  ;;  %v2659_v4 = vmul.f32 %v10086_v27, %v2421_v21 }
 0x66d   : > { %2632 = vrot.lane.b32.xlu1 %v2414_v7, %s12138_s15  ;;  %v2325_v55 = vpop.f32.mrb[66].mxu0  ;;  %v2433_v52 = vpop.f32.mrb[66].mxu1 }
 0x66e   : > { %v2326_v56 = vpop.f32.mrb[67].mxu0  ;;  %v2435_v60 = vpop.f32.mrb[67].mxu1 }
 0x66f   : > { %v2710_v25 = vmul.f32 %v10104_v61, %v2326_v56  ;;  %v10132_v56 = vpop.permute.xlu1 %2785 }
 0x670   : > { %2669 = vrot.lane.b32.xlu0 %v2657_v34, %s12127_s10  ;;  %v2707_v34 = vmul.f32 %v10104_v61, %v2323_v54  ;;  %12251 = vst [vmem:[#allocation67_spill] sm:$0xff] %v10132_v56 }
 0x671   : > { %2671 = vrot.lane.b32.xlu1 %v2658_v44, %s12127_s10  ;;  %v2708_v44 = vmul.f32 %v10113_v22, %v2429_v15  ;;  %v2712_v15 = vmul.f32 %v10102_v49, %v2435_v60 }
 0x673   : > { %v2330_v0 = vpop.f32.mrb[68].mxu0  ;;  %v2439_v7 = vpop.f32.mrb[68].mxu1 }
 0x674   : > { %2673 = vrot.lane.b32.xlu0 %v2659_v4, %s12127_s10  ;;  %v2331_v11 = vpop.f32.mrb[69].mxu0  ;;  %v2441_v18 = vpop.f32.mrb[69].mxu1 }
 0x675   : > { %2677 = vrot.lane.b32.xlu1 %v2661_v36, %s12127_s10  ;;  %v2333_v13 = vpop.f32.mrb[70].mxu0  ;;  %v2443_v14 = vpop.f32.mrb[70].mxu1 }
 0x676   : > { %v2334_v21 = vpop.f32.mrb[71].mxu0  ;;  %v2445_v30 = vpop.f32.mrb[71].mxu1 }
 0x678   : > { %2675 = vrot.lane.b32.xlu0 %v2660_v5, %s12127_s10  ;;  %v2709_v5 = vmul.f32 %v10102_v49, %v2431_v48  ;;  %v10134_v48 = vpop.permute.xlu0 %2783 }
 0x679   : > { %2679 = vrot.lane.b32.xlu1 %v2662_v32, %s12127_s10  ;;  %v2711_v32 = vmul.f32 %v10113_v22, %v2433_v52  ;;  %12252 = vst [vmem:[#allocation68_spill] sm:$0xff] %v10134_v48  ;;  %v10141_v52 = vsel %vm12115_vm2, %v10134_v48, %v10132_v56 }
 0x67a   : > { %12253 = vst [vmem:[#allocation69_spill] sm:$0xff] %v10141_v52 }
 0x67b   : > { %v2338_v55 = vpop.f32.mrb[72].mxu0  ;;  %v2449_v4 = vpop.f32.mrb[72].mxu1 }
 0x67c   : > { %2719 = vrot.lane.b32.xlu0 %v2707_v34, %s12125_s16  ;;  %v2339_v24 = vpop.f32.mrb[73].mxu0  ;;  %v2451_v36 = vpop.f32.mrb[73].mxu1  ;;  %v2793_v60 = vmul.f32 %v10141_v52, %v2449_v4 }
 0x67d   : > { %2721 = vrot.lane.b32.xlu1 %v2708_v44, %s12125_s16  ;;  %v2341_v0 = vpop.f32.mrb[74].mxu0  ;;  %v2453_v13 = vpop.f32.mrb[74].mxu1 }
 0x67e   : > { %v2342_v54 = vpop.f32.mrb[75].mxu0  ;;  %v2455_v1 = vpop.f32.mrb[75].mxu1 }
 0x67f   : > { %v10159_v34 = vpop.permute.xlu1 %2469 }
 0x680   : > { %2725 = vrot.lane.b32.xlu0 %v2710_v25, %s12125_s16  ;;  %12255 = vst [vmem:[#allocation71_spill] sm:$0xff] %v10159_v34  ;;  %v2477_v6 = vmul.f32 %v10159_v34, %v10028_v35 }
 0x681   : > { %2723 = vrot.lane.b32.xlu1 %v2709_v5, %s12125_s16 }
 0x683   : > { %v10163_v55 = vpop.permute.xlu1 %2842 }
 0x684   : > { %2729 = vrot.lane.b32.xlu0 %v2712_v15, %s12125_s16 }
 0x685   : > { %2727 = vrot.lane.b32.xlu1 %v2711_v32, %s12125_s16 }
 0x688   : > { %2756 = vrot.lane.b32.xlu0 %v2439_v7, %s12116_s26  ;;  %v2792_v7 = vmul.f32 %v10134_v48, %v2339_v24 }
 0x689   : > { %2754 = vrot.lane.b32.xlu1 %v2331_v11, %s12116_s26  ;;  %v2796_v11 = vmul.f32 %v10141_v52, %v2453_v13 }
 0x68c   : > { %2762 = vrot.lane.b32.xlu0 %v2443_v14, %s12116_s26  ;;  %v2797_v14 = vmul.f32 %v10132_v56, %v2455_v1 }
 0x68d   : > { %2758 = vrot.lane.b32.xlu1 %v2441_v18, %s12116_s26  ;;  %v2795_v18 = vmul.f32 %v10134_v48, %v2342_v54 }
 0x690   : > { %2764 = vrot.lane.b32.xlu0 %v2445_v30, %s12116_s26  ;;  %v2794_v30 = vmul.f32 %v10132_v56, %v2451_v36 }
 0x691   : > { %2760 = vrot.lane.b32.xlu1 %v2334_v21, %s12116_s26  ;;  %v10157_v21 = vpop.permute.xlu0 %2467 }
 0x692   : > { %12254 = vst [vmem:[#allocation70_spill] sm:$0xff] %v10157_v21  ;;  %v10204_v53 = vsel %vm1633_vm13, %v10157_v21, %v10159_v34  ;;  %v2475_v2 = vmul.f32 %v10157_v21, %v10026_v8  ;;  %v2478_v48 = vmul.f32 %v10157_v21, %v10032_v39 }
 0x693   : > { %12256 = vst [vmem:[#allocation72_spill] sm:$0xff] %v10204_v53  ;;  %v2476_v52 = vmul.f32 %v10204_v53, %v10030_v37  ;;  %v2479_v8 = vmul.f32 %v10204_v53, %v10036_v38 }
 0x694   : > { %2806 = vrot.lane.b32.xlu0 %v2793_v60, %s12110_s22 }
 0x695   : > { %2804 = vrot.lane.b32.xlu1 %v2792_v7, %s12110_s22  ;;  %v10161_v44 = vpop.permute.xlu0 %2837 }
 0x698   : > { %2812 = vrot.lane.b32.xlu0 %v2796_v11, %s12110_s22 }
 0x699   : > { %2810 = vrot.lane.b32.xlu1 %v2795_v18, %s12110_s22 }
 0x69c   : > { %2814 = vrot.lane.b32.xlu0 %v2797_v14, %s12110_s22 }
 0x69d   : > { %2808 = vrot.lane.b32.xlu1 %v2794_v30, %s12110_s22 }
 0x6b6   : > { %v2488_v4 = vpop.permute.xlu0 %2487 }
 0x6b7   : > { %v2490_v24 = vpop.permute.xlu1 %2489 }
 0x6b8   : > { %v2499_v42 = vsel %vm1483_vm7, %v2488_v4, %v2490_v24  ;;  %v2480_v4 = vmul.f32 %v10159_v34, %v10034_v43 }
 0x6b9   : > { %v2509_v22 = vadd.f32 %v2499_v42, %v2475_v2 }
 0x6ba   : > { %v10165_v0 = vpop.permute.xlu0 %2491 }
 0x6bb   : > { %v2494_v13 = vpop.permute.xlu1 %2493  ;;  %v2500_v3 = vsel %vm1483_vm7, %v2490_v24, %v10165_v0 }
 0x6bc   : > { %v2510_v37 = vadd.f32 %v2500_v3, %v2476_v52 }
 0x6be   : > { %v2496_v1 = vpop.permute.xlu0 %2495 }
 0x6bf   : > { %v10167_v25 = vpop.permute.xlu1 %2497  ;;  %v2501_v35 = vsel %vm1483_vm7, %v2494_v13, %v2496_v1 }
 0x6c0   : > { %v2502_v43 = vsel %vm1483_vm7, %v2496_v1, %v10167_v25  ;;  %v2512_v42 = vadd.f32 %v2501_v35, %v2478_v48  ;;  %v2514_v48 = vadd.f32 %v10167_v25, %v2480_v4 }
 0x6c2   : > { %v2546_v36 = vpop.permute.xlu0 %2545 }
 0x6c3   : > { %v2548_v54 = vpop.permute.xlu1 %2547 }
 0x6c4   : > { %v2558_v61 = vsel %vm12144_vm5, %v2546_v36, %v2548_v54 }
 0x6c5   : > { %v2568_v36 = vadd.f32 %v2558_v61, %v2509_v22  ;;  %v2511_v61 = vadd.f32 %v10165_v0, %v2477_v6  ;;  %v2513_v22 = vadd.f32 %v2502_v43, %v2479_v8 }
 0x6c6   : > { %v10169_v5 = vpop.permute.xlu0 %2549 }
 0x6c7   : > { %v2552_v15 = vpop.permute.xlu1 %2551  ;;  %v2559_v24 = vsel %vm12144_vm5, %v2548_v54, %v10169_v5 }
 0x6c8   : > { %v2569_v13 = vadd.f32 %v2559_v24, %v2510_v37 }
 0x6ca   : > { %v2554_v32 = vpop.permute.xlu0 %2553 }
 0x6cb   : > { %v10171_v60 = vpop.permute.xlu1 %2555  ;;  %v2560_v38 = vsel %vm12144_vm5, %v2552_v15, %v2554_v32 }
 0x6cc   : > { %v2561_v3 = vsel %vm12144_vm5, %v2554_v32, %v10171_v60  ;;  %v2571_v15 = vadd.f32 %v2560_v38, %v2512_v42  ;;  %v2570_v32 = vadd.f32 %v10169_v5, %v2511_v61  ;;  %v2573_v6 = vadd.f32 %v10171_v60, %v2514_v48 }
 0x6ce   : > { %v2595_v7 = vpop.permute.xlu0 %2594 }
 0x6cf   : > { %v2597_v11 = vpop.permute.xlu1 %2596 }
 0x6d0   : > { %v2606_v29 = vsel %vm1585_vm11, %v2595_v7, %v2597_v11 }
 0x6d1   : > { %v2616_v52 = vadd.f32 %v2606_v29, %v2568_v36 }
 0x6d2   : > { %v10173_v18 = vpop.permute.xlu0 %2598 }
 0x6d3   : > { %v2601_v14 = vpop.permute.xlu1 %2600  ;;  %v2607_v2 = vsel %vm1585_vm11, %v2597_v11, %v10173_v18 }
 0x6d4   : > { %v2617_v34 = vadd.f32 %v2607_v2, %v2569_v13 }
 0x6d6   : > { %v2603_v30 = vpop.permute.xlu0 %2602 }
 0x6d7   : > { %v10175_v17 = vpop.permute.xlu1 %2604  ;;  %v2608_v54 = vsel %vm1585_vm11, %v2601_v14, %v2603_v30  ;;  %v2572_v14 = vadd.f32 %v2561_v3, %v2513_v22 }
 0x6d8   : > { %v2609_v35 = vsel %vm1585_vm11, %v2603_v30, %v10175_v17  ;;  %v2619_v37 = vadd.f32 %v2608_v54, %v2571_v15  ;;  %v2618_v30 = vadd.f32 %v10173_v18, %v2570_v32 }
 0x6d9   : > { %v2620_v4 = vadd.f32 %v2609_v35, %v2572_v14 }
 0x6da   : > { %v2627_v50 = vpop.permute.xlu0 %2626 }
 0x6db   : > { %v10177_v16 = vpop.permute.xlu1 %2628  ;;  %v2642_v24 = vadd.f32 %v2627_v50, %v2616_v52 }
 0x6dc   : > { %v2634_v7 = vsel %vm1633_vm13, %v2627_v50, %v10177_v16  ;;  %v2644_v42 = vadd.f32 %v10177_v16, %v2618_v30 }
 0x6dd   : > { %v2643_v36 = vadd.f32 %v2634_v7, %v2617_v34  ;;  %v2621_v34 = vadd.f32 %v10175_v17, %v2573_v6 }
 0x6de   : > { %v10179_v51 = vpop.permute.xlu0 %2630 }
 0x6df   : > { %v10181_v45 = vpop.permute.xlu1 %2632  ;;  %v2645_v5 = vadd.f32 %v10179_v51, %v2619_v37 }
 0x6e0   : > { %v2635_v0 = vsel %vm1633_vm13, %v10179_v51, %v10181_v45  ;;  %v2647_v51 = vadd.f32 %v10181_v45, %v2621_v34 }
 0x6e1   : > { %v2646_v13 = vadd.f32 %v2635_v0, %v2620_v4  ;;  %v12078_v0 = vmov 0.0  }
 0x6e2   : > { %v2670_v47 = vpop.permute.xlu0 %2669  ;;  %8933 = vmatprep.subr.bf16.mxu1 %v12078_v0  ;;  %8935 = vmatprep.mubr.msk.bf16.mxu1 %vm12076_vm10, %v12078_v0 }
 0x6e3   : > { %v10183_v40 = vpop.permute.xlu1 %2671  ;;  %v2692_v8 = vadd.f32 %v2670_v47, %v2642_v24 }
 0x6e4   : > { %v2682_v29 = vsel %vm12105_vm1, %v2670_v47, %v10183_v40 }
 0x6e5   : > { %v2693_v43 = vadd.f32 %v2682_v29, %v2643_v36 }
 0x6e6   : > { %v10185_v12 = vpop.permute.xlu0 %2673 }
 0x6e7   : > { %v10187_v26 = vpop.permute.xlu1 %2677  ;;  %v2683_v16 = vsel %vm12105_vm1, %v10183_v40, %v10185_v12 }
 0x6e8   : > { %v2694_v24 = vadd.f32 %v2683_v16, %v2644_v42  ;;  %v10321_v16 = vmul.f32 0.0, %v10132_v56 }
 0x6ea   : > { %v10189_v23 = vpop.permute.xlu0 %2675  ;;  %12259 = vst [vmem:[#allocation75_spill] sm:$0xff] %v10321_v16 }
 0x6eb   : > { %v10191_v59 = vpop.permute.xlu1 %2679  ;;  %v2684_v60 = vsel %vm12105_vm1, %v10189_v23, %v10187_v26  ;;  %v2695_v18 = vadd.f32 %v10189_v23, %v2645_v5 }
 0x6ec   : > { %v2685_v17 = vsel %vm12105_vm1, %v10187_v26, %v10191_v59  ;;  %v2696_v7 = vadd.f32 %v2684_v60, %v2646_v13 }
 0x6ee   : > { %v10193_v9 = vpop.permute.xlu0 %2719 }
 0x6ef   : > { %v10195_v10 = vpop.permute.xlu1 %2721  ;;  %v2742_v47 = vadd.f32 %v10193_v9, %v2692_v8 }
 0x6f0   : > { %v2732_v25 = vsel %vm12137_vm4, %v10193_v9, %v10195_v10 }
 0x6f1   : > { %v2743_v3 = vadd.f32 %v2732_v25, %v2693_v43 }
 0x6f2   : > { %v10197_v57 = vpop.permute.xlu0 %2725 }
 0x6f3   : > { %v10199_v41 = vpop.permute.xlu1 %2723  ;;  %v2745_v23 = vadd.f32 %v10197_v57, %v2695_v18 }
 0x6f4   : > { %v2733_v12 = vsel %vm12137_vm4, %v10195_v10, %v10199_v41 }
 0x6f5   : > { %v2744_v8 = vadd.f32 %v2733_v12, %v2694_v24  ;;  %v9266_v24 = vld [vmem:[%s12215_s19 + $0x28] sm:$0xff]   ;;  %v9267_v12 = vld [vmem:[%s12215_s19 + $0x30] sm:$0xff]  }
 0x6f6   : > { %v10206_v33 = vpop.permute.xlu0 %2729 }
 0x6f7   : > { %v10209_v46 = vpop.permute.xlu1 %2727 }
 0x6f8   : > { %v2734_v52 = vsel %vm12137_vm4, %v10197_v57, %v10209_v46  ;;  %v2735_v45 = vsel %vm12137_vm4, %v10209_v46, %v10206_v33 }
 0x6f9   : > { %v2746_v48 = vadd.f32 %v2734_v52, %v2696_v7 }
 0x6fa   : > { %v10229_v28 = vpop.permute.xlu0 %2756 }
 0x6fb   : > { %v2755_v39 = vpop.permute.xlu1 %2754 }
 0x6fc   : > { %v2767_v2 = vsel %vm12106_vm0, %v2755_v39, %v10229_v28  ;;  %v2777_v9 = vadd.f32 %v2755_v39, %v2742_v47  ;;  %v2697_v39 = vadd.f32 %v2685_v17, %v2647_v51 }
 0x6fd   : > { %v2778_v61 = vadd.f32 %v2767_v2, %v2743_v3 }
 0x6fe   : > { %v2763_v1 = vpop.permute.xlu0 %2762  ;;  %v2747_v29 = vadd.f32 %v2735_v45, %v2697_v39  ;;  %v12260_v45 = vmov 0   ;;  %v9263_v39 = vld [vmem:[%s12215_s19 + $0x10] sm:$0xff]  }
 0x6ff   : > { %v2759_v11 = vpop.permute.xlu1 %2758 }
 0x700   : > { %v2768_v46 = vsel %vm12106_vm0, %v10229_v28, %v2759_v11 }
 0x701   : > { %v2779_v28 = vadd.f32 %v2768_v46, %v2744_v8 }
 0x702   : > { %v2765_v50 = vpop.permute.xlu0 %2764 }
 0x703   : > { %v2761_v38 = vpop.permute.xlu1 %2760  ;;  %v2770_v32 = vsel %vm12106_vm0, %v2763_v1, %v2765_v50 }
 0x704   : > { %v2769_v59 = vsel %vm12106_vm0, %v2761_v38, %v2763_v1  ;;  %v2780_v57 = vadd.f32 %v2761_v38, %v2745_v23  ;;  %v2782_v25 = vadd.f32 %v2770_v32, %v2747_v29 }
 0x705   : > { %v2781_v14 = vadd.f32 %v2769_v59, %v2746_v48  ;;  %v9264_v48 = vld [vmem:[%s12215_s19 + $0x18] sm:$0xff]  }
 0x706   : > { %v2807_v54 = vpop.permute.xlu0 %2806 }
 0x707   : > { %v2805_v22 = vpop.permute.xlu1 %2804 }
 0x708   : > { %v2817_v26 = vsel %vm12107_vm12, %v2805_v22, %v2807_v54  ;;  %v2827_v15 = vadd.f32 %v2805_v22, %v2777_v9  ;;  %v10304_v9 = vmul.f32 0.0, %v10086_v27  ;;  %v9261_v22 = vld [vmem:[%s12215_s19] sm:$0xff]  }
 0x709   : > { %v2828_v35 = vadd.f32 %v2817_v26, %v2778_v61 }
 0x70a   : > { %v2813_v40 = vpop.permute.xlu0 %2812  ;;  %v2845_v37 = vadd.f32 %v10161_v44, %v2827_v15  ;;  %12257 = vst [vmem:[#allocation73_spill] sm:$0xff] %v10304_v9  ;;  %v9262_v15 = vld [vmem:[%s12215_s19 + $0x8] sm:$0xff]  }
 0x70b   : > { %v2811_v33 = vpop.permute.xlu1 %2810  ;;  %v2846_v41 = vadd.f32 %v10161_v44, %v2828_v35  ;;  %v9265_v35 = vld [vmem:[%s12215_s19 + $0x20] sm:$0xff]  }
 0x70c   : > { %v2819_v36 = vsel %vm12107_vm12, %v2811_v33, %v2813_v40  ;;  %v2830_v6 = vadd.f32 %v2811_v33, %v2780_v57  ;;  %v2851_v5 = vmax.f32 %v2845_v37, 0.0  ;;  %v9268_v57 = vld [vmem:[%s12215_s19 + $0x38] sm:$0xff]  }
 0x70d   : > { %v2831_v10 = vadd.f32 %v2819_v36, %v2781_v14  ;;  %v2852_v60 = vmax.f32 %v2846_v41, 0.0 }
 0x70e   : > { %v2848_v1 = vadd.f32 %v10163_v55, %v2830_v6  ;;  %v2815_v50 = vpop.permute.xlu0 %2814 }
 0x70f   : > { %v2849_v11 = vadd.f32 %v10163_v55, %v2831_v10  ;;  %v2820_v30 = vsel %vm12107_vm12, %v2813_v40, %v2815_v50  ;;  %v2809_v4 = vpop.permute.xlu1 %2808  ;;  %v9269_v40 = vld [vmem:[%s12215_s19 + $0x40] sm:$0xff]   ;;  %s12450_s19 = smov 34  }
 0x710   : > { %v2854_v43 = vmax.f32 %v2848_v1, 0.0  ;;  %v2832_v38 = vadd.f32 %v2820_v30, %v2782_v25  ;;  %v2818_v34 = vsel %vm12107_vm12, %v2807_v54, %v2809_v4  ;;  %v3498_v54 = vld [vmem:[%s9508_s24 + $0x8] sm:$0xff] }
 0x711   : > { %v2855_v47 = vmax.f32 %v2849_v11, 0.0  ;;  %v2829_v2 = vadd.f32 %v2818_v34, %v2779_v28 }
 0x712   : > { %v2850_v42 = vadd.f32 %v10163_v55, %v2832_v38  ;;  %v2857_v13 = vpack.c.bf16 %v2854_v43, %v2851_v5  ;;  %v3497_v55 = vld [vmem:[%s9508_s24] sm:$0xff] }
 0x713   : > { %v2847_v18 = vadd.f32 %v10161_v44, %v2829_v2  ;;  %v2858_v3 = vpack.c.bf16 %v2855_v47, %v2852_v60  ;;  %v10310_v44 = vmul.f32 0.0, %v10102_v49 }
 0x714   : > { %v2856_v51 = vmax.f32 %v2850_v42, 0.0  ;;  %2863 = vrot.lane.b32.xlu1 %v2857_v13, %s12108_s18 }
 0x715   : > { %v2853_v17 = vmax.f32 %v2847_v18, 0.0  ;;  %2865 = vrot.lane.b32.xlu0 %v2858_v3, %s12108_s18  ;;  %12258 = vst [vmem:[#allocation74_spill] sm:$0xff] %v10310_v44 }
 0x717   : > { %v2859_v52 = vpack.c.bf16 %v2856_v51, %v2853_v17 }
 0x719   : > { %3359 = vrot.lane.b32.xlu0 %v10304_v9, %s12127_s10  ;;  %2867 = vrot.lane.b32.xlu1 %v2859_v52, %s12108_s18 }
 0x71d   : > { %3399 = vrot.lane.b32.xlu0 %v10310_v44, %s12125_s16  ;;  %3365 = vrot.lane.b32.xlu1 %v10304_v9, %s12127_s10 }
 0x721   : > { %3501 = vperm.xlu0 %9221, %v3497_v55   ;;  %3405 = vrot.lane.b32.xlu1 %v10310_v44, %s12125_s16 }
 0x725   : > { %3506 = vperm.xlu1 %9220, %v3498_v54   ;;  %9223 = vrot.lane.b32.xlu0 %v12078_v0, %s12116_s26 }
 0x729   : > { %3473 = vrot.lane.b32.xlu1 %v10321_v16, %s12110_s22 }
 0x786   : > { %v2864_v7 = vpop.permute.xlu1 %2863 }
 0x787   : > { %v2866_v23 = vpop.permute.xlu0 %2865 }
 0x788   : > { %v2870_v61 = vsel %vm12115_vm2, %v2864_v7, %v2866_v23 }
 0x789   : > { %2971 = vmatprep.subr.bf16.mxu0 %v2870_v61 }
 0x78a   : > { %2972 = vmatpush1.bf16.msra.mxu0 %v12260_v45 }
 0x78b   : > { %v2868_v59 = vpop.permute.xlu1 %2867 }
 0x78c   : > { %v2871_v26 = vsel %vm12115_vm2, %v2866_v23, %v2868_v59 }
 0x78d   : > { %8620 = vmatmul.mubr.msk.bf16.vlgmr.msra.gmra.mrb[76].mxu0 %vm12124_vm15, %v9261_v22  ;;  %8934 = vmatpush3.bf16.msra.mxu1 %v2871_v26 }
 0x78e   : > { %3013 = vmatprep.mubr.bf16.mxu0 %v12260_v45  ;;  %8971 = vmatprep.subr.bf16.mxu1 %v12078_v0 }
 0x790   : > { %8936 = vmatmul.mubr.msk.bf16.vlgmr.msra.gmra.mrb[76].mxu1 %vm12124_vm15, %v9261_v22 }
 0x791   : > { %8939 = vmatprep.mubr.msk.bf16.mxu1 %vm12076_vm10, %v12078_v0 }
 0x795   : > { %8621 = vmatmul.mubr.msk.bf16.gmra.mrb[80].mxu0 %vm12124_vm15, %v9262_v15 }
 0x796   : > { %3023 = vmatprep.mubr.bf16.mxu0 %v12260_v45 }
 0x798   : > { %8940 = vmatmul.mubr.msk.bf16.gmra.mrb[80].mxu1 %vm12124_vm15, %v9262_v15 }
 0x799   : > { %8943 = vmatprep.mubr.msk.bf16.mxu1 %vm12076_vm10, %v12078_v0 }
 0x79d   : > { %8622 = vmatmul.mubr.msk.bf16.gmra.mrb[84].mxu0 %vm12124_vm15, %v9263_v39 }
 0x79e   : > { %3033 = vmatprep.mubr.bf16.mxu0 %v12260_v45 }
 0x7a0   : > { %8944 = vmatmul.mubr.msk.bf16.gmra.mrb[84].mxu1 %vm12124_vm15, %v9263_v39 }
 0x7a1   : > { %8947 = vmatprep.mubr.msk.bf16.mxu1 %vm12076_vm10, %v12078_v0 }
 0x7a5   : > { %8623 = vmatmul.mubr.msk.bf16.gmra.mrb[88].mxu0 %vm12124_vm15, %v9264_v48 }
 0x7a6   : > { %3043 = vmatprep.mubr.bf16.mxu0 %v12260_v45 }
 0x7a8   : > { %8948 = vmatmul.mubr.msk.bf16.gmra.mrb[88].mxu1 %vm12124_vm15, %v9264_v48 }
 0x7a9   : > { %8951 = vmatprep.mubr.msk.bf16.mxu1 %vm12076_vm10, %v12078_v0 }
 0x7ad   : > { %8624 = vmatmul.mubr.msk.bf16.gmra.mrb[92].mxu0 %vm12124_vm15, %v9265_v35 }
 0x7ae   : > { %3051 = vmatprep.mubr.bf16.mxu0 %v12260_v45 }
 0x7b0   : > { %8952 = vmatmul.mubr.msk.bf16.gmra.mrb[92].mxu1 %vm12124_vm15, %v9265_v35 }
 0x7b1   : > { %8955 = vmatprep.mubr.msk.bf16.mxu1 %vm12076_vm10, %v12078_v0 }
 0x7b5   : > { %8625 = vmatmul.mubr.msk.bf16.gmra.mrb[96].mxu0 %vm12124_vm15, %v9266_v24 }
 0x7b6   : > { %3059 = vmatprep.mubr.bf16.mxu0 %v12260_v45 }
 0x7b8   : > { %8956 = vmatmul.mubr.msk.bf16.gmra.mrb[96].mxu1 %vm12124_vm15, %v9266_v24 }
 0x7b9   : > { %8959 = vmatprep.mubr.msk.bf16.mxu1 %vm12076_vm10, %v12078_v0 }
 0x7bd   : > { %8626 = vmatmul.mubr.msk.bf16.gmra.mrb[100].mxu0 %vm12124_vm15, %v9267_v12 }
 0x7be   : > { %3067 = vmatprep.mubr.bf16.mxu0 %v12260_v45 }
 0x7c0   : > { %8960 = vmatmul.mubr.msk.bf16.gmra.mrb[100].mxu1 %vm12124_vm15, %v9267_v12 }
 0x7c1   : > { %8963 = vmatprep.mubr.msk.bf16.mxu1 %vm12076_vm10, %v12078_v0 }
 0x7c5   : > { %8627 = vmatmul.mubr.msk.bf16.gmra.mrb[104].mxu0 %vm12124_vm15, %v9268_v57 }
 0x7c6   : > { %3075 = vmatprep.mubr.bf16.mxu0 %v12260_v45 }
 0x7c8   : > { %8964 = vmatmul.mubr.msk.bf16.gmra.mrb[104].mxu1 %vm12124_vm15, %v9268_v57 }
 0x7c9   : > { %8967 = vmatprep.mubr.msk.bf16.mxu1 %vm12076_vm10, %v12078_v0 }
 0x7cd   : > { %8628 = vmatmul.mubr.msk.bf16.gmra.mrb[108].mxu0 %vm12124_vm15, %v9269_v40 }
 0x7ce   : > { %3756 = vmatprep.mubr.bf16.mxu0 %v12260_v45 }
 0x7d0   : > { %8968 = vmatmul.mubr.msk.bf16.gmra.mrb[108].mxu1 %vm12124_vm15, %v9269_v40 }
 0x7d1   : > { %8973 = vmatprep.mubr.msk.bf16.mxu1 %vm12076_vm10, %v12078_v0 }
 0x860   : > { %v10385_v29 = vpop.f32.mrb[76].mxu0 }
 0x861   : > { %v10387_v32 = vpop.f32.mrb[77].mxu0  ;;  %v3197_v9 = vmul.f32 %v10385_v29, %v10157_v21  ;;  %v12267_v29 = vld [vmem:[#allocation71_spill] sm:$0xff] }
 0x862   : > { %v10389_v14 = vpop.f32.mrb[78].mxu0  ;;  %v3198_v49 = vmul.f32 %v10387_v32, %v10204_v53 }
 0x863   : > { %v10391_v33 = vpop.f32.mrb[79].mxu0  ;;  %v10393_v46 = vpop.f32.mrb[76].mxu1 }
 0x864   : > { %v8937_v37 = vpop.f32.mrb[77].mxu1  ;;  %v3199_v56 = vmul.f32 %v10393_v46, %v12267_v29 }
 0x865   : > { %v10395_v36 = vpop.f32.mrb[78].mxu1 }
 0x866   : > { %v8938_v6 = vpop.f32.mrb[79].mxu1  ;;  %v3202_v32 = vmul.f32 %v10395_v36, %v12267_v29 }
 0x868   : > { %v3015_v8 = vpop.f32.mrb[80].mxu0 }
 0x869   : > { %v3017_v41 = vpop.f32.mrb[81].mxu0 }
 0x86a   : > { %3211 = vrot.lane.b32.xlu1 %v3017_v41, %s12142_s23  ;;  %v3019_v10 = vpop.f32.mrb[82].mxu0 }
 0x86b   : > { %v3126_v25 = vpop.f32.mrb[80].mxu1  ;;  %v3021_v1 = vpop.f32.mrb[83].mxu0 }
 0x86c   : > { %3213 = vrot.lane.b32.xlu0 %v3126_v25, %s12142_s23  ;;  %v8941_v50 = vpop.f32.mrb[81].mxu1 }
 0x86d   : > { %v3129_v28 = vpop.f32.mrb[82].mxu1 }
 0x86e   : > { %v8942_v11 = vpop.f32.mrb[83].mxu1  ;;  %3219 = vrot.lane.b32.xlu1 %v3129_v28, %s12142_s23 }
 0x870   : > { %3209 = vrot.lane.b32.xlu0 %v3015_v8, %s12142_s23  ;;  %v3025_v30 = vpop.f32.mrb[84].mxu0 }
 0x871   : > { %v3027_v4 = vpop.f32.mrb[85].mxu0  ;;  %v3237_v51 = vmul.f32 %v3025_v30, %v10043_v63 }
 0x872   : > { %3215 = vrot.lane.b32.xlu1 %v3019_v10, %s12142_s23  ;;  %v3029_v5 = vpop.f32.mrb[86].mxu0  ;;  %v3238_v34 = vmul.f32 %v3027_v4, %v10048_v58 }
 0x873   : > { %v3031_v43 = vpop.f32.mrb[87].mxu0  ;;  %v3134_v38 = vpop.f32.mrb[84].mxu1  ;;  %v3240_v54 = vmul.f32 %v3029_v5, %v10043_v63 }
 0x874   : > { %v8945_v60 = vpop.f32.mrb[85].mxu1  ;;  %3217 = vrot.lane.b32.xlu0 %v3021_v1, %s12142_s23  ;;  %v3239_v2 = vmul.f32 %v3134_v38, %v10041_v62  ;;  %v3241_v61 = vmul.f32 %v3031_v43, %v10048_v58 }
 0x875   : > { %v3137_v47 = vpop.f32.mrb[86].mxu1 }
 0x876   : > { %v8946_v42 = vpop.f32.mrb[87].mxu1  ;;  %3251 = vrot.lane.b32.xlu1 %v3238_v34, %s12135_s2  ;;  %v3242_v13 = vmul.f32 %v3137_v47, %v10041_v62  ;;  %v12261_v47 = vld [vmem:[#allocation63_spill] sm:$0xff] }
 0x878   : > { %3253 = vrot.lane.b32.xlu0 %v3239_v2, %s12135_s2  ;;  %v3035_v18 = vpop.f32.mrb[88].mxu0 }
 0x879   : > { %v3037_v3 = vpop.f32.mrb[89].mxu0  ;;  %v3277_v37 = vmul.f32 %v3035_v18, %v10058_v20  ;;  %v12262_v18 = vld [vmem:[#allocation62_spill] sm:$0xff] }
 0x87a   : > { %3259 = vrot.lane.b32.xlu1 %v3242_v13, %s12135_s2  ;;  %v3039_v17 = vpop.f32.mrb[90].mxu0  ;;  %v3278_v59 = vmul.f32 %v3037_v3, %v10068_v31 }
 0x87b   : > { %v3041_v52 = vpop.f32.mrb[91].mxu0  ;;  %v3142_v55 = vpop.f32.mrb[88].mxu1  ;;  %v3280_v8 = vmul.f32 %v3039_v17, %v10058_v20 }
 0x87c   : > { %v8949_v7 = vpop.f32.mrb[89].mxu1  ;;  %3249 = vrot.lane.b32.xlu0 %v3237_v51, %s12135_s2  ;;  %v3279_v39 = vmul.f32 %v3142_v55, %v10056_v19  ;;  %v3281_v25 = vmul.f32 %v3041_v52, %v10068_v31 }
 0x87d   : > { %v3145_v23 = vpop.f32.mrb[90].mxu1 }
 0x87e   : > { %3255 = vrot.lane.b32.xlu1 %v3240_v54, %s12135_s2  ;;  %v8950_v22 = vpop.f32.mrb[91].mxu1  ;;  %v3282_v12 = vmul.f32 %v3145_v23, %v10056_v19 }
 0x87f   : > { %v12263_v22 = vld [vmem:[#allocation66_spill] sm:$0xff] }
 0x880   : > { %3257 = vrot.lane.b32.xlu0 %v3241_v61, %s12135_s2  ;;  %v3045_v26 = vpop.f32.mrb[92].mxu0  ;;  %s12326_s2 = sld [smem:[#allocation21_spill]] }
 0x881   : > { %v3046_v15 = vpop.f32.mrb[93].mxu0 }
 0x882   : > { %3291 = vrot.lane.b32.xlu1 %v3278_v59, %s12140_s7  ;;  %v3048_v48 = vpop.f32.mrb[94].mxu0 }
 0x883   : > { %v3049_v35 = vpop.f32.mrb[95].mxu0  ;;  %v3150_v24 = vpop.f32.mrb[92].mxu1 }
 0x884   : > { %3293 = vrot.lane.b32.xlu0 %v3279_v39, %s12140_s7  ;;  %v8953_v57 = vpop.f32.mrb[93].mxu1  ;;  %v12264_v39 = vld [vmem:[#allocation65_spill] sm:$0xff] }
 0x885   : > { %v3153_v40 = vpop.f32.mrb[94].mxu1 }
 0x886   : > { %3299 = vrot.lane.b32.xlu1 %v3282_v12, %s12140_s7  ;;  %v8954_v6 = vpop.f32.mrb[95].mxu1 }
 0x888   : > { %3289 = vrot.lane.b32.xlu0 %v3277_v37, %s12140_s7  ;;  %v3053_v41 = vpop.f32.mrb[96].mxu0 }
 0x889   : > { %v3054_v10 = vpop.f32.mrb[97].mxu0 }
 0x88a   : > { %3295 = vrot.lane.b32.xlu1 %v3280_v8, %s12140_s7  ;;  %v3056_v1 = vpop.f32.mrb[98].mxu0  ;;  %v3343_v3 = vmul.f32 %v3054_v10, %v12262_v18 }
 0x88b   : > { %v3057_v50 = vpop.f32.mrb[99].mxu0  ;;  %v3158_v28 = vpop.f32.mrb[96].mxu1  ;;  %v12265_v1 = vld [vmem:[#allocation68_spill] sm:$0xff] }
 0x88c   : > { %v8957_v11 = vpop.f32.mrb[97].mxu1  ;;  %3297 = vrot.lane.b32.xlu0 %v3281_v25, %s12140_s7  ;;  %v3344_v2 = vmul.f32 %v3158_v28, %v12261_v47  ;;  %v3346_v17 = vmul.f32 %v3057_v50, %v12262_v18  ;;  %v12266_v28 = vld [vmem:[#allocation69_spill] sm:$0xff] }
 0x88d   : > { %v3162_v30 = vpop.f32.mrb[98].mxu1 }
 0x88e   : > { %3323 = vrot.lane.b32.xlu1 %v3150_v24, %s12138_s15  ;;  %v8958_v4 = vpop.f32.mrb[99].mxu1  ;;  %v3347_v54 = vmul.f32 %v3162_v30, %v12261_v47 }
 0x890   : > { %3321 = vrot.lane.b32.xlu0 %v3046_v15, %s12138_s15  ;;  %v3061_v5 = vpop.f32.mrb[100].mxu0 }
 0x891   : > { %v3062_v43 = vpop.f32.mrb[101].mxu0  ;;  %v10461_v5 = vpop.permute.xlu1 %3365 }
 0x892   : > { %3327 = vrot.lane.b32.xlu1 %v3153_v40, %s12138_s15  ;;  %v3064_v38 = vpop.f32.mrb[102].mxu0  ;;  %v3383_v48 = vmul.f32 %v3062_v43, %v12264_v39  ;;  %v10463_v43 = vpop.permute.xlu0 %3359 }
 0x893   : > { %v3065_v34 = vpop.f32.mrb[103].mxu0  ;;  %v3168_v60 = vpop.f32.mrb[100].mxu1 }
 0x894   : > { %v8961_v42 = vpop.f32.mrb[101].mxu1  ;;  %3325 = vrot.lane.b32.xlu0 %v3049_v35, %s12138_s15  ;;  %v3384_v59 = vmul.f32 %v3168_v60, %v12263_v22  ;;  %v3386_v24 = vmul.f32 %v3065_v34, %v12264_v39 }
 0x895   : > { %v3172_v13 = vpop.f32.mrb[102].mxu1  ;;  %v10465_v38 = vpop.permute.xlu1 %3405 }
 0x896   : > { %3357 = vrot.lane.b32.xlu1 %v3344_v2, %s12127_s10  ;;  %v8962_v51 = vpop.f32.mrb[103].mxu1  ;;  %v3387_v40 = vmul.f32 %v3172_v13, %v12263_v22  ;;  %v10467_v34 = vpop.permute.xlu0 %3399 }
 0x898   : > { %3355 = vrot.lane.b32.xlu0 %v3343_v3, %s12127_s10  ;;  %v3069_v52 = vpop.f32.mrb[104].mxu0 }
 0x899   : > { %v3070_v55 = vpop.f32.mrb[105].mxu0  ;;  %v10469_v60 = vpop.permute.xlu1 %3506 }
 0x89a   : > { %3361 = vrot.lane.b32.xlu1 %v3346_v17, %s12127_s10  ;;  %v3072_v7 = vpop.f32.mrb[106].mxu0  ;;  %v10471_v2 = vpop.permute.xlu0 %3501 }
 0x89b   : > { %v3073_v23 = vpop.f32.mrb[107].mxu0  ;;  %v3178_v61 = vpop.f32.mrb[104].mxu1 }
 0x89c   : > { %3363 = vrot.lane.b32.xlu0 %v3347_v54, %s12127_s10  ;;  %v8965_v26 = vpop.f32.mrb[105].mxu1  ;;  %s12314_s10 = smov 95  }
 0x89d   : > { %v3182_v15 = vpop.f32.mrb[106].mxu1  ;;  %v10473_v42 = vpop.permute.xlu1 %3473 }
 0x89e   : > { %3397 = vrot.lane.b32.xlu1 %v3384_v59, %s12125_s16  ;;  %v8966_v35 = vpop.f32.mrb[107].mxu1  ;;  %v10475_v13 = vpop.permute.xlu0 %9223 }
 0x8a0   : > { %3395 = vrot.lane.b32.xlu0 %v3383_v48, %s12125_s16  ;;  %v3077_v12 = vpop.f32.mrb[108].mxu0 }
 0x8a1   : > { %v3078_v57 = vpop.f32.mrb[109].mxu0 }
 0x8a2   : > { %3401 = vrot.lane.b32.xlu1 %v3386_v24, %s12125_s16  ;;  %v3080_v37 = vpop.f32.mrb[110].mxu0  ;;  %v3457_v50 = vmul.f32 %v3078_v57, %v12265_v1 }
 0x8a3   : > { %v3081_v6 = vpop.f32.mrb[111].mxu0  ;;  %v3188_v8 = vpop.f32.mrb[108].mxu1 }
 0x8a4   : > { %v8969_v41 = vpop.f32.mrb[109].mxu1  ;;  %3403 = vrot.lane.b32.xlu0 %v3387_v40, %s12125_s16  ;;  %v3458_v11 = vmul.f32 %v3188_v8, %v12266_v28  ;;  %v3460_v4 = vmul.f32 %v3081_v6, %v12265_v1  ;;  %s12310_s16 = smov 110  }
 0x8a5   : > { %v3192_v10 = vpop.f32.mrb[110].mxu1 }
 0x8a6   : > { %3431 = vrot.lane.b32.xlu1 %v3178_v61, %s12116_s26  ;;  %v8970_v25 = vpop.f32.mrb[111].mxu1  ;;  %v3461_v30 = vmul.f32 %v3192_v10, %v12266_v28 }
 0x8a8   : > { %3429 = vrot.lane.b32.xlu0 %v3070_v55, %s12116_s26 }
 0x8aa   : > { %3435 = vrot.lane.b32.xlu1 %v3073_v23, %s12116_s26 }
 0x8ac   : > { %3437 = vrot.lane.b32.xlu0 %v3182_v15, %s12116_s26  ;;  %s12290_s26 = smov 17  }
 0x8ae   : > { %3469 = vrot.lane.b32.xlu1 %v3457_v50, %s12110_s22 }
 0x8b0   : > { %3471 = vrot.lane.b32.xlu0 %v3458_v11, %s12110_s22  ;;  %v8531_v11 = vld [vmem:[%s9468_s17 + $0x4] ss:$8 sm:$0x3] }
 0x8b1   : > { %vm1140_vm10 = vcmp.gt.f32.partialorder %v8531_v11, 0.5  ;;  %v3200_v11 = vmul.f32 %v10389_v14, %v10157_v21 }
 0x8b2   : > { %3477 = vrot.lane.b32.xlu1 %v3461_v30, %s12110_s22  ;;  %v10501_v1 = vsel %vm1140_vm10, 1, %v12260_v45 }
 0x8b4   : > { %3475 = vrot.lane.b32.xlu0 %v3460_v4, %s12110_s22 }
 0x8b8   : > { %3479 = vrot.lane.b32.xlu0 %v10321_v16, %s12110_s22  ;;  %s12282_s22 = smov 112  }
 0x8dc   : > { %v3212_v3 = vpop.permute.xlu1 %3211 }
 0x8de   : > { %v3214_v51 = vpop.permute.xlu0 %3213 }
 0x8df   : > { %v3222_v28 = vsel %vm1483_vm7, %v3212_v3, %v3214_v51  ;;  %v3233_v46 = vadd.f32 %v3214_v51, %v3199_v56 }
 0x8e0   : > { %v3220_v17 = vpop.permute.xlu1 %3219  ;;  %v3232_v47 = vadd.f32 %v3222_v28, %v3198_v49  ;;  %v12269_v49 = vld [vmem:[#allocation40_spill] sm:$0xff] }
 0x8e1   : > { %v3550_v28 = vrot.slane %v10501_v1, %v12269_v49 }
 0x8e2   : > { %v3210_v52 = vpop.permute.xlu0 %3209 }
 0x8e3   : > { %v3221_v16 = vsel %vm1483_vm7, %v3210_v52, %v3212_v3  ;;  %v3201_v52 = vmul.f32 %v10391_v33, %v10204_v53  ;;  %v12268_v33 = vld [vmem:[#allocation39_spill] sm:$0xff] }
 0x8e4   : > { %v3216_v55 = vpop.permute.xlu1 %3215  ;;  %v3231_v39 = vadd.f32 %v3221_v16, %v3197_v9 }
 0x8e6   : > { %v3218_v54 = vpop.permute.xlu0 %3217 }
 0x8e7   : > { %v3223_v3 = vsel %vm1483_vm7, %v3216_v55, %v3218_v54  ;;  %v3224_v53 = vsel %vm1483_vm7, %v3218_v54, %v3220_v17 }
 0x8e8   : > { %v3252_v7 = vpop.permute.xlu1 %3251  ;;  %v3234_v55 = vadd.f32 %v3223_v3, %v3200_v11  ;;  %v3235_v54 = vadd.f32 %v3224_v53, %v3201_v52 }
 0x8ea   : > { %v3254_v23 = vpop.permute.xlu0 %3253 }
 0x8eb   : > { %v3262_v27 = vsel %vm12144_vm5, %v3252_v7, %v3254_v23  ;;  %v3273_v51 = vadd.f32 %v3254_v23, %v3233_v46 }
 0x8ec   : > { %v10477_v61 = vpop.permute.xlu1 %3259 }
 0x8ee   : > { %v3250_v59 = vpop.permute.xlu0 %3249 }
 0x8ef   : > { %v3261_v0 = vsel %vm12144_vm5, %v3250_v59, %v3252_v7  ;;  %v3272_v7 = vadd.f32 %v3262_v27, %v3232_v47 }
 0x8f0   : > { %v3256_v26 = vpop.permute.xlu1 %3255  ;;  %v3271_v18 = vadd.f32 %v3261_v0, %v3231_v39  ;;  %v3236_v39 = vadd.f32 %v3220_v17, %v3202_v32 }
 0x8f2   : > { %v3258_v15 = vpop.permute.xlu0 %3257 }
 0x8f3   : > { %v3263_v9 = vsel %vm12144_vm5, %v3256_v26, %v3258_v15 }
 0x8f4   : > { %v3292_v48 = vpop.permute.xlu1 %3291  ;;  %v3274_v26 = vadd.f32 %v3263_v9, %v3234_v55 }
 0x8f6   : > { %v10479_v35 = vpop.permute.xlu0 %3293 }
 0x8f7   : > { %v3302_v16 = vsel %vm1585_vm11, %v3292_v48, %v10479_v35  ;;  %v3313_v19 = vadd.f32 %v10479_v35, %v3273_v51 }
 0x8f8   : > { %v10481_v24 = vpop.permute.xlu1 %3299 }
 0x8fa   : > { %v3290_v12 = vpop.permute.xlu0 %3289 }
 0x8fb   : > { %v3301_v14 = vsel %vm1585_vm11, %v3290_v12, %v3292_v48  ;;  %v3264_v12 = vsel %vm12144_vm5, %v3258_v15, %v10477_v61  ;;  %v3312_v48 = vadd.f32 %v3302_v16, %v3272_v7  ;;  %v3276_v15 = vadd.f32 %v10477_v61, %v3236_v39 }
 0x8fc   : > { %v3296_v57 = vpop.permute.xlu1 %3295  ;;  %v3311_v29 = vadd.f32 %v3301_v14, %v3271_v18  ;;  %v3275_v18 = vadd.f32 %v3264_v12, %v3235_v54 }
 0x8fe   : > { %v3298_v40 = vpop.permute.xlu0 %3297 }
 0x8ff   : > { %v3303_v59 = vsel %vm1585_vm11, %v3296_v57, %v3298_v40  ;;  %v3304_v27 = vsel %vm1585_vm11, %v3298_v40, %v10481_v24 }
 0x900   : > { %v10483_v37 = vpop.permute.xlu1 %3323  ;;  %v3314_v3 = vadd.f32 %v3303_v59, %v3274_v26  ;;  %v3315_v52 = vadd.f32 %v3304_v27, %v3275_v18 }
 0x901   : > { %v3339_v32 = vadd.f32 %v10483_v37, %v3313_v19 }
 0x902   : > { %v3322_v6 = vpop.permute.xlu0 %3321 }
 0x903   : > { %v3329_v0 = vsel %vm1633_vm13, %v3322_v6, %v10483_v37  ;;  %v3337_v47 = vadd.f32 %v3322_v6, %v3311_v29 }
 0x904   : > { %v10485_v8 = vpop.permute.xlu1 %3327  ;;  %v3338_v57 = vadd.f32 %v3329_v0, %v3312_v48 }
 0x906   : > { %v3326_v41 = vpop.permute.xlu0 %3325 }
 0x907   : > { %v3330_v53 = vsel %vm1633_vm13, %v3326_v41, %v10485_v8  ;;  %v3340_v40 = vadd.f32 %v3326_v41, %v3314_v3 }
 0x908   : > { %v3358_v10 = vpop.permute.xlu1 %3357  ;;  %v3341_v16 = vadd.f32 %v3330_v53, %v3315_v52 }
 0x909   : > { %v3368_v6 = vsel %vm12105_vm1, %v3358_v10, %v10463_v43 }
 0x90a   : > { %v3356_v25 = vpop.permute.xlu0 %3355  ;;  %v3379_v7 = vadd.f32 %v3368_v6, %v3339_v32 }
 0x90b   : > { %v3367_v11 = vsel %vm12105_vm1, %v3356_v25, %v3358_v10  ;;  %v3377_v17 = vadd.f32 %v3356_v25, %v3337_v47  ;;  %v3316_v25 = vadd.f32 %v10481_v24, %v3276_v15 }
 0x90c   : > { %v10487_v50 = vpop.permute.xlu1 %3361  ;;  %v3378_v29 = vadd.f32 %v3367_v11, %v3338_v57 }
 0x90d   : > { %v3380_v46 = vadd.f32 %v10487_v50, %v3340_v40 }
 0x90e   : > { %v10490_v30 = vpop.permute.xlu0 %3363 }
 0x90f   : > { %v3369_v35 = vsel %vm12105_vm1, %v10487_v50, %v10490_v30  ;;  %v12270_v50 = vunpack.i.l.bf16 %v10475_v13 }
 0x910   : > { %v10492_v4 = vpop.permute.xlu1 %3397  ;;  %v3381_v10 = vadd.f32 %v3369_v35, %v3341_v16 }
 0x911   : > { %v3408_v43 = vsel %vm12137_vm4, %v10492_v4, %v10467_v34 }
 0x912   : > { %v3396_v44 = vpop.permute.xlu0 %3395  ;;  %v3419_v48 = vadd.f32 %v3408_v43, %v3379_v7 }
 0x913   : > { %v3407_v23 = vsel %vm12137_vm4, %v3396_v44, %v10492_v4  ;;  %v3417_v59 = vadd.f32 %v3396_v44, %v3377_v17  ;;  %v3370_v44 = vsel %vm12105_vm1, %v10490_v30, %v10461_v5  ;;  %v3342_v4 = vadd.f32 %v10485_v8, %v3316_v25 }
 0x914   : > { %v3402_v22 = vpop.permute.xlu1 %3401  ;;  %v3418_v41 = vadd.f32 %v3407_v23, %v3378_v29  ;;  %vm10576_vm1 = vcmp.eq.s32.totalorder %v3550_v28, 1 }
 0x915   : > { %v3420_v24 = vadd.f32 %v3402_v22, %v3380_v46  ;;  %v3382_v47 = vadd.f32 %v3370_v44, %v3342_v4 }
 0x916   : > { %v10517_v21 = vpop.permute.xlu0 %3403 }
 0x917   : > { %v3409_v19 = vsel %vm12137_vm4, %v3402_v22, %v10517_v21  ;;  %v3410_v22 = vsel %vm12137_vm4, %v10517_v21, %v10465_v38  ;;  %v12276_v21 = vunpack.i.h.bf16 %v10475_v13 }
 0x918   : > { %v3432_v36 = vpop.permute.xlu1 %3431 }
 0x919   : > { %v3442_v39 = vsel %vm12106_vm0, %v3432_v36, %v12270_v50 }
 0x91a   : > { %v3430_v56 = vpop.permute.xlu0 %3429  ;;  %v3453_v8 = vadd.f32 %v3442_v39, %v3419_v48 }
 0x91b   : > { %v3441_v9 = vsel %vm12106_vm0, %v3430_v56, %v3432_v36  ;;  %v3451_v37 = vadd.f32 %v3430_v56, %v3417_v59  ;;  %v3421_v56 = vadd.f32 %v3409_v19, %v3381_v10  ;;  %v12271_v36 = vrot.slane %v10501_v1, %v12268_v33  ;;  %v12277_v19 = vld [vmem:[#allocation38_spill] sm:$0xff] }
 0x91c   : > { %v3436_v14 = vpop.permute.xlu1 %3435  ;;  %v3452_v12 = vadd.f32 %v3441_v9, %v3418_v41 }
 0x91d   : > { %v3454_v5 = vadd.f32 %v3436_v14, %v3420_v24  ;;  %vm10572_vm10 = vcmp.eq.s32.totalorder %v12271_v36, 1 }
 0x91e   : > { %v3438_v61 = vpop.permute.xlu0 %3437 }
 0x91f   : > { %v3443_v54 = vsel %vm12106_vm0, %v3436_v14, %v3438_v61  ;;  %v3444_v38 = vsel %vm12106_vm0, %v3438_v61, %v12276_v21  ;;  %v3422_v14 = vadd.f32 %v3410_v22, %v3382_v47  ;;  %vm3553_vm0 = vmpackc.low %vm10576_vm1, %vm10572_vm10 }
 0x920   : > { %v3470_v55 = vpop.permute.xlu1 %3469  ;;  %v3455_v11 = vadd.f32 %v3443_v54, %v3421_v56  ;;  %v3554_v16 = vsel %vm3553_vm0, 65537, %v12260_v45 }
 0x921   : > { %v3491_v26 = vadd.f32 %v3470_v55, %v3451_v37  ;;  %v3456_v28 = vadd.f32 %v3444_v38, %v3422_v14  ;;  %v3558_v43 = vrot.slane %v3554_v16, %v12268_v33 }
 0x922   : > { %v3472_v0 = vpop.permute.xlu0 %3471 }
 0x923   : > { %v3481_v34 = vsel %vm12107_vm12, %v3470_v55, %v3472_v0  ;;  %v3482_v30 = vsel %vm12107_vm12, %v3472_v0, %v10473_v42  ;;  %v3509_v42 = vadd.f32 %v10471_v2, %v3491_v26 }
 0x924   : > { %v3492_v51 = vadd.f32 %v3481_v34, %v3452_v12  ;;  %v3478_v15 = vpop.permute.xlu1 %3477  ;;  %v3493_v53 = vadd.f32 %v3482_v30, %v3453_v8 }
 0x925   : > { %v3515_v13 = vmax.f32 %v3509_v42, 0.0 }
 0x926   : > { %v3476_v18 = vpop.permute.xlu0 %3475  ;;  %v3510_v17 = vadd.f32 %v10471_v2, %v3492_v51  ;;  %v3511_v32 = vadd.f32 %v10471_v2, %v3493_v53  ;;  %v3561_v2 = vsub.s32 4, %v12277_v19 }
 0x927   : > { %v3483_v1 = vsel %vm12107_vm12, %v3476_v18, %v3478_v15  ;;  %v3494_v57 = vadd.f32 %v3476_v18, %v3454_v5 }
 0x928   : > { %v3495_v23 = vadd.f32 %v3483_v1, %v3455_v11  ;;  %v3516_v35 = vmax.f32 %v3510_v17, 0.0  ;;  %v3517_v55 = vmax.f32 %v3511_v32, 0.0  ;;  %v3562_v44 = vrot.slane %v3554_v16, %v3561_v2  ;;  %v3671_v32 = vld [vmem:[#allocation5] sm:$0xff] }
 0x929   : > { %v3512_v52 = vadd.f32 %v10469_v60, %v3494_v57  ;;  %v9271_v16 = vld [vmem:[%s12218_s6] sm:$0xff]  }
 0x92a   : > { %v3513_v40 = vadd.f32 %v10469_v60, %v3495_v23  ;;  %v3480_v6 = vpop.permute.xlu0 %3479 }
 0x92b   : > { %v3518_v29 = vmax.f32 %v3512_v52, 0.0  ;;  %v3484_v61 = vsel %vm12107_vm12, %v3478_v15, %v3480_v6 }
 0x92c   : > { %v3519_v59 = vmax.f32 %v3513_v40, 0.0  ;;  %v3496_v9 = vadd.f32 %v3484_v61, %v3456_v28  ;;  %v4238_v61 = vld [vmem:[%s12289_s12] sm:$0xff]  ;;  %s12424_s12 = smov 60  }
 0x92d   : > { %v3521_v25 = vpack.c.bf16 %v3518_v29, %v3515_v13 }
 0x92e   : > { %v3514_v46 = vadd.f32 %v10469_v60, %v3496_v9  ;;  %v3522_v41 = vpack.c.bf16 %v3519_v59, %v3516_v35  ;;  %v8532_v60 = vld [vmem:[%s9468_s17 + $0x5] ss:$8 sm:$0x3] }
 0x92f   : > { %3527 = vrot.lane.b32.xlu1 %v3521_v25, %s12108_s18  ;;  %vm1143_vm0 = vcmp.gt.f32.partialorder %v8532_v60, 0.5  ;;  %v8659_v25 = vcombine.high %v3671_v32, %v3671_v32  ;;  %v9275_v60 = vld [vmem:[%s12218_s6 + $0x8] sm:$0xff]  }
 0x930   : > { %v3520_v7 = vmax.f32 %v3514_v46, 0.0  ;;  %3529 = vrot.lane.b32.xlu0 %v3522_v41, %s12108_s18  ;;  %v3601_v10 = vsel %vm1143_vm0, 1, %v12260_v45  ;;  %v8658_v46 = vcombine.low %v3671_v32, %v3671_v32  ;;  %v3672_v41 = vld [vmem:[#allocation5 + $0x8] sm:$0xff] }
 0x931   : > { %v3605_v24 = vrot.slane %v3601_v10, %v12268_v33  ;;  %v3609_v12 = vrot.slane %v3601_v10, %v12269_v49  ;;  %v12291_v10 = vmov 0.0  }
 0x932   : > { %v3523_v37 = vpack.c.bf16 %v3520_v7, %v3517_v55 }
 0x933   : > { %vm3610_vm1 = vcmp.eq.s32.totalorder %v3605_v24, 1  ;;  %vm3611_vm10 = vcmp.eq.s32.totalorder %v3609_v12, 1  ;;  %v9276_v24 = vld [vmem:[%s12218_s6 + $0x10] sm:$0xff]   ;;  %v9277_v12 = vld [vmem:[%s12218_s6 + $0x18] sm:$0xff]  }
 0x934   : > { %3531 = vrot.lane.b32.xlu1 %v3523_v37, %s12108_s18  ;;  %3563 = vrot.lane.b32.xlu0 %v3558_v43, %s12145_s11  ;;  %vm3612_vm12 = vmpackc.low %vm3611_vm10, %vm3610_vm1  ;;  %s12278_s18 = smov 111   ;;  %v3925_v37 = vsel %vm1671_vm14, %v8658_v46, 0 }
 0x935   : > { %v3613_v34 = vsel %vm3612_vm12, 65537, %v12260_v45 }
 0x936   : > { %v3617_v4 = vrot.slane %v3613_v34, %v12268_v33  ;;  %v3621_v48 = vrot.slane %v3613_v34, %v3561_v2  ;;  %v8660_v2 = vcombine.low %v3672_v41, %v3672_v41  ;;  %v9283_v34 = vld [vmem:[%s9513_s30 + $0x20] ss:$0 sps:$4 sm:$0xff]  }
 0x938   : > { %3565 = vrot.lane.b32.xlu1 %v3562_v44, %s12145_s11 }
 0x9a1   : > { %v3528_v0 = vpop.permute.xlu1 %3527 }
 0x9a2   : > { %v3530_v50 = vpop.permute.xlu0 %3529 }
 0x9a3   : > { %v3533_v39 = vsel %vm12115_vm2, %v3528_v0, %v3530_v50  ;;  %v9278_v0 = vld [vmem:[%s12218_s6 + $0x20] ss:$0 sps:$4 sm:$0xff]   ;;  %s12394_s6 = sld [smem:[#allocation29_spill]] }
 0x9a4   : > { %3573 = vrot.lane.b32.xlu0 %v3533_v39, %s12145_s11 }
 0x9a6   : > { %v3532_v54 = vpop.permute.xlu1 %3531  ;;  %v10619_v56 = vpop.permute.xlu0 %3563 }
 0x9a7   : > { %v3534_v26 = vsel %vm12115_vm2, %v3530_v50, %v3532_v54  ;;  %12279 = vst [vmem:[#allocation76_spill] sm:$0xff] %v10619_v56  ;;  %vm12114_vm0 = vcmp.ne.s16.totalorder %v10619_v56, 0  ;;  %v9279_v50 = vld [vmem:[%s9513_s30] sm:$0xff]   ;;  %v9281_v54 = vld [vmem:[%s9513_s30 + $0x10] sm:$0xff]  }
 0x9a8   : > { %3584 = vrot.lane.b32.xlu0 %v3558_v43, %s12278_s18  ;;  %3575 = vrot.lane.b32.xlu1 %v3534_v26, %s12145_s11  ;;  %v8661_v43 = vcombine.high %v3672_v41, %v3672_v41 }
 0x9aa   : > { %v10622_v51 = vpop.permute.xlu1 %3565 }
 0x9ab   : > { %12280 = vst [vmem:[#allocation77_spill] sm:$0xff] %v10622_v51  ;;  %v10629_v30 = vsel %vm1444_vm3, %v10619_v56, %v10622_v51  ;;  %vm12113_vm12 = vcmp.ne.s16.totalorder %v10622_v51, 0 }
 0x9ac   : > { %3594 = vrot.lane.b32.xlu0 %v12260_v45, %s12145_s11  ;;  %3586 = vrot.lane.b32.xlu1 %v3562_v44, %s12278_s18  ;;  %12281 = vst [vmem:[#allocation78_spill] sm:$0xff] %v10629_v30  ;;  %vm12112_vm1 = vcmp.ne.s16.totalorder %v10629_v30, 0  ;;  %v3931_v44 = vsel %vm1671_vm14, %v8660_v2, 0  ;;  %v12428_v30 = vld [vmem:[#allocation72_spill] sm:$0xff] }
 0x9b0   : > { %3622 = vrot.lane.b32.xlu1 %v3617_v4, %s12278_s18  ;;  %3624 = vrot.lane.b32.xlu0 %v3621_v48, %s12278_s18 }
 0xa16   : > { %v3574_v22 = vpop.permute.xlu0 %3573 }
 0xa17   : > { %v3581_v5 = vsel %vm12114_vm0, 0, %v3574_v22 }
 0xa18   : > { %3633 = vrot.lane.b32.xlu1 %v3581_v5, %s12282_s22 }
 0xa1a   : > { %v3576_v36 = vpop.permute.xlu1 %3575  ;;  %v10641_v11 = vpop.permute.xlu0 %3584 }
 0xa1b   : > { %v3583_v27 = vsel %vm12113_vm12, %v3534_v26, %v3576_v36  ;;  %v3577_v47 = vsel %vm1444_vm3, %v3574_v22, %v3576_v36  ;;  %12283 = vst [vmem:[#allocation79_spill] sm:$0xff] %v10641_v11  ;;  %vm12123_vm10 = vcmp.ne.s16.totalorder %v10641_v11, 0 }
 0xa1c   : > { %3637 = vrot.lane.b32.xlu1 %v3583_v27, %s12282_s22  ;;  %v3582_v8 = vsel %vm12112_vm1, %v3533_v39, %v3577_v47 }
 0xa1d   : > { %3635 = vrot.lane.b32.xlu0 %v3582_v8, %s12282_s22 }
 0xa1e   : > { %v10643_v15 = vpop.permute.xlu1 %3586  ;;  %v3595_v3 = vpop.permute.xlu0 %3594 }
 0xa1f   : > { %12284 = vst [vmem:[#allocation80_spill] sm:$0xff] %v10643_v15  ;;  %v10650_v21 = vsel %vm1427_vm8, %v10641_v11, %v10643_v15  ;;  %v3596_v1 = vsel %vm1444_vm3, %v3595_v3, %v3574_v22  ;;  %vm12120_vm2 = vcmp.ne.s16.totalorder %v10643_v15, 0 }
 0xa20   : > { %12286 = vst [vmem:[#allocation82_spill] sm:$0xff] %v10650_v21  ;;  %vm12118_vm1 = vcmp.ne.s16.totalorder %v10650_v21, 0  ;;  %v3598_v53 = vsel %vm12123_vm10, 0, %v3596_v1  ;;  %v3600_v13 = vsel %vm12120_vm2, %v3534_v26, %v3576_v36  ;;  %vm12293_vm2 = vcmask 64512   ;;  %v9282_v26 = vld [vmem:[%s9513_s30 + $0x18] sm:$0xff]  }
 0xa21   : > { %v3599_v23 = vsel %vm12118_vm1, %v3533_v39, %v3577_v47  ;;  %v9280_v39 = vld [vmem:[%s9513_s30 + $0x8] sm:$0xff]  }
 0xa22   : > { %v10645_v18 = vpop.permute.xlu1 %3622  ;;  %v10652_v38 = vpop.permute.xlu0 %3624 }
 0xa23   : > { %12285 = vst [vmem:[#allocation81_spill] sm:$0xff] %v10645_v18  ;;  %12287 = vst [vmem:[#allocation83_spill] sm:$0xff] %v10652_v38  ;;  %v10660_v57 = vsel %vm1427_vm8, %v10645_v18, %v10652_v38  ;;  %vm12122_vm12 = vcmp.ne.s16.totalorder %v10645_v18, 0  ;;  %vm12119_vm1 = vcmp.ne.s16.totalorder %v10652_v38, 0 }
 0xa24   : > { %12288 = vst [vmem:[#allocation84_spill] sm:$0xff] %v10660_v57  ;;  %vm12121_vm0 = vcmp.ne.s16.totalorder %v10660_v57, 0 }
 0xa8a   : > { %v3634_v42 = vpop.permute.xlu1 %3633 }
 0xa8e   : > { %v3638_v14 = vpop.permute.xlu1 %3637 }
 0xa8f   : > { %v3636_v17 = vpop.permute.xlu0 %3635  ;;  %v3646_v29 = vsel %vm12119_vm1, %v3600_v13, %v3638_v14  ;;  %vm12292_vm1 = vmmov 0  }
 0xa90   : > { %v3639_v52 = vsel %vm1512_vm9, %v3634_v42, %v3636_v17  ;;  %v3640_v28 = vsel %vm1512_vm9, %v3636_v17, %v3638_v14 }
 0xa91   : > { %v3644_v40 = vsel %vm12122_vm12, %v3598_v53, %v3639_v52  ;;  %v3645_v6 = vsel %vm12121_vm0, %v3599_v23, %v3640_v28  ;;  %vm12294_vm0 = vmmov %vm12293_vm2 }
 0xa92   : > { %3650 = vrot.lane.b32.xlu0 %v3644_v40, %s12290_s26  ;;  %3652 = vrot.lane.b32.xlu1 %v3645_v6, %s12290_s26  ;;  %vm12295_vm12 = vmmov %vm12294_vm0 }
 0xa93   : > { %vm12296_vm10 = vmmov %vm12294_vm0 }
 0xa96   : > { %3654 = vrot.lane.b32.xlu0 %v3646_v29, %s12290_s26 }
 0xa9a   : > { %4241 = vperm.xlu0 %9221, %v4238_v61  }
 0xb04   : > { %v3651_v35 = vpop.permute.xlu0 %3650  ;;  %v3653_v59 = vpop.permute.xlu1 %3652 }
 0xb05   : > { %v3656_v9 = vsel %vm1616_vm6, %v3651_v35, %v3653_v59 }
 0xb06   : > { %3724 = vmatprep.subr.bf16.mxu0 %v3656_v9  ;;  %v12302_v9 = vld [vmem:[#allocation45_spill] sm:$0xff] }
 0xb07   : > { %3725 = vmatpush1.bf16.msra.mxu0 %v12260_v45 }
 0xb08   : > { %v3655_v55 = vpop.permute.xlu0 %3654  ;;  %8662 = vmatprep.subr.msk.bf16.mxu0 %vm1671_vm14, %v8659_v25 }
 0xb09   : > { %v3657_v7 = vsel %vm1616_vm6, %v3653_v59, %v3655_v55 }
 0xb0a   : > { %8643 = vmatmul.mubr.msk.bf16.vlgmr.msra.gmra.mrb[112].mxu0 %vm12124_vm15, %v9271_v16  ;;  %8972 = vmatpush3.bf16.msra.mxu1 %v3657_v7 }
 0xb0b   : > { %3937 = vmatpush1.bf16.msra.mxu0 %v3925_v37  ;;  %8668 = vmatprep.subr.msk.bf16.mxu1 %vm1671_vm14, %v8661_v43  ;;  %v12304_v43 = vld [vmem:[#allocation42_spill] sm:$0xff] }
 0xb0c   : > { %3766 = vmatprep.mubr.bf16.mxu0 %v12260_v45  ;;  %v12305_v37 = vld [vmem:[#allocation46_spill] sm:$0xff] }
 0xb0d   : > { %8974 = vmatmul.mubr.msk.bf16.vlgmr.msra.gmra.mrb[112].mxu1 %vm12124_vm15, %v9271_v16  ;;  %v12303_v16 = vld [vmem:[#allocation44_spill] sm:$0xff] }
 0xb0e   : > { %4013 = vmatpush1.bf16.msra.mxu1 %v3931_v44  ;;  %8977 = vmatprep.mubr.msk.bf16.mxu1 %vm12292_vm1, %v12291_v10 }
 0xb12   : > { %8644 = vmatmul.mubr.msk.bf16.gmra.mrb[116].mxu0 %vm12124_vm15, %v9275_v60 }
 0xb13   : > { %3776 = vmatprep.mubr.bf16.mxu0 %v12260_v45 }
 0xb15   : > { %8978 = vmatmul.mubr.msk.bf16.gmra.mrb[116].mxu1 %vm12124_vm15, %v9275_v60 }
 0xb16   : > { %8981 = vmatprep.mubr.msk.bf16.mxu1 %vm12292_vm1, %v12291_v10 }
 0xb1a   : > { %8645 = vmatmul.mubr.msk.bf16.gmra.mrb[120].mxu0 %vm12124_vm15, %v9276_v24 }
 0xb1b   : > { %3784 = vmatprep.mubr.bf16.mxu0 %v12260_v45 }
 0xb1d   : > { %8982 = vmatmul.mubr.msk.bf16.gmra.mrb[120].mxu1 %vm12124_vm15, %v9276_v24 }
 0xb1e   : > { %8985 = vmatprep.mubr.msk.bf16.mxu1 %vm12292_vm1, %v12291_v10 }
 0xb22   : > { %8646 = vmatmul.mubr.msk.bf16.gmra.mrb[124].mxu0 %vm12124_vm15, %v9277_v12 }
 0xb23   : > { %3792 = vmatprep.mubr.bf16.mxu0 %v12260_v45 }
 0xb25   : > { %8986 = vmatmul.mubr.msk.bf16.gmra.mrb[124].mxu1 %vm12124_vm15, %v9277_v12 }
 0xb26   : > { %8989 = vmatprep.mubr.msk.bf16.mxu1 %vm12292_vm1, %v12291_v10 }
 0xb2a   : > { %8647 = vmatmul.mubr.msk.bf16.gmra.mrb[128].mxu0 %vm12124_vm15, %v9278_v0 }
 0xb2b   : > { %3968 = vmatprep.mubr.bf16.mxu0 %v12260_v45 }
 0xb2d   : > { %8990 = vmatmul.mubr.msk.bf16.gmra.mrb[128].mxu1 %vm12124_vm15, %v9278_v0  ;;  %vm12297_vm15 = vmmov %vm12294_vm0 }
 0xb2e   : > { %4044 = vmatprep.mubr.bf16.mxu1 %v12260_v45 }
 0xb32   : > { %8663 = vmatmul.mubr.msk.bf16.vlgmr.msra.gmra.mrb[112].mxu0 %vm12293_vm2, %v9279_v50  ;;  %vm12298_vm2 = vmmov %vm12294_vm0 }
 0xb33   : > { %3978 = vmatprep.mubr.bf16.mxu0 %v12260_v45 }
 0xb35   : > { %8669 = vmatmul.mubr.msk.bf16.vlgmr.msra.gmra.mrb[112].mxu1 %vm12294_vm0, %v9279_v50 }
 0xb36   : > { %4052 = vmatprep.mubr.bf16.mxu1 %v12260_v45 }
 0xb3a   : > { %8664 = vmatmul.mubr.msk.bf16.gmra.mrb[116].mxu0 %vm12295_vm12, %v9280_v39  ;;  %vm12299_vm12 = vmmov %vm12294_vm0 }
 0xb3b   : > { %3988 = vmatprep.mubr.bf16.mxu0 %v12260_v45 }
 0xb3d   : > { %8670 = vmatmul.mubr.msk.bf16.gmra.mrb[116].mxu1 %vm12296_vm10, %v9280_v39  ;;  %vm12300_vm10 = vmmov %vm12294_vm0  ;;  %v12306_v39 = vld [vmem:[#allocation43_spill] sm:$0xff] }
 0xb3e   : > { %4060 = vmatprep.mubr.bf16.mxu1 %v12260_v45 }
 0xb42   : > { %8665 = vmatmul.mubr.msk.bf16.gmra.mrb[120].mxu0 %vm12297_vm15, %v9281_v54  ;;  %vm12301_vm15 = vmmov %vm12294_vm0 }
 0xb43   : > { %3996 = vmatprep.mubr.bf16.mxu0 %v12260_v45 }
 0xb45   : > { %8671 = vmatmul.mubr.msk.bf16.gmra.mrb[132].mxu1 %vm12298_vm2, %v9281_v54  ;;  %vm12322_vm2 = vcmask 900096  }
 0xb46   : > { %4069 = vmatprep.mubr.bf16.mxu1 %v12260_v45 }
 0xb4a   : > { %8666 = vmatmul.mubr.msk.bf16.gmra.mrb[124].mxu0 %vm12294_vm0, %v9282_v26  ;;  %vm12323_vm0 = vmmov %vm12322_vm2 }
 0xb4b   : > { %4004 = vmatprep.mubr.bf16.mxu0 %v12260_v45 }
 0xb4d   : > { %8672 = vmatmul.mubr.msk.bf16.gmra.mrb[136].mxu1 %vm12299_vm12, %v9282_v26  ;;  %v12307_v26 = vld [vmem:[#allocation47_spill] sm:$0xff]  ;;  %vm12324_vm12 = vcmask 777216  }
 0xb4e   : > { %4079 = vmatprep.mubr.bf16.mxu1 %v12260_v45 }
 0xb52   : > { %8667 = vmatmul.mubr.msk.bf16.gmra.mrb[128].mxu0 %vm12300_vm10, %v9283_v34  ;;  %vm12325_vm10 = vmmov %vm12324_vm12 }
 0xb53   : > { %4374 = vmatprep.mubr.bf16.mxu0 %v12260_v45 }
 0xb55   : > { %8673 = vmatmul.mubr.msk.bf16.gmra.mrb[140].mxu1 %vm12301_vm15, %v9283_v34 }
 0xb56   : > { %4450 = vmatprep.mubr.bf16.mxu1 %v12260_v45 }
 0xbf0   : > { %v3850_v4 = vpop.f32.mrb[120].mxu1 }
 0xbf1   : > { %v8983_v48 = vpop.f32.mrb[121].mxu1 }
 0xbf2   : > { %v3853_v22 = vpop.f32.mrb[122].mxu1 }
 0xbf3   : > { %v8984_v5 = vpop.f32.mrb[123].mxu1 }
 0xbf8   : > { %v3859_v36 = vpop.f32.mrb[124].mxu1 }
 0xbf9   : > { %v8987_v27 = vpop.f32.mrb[125].mxu1 }
 0xbfa   : > { %v3863_v47 = vpop.f32.mrb[126].mxu1 }
 0xbfb   : > { %v8988_v8 = vpop.f32.mrb[127].mxu1 }
 0xc00   : > { %v10745_v3 = vpop.f32.mrb[128].mxu1 }
 0xc01   : > { %v8991_v42 = vpop.f32.mrb[129].mxu1 }
 0xc02   : > { %v3873_v1 = vpop.f32.mrb[130].mxu1 }
 0xc03   : > { %v8992_v14 = vpop.f32.mrb[131].mxu1 }
 0xc05   : > { %v10747_v53 = vpop.f32.mrb[112].mxu0 }
 0xc06   : > { %v10749_v17 = vpop.f32.mrb[113].mxu0 }
 0xc07   : > { %v3974_v23 = vpop.f32.mrb[114].mxu0 }
 0xc08   : > { %v3976_v52 = vpop.f32.mrb[115].mxu0  ;;  %v10751_v28 = vpop.f32.mrb[112].mxu1 }
 0xc09   : > { %v4048_v40 = vpop.f32.mrb[113].mxu1  ;;  %4096 = vrot.lane.b32.xlu0 %v3976_v52, %s12145_s11 }
 0xc0a   : > { %v4049_v6 = vpop.f32.mrb[114].mxu1 }
 0xc0b   : > { %4098 = vrot.lane.b32.xlu1 %v4049_v6, %s12145_s11  ;;  %v4051_v13 = vpop.f32.mrb[115].mxu1  ;;  %v12308_v6 = vld [vmem:[#allocation50_spill] sm:$0xff] }
 0xc0d   : > { %v3980_v29 = vpop.f32.mrb[116].mxu0 }
 0xc0e   : > { %v3982_v61 = vpop.f32.mrb[117].mxu0  ;;  %v4108_v2 = vmul.f32 %v3980_v29, %v12304_v43 }
 0xc0f   : > { %4094 = vrot.lane.b32.xlu1 %v3974_v23, %s12145_s11  ;;  %v3984_v32 = vpop.f32.mrb[118].mxu0  ;;  %v4109_v25 = vmul.f32 %v3982_v61, %v12302_v9 }
 0xc10   : > { %v3986_v35 = vpop.f32.mrb[119].mxu0  ;;  %v4054_v59 = vpop.f32.mrb[116].mxu1  ;;  %v4128_v54 = vmul.f32 %v3984_v32, %v12306_v39 }
 0xc11   : > { %v4110_v46 = vmul.f32 %v4054_v59, %v12303_v16  ;;  %v4056_v41 = vpop.f32.mrb[117].mxu1  ;;  %v4129_v34 = vmul.f32 %v3986_v35, %v12307_v26 }
 0xc12   : > { %v4057_v55 = vpop.f32.mrb[118].mxu1  ;;  %v12312_v41 = vld [vmem:[#allocation52_spill] sm:$0xff] }
 0xc13   : > { %v4059_v7 = vpop.f32.mrb[119].mxu1  ;;  %4118 = vrot.lane.b32.xlu0 %v4110_v46, %s12142_s23  ;;  %4116 = vrot.lane.b32.xlu1 %v4109_v25, %s12142_s23  ;;  %v4130_v44 = vmul.f32 %v4057_v55, %v12305_v37  ;;  %v12311_v25 = vld [vmem:[#allocation48_spill] sm:$0xff] }
 0xc15   : > { %v3990_v60 = vpop.f32.mrb[120].mxu0 }
 0xc16   : > { %v3991_v24 = vpop.f32.mrb[121].mxu0 }
 0xc17   : > { %4114 = vrot.lane.b32.xlu0 %v4108_v2, %s12142_s23  ;;  %4138 = vrot.lane.b32.xlu1 %v4130_v44, %s12282_s22  ;;  %v3993_v12 = vpop.f32.mrb[122].mxu0 }
 0xc18   : > { %v3994_v0 = vpop.f32.mrb[123].mxu0  ;;  %v4062_v50 = vpop.f32.mrb[132].mxu1 }
 0xc19   : > { %v4063_v48 = vadd.f32 %v4062_v50, %v3850_v4  ;;  %v4064_v5 = vpop.f32.mrb[133].mxu1  ;;  %v12309_v4 = vld [vmem:[#allocation49_spill] sm:$0xff]  ;;  %v4161_v46 = vmul.f32 %v3994_v0, %v12311_v25 }
 0xc1a   : > { %v4065_v27 = vpop.f32.mrb[134].mxu1  ;;  %v12316_v5 = vld [vmem:[#allocation54_spill] sm:$0xff] }
 0xc1b   : > { %v4066_v8 = vadd.f32 %v4065_v27, %v3853_v22  ;;  %v4067_v42 = vpop.f32.mrb[135].mxu1  ;;  %4134 = vrot.lane.b32.xlu1 %v4128_v54, %s12282_s22  ;;  %4136 = vrot.lane.b32.xlu0 %v4129_v34, %s12282_s22  ;;  %v12315_v34 = vld [vmem:[#allocation51_spill] sm:$0xff] }
 0xc1c   : > { %v4163_v29 = vmul.f32 %v4067_v42, %v12309_v4  ;;  %v12318_v42 = vld [vmem:[#allocation55_spill] sm:$0xff] }
 0xc1d   : > { %v3998_v1 = vpop.f32.mrb[124].mxu0  ;;  %v4162_v13 = vmul.f32 %v4066_v8, %v12308_v6 }
 0xc1e   : > { %v3999_v14 = vpop.f32.mrb[125].mxu0 }
 0xc1f   : > { %4152 = vrot.lane.b32.xlu1 %v4063_v48, %s12278_s18  ;;  %4150 = vrot.lane.b32.xlu0 %v3991_v24, %s12278_s18  ;;  %v4001_v23 = vpop.f32.mrb[126].mxu0  ;;  %v12313_v24 = vld [vmem:[#allocation53_spill] sm:$0xff]  ;;  %v4181_v48 = vmul.f32 %v3999_v14, %v12315_v34 }
 0xc20   : > { %v4002_v52 = vpop.f32.mrb[127].mxu0  ;;  %v4071_v40 = vpop.f32.mrb[136].mxu1 }
 0xc21   : > { %v4072_v61 = vadd.f32 %v4071_v40, %v3859_v36  ;;  %v4073_v22 = vpop.f32.mrb[137].mxu1  ;;  %v10792_v23 = vpop.permute.xlu0 %4241 }
 0xc22   : > { %v4075_v32 = vpop.f32.mrb[138].mxu1  ;;  %v4183_v55 = vmul.f32 %v4073_v22, %v12312_v41 }
 0xc23   : > { %v4076_v35 = vadd.f32 %v4075_v32, %v3863_v47  ;;  %v4077_v59 = vpop.f32.mrb[139].mxu1  ;;  %4169 = vrot.lane.b32.xlu1 %v4162_v13, %s12310_s16  ;;  %4171 = vrot.lane.b32.xlu0 %v4163_v29, %s12310_s16  ;;  %v4182_v47 = vmul.f32 %v4072_v61, %v12313_v24 }
 0xc25   : > { %v4006_v7 = vpop.f32.mrb[128].mxu0 }
 0xc26   : > { %v4007_v2 = vpop.f32.mrb[129].mxu0 }
 0xc27   : > { %4191 = vrot.lane.b32.xlu1 %v4183_v55, %s12140_s7  ;;  %4167 = vrot.lane.b32.xlu0 %v4161_v46, %s12310_s16  ;;  %v4009_v44 = vpop.f32.mrb[130].mxu0  ;;  %v4218_v27 = vmul.f32 %v4007_v2, %v12316_v5 }
 0xc28   : > { %v4010_v36 = vpop.f32.mrb[131].mxu0  ;;  %v4081_v60 = vpop.f32.mrb[140].mxu1  ;;  %v12319_v44 = vld [vmem:[#allocation58_spill] sm:$0xff] }
 0xc29   : > { %v4082_v12 = vadd.f32 %v4081_v60, %v10745_v3  ;;  %v4083_v50 = vpop.f32.mrb[141].mxu1  ;;  %v12317_v3 = vld [vmem:[#allocation56_spill] sm:$0xff]  ;;  %v4088_v36 = vmul.f32 %v10747_v53, %v12319_v44 }
 0xc2a   : > { %v4085_v54 = vpop.f32.mrb[142].mxu1  ;;  %v4220_v1 = vmul.f32 %v4083_v50, %v12318_v42 }
 0xc2b   : > { %4208 = vrot.lane.b32.xlu1 %v4077_v59, %s12314_s10  ;;  %4189 = vrot.lane.b32.xlu0 %v4182_v47, %s12140_s7  ;;  %v4086_v0 = vpop.f32.mrb[143].mxu1  ;;  %v4219_v8 = vmul.f32 %v4082_v12, %v12317_v3 }
 0xc2f   : > { %4206 = vrot.lane.b32.xlu0 %v4076_v35, %s12314_s10  ;;  %4187 = vrot.lane.b32.xlu1 %v4181_v48, %s12140_s7 }
 0xc33   : > { %4204 = vrot.lane.b32.xlu1 %v4002_v52, %s12314_s10  ;;  %4224 = vrot.lane.b32.xlu0 %v4218_v27, %s12138_s15  ;;  %v12320_v27 = vld [vmem:[#allocation59_spill] sm:$0xff] }
 0xc37   : > { %4226 = vrot.lane.b32.xlu1 %v4219_v8, %s12138_s15  ;;  %4228 = vrot.lane.b32.xlu0 %v4220_v1, %s12138_s15  ;;  %v4089_v8 = vmul.f32 %v10749_v17, %v12320_v27  ;;  %v12321_v1 = vld [vmem:[#allocation57_spill] sm:$0xff] }
 0xc7b   : > { %v4097_v40 = vpop.permute.xlu0 %4096 }
 0xc7d   : > { %v4099_v14 = vpop.permute.xlu1 %4098 }
 0xc7e   : > { %v4101_v0 = vsel %vm1444_vm3, %v4097_v40, %v4099_v14 }
 0xc7f   : > { %v4106_v53 = vadd.f32 %v4101_v0, %v4089_v8 }
 0xc81   : > { %v4095_v13 = vpop.permute.xlu1 %4094 }
 0xc82   : > { %v4100_v55 = vsel %vm1444_vm3, %v4095_v13, %v4097_v40  ;;  %v4090_v13 = vmul.f32 %v10751_v28, %v12321_v1 }
 0xc83   : > { %v4105_v47 = vadd.f32 %v4100_v55, %v4088_v36 }
 0xc84   : > { %v4107_v38 = vadd.f32 %v4099_v14, %v4090_v13 }
 0xc85   : > { %v4119_v29 = vpop.permute.xlu0 %4118  ;;  %v4117_v61 = vpop.permute.xlu1 %4116 }
 0xc86   : > { %v4121_v49 = vsel %vm1483_vm7, %v4117_v61, %v4119_v29  ;;  %v4127_v36 = vadd.f32 %v4119_v29, %v4107_v38 }
 0xc87   : > { %v4126_v15 = vadd.f32 %v4121_v49, %v4106_v53 }
 0xc89   : > { %v4115_v22 = vpop.permute.xlu0 %4114  ;;  %v4139_v32 = vpop.permute.xlu1 %4138 }
 0xc8a   : > { %v4120_v60 = vsel %vm1483_vm7, %v4115_v22, %v4117_v61 }
 0xc8b   : > { %v4125_v48 = vadd.f32 %v4120_v60, %v4105_v47  ;;  %v4147_v47 = vadd.f32 %v4139_v32, %v4127_v36 }
 0xc8d   : > { %v4135_v52 = vpop.permute.xlu1 %4134  ;;  %v4137_v35 = vpop.permute.xlu0 %4136 }
 0xc8e   : > { %v4140_v12 = vsel %vm1512_vm9, %v4135_v52, %v4137_v35  ;;  %v4141_v52 = vsel %vm1512_vm9, %v4137_v35, %v4139_v32 }
 0xc8f   : > { %v4145_v33 = vadd.f32 %v4140_v12, %v4125_v48  ;;  %v4146_v57 = vadd.f32 %v4141_v52, %v4126_v15 }
 0xc91   : > { %v4153_v59 = vpop.permute.xlu1 %4152  ;;  %v4151_v46 = vpop.permute.xlu0 %4150 }
 0xc92   : > { %v4154_v40 = vsel %vm1427_vm8, %v4151_v46, %v4153_v59  ;;  %v4158_v60 = vadd.f32 %v4151_v46, %v4145_v33  ;;  %v4160_v0 = vadd.f32 %v4153_v59, %v4147_v47 }
 0xc93   : > { %v4159_v14 = vadd.f32 %v4154_v40, %v4146_v57 }
 0xc95   : > { %v4170_v7 = vpop.permute.xlu1 %4169  ;;  %v4172_v2 = vpop.permute.xlu0 %4171 }
 0xc96   : > { %v4174_v28 = vsel %vm12322_vm2, %v4170_v7, %v4172_v2  ;;  %vm12327_vm2 = vmmov %vm12301_vm15 }
 0xc97   : > { %v4180_v49 = vadd.f32 %v4174_v28, %v4160_v0 }
 0xc99   : > { %v4192_v50 = vpop.permute.xlu1 %4191  ;;  %v4168_v54 = vpop.permute.xlu0 %4167 }
 0xc9a   : > { %v4173_v61 = vsel %vm12323_vm0, %v4168_v54, %v4170_v7  ;;  %v4178_v12 = vadd.f32 %v4168_v54, %v4158_v60  ;;  %vm12328_vm0 = vmmov %vm12327_vm2 }
 0xc9b   : > { %v4179_v29 = vadd.f32 %v4173_v61, %v4159_v14  ;;  %vm12333_vm4 = vmmov %vm12328_vm0 }
 0xc9d   : > { %v4209_v22 = vpop.permute.xlu1 %4208  ;;  %v4190_v55 = vpop.permute.xlu0 %4189 }
 0xc9e   : > { %v4194_v48 = vsel %vm1585_vm11, %v4190_v55, %v4192_v50 }
 0xc9f   : > { %v4200_v2 = vadd.f32 %v4194_v48, %v4180_v49 }
 0xca1   : > { %v4207_v17 = vpop.permute.xlu0 %4206  ;;  %v4188_v18 = vpop.permute.xlu1 %4187 }
 0xca2   : > { %v4193_v35 = vsel %vm1585_vm11, %v4188_v18, %v4190_v55  ;;  %v4198_v38 = vadd.f32 %v4188_v18, %v4178_v12  ;;  %v4211_v15 = vsel %vm12324_vm12, %v4207_v17, %v4209_v22  ;;  %v4644_v12 = vld [vmem:[%s9533_s27] sm:$0xff]  ;;  %vm12329_vm12 = vmmov %vm12328_vm0 }
 0xca3   : > { %v4199_v13 = vadd.f32 %v4193_v35, %v4179_v29  ;;  %v4217_v54 = vadd.f32 %v4211_v15, %v4200_v2 }
 0xca5   : > { %v4205_v8 = vpop.permute.xlu1 %4204  ;;  %v4225_v33 = vpop.permute.xlu0 %4224 }
 0xca6   : > { %v4210_v32 = vsel %vm12325_vm10, %v4205_v8, %v4207_v17  ;;  %v4215_v46 = vadd.f32 %v4205_v8, %v4198_v38  ;;  %vm12330_vm10 = vmmov %vm12328_vm0 }
 0xca7   : > { %v4216_v59 = vadd.f32 %v4210_v32, %v4199_v13  ;;  %v9288_v13 = vld [vmem:[%s12326_s2] sm:$0xff]  }
 0xca8   : > { %v4235_v7 = vadd.f32 %v4225_v33, %v4215_v46 }
 0xca9   : > { %v4227_v57 = vpop.permute.xlu1 %4226  ;;  %v4229_v50 = vpop.permute.xlu0 %4228 }
 0xcaa   : > { %v4230_v53 = vsel %vm1633_vm13, %v4225_v33, %v4227_v57  ;;  %v4231_v18 = vsel %vm1633_vm13, %v4227_v57, %v4229_v50  ;;  %v4244_v55 = vadd.f32 %v10792_v23, %v4235_v7  ;;  %v9289_v7 = vld [vmem:[%s12326_s2 + $0x8] sm:$0xff]   ;;  %v9292_v57 = vld [vmem:[%s12326_s2 + $0x20] ss:$0 sps:$4 sm:$0xff]  }
 0xcab   : > { %v4236_v52 = vadd.f32 %v4230_v53, %v4216_v59  ;;  %v4237_v36 = vadd.f32 %v4231_v18, %v4217_v54  ;;  %v9290_v54 = vld [vmem:[%s12326_s2 + $0x10] sm:$0xff]   ;;  %v9291_v59 = vld [vmem:[%s12326_s2 + $0x18] sm:$0xff]   ;;  %s12371_s2 = smov 94  }
 0xcac   : > { %v4247_v60 = vmax.f32 %v4244_v55, 0.0 }
 0xcad   : > { %v4245_v22 = vadd.f32 %v10792_v23, %v4236_v52  ;;  %v4246_v40 = vadd.f32 %v10792_v23, %v4237_v36 }
 0xcaf   : > { %v4248_v47 = vmax.f32 %v4245_v22, 0.0  ;;  %v4249_v17 = vmax.f32 %v4246_v40, 0.0 }
 0xcb1   : > { %v8894_v28 = vpack.c.bf16 %v4249_v17, %v4249_v17  ;;  %v8893_v61 = vpack.c.bf16 %v4248_v47, %v4247_v60 }
 0xcb3   : > { %4261 = vrot.lane.b32.xlu1 %v8893_v61, %s12290_s26  ;;  %4263 = vrot.lane.b32.xlu0 %v8894_v28, %s12290_s26 }
 0xcb7   : > { %4647 = vperm.xlu0 %9221, %v4644_v12  }
 0xd25   : > { %v4262_v0 = vpop.permute.xlu1 %4261  ;;  %v4264_v14 = vpop.permute.xlu0 %4263 }
 0xd26   : > { %v4265_v48 = vrot.slane %v4262_v0, 4  ;;  %v4266_v35 = vrot.slane %v4264_v14, 4 }
 0xd28   : > { %v4267_v38 = vsel %vm1671_vm14, %v4265_v48, %v4266_v35 }
 0xd29   : > { %v4268_v23 = vsel %vm1616_vm6, %v4262_v0, %v4267_v38 }
 0xd2a   : > { %4270 = vst [vmem:[#allocation10 + $0x4] sm:$0xff] %v4268_v23 }
 0xd31   : > { %v4280_v49 = vld [vmem:[#allocation10] sm:$0xff]  ;;  %v4281_v29 = vld [vmem:[#allocation10 + $0x8] sm:$0xff] }
 0xd32   : > { %v8682_v8 = vcombine.high %v4280_v49, %v4280_v49  ;;  %v8684_v33 = vcombine.high %v4281_v29, %v4281_v29  ;;  %v8681_v15 = vcombine.low %v4280_v49, %v4280_v49  ;;  %v8683_v32 = vcombine.low %v4281_v29, %v4281_v29 }
 0xd34   : > { %8685 = vmatprep.subr.msk.bf16.mxu0 %vm1671_vm14, %v8682_v8  ;;  %8691 = vmatprep.subr.msk.bf16.mxu1 %vm1671_vm14, %v8684_v33  ;;  %v4331_v46 = vsel %vm1671_vm14, %v8681_v15, 0  ;;  %v4337_v2 = vsel %vm1671_vm14, %v8683_v32, 0 }
 0xd35   : > { %4343 = vmatpush1.bf16.msra.mxu0 %v4331_v46  ;;  %4419 = vmatpush1.bf16.msra.mxu1 %v4337_v2 }
 0xd38   : > { %8686 = vmatmul.mubr.msk.bf16.vlgmr.msra.gmra.mrb[132].mxu0 %vm12301_vm15, %v9288_v13  ;;  %8692 = vmatmul.mubr.msk.bf16.vlgmr.msra.gmra.mrb[144].mxu1 %vm12327_vm2, %v9288_v13  ;;  %vm12331_vm15 = vmmov %vm12328_vm0 }
 0xd39   : > { %4384 = vmatprep.mubr.bf16.mxu0 %v12260_v45  ;;  %4458 = vmatprep.mubr.bf16.mxu1 %v12260_v45  ;;  %vm12332_vm2 = vmmov %vm12328_vm0 }
 0xd40   : > { %8687 = vmatmul.mubr.msk.bf16.gmra.mrb[136].mxu0 %vm12328_vm0, %v9289_v7  ;;  %8693 = vmatmul.mubr.msk.bf16.gmra.mrb[148].mxu1 %vm12329_vm12, %v9289_v7  ;;  %vm12334_vm12 = vmmov %vm12328_vm0 }
 0xd41   : > { %4394 = vmatprep.mubr.bf16.mxu0 %v12260_v45  ;;  %4466 = vmatprep.mubr.bf16.mxu1 %v12260_v45 }
 0xd48   : > { %8688 = vmatmul.mubr.msk.bf16.gmra.mrb[140].mxu0 %vm12330_vm10, %v9290_v54  ;;  %8694 = vmatmul.mubr.msk.bf16.gmra.mrb[152].mxu1 %vm12331_vm15, %v9290_v54  ;;  %vm12337_vm15 = vcmask 777216  }
 0xd49   : > { %4402 = vmatprep.mubr.bf16.mxu0 %v12260_v45  ;;  %4475 = vmatprep.mubr.bf16.mxu1 %v12260_v45 }
 0xd50   : > { %8689 = vmatmul.mubr.msk.bf16.gmra.mrb[144].mxu0 %vm12332_vm2, %v9291_v59  ;;  %8695 = vmatmul.mubr.msk.bf16.gmra.mrb[156].mxu1 %vm12333_vm4, %v9291_v59  ;;  %vm12335_vm4 = vcmask 900096   ;;  %vm12338_vm2 = vmmov %vm12337_vm15 }
 0xd51   : > { %4410 = vmatprep.mubr.bf16.mxu0 %v12260_v45  ;;  %4485 = vmatprep.mubr.bf16.mxu1 %v12260_v45  ;;  %vm12336_vm10 = vmmov %vm12335_vm4 }
 0xd58   : > { %8690 = vmatmul.mubr.msk.bf16.gmra.mrb[148].mxu0 %vm12328_vm0, %v9292_v57  ;;  %8696 = vmatmul.mubr.msk.bf16.gmra.mrb[160].mxu1 %vm12334_vm12, %v9292_v57  ;;  %vm4831_vm12 = vcmask 1040384  }
 0xd59   : > { %4718 = vmatprep.mubr.bf16.mxu0 %v12260_v45  ;;  %4876 = vmatprep.mubr.bf16.mxu1 %v12260_v45 }
 0xe0b   : > { %v10852_v50 = vpop.f32.mrb[132].mxu0  ;;  %v10854_v53 = vpop.f32.mrb[144].mxu1 }
 0xe0c   : > { %v10856_v18 = vpop.f32.mrb[133].mxu0  ;;  %v4454_v55 = vpop.f32.mrb[145].mxu1 }
 0xe0d   : > { %v4380_v52 = vpop.f32.mrb[134].mxu0  ;;  %v4455_v36 = vpop.f32.mrb[146].mxu1 }
 0xe0e   : > { %4500 = vrot.lane.b32.xlu1 %v4380_v52, %s12145_s11  ;;  %v4382_v22 = vpop.f32.mrb[135].mxu0  ;;  %v4457_v40 = vpop.f32.mrb[147].mxu1 }
 0xe0f   : > { %4502 = vrot.lane.b32.xlu0 %v4382_v22, %s12145_s11 }
 0xe12   : > { %4504 = vrot.lane.b32.xlu1 %v4455_v36, %s12145_s11 }
 0xe13   : > { %v4386_v60 = vpop.f32.mrb[136].mxu0  ;;  %v4460_v47 = vpop.f32.mrb[148].mxu1 }
 0xe14   : > { %v4514_v17 = vmul.f32 %v4386_v60, %v12304_v43  ;;  %v4388_v28 = vpop.f32.mrb[137].mxu0  ;;  %v4462_v61 = vpop.f32.mrb[149].mxu1  ;;  %v4516_v38 = vmul.f32 %v4460_v47, %v12303_v16 }
 0xe15   : > { %v4515_v12 = vmul.f32 %v4388_v28, %v12302_v9  ;;  %v4390_v0 = vpop.f32.mrb[138].mxu0  ;;  %v4463_v14 = vpop.f32.mrb[150].mxu1 }
 0xe16   : > { %4520 = vrot.lane.b32.xlu0 %v4514_v17, %s12142_s23  ;;  %v4392_v48 = vpop.f32.mrb[139].mxu0  ;;  %v4465_v35 = vpop.f32.mrb[151].mxu1  ;;  %v4534_v23 = vmul.f32 %v4390_v0, %v12306_v39  ;;  %v4536_v32 = vmul.f32 %v4463_v14, %v12305_v37 }
 0xe17   : > { %4522 = vrot.lane.b32.xlu1 %v4515_v12, %s12142_s23  ;;  %v4535_v8 = vmul.f32 %v4392_v48, %v12307_v26 }
 0xe1a   : > { %4524 = vrot.lane.b32.xlu0 %v4516_v38, %s12142_s23  ;;  %s12341_s23 = sld [smem:[#allocation22_spill]] }
 0xe1b   : > { %v4468_v49 = vpop.f32.mrb[152].mxu1  ;;  %4540 = vrot.lane.b32.xlu1 %v4534_v23, %s12282_s22  ;;  %v4396_v29 = vpop.f32.mrb[140].mxu0 }
 0xe1c   : > { %v4397_v33 = vpop.f32.mrb[141].mxu0  ;;  %v4470_v15 = vpop.f32.mrb[153].mxu1 }
 0xe1d   : > { %v4399_v46 = vpop.f32.mrb[142].mxu0  ;;  %v4471_v2 = vpop.f32.mrb[154].mxu1 }
 0xe1e   : > { %v4473_v13 = vpop.f32.mrb[155].mxu1  ;;  %4542 = vrot.lane.b32.xlu0 %v4535_v8, %s12282_s22  ;;  %v4400_v7 = vpop.f32.mrb[143].mxu0  ;;  %v4568_v36 = vmul.f32 %v4471_v2, %v12308_v6 }
 0xe1f   : > { %4544 = vrot.lane.b32.xlu1 %v4536_v32, %s12282_s22  ;;  %v4567_v57 = vmul.f32 %v4400_v7, %v12311_v25  ;;  %v4569_v17 = vmul.f32 %v4473_v13, %v12309_v4  ;;  %v10896_v32 = vpop.permute.xlu0 %4647 }
 0xe22   : > { %4556 = vrot.lane.b32.xlu0 %v4397_v33, %s12278_s18 }
 0xe23   : > { %v4477_v54 = vpop.f32.mrb[156].mxu1  ;;  %4558 = vrot.lane.b32.xlu1 %v4468_v49, %s12278_s18  ;;  %v4404_v59 = vpop.f32.mrb[144].mxu0 }
 0xe24   : > { %v4405_v55 = vpop.f32.mrb[145].mxu0  ;;  %v4479_v52 = vpop.f32.mrb[157].mxu1  ;;  %v4588_v0 = vmul.f32 %v4477_v54, %v12313_v24 }
 0xe25   : > { %v4407_v22 = vpop.f32.mrb[146].mxu0  ;;  %v4481_v40 = vpop.f32.mrb[158].mxu1  ;;  %v4587_v28 = vmul.f32 %v4405_v55, %v12315_v34  ;;  %v4589_v35 = vmul.f32 %v4479_v52, %v12312_v41 }
 0xe26   : > { %4573 = vrot.lane.b32.xlu0 %v4567_v57, %s12310_s16  ;;  %v4408_v60 = vpop.f32.mrb[147].mxu0  ;;  %v4483_v47 = vpop.f32.mrb[159].mxu1 }
 0xe27   : > { %4575 = vrot.lane.b32.xlu1 %v4568_v36, %s12310_s16 }
 0xe2a   : > { %4577 = vrot.lane.b32.xlu0 %v4569_v17, %s12310_s16 }
 0xe2b   : > { %v4487_v61 = vpop.f32.mrb[160].mxu1  ;;  %4593 = vrot.lane.b32.xlu1 %v4587_v28, %s12140_s7  ;;  %v4412_v12 = vpop.f32.mrb[148].mxu0 }
 0xe2c   : > { %v4413_v14 = vpop.f32.mrb[149].mxu0  ;;  %v4489_v48 = vpop.f32.mrb[161].mxu1  ;;  %v4625_v15 = vmul.f32 %v4487_v61, %v12317_v3 }
 0xe2d   : > { %v4415_v38 = vpop.f32.mrb[150].mxu0  ;;  %v4491_v23 = vpop.f32.mrb[162].mxu1  ;;  %v4624_v8 = vmul.f32 %v4413_v14, %v12316_v5  ;;  %v4626_v33 = vmul.f32 %v4489_v48, %v12318_v42 }
 0xe2e   : > { %4595 = vrot.lane.b32.xlu0 %v4588_v0, %s12140_s7  ;;  %v4416_v49 = vpop.f32.mrb[151].mxu0  ;;  %v4492_v29 = vpop.f32.mrb[163].mxu1  ;;  %v4496_v23 = vmul.f32 %v10854_v53, %v12321_v1 }
 0xe2f   : > { %4597 = vrot.lane.b32.xlu1 %v4589_v35, %s12140_s7  ;;  %v4495_v49 = vmul.f32 %v10856_v18, %v12320_v27  ;;  %s12340_s7 = sld [smem:[#allocation26_spill]] }
 0xe32   : > { %4612 = vrot.lane.b32.xlu0 %v4481_v40, %s12314_s10 }
 0xe33   : > { %4610 = vrot.lane.b32.xlu1 %v4408_v60, %s12314_s10  ;;  %v4494_v60 = vmul.f32 %v10852_v50, %v12319_v44 }
 0xe36   : > { %4630 = vrot.lane.b32.xlu0 %v4624_v8, %s12138_s15 }
 0xe37   : > { %4614 = vrot.lane.b32.xlu1 %v4483_v47, %s12314_s10 }
 0xe3a   : > { %4634 = vrot.lane.b32.xlu0 %v4626_v33, %s12138_s15 }
 0xe3b   : > { %4632 = vrot.lane.b32.xlu1 %v4625_v15, %s12138_s15  ;;  %s12339_s15 = sld [smem:[#allocation23_spill]] }
 0xe80   : > { %v4501_v46 = vpop.permute.xlu1 %4500 }
 0xe81   : > { %v4503_v2 = vpop.permute.xlu0 %4502 }
 0xe82   : > { %v4506_v22 = vsel %vm1444_vm3, %v4501_v46, %v4503_v2 }
 0xe83   : > { %v4511_v17 = vadd.f32 %v4506_v22, %v4494_v60 }
 0xe84   : > { %v4505_v13 = vpop.permute.xlu1 %4504 }
 0xe85   : > { %v4507_v38 = vsel %vm1444_vm3, %v4503_v2, %v4505_v13  ;;  %v4513_v15 = vadd.f32 %v4505_v13, %v4496_v23 }
 0xe86   : > { %v4512_v33 = vadd.f32 %v4507_v38, %v4495_v49 }
 0xe88   : > { %v4521_v7 = vpop.permute.xlu0 %4520 }
 0xe89   : > { %v4523_v54 = vpop.permute.xlu1 %4522 }
 0xe8a   : > { %v4526_v47 = vsel %vm1483_vm7, %v4521_v7, %v4523_v54 }
 0xe8b   : > { %v4531_v0 = vadd.f32 %v4526_v47, %v4511_v17 }
 0xe8c   : > { %v4525_v59 = vpop.permute.xlu0 %4524 }
 0xe8d   : > { %v4541_v57 = vpop.permute.xlu1 %4540  ;;  %v4527_v50 = vsel %vm1483_vm7, %v4523_v54, %v4525_v59  ;;  %v4533_v60 = vadd.f32 %v4525_v59, %v4513_v15 }
 0xe8e   : > { %v4532_v22 = vadd.f32 %v4527_v50, %v4512_v33 }
 0xe90   : > { %v4543_v55 = vpop.permute.xlu0 %4542 }
 0xe91   : > { %v4545_v52 = vpop.permute.xlu1 %4544  ;;  %v4546_v61 = vsel %vm1512_vm9, %v4541_v57, %v4543_v55 }
 0xe92   : > { %v4551_v14 = vadd.f32 %v4546_v61, %v4531_v0  ;;  %v4547_v7 = vsel %vm1512_vm9, %v4543_v55, %v4545_v52  ;;  %v4553_v61 = vadd.f32 %v4545_v52, %v4533_v60 }
 0xe93   : > { %v4552_v53 = vadd.f32 %v4547_v7, %v4532_v22 }
 0xe94   : > { %v4557_v36 = vpop.permute.xlu0 %4556 }
 0xe95   : > { %v4559_v40 = vpop.permute.xlu1 %4558  ;;  %v4564_v29 = vadd.f32 %v4557_v36, %v4551_v14 }
 0xe96   : > { %v4560_v2 = vsel %vm1427_vm8, %v4557_v36, %v4559_v40  ;;  %v4566_v13 = vadd.f32 %v4559_v40, %v4553_v61 }
 0xe97   : > { %v4565_v38 = vadd.f32 %v4560_v2, %v4552_v53 }
 0xe98   : > { %v4574_v28 = vpop.permute.xlu0 %4573 }
 0xe99   : > { %v4576_v12 = vpop.permute.xlu1 %4575  ;;  %v4584_v57 = vadd.f32 %v4574_v28, %v4564_v29 }
 0xe9a   : > { %v4579_v18 = vsel %vm12335_vm4, %v4574_v28, %v4576_v12  ;;  %vm12344_vm4 = vcmask 1041408  }
 0xe9b   : > { %v4585_v59 = vadd.f32 %v4579_v18, %v4565_v38 }
 0xe9c   : > { %v4578_v48 = vpop.permute.xlu0 %4577 }
 0xe9d   : > { %v4594_v35 = vpop.permute.xlu1 %4593  ;;  %v4580_v54 = vsel %vm12336_vm10, %v4576_v12, %v4578_v48  ;;  %vm12345_vm10 = vmmov %vm12344_vm4 }
 0xe9e   : > { %v4604_v47 = vadd.f32 %v4594_v35, %v4584_v57  ;;  %v4586_v50 = vadd.f32 %v4580_v54, %v4566_v13  ;;  %v4660_v54 = vld [vmem:[%s12339_s15] sm:$0x3]  ;;  %s12369_s15 = smov 126  }
 0xea0   : > { %v4596_v8 = vpop.permute.xlu0 %4595 }
 0xea1   : > { %v4598_v46 = vpop.permute.xlu1 %4597  ;;  %v4599_v23 = vsel %vm1585_vm11, %v4594_v35, %v4596_v8 }
 0xea2   : > { %v4600_v55 = vsel %vm1585_vm11, %v4596_v8, %v4598_v46  ;;  %v4605_v15 = vadd.f32 %v4599_v23, %v4585_v59  ;;  %v4656_v59 = vld [vmem:[%s12341_s23] sm:$0x1]  ;;  %s12352_s23 = sld [smem:[#allocation24_spill]] }
 0xea3   : > { %v4606_v28 = vadd.f32 %v4600_v55, %v4586_v50  ;;  %v9443_v50 = vmov 1966171168  }
 0xea4   : > { %v4613_v17 = vpop.permute.xlu0 %4612 }
 0xea5   : > { %v4611_v0 = vpop.permute.xlu1 %4610 }
 0xea6   : > { %v4621_v14 = vadd.f32 %v4611_v0, %v4604_v47  ;;  %v4616_v33 = vsel %vm12337_vm15, %v4611_v0, %v4613_v17  ;;  %vm12346_vm15 = vcmask 15360  }
 0xea7   : > { %v4622_v7 = vadd.f32 %v4616_v33, %v4605_v15  ;;  %vm12349_vm5 = vmmov %vm12346_vm15 }
 0xea8   : > { %v4631_v49 = vpop.permute.xlu0 %4630 }
 0xea9   : > { %v4641_v36 = vadd.f32 %v4631_v49, %v4621_v14  ;;  %v4615_v29 = vpop.permute.xlu1 %4614  ;;  %v5366_v14 = vld [vmem:[%s12340_s7] sm:$0xff]  ;;  %s12342_s7 = sld [smem:[#allocation25_spill]] }
 0xeaa   : > { %v4617_v52 = vsel %vm12338_vm2, %v4613_v17, %v4615_v29  ;;  %vm12347_vm2 = vmmov %vm12344_vm4 }
 0xeab   : > { %v4650_v12 = vadd.f32 %v10896_v32, %v4641_v36  ;;  %v4623_v57 = vadd.f32 %v4617_v52, %v4606_v28  ;;  %v4733_v36 = vunpack.c.l.s4 %v9443_v50 }
 0xeac   : > { %v4635_v48 = vpop.permute.xlu0 %4634 }
 0xead   : > { %v4653_v40 = vmax.f32 %v4650_v12, 0.0  ;;  %v4633_v35 = vpop.permute.xlu1 %4632  ;;  %v4734_v29 = vunpack.c.0.s8 %v4733_v36 }
 0xeae   : > { %v4636_v8 = vsel %vm1633_vm13, %v4631_v49, %v4633_v35  ;;  %v4637_v46 = vsel %vm1633_vm13, %v4633_v35, %v4635_v48 }
 0xeaf   : > { %v4657_v22 = vpack.c.bf16 %v4653_v40, %v4653_v40  ;;  %v4642_v60 = vadd.f32 %v4636_v8, %v4622_v7  ;;  %v4643_v2 = vadd.f32 %v4637_v46, %v4623_v57  ;;  %v4737_v48 = vsub.s32 %v4734_v29, %v12277_v19  ;;  %v4757_v8 = vld [vmem:[#allocation2] sm:$0xff]  ;;  %v9296_v50 = vld [vmem:[%s12342_s7 + $0x18] sm:$0xff]  }
 0xeb0   : > { %v5020_v46 = vcombine.high %v4757_v8, %v4757_v8  ;;  %v9297_v36 = vld [vmem:[%s12342_s7 + $0x20] ss:$0 sps:$4 sm:$0xff]  }
 0xeb1   : > { %v4651_v47 = vadd.f32 %v10896_v32, %v4642_v60  ;;  %v4652_v17 = vadd.f32 %v10896_v32, %v4643_v2  ;;  %4669 = vrot.lane.b32.xlu1 %v4657_v22, %s12290_s26  ;;  %v12343_v22 = vld [vmem:[#allocation41_spill] sm:$0xff] }
 0xeb2   : > { %v5027_v60 = vrot.slane %v4757_v8, %v12343_v22  ;;  %v9299_v29 = vld [vmem:[%s12352_s23] sm:$0xff]  }
 0xeb3   : > { %v4654_v53 = vmax.f32 %v4651_v47, 0.0  ;;  %v4655_v61 = vmax.f32 %v4652_v17, 0.0 }
 0xeb5   : > { %v4658_v0 = vpack.c.bf16 %v4654_v53, %v4654_v53  ;;  %v4659_v18 = vpack.c.bf16 %v4655_v61, %v4655_v61  ;;  %v5034_v53 = vrot.slane %v5020_v46, %v12343_v22 }
 0xeb7   : > { %4671 = vrot.lane.b32.xlu0 %v4658_v0, %s12290_s26  ;;  %4673 = vrot.lane.b32.xlu1 %v4659_v18, %s12290_s26  ;;  %v5035_v18 = vcombine.high %v5027_v60, %v5027_v60 }
 0xebb   : > { %4663 = vperm.xlu0 %9221, %v4660_v54  }
 0xebf   : > { %5369 = vperm.xlu0 %9221, %v5366_v14  }
 0xf23   : > { %v4670_v38 = vpop.permute.xlu1 %4669 }
 0xf29   : > { %v4674_v13 = vpop.permute.xlu1 %4673  ;;  %v4672_v23 = vpop.permute.xlu0 %4671 }
 0xf2a   : > { %v4675_v32 = vsel %vm1616_vm6, %v4670_v38, %v4672_v23  ;;  %v4676_v55 = vsel %vm1616_vm6, %v4672_v23, %v4674_v13  ;;  %v9293_v38 = vld [vmem:[%s12342_s7] sm:$0xff]   ;;  %v5036_v13 = vcombine.high %v5034_v53, %v5034_v53 }
 0xf2b   : > { %8697 = vmatprep.subr.msk.bf16.mxu0 %vm1671_vm14, %v4676_v55  ;;  %v4681_v49 = vsel %vm1671_vm14, %v4675_v32, 0  ;;  %v5053_v32 = vsel %vm12345_vm10, %v5027_v60, 0 }
 0xf2c   : > { %4687 = vmatpush1.bf16.msra.mxu0 %v4681_v49  ;;  %v9294_v49 = vld [vmem:[%s12342_s7 + $0x8] sm:$0xff]  }
 0xf2f   : > { %8698 = vmatmul.mubr.msk.bf16.vlgmr.msra.gmra.mrb[152].mxu0 %vm12328_vm0, %v4656_v59  ;;  %vm12348_vm0 = vmmov %vm12347_vm2  ;;  %v9295_v59 = vld [vmem:[%s12342_s7 + $0x10] sm:$0xff]   ;;  %s12419_s7 = smov 64  }
 0xf30   : > { %4952 = vmatprep.mubr.bf16.mxu0 %v12260_v45  ;;  %v5059_v55 = vsel %vm12348_vm0, %v5034_v53, 0 }
 0xf3a   : > { %v4664_v33 = vpop.permute.xlu0 %4663 }
0x1002   : > { %v4720_v52 = vpop.f32.mrb[152].mxu0 }
0x1003   : > { %v4721_v15 = vadd.f32 %v4720_v52, %v4664_v33  ;;  %v4722_v28 = vpop.f32.mrb[153].mxu0  ;;  %v9301_v52 = vld [vmem:[%s12352_s23 + $0x10] sm:$0xff]  }
0x1004   : > { %v4723_v12 = vadd.f32 %v4722_v28, %v4664_v33  ;;  %v4724_v7 = vpop.f32.mrb[154].mxu0  ;;  %v9300_v33 = vld [vmem:[%s12352_s23 + $0x8] sm:$0xff]   ;;  %v9303_v28 = vld [vmem:[%s12352_s23 + $0x20] ss:$0 sps:$4 sm:$0xff]  }
0x1005   : > { %v4725_v40 = vpop.f32.mrb[155].mxu0 }
0x1006   : > { %v8699_v57 = vpack.c.bf16 %v4723_v12, %v4721_v15  ;;  %v9302_v15 = vld [vmem:[%s12352_s23 + $0x18] sm:$0xff]  }
0x1008   : > { %v4738_v35 = vrot.slane %v8699_v57, %v4737_v48 }
0x100a   : > { %8700 = vst.sshfl [vmem:[#allocation3 + $0x1] sm:$0x5 pattern:$0x73625140] %v4738_v35 }
0x1011   : > { %v8706_v2 = vld.sshfl [vmem:[#allocation3] sm:$0x33 pattern:$0x75316420] }
0x1012   : > { %v4799_v47 = vcombine.high %v8706_v2, %v8706_v2  ;;  %v4806_v17 = vrot.slane %v8706_v2, %v4737_v48 }
0x1014   : > { %v4813_v61 = vrot.slane %v4799_v47, %v4737_v48  ;;  %v4814_v0 = vcombine.high %v4806_v17, %v4806_v17  ;;  %v4833_v54 = vsel %vm4831_vm12, %v4806_v17, 0 }
0x1016   : > { %8707 = vmatprep.subr.msk.bf16.mxu1 %vm4831_vm12, %v4813_v61  ;;  %v4815_v14 = vcombine.high %v4813_v61, %v4813_v61  ;;  %v4839_v23 = vsel %vm4831_vm12, %v4814_v0, 0 }
0x1017   : > { %4845 = vmatpush1.bf16.msra.mxu1 %v4833_v54 }
0x1018   : > { %8713 = vmatprep.subr.msk.bf16.mxu0 %vm4831_vm12, %v4815_v14  ;;  %8724 = vmatprep.subr.msk.bf16.mxu1 %vm12344_vm4, %v5035_v18  ;;  %vm12350_vm12 = vmmov %vm12349_vm5 }
0x1019   : > { %4921 = vmatpush1.bf16.msra.mxu0 %v4839_v23  ;;  %vm12351_vm4 = vmmov %vm12349_vm5 }
0x101a   : > { %8708 = vmatmul.mubr.msk.bf16.vlgmr.msra.gmra.mrb[164].mxu1 %vm12346_vm15, %v9293_v38  ;;  %8730 = vmatprep.subr.msk.bf16.mxu0 %vm12347_vm2, %v5036_v13  ;;  %vm12353_vm10 = vmmov %vm12351_vm4 }
0x101b   : > { %4886 = vmatprep.mubr.bf16.mxu1 %v12260_v45  ;;  %5065 = vmatpush1.bf16.msra.mxu1 %v5053_v32  ;;  %vm12355_vm15 = vmmov %vm12351_vm4 }
0x101c   : > { %8714 = vmatmul.mubr.msk.bf16.vlgmr.msra.gmra.mrb[156].mxu0 %vm12349_vm5, %v9293_v38  ;;  %vm12354_vm5 = vmmov %vm12351_vm4 }
0x101d   : > { %4960 = vmatprep.mubr.bf16.mxu0 %v12260_v45  ;;  %5141 = vmatpush1.bf16.msra.mxu0 %v5059_v55  ;;  %vm12356_vm2 = vmmov %vm12351_vm4 }
0x101e   : > { %vm12357_vm0 = vmmov %vm12356_vm2 }
0x1022   : > { %8709 = vmatmul.mubr.msk.bf16.gmra.mrb[168].mxu1 %vm12350_vm12, %v9294_v49  ;;  %vm12358_vm12 = vmmov %vm12357_vm0 }
0x1023   : > { %4896 = vmatprep.mubr.bf16.mxu1 %v12260_v45 }
0x1024   : > { %8715 = vmatmul.mubr.msk.bf16.gmra.mrb[160].mxu0 %vm12351_vm4, %v9294_v49  ;;  %vm12359_vm4 = vcmask 31744  }
0x1025   : > { %4968 = vmatprep.mubr.bf16.mxu0 %v12260_v45 }
0x102a   : > { %8710 = vmatmul.mubr.msk.bf16.gmra.mrb[172].mxu1 %vm12353_vm10, %v9295_v59  ;;  %vm12360_vm10 = vmmov %vm12359_vm4 }
0x102b   : > { %4904 = vmatprep.mubr.bf16.mxu1 %v12260_v45 }
0x102c   : > { %8716 = vmatmul.mubr.msk.bf16.gmra.mrb[164].mxu0 %vm12354_vm5, %v9295_v59  ;;  %vm12361_vm5 = vmmov %vm12359_vm4 }
0x102d   : > { %4977 = vmatprep.mubr.bf16.mxu0 %v12260_v45 }
0x1032   : > { %8711 = vmatmul.mubr.msk.bf16.gmra.mrb[176].mxu1 %vm12355_vm15, %v9296_v50  ;;  %vm12362_vm15 = vmmov %vm12359_vm4 }
0x1033   : > { %4912 = vmatprep.mubr.bf16.mxu1 %v12260_v45 }
0x1034   : > { %8717 = vmatmul.mubr.msk.bf16.gmra.mrb[168].mxu0 %vm12356_vm2, %v9296_v50  ;;  %vm12363_vm2 = vmmov %vm12359_vm4 }
0x1035   : > { %4987 = vmatprep.mubr.bf16.mxu0 %v12260_v45 }
0x103a   : > { %8712 = vmatmul.mubr.msk.bf16.gmra.mrb[180].mxu1 %vm12357_vm0, %v9297_v36  ;;  %vm12364_vm0 = vmmov %vm12363_vm2 }
0x103b   : > { %5096 = vmatprep.mubr.bf16.mxu1 %v12260_v45 }
0x103c   : > { %8718 = vmatmul.mubr.msk.bf16.gmra.mrb[172].mxu0 %vm12358_vm12, %v9297_v36  ;;  %vm12365_vm12 = vmmov %vm12364_vm0 }
0x103d   : > { %5172 = vmatprep.mubr.bf16.mxu0 %v12260_v45 }
0x1042   : > { %8725 = vmatmul.mubr.msk.bf16.vlgmr.msra.gmra.mrb[164].mxu1 %vm12359_vm4, %v9299_v29  ;;  %vm12366_vm4 = vmmov %vm12364_vm0 }
0x1043   : > { %5106 = vmatprep.mubr.bf16.mxu1 %v12260_v45 }
0x1044   : > { %8731 = vmatmul.mubr.msk.bf16.vlgmr.msra.gmra.mrb[156].mxu0 %vm12360_vm10, %v9299_v29  ;;  %vm12367_vm10 = vmmov %vm12364_vm0 }
0x1045   : > { %5180 = vmatprep.mubr.bf16.mxu0 %v12260_v45 }
0x104a   : > { %8726 = vmatmul.mubr.msk.bf16.gmra.mrb[168].mxu1 %vm12361_vm5, %v9300_v33  ;;  %vm12368_vm5 = vmmov %vm12364_vm0 }
0x104b   : > { %5116 = vmatprep.mubr.bf16.mxu1 %v12260_v45 }
0x104c   : > { %8732 = vmatmul.mubr.msk.bf16.gmra.mrb[160].mxu0 %vm12362_vm15, %v9300_v33  ;;  %vm12372_vm15 = vcmask 900096  }
0x104d   : > { %5188 = vmatprep.mubr.bf16.mxu0 %v12260_v45 }
0x1052   : > { %8727 = vmatmul.mubr.msk.bf16.gmra.mrb[172].mxu1 %vm12363_vm2, %v9301_v52  ;;  %vm12373_vm2 = vmmov %vm12372_vm15 }
0x1053   : > { %5124 = vmatprep.mubr.bf16.mxu1 %v12260_v45 }
0x1054   : > { %8733 = vmatmul.mubr.msk.bf16.gmra.mrb[164].mxu0 %vm12364_vm0, %v9301_v52  ;;  %vm12374_vm0 = vcmask 777216  }
0x1055   : > { %5197 = vmatprep.mubr.bf16.mxu0 %v12260_v45 }
0x105a   : > { %8728 = vmatmul.mubr.msk.bf16.gmra.mrb[176].mxu1 %vm12365_vm12, %v9302_v15  ;;  %vm12375_vm12 = vmmov %vm12374_vm0 }
0x105b   : > { %5132 = vmatprep.mubr.bf16.mxu1 %v12260_v45 }
0x105c   : > { %8734 = vmatmul.mubr.msk.bf16.gmra.mrb[168].mxu0 %vm12366_vm4, %v9302_v15  ;;  %vm12378_vm4 = vcmask 64512  }
0x105d   : > { %5207 = vmatprep.mubr.bf16.mxu0 %v12260_v45 }
0x1062   : > { %8729 = vmatmul.mubr.msk.bf16.gmra.mrb[180].mxu1 %vm12367_vm10, %v9303_v28  ;;  %vm12379_vm10 = vmmov %vm12378_vm4 }
0x1063   : > { %5502 = vmatprep.mubr.bf16.mxu1 %v12260_v45 }
0x1064   : > { %8735 = vmatmul.mubr.msk.bf16.gmra.mrb[172].mxu0 %vm12368_vm5, %v9303_v28  ;;  %vm12380_vm5 = vmmov %vm12378_vm4 }
0x1065   : > { %5578 = vmatprep.mubr.bf16.mxu0 %v12260_v45 }
0x1115   : > { %v10991_v12 = vpop.f32.mrb[164].mxu1 }
0x1116   : > { %v10993_v48 = vpop.f32.mrb[165].mxu1 }
0x1117   : > { %v5102_v7 = vpop.f32.mrb[166].mxu1  ;;  %v10995_v40 = vpop.f32.mrb[156].mxu0 }
0x1118   : > { %5222 = vrot.lane.b32.xlu1 %v5102_v7, %s12145_s11  ;;  %v5104_v57 = vpop.f32.mrb[167].mxu1  ;;  %v5176_v35 = vpop.f32.mrb[157].mxu0 }
0x1119   : > { %5224 = vrot.lane.b32.xlu0 %v5104_v57, %s12145_s11  ;;  %v5177_v8 = vpop.f32.mrb[158].mxu0 }
0x111a   : > { %v5179_v46 = vpop.f32.mrb[159].mxu0 }
0x111c   : > { %5226 = vrot.lane.b32.xlu1 %v5177_v8, %s12145_s11  ;;  %s12370_s11 = smov 96  }
0x111d   : > { %v5108_v22 = vpop.f32.mrb[168].mxu1 }
0x111e   : > { %v5236_v60 = vmul.f32 %v5108_v22, %v12304_v43  ;;  %v5110_v2 = vpop.f32.mrb[169].mxu1 }
0x111f   : > { %v5237_v47 = vmul.f32 %v5110_v2, %v12302_v9  ;;  %v5112_v17 = vpop.f32.mrb[170].mxu1  ;;  %v5182_v53 = vpop.f32.mrb[160].mxu0 }
0x1120   : > { %5242 = vrot.lane.b32.xlu0 %v5236_v60, %s12369_s15  ;;  %v5114_v61 = vpop.f32.mrb[171].mxu1  ;;  %v5184_v0 = vpop.f32.mrb[161].mxu0  ;;  %v5238_v54 = vmul.f32 %v5182_v53, %v12303_v16  ;;  %v5256_v38 = vmul.f32 %v5112_v17, %v12306_v39 }
0x1121   : > { %5244 = vrot.lane.b32.xlu1 %v5237_v47, %s12369_s15  ;;  %v5185_v18 = vpop.f32.mrb[162].mxu0  ;;  %v5257_v23 = vmul.f32 %v5114_v61, %v12307_v26 }
0x1122   : > { %v5187_v14 = vpop.f32.mrb[163].mxu0  ;;  %v5258_v55 = vmul.f32 %v5185_v18, %v12305_v37 }
0x1124   : > { %5246 = vrot.lane.b32.xlu0 %v5238_v54, %s12369_s15 }
0x1125   : > { %v5118_v13 = vpop.f32.mrb[172].mxu1  ;;  %5262 = vrot.lane.b32.xlu1 %v5256_v38, %s12282_s22 }
0x1126   : > { %v5119_v32 = vpop.f32.mrb[173].mxu1 }
0x1127   : > { %v5121_v49 = vpop.f32.mrb[174].mxu1  ;;  %v5190_v59 = vpop.f32.mrb[164].mxu0 }
0x1128   : > { %v5122_v50 = vpop.f32.mrb[175].mxu1  ;;  %5264 = vrot.lane.b32.xlu0 %v5257_v23, %s12282_s22  ;;  %v5192_v36 = vpop.f32.mrb[165].mxu0 }
0x1129   : > { %5266 = vrot.lane.b32.xlu1 %v5258_v55, %s12282_s22  ;;  %v5193_v29 = vpop.f32.mrb[166].mxu0  ;;  %v5289_v15 = vmul.f32 %v5122_v50, %v12311_v25 }
0x112a   : > { %v5195_v33 = vpop.f32.mrb[167].mxu0  ;;  %v5290_v7 = vmul.f32 %v5193_v29, %v12308_v6 }
0x112b   : > { %v5291_v60 = vmul.f32 %v5195_v33, %v12309_v4 }
0x112c   : > { %5278 = vrot.lane.b32.xlu0 %v5119_v32, %s12278_s18 }
0x112d   : > { %v5126_v52 = vpop.f32.mrb[176].mxu1  ;;  %5280 = vrot.lane.b32.xlu1 %v5190_v59, %s12278_s18  ;;  %v11035_v59 = vpop.permute.xlu0 %5369 }
0x112e   : > { %v5127_v28 = vpop.f32.mrb[177].mxu1 }
0x112f   : > { %v5129_v57 = vpop.f32.mrb[178].mxu1  ;;  %v5199_v35 = vpop.f32.mrb[168].mxu0  ;;  %v5309_v47 = vmul.f32 %v5127_v28, %v12315_v34 }
0x1130   : > { %v5130_v8 = vpop.f32.mrb[179].mxu1  ;;  %5295 = vrot.lane.b32.xlu0 %v5289_v15, %s12310_s16  ;;  %v5201_v46 = vpop.f32.mrb[169].mxu0  ;;  %v5310_v53 = vmul.f32 %v5199_v35, %v12313_v24 }
0x1131   : > { %5297 = vrot.lane.b32.xlu1 %v5290_v7, %s12310_s16  ;;  %v5203_v22 = vpop.f32.mrb[170].mxu0  ;;  %v5311_v23 = vmul.f32 %v5201_v46, %v12312_v41 }
0x1132   : > { %v5205_v2 = vpop.f32.mrb[171].mxu0 }
0x1134   : > { %5299 = vrot.lane.b32.xlu0 %v5291_v60, %s12310_s16  ;;  %v5216_v60 = vmul.f32 %v10991_v12, %v12319_v44 }
0x1135   : > { %v5134_v17 = vpop.f32.mrb[180].mxu1  ;;  %5315 = vrot.lane.b32.xlu1 %v5309_v47, %s12370_s11 }
0x1136   : > { %v5135_v61 = vpop.f32.mrb[181].mxu1 }
0x1137   : > { %v5137_v0 = vpop.f32.mrb[182].mxu1  ;;  %v5209_v18 = vpop.f32.mrb[172].mxu0  ;;  %v5346_v32 = vmul.f32 %v5135_v61, %v12316_v5 }
0x1138   : > { %v5138_v54 = vpop.f32.mrb[183].mxu1  ;;  %5317 = vrot.lane.b32.xlu0 %v5310_v53, %s12370_s11  ;;  %v5211_v14 = vpop.f32.mrb[173].mxu0  ;;  %v5347_v49 = vmul.f32 %v5209_v18, %v12317_v3 }
0x1139   : > { %5332 = vrot.lane.b32.xlu1 %v5130_v8, %s12314_s10  ;;  %v5213_v38 = vpop.f32.mrb[174].mxu0  ;;  %v5348_v55 = vmul.f32 %v5211_v14, %v12318_v42  ;;  %v5217_v14 = vmul.f32 %v10993_v48, %v12320_v27 }
0x113a   : > { %v5214_v13 = vpop.f32.mrb[175].mxu0  ;;  %v5218_v38 = vmul.f32 %v10995_v40, %v12321_v1 }
0x113c   : > { %5334 = vrot.lane.b32.xlu0 %v5203_v22, %s12314_s10 }
0x113d   : > { %5319 = vrot.lane.b32.xlu1 %v5311_v23, %s12370_s11 }
0x1140   : > { %5352 = vrot.lane.b32.xlu0 %v5346_v32, %s12371_s2 }
0x1141   : > { %5336 = vrot.lane.b32.xlu1 %v5205_v2, %s12314_s10 }
0x1144   : > { %5356 = vrot.lane.b32.xlu0 %v5348_v55, %s12371_s2 }
0x1145   : > { %5354 = vrot.lane.b32.xlu1 %v5347_v49, %s12371_s2 }
0x118a   : > { %v5223_v50 = vpop.permute.xlu1 %5222 }
0x118b   : > { %v5225_v36 = vpop.permute.xlu0 %5224 }
0x118c   : > { %v5228_v46 = vsel %vm1444_vm3, %v5223_v50, %v5225_v36 }
0x118d   : > { %v5233_v17 = vadd.f32 %v5228_v46, %v5216_v60 }
0x118e   : > { %v5227_v29 = vpop.permute.xlu1 %5226 }
0x118f   : > { %v5229_v54 = vsel %vm1444_vm3, %v5225_v36, %v5227_v29  ;;  %v5235_v55 = vadd.f32 %v5227_v29, %v5218_v38 }
0x1190   : > { %v5234_v32 = vadd.f32 %v5229_v54, %v5217_v14 }
0x1192   : > { %v5243_v33 = vpop.permute.xlu0 %5242 }
0x1193   : > { %v5245_v52 = vpop.permute.xlu1 %5244 }
0x1194   : > { %v5248_v47 = vsel %vm1483_vm7, %v5243_v33, %v5245_v52 }
0x1195   : > { %v5253_v0 = vadd.f32 %v5248_v47, %v5233_v17 }
0x1196   : > { %v5247_v15 = vpop.permute.xlu0 %5246 }
0x1197   : > { %v5263_v28 = vpop.permute.xlu1 %5262  ;;  %v5249_v12 = vsel %vm1483_vm7, %v5245_v52, %v5247_v15 }
0x1198   : > { %v5254_v33 = vadd.f32 %v5249_v12, %v5234_v32 }
0x119a   : > { %v5265_v7 = vpop.permute.xlu0 %5264 }
0x119b   : > { %v5267_v57 = vpop.permute.xlu1 %5266  ;;  %v5268_v53 = vsel %vm1512_vm9, %v5263_v28, %v5265_v7  ;;  %v5255_v28 = vadd.f32 %v5247_v15, %v5235_v55 }
0x119c   : > { %v5273_v13 = vadd.f32 %v5268_v53, %v5253_v0  ;;  %v5269_v50 = vsel %vm1512_vm9, %v5265_v7, %v5267_v57 }
0x119d   : > { %v5274_v47 = vadd.f32 %v5269_v50, %v5254_v33  ;;  %v5275_v48 = vadd.f32 %v5267_v57, %v5255_v28 }
0x119e   : > { %v5279_v35 = vpop.permute.xlu0 %5278 }
0x119f   : > { %v5281_v8 = vpop.permute.xlu1 %5280  ;;  %v5286_v46 = vadd.f32 %v5279_v35, %v5273_v13 }
0x11a0   : > { %v5282_v36 = vsel %vm1427_vm8, %v5279_v35, %v5281_v8  ;;  %v5288_v0 = vadd.f32 %v5281_v8, %v5275_v48 }
0x11a1   : > { %v5287_v53 = vadd.f32 %v5282_v36, %v5274_v47 }
0x11a2   : > { %v5296_v22 = vpop.permute.xlu0 %5295 }
0x11a3   : > { %v5298_v2 = vpop.permute.xlu1 %5297  ;;  %v5306_v17 = vadd.f32 %v5296_v22, %v5286_v46 }
0x11a4   : > { %v5301_v40 = vsel %vm12372_vm15, %v5296_v22, %v5298_v2  ;;  %vm12381_vm15 = vmmov %vm12378_vm4 }
0x11a5   : > { %v5307_v14 = vadd.f32 %v5301_v40, %v5287_v53  ;;  %v5772_v40 = vld [vmem:[%s12376_s3] sm:$0xff]  ;;  %s12388_s3 = smov 127  }
0x11a6   : > { %v5300_v61 = vpop.permute.xlu0 %5299 }
0x11a7   : > { %v5316_v18 = vpop.permute.xlu1 %5315  ;;  %v5302_v52 = vsel %vm12373_vm2, %v5298_v2, %v5300_v61  ;;  %vm12382_vm2 = vmmov %vm12378_vm4 }
0x11a8   : > { %v5326_v29 = vadd.f32 %v5316_v18, %v5306_v17  ;;  %v5308_v38 = vadd.f32 %v5302_v52, %v5288_v0 }
0x11aa   : > { %v5318_v23 = vpop.permute.xlu0 %5317 }
0x11ab   : > { %v5333_v49 = vpop.permute.xlu1 %5332  ;;  %v5321_v54 = vsel %vm1585_vm11, %v5316_v18, %v5318_v23 }
0x11ac   : > { %v5343_v35 = vadd.f32 %v5333_v49, %v5326_v29  ;;  %v5327_v32 = vadd.f32 %v5321_v54, %v5307_v14 }
0x11ae   : > { %v5335_v60 = vpop.permute.xlu0 %5334 }
0x11af   : > { %v5320_v19 = vpop.permute.xlu1 %5319  ;;  %v5338_v57 = vsel %vm12374_vm0, %v5333_v49, %v5335_v60  ;;  %vm12383_vm0 = vmmov %vm12382_vm2 }
0x11b0   : > { %v5322_v7 = vsel %vm1585_vm11, %v5318_v23, %v5320_v19  ;;  %v5344_v61 = vadd.f32 %v5338_v57, %v5327_v32  ;;  %v9308_v32 = vld [vmem:[%s12377_s5] sm:$0xff]  }
0x11b1   : > { %v5328_v22 = vadd.f32 %v5322_v7, %v5308_v38 }
0x11b2   : > { %v5353_v15 = vpop.permute.xlu0 %5352 }
0x11b3   : > { %v5337_v13 = vpop.permute.xlu1 %5336  ;;  %v5363_v55 = vadd.f32 %v5353_v15, %v5343_v35 }
0x11b4   : > { %v5339_v12 = vsel %vm12375_vm12, %v5335_v60, %v5337_v13  ;;  %vm12384_vm12 = vmmov %vm12383_vm0 }
0x11b5   : > { %v5345_v8 = vadd.f32 %v5339_v12, %v5328_v22  ;;  %v5372_v23 = vadd.f32 %v11035_v59, %v5363_v55  ;;  %v9309_v22 = vld [vmem:[%s12377_s5 + $0x8] sm:$0xff]   ;;  %v9310_v55 = vld [vmem:[%s12377_s5 + $0x10] sm:$0xff]  }
0x11b6   : > { %v5357_v2 = vpop.permute.xlu0 %5356 }
0x11b7   : > { %v5355_v50 = vpop.permute.xlu1 %5354  ;;  %v5375_v36 = vmax.f32 %v5372_v23, 0.0 }
0x11b8   : > { %v5358_v18 = vsel %vm1633_vm13, %v5353_v15, %v5355_v50  ;;  %v5359_v19 = vsel %vm1633_vm13, %v5355_v50, %v5357_v2  ;;  %v9311_v2 = vld [vmem:[%s12377_s5 + $0x18] sm:$0xff]  }
0x11b9   : > { %v5364_v33 = vadd.f32 %v5358_v18, %v5344_v61  ;;  %v5365_v28 = vadd.f32 %v5359_v19, %v5345_v8  ;;  %v9312_v61 = vld [vmem:[%s12377_s5 + $0x20] ss:$0 sps:$4 sm:$0xff]   ;;  %s12393_s5 = sld [smem:[#allocation30_spill]] }
0x11bb   : > { %v5373_v49 = vadd.f32 %v11035_v59, %v5364_v33  ;;  %v5374_v46 = vadd.f32 %v11035_v59, %v5365_v28 }
0x11bd   : > { %v5376_v60 = vmax.f32 %v5373_v49, 0.0  ;;  %v5377_v47 = vmax.f32 %v5374_v46, 0.0 }
0x11bf   : > { %v8895_v48 = vpack.c.bf16 %v5376_v60, %v5375_v36  ;;  %v8896_v17 = vpack.c.bf16 %v5377_v47, %v5377_v47 }
0x11c1   : > { %5389 = vrot.lane.b32.xlu1 %v8895_v48, %s12290_s26  ;;  %5391 = vrot.lane.b32.xlu0 %v8896_v17, %s12290_s26 }
0x11c5   : > { %5775 = vperm.xlu0 %9221, %v5772_v40  }
0x1233   : > { %v5390_v52 = vpop.permute.xlu1 %5389  ;;  %v5392_v53 = vpop.permute.xlu0 %5391 }
0x1234   : > { %v5393_v0 = vrot.slane %v5390_v52, 4  ;;  %v5394_v29 = vrot.slane %v5392_v53, 4 }
0x1236   : > { %v5395_v54 = vsel %vm1671_vm14, %v5393_v0, %v5394_v29 }
0x1237   : > { %v5396_v59 = vsel %vm1616_vm6, %v5390_v52, %v5395_v54 }
0x1238   : > { %5398 = vst [vmem:[#allocation4 + $0x4] sm:$0xff] %v5396_v59 }
0x123f   : > { %v5408_v7 = vld [vmem:[#allocation4] sm:$0xff]  ;;  %v5409_v15 = vld [vmem:[#allocation4 + $0x8] sm:$0xff] }
0x1240   : > { %v8744_v14 = vcombine.high %v5408_v7, %v5408_v7  ;;  %v8746_v38 = vcombine.high %v5409_v15, %v5409_v15  ;;  %v8743_v35 = vcombine.low %v5408_v7, %v5408_v7  ;;  %v8745_v13 = vcombine.low %v5409_v15, %v5409_v15 }
0x1242   : > { %8747 = vmatprep.subr.msk.bf16.mxu1 %vm1671_vm14, %v8744_v14  ;;  %8753 = vmatprep.subr.msk.bf16.mxu0 %vm1671_vm14, %v8746_v38  ;;  %v5459_v57 = vsel %vm1671_vm14, %v8743_v35, 0  ;;  %v5465_v12 = vsel %vm1671_vm14, %v8745_v13, 0 }
0x1243   : > { %5471 = vmatpush1.bf16.msra.mxu1 %v5459_v57  ;;  %5547 = vmatpush1.bf16.msra.mxu0 %v5465_v12 }
0x1246   : > { %8748 = vmatmul.mubr.msk.bf16.vlgmr.msra.gmra.mrb[184].mxu1 %vm12378_vm4, %v9308_v32  ;;  %8754 = vmatmul.mubr.msk.bf16.vlgmr.msra.gmra.mrb[176].mxu0 %vm12379_vm10, %v9308_v32  ;;  %vm12385_vm4 = vmmov %vm12383_vm0 }
0x1247   : > { %5512 = vmatprep.mubr.bf16.mxu1 %v12260_v45  ;;  %5586 = vmatprep.mubr.bf16.mxu0 %v12260_v45  ;;  %vm12386_vm10 = vmmov %vm12383_vm0 }
0x124e   : > { %8749 = vmatmul.mubr.msk.bf16.gmra.mrb[188].mxu1 %vm12380_vm5, %v9309_v22  ;;  %8755 = vmatmul.mubr.msk.bf16.gmra.mrb[180].mxu0 %vm12381_vm15, %v9309_v22  ;;  %vm12387_vm5 = vmmov %vm12383_vm0  ;;  %vm12389_vm15 = vcmask 900096  }
0x124f   : > { %5522 = vmatprep.mubr.bf16.mxu1 %v12260_v45  ;;  %5594 = vmatprep.mubr.bf16.mxu0 %v12260_v45 }
0x1256   : > { %8750 = vmatmul.mubr.msk.bf16.gmra.mrb[192].mxu1 %vm12382_vm2, %v9310_v55  ;;  %8756 = vmatmul.mubr.msk.bf16.gmra.mrb[184].mxu0 %vm12383_vm0, %v9310_v55  ;;  %vm12390_vm2 = vmmov %vm12389_vm15  ;;  %vm12391_vm0 = vcmask 777216  }
0x1257   : > { %5530 = vmatprep.mubr.bf16.mxu1 %v12260_v45  ;;  %5603 = vmatprep.mubr.bf16.mxu0 %v12260_v45 }
0x125e   : > { %8751 = vmatmul.mubr.msk.bf16.gmra.mrb[196].mxu1 %vm12384_vm12, %v9311_v2  ;;  %8757 = vmatmul.mubr.msk.bf16.gmra.mrb[188].mxu0 %vm12385_vm4, %v9311_v2  ;;  %vm12392_vm12 = vmmov %vm12391_vm0 }
0x125f   : > { %5538 = vmatprep.mubr.bf16.mxu1 %v12260_v45  ;;  %5613 = vmatprep.mubr.bf16.mxu0 %v12260_v45 }
0x1266   : > { %8752 = vmatmul.mubr.msk.bf16.gmra.mrb[200].mxu1 %vm12386_vm10, %v9312_v61  ;;  %8758 = vmatmul.mubr.msk.bf16.gmra.mrb[192].mxu0 %vm12387_vm5, %v9312_v61  ;;  %vm12395_vm10 = vmmov %vm12385_vm4 }
0x1267   : > { %5982 = vmatprep.mubr.bf16.mxu1 %v12260_v45  ;;  %6095 = vmatprep.mubr.bf16.mxu0 %v12260_v45  ;;  %vm12396_vm5 = vmmov %vm12385_vm4 }
0x1319   : > { %v11095_v8 = vpop.f32.mrb[184].mxu1  ;;  %v11097_v50 = vpop.f32.mrb[176].mxu0 }
0x131a   : > { %v11099_v18 = vpop.f32.mrb[185].mxu1  ;;  %v5582_v19 = vpop.f32.mrb[177].mxu0 }
0x131b   : > { %v5508_v23 = vpop.f32.mrb[186].mxu1  ;;  %v5583_v33 = vpop.f32.mrb[178].mxu0 }
0x131c   : > { %5628 = vrot.lane.b32.xlu1 %v5508_v23, %s12388_s3  ;;  %v5510_v28 = vpop.f32.mrb[187].mxu1  ;;  %v5585_v49 = vpop.f32.mrb[179].mxu0 }
0x131d   : > { %5630 = vrot.lane.b32.xlu0 %v5510_v28, %s12388_s3 }
0x1320   : > { %5632 = vrot.lane.b32.xlu1 %v5583_v33, %s12388_s3 }
0x1321   : > { %v5514_v46 = vpop.f32.mrb[188].mxu1  ;;  %v5588_v36 = vpop.f32.mrb[180].mxu0 }
0x1322   : > { %v5642_v60 = vmul.f32 %v5514_v46, %v12304_v43  ;;  %v5516_v47 = vpop.f32.mrb[189].mxu1  ;;  %v5590_v48 = vpop.f32.mrb[181].mxu0  ;;  %v5644_v29 = vmul.f32 %v5588_v36, %v12303_v16  ;;  %v12426_v43 = vld [vmem:[#allocation70_spill] sm:$0xff] }
0x1323   : > { %v5643_v17 = vmul.f32 %v5516_v47, %v12302_v9  ;;  %v5518_v40 = vpop.f32.mrb[190].mxu1  ;;  %v5591_v52 = vpop.f32.mrb[182].mxu0 }
0x1324   : > { %5648 = vrot.lane.b32.xlu0 %v5642_v60, %s12369_s15  ;;  %v5520_v53 = vpop.f32.mrb[191].mxu1  ;;  %v5593_v0 = vpop.f32.mrb[183].mxu0  ;;  %v5662_v54 = vmul.f32 %v5518_v40, %v12306_v39  ;;  %v5664_v35 = vmul.f32 %v5591_v52, %v12305_v37 }
0x1325   : > { %5650 = vrot.lane.b32.xlu1 %v5643_v17, %s12369_s15  ;;  %v5663_v15 = vmul.f32 %v5520_v53, %v12307_v26 }
0x1328   : > { %5652 = vrot.lane.b32.xlu0 %v5644_v29, %s12369_s15 }
0x1329   : > { %v5524_v59 = vpop.f32.mrb[192].mxu1  ;;  %5668 = vrot.lane.b32.xlu1 %v5662_v54, %s12282_s22  ;;  %v5596_v7 = vpop.f32.mrb[184].mxu0 }
0x132a   : > { %v5525_v14 = vpop.f32.mrb[193].mxu1  ;;  %v5598_v38 = vpop.f32.mrb[185].mxu0 }
0x132b   : > { %v5527_v13 = vpop.f32.mrb[194].mxu1  ;;  %v5599_v57 = vpop.f32.mrb[186].mxu0 }
0x132c   : > { %v5528_v12 = vpop.f32.mrb[195].mxu1  ;;  %5670 = vrot.lane.b32.xlu0 %v5663_v15, %s12282_s22  ;;  %v5601_v32 = vpop.f32.mrb[187].mxu0  ;;  %v5696_v23 = vmul.f32 %v5599_v57, %v12308_v6 }
0x132d   : > { %5672 = vrot.lane.b32.xlu1 %v5664_v35, %s12282_s22  ;;  %v5695_v2 = vmul.f32 %v5528_v12, %v12311_v25  ;;  %v5697_v36 = vmul.f32 %v5601_v32, %v12309_v4  ;;  %v11139_v38 = vpop.permute.xlu0 %5775 }
0x1330   : > { %5684 = vrot.lane.b32.xlu0 %v5525_v14, %s12278_s18 }
0x1331   : > { %v5532_v22 = vpop.f32.mrb[196].mxu1  ;;  %5686 = vrot.lane.b32.xlu1 %v5596_v7, %s12278_s18  ;;  %v5605_v55 = vpop.f32.mrb[188].mxu0 }
0x1332   : > { %v5533_v61 = vpop.f32.mrb[197].mxu1  ;;  %v5607_v19 = vpop.f32.mrb[189].mxu0  ;;  %v5716_v17 = vmul.f32 %v5605_v55, %v12313_v24 }
0x1333   : > { %v5535_v33 = vpop.f32.mrb[198].mxu1  ;;  %v5609_v28 = vpop.f32.mrb[190].mxu0  ;;  %v5715_v60 = vmul.f32 %v5533_v61, %v12315_v34  ;;  %v5717_v53 = vmul.f32 %v5607_v19, %v12312_v41 }
0x1334   : > { %5701 = vrot.lane.b32.xlu0 %v5695_v2, %s12310_s16  ;;  %v5536_v49 = vpop.f32.mrb[199].mxu1  ;;  %v5611_v46 = vpop.f32.mrb[191].mxu0 }
0x1335   : > { %5703 = vrot.lane.b32.xlu1 %v5696_v23, %s12310_s16 }
0x1338   : > { %5705 = vrot.lane.b32.xlu0 %v5697_v36, %s12310_s16 }
0x1339   : > { %v5540_v47 = vpop.f32.mrb[200].mxu1  ;;  %5721 = vrot.lane.b32.xlu1 %v5715_v60, %s12370_s11  ;;  %v5615_v48 = vpop.f32.mrb[192].mxu0 }
0x133a   : > { %v5541_v40 = vpop.f32.mrb[201].mxu1  ;;  %v5617_v52 = vpop.f32.mrb[193].mxu0  ;;  %v5753_v14 = vmul.f32 %v5615_v48, %v12317_v3 }
0x133b   : > { %v5543_v0 = vpop.f32.mrb[202].mxu1  ;;  %v5619_v29 = vpop.f32.mrb[194].mxu0  ;;  %v5752_v7 = vmul.f32 %v5541_v40, %v12316_v5  ;;  %v5754_v15 = vmul.f32 %v5617_v52, %v12318_v42 }
0x133c   : > { %5723 = vrot.lane.b32.xlu0 %v5716_v17, %s12370_s11  ;;  %v5544_v54 = vpop.f32.mrb[203].mxu1  ;;  %v5620_v59 = vpop.f32.mrb[195].mxu0  ;;  %v5624_v0 = vmul.f32 %v11097_v50, %v12321_v1  ;;  %v5623_v29 = vmul.f32 %v11099_v18, %v12320_v27  ;;  %v12420_v27 = vld [vmem:[#allocation64_spill] sm:$0xff] }
0x133d   : > { %5725 = vrot.lane.b32.xlu1 %v5717_v53, %s12370_s11 }
0x1340   : > { %5740 = vrot.lane.b32.xlu0 %v5609_v28, %s12314_s10  ;;  %v5622_v28 = vmul.f32 %v11095_v8, %v12319_v44 }
0x1341   : > { %5738 = vrot.lane.b32.xlu1 %v5536_v49, %s12314_s10 }
0x1344   : > { %5758 = vrot.lane.b32.xlu0 %v5752_v7, %s12371_s2 }
0x1345   : > { %5742 = vrot.lane.b32.xlu1 %v5611_v46, %s12314_s10 }
0x1348   : > { %5762 = vrot.lane.b32.xlu0 %v5754_v15, %s12371_s2 }
0x1349   : > { %5760 = vrot.lane.b32.xlu1 %v5753_v14, %s12371_s2 }
0x138e   : > { %v5629_v35 = vpop.permute.xlu1 %5628 }
0x138f   : > { %v5631_v13 = vpop.permute.xlu0 %5630 }
0x1390   : > { %v5634_v33 = vsel %vm1444_vm3, %v5629_v35, %v5631_v13 }
0x1391   : > { %v5639_v36 = vadd.f32 %v5634_v33, %v5622_v28 }
0x1392   : > { %v5633_v57 = vpop.permute.xlu1 %5632 }
0x1393   : > { %v5635_v53 = vsel %vm1444_vm3, %v5631_v13, %v5633_v57  ;;  %v5641_v7 = vadd.f32 %v5633_v57, %v5624_v0 }
0x1394   : > { %v5640_v59 = vadd.f32 %v5635_v53, %v5623_v29 }
0x1396   : > { %v5649_v12 = vpop.permute.xlu0 %5648 }
0x1397   : > { %v5651_v32 = vpop.permute.xlu1 %5650 }
0x1398   : > { %v5654_v49 = vsel %vm1483_vm7, %v5649_v12, %v5651_v32 }
0x1399   : > { %v5659_v48 = vadd.f32 %v5654_v49, %v5639_v36 }
0x139a   : > { %v5653_v22 = vpop.permute.xlu0 %5652 }
0x139b   : > { %v5669_v55 = vpop.permute.xlu1 %5668  ;;  %v5655_v8 = vsel %vm1483_vm7, %v5651_v32, %v5653_v22 }
0x139c   : > { %v5660_v12 = vadd.f32 %v5655_v8, %v5640_v59 }
0x139e   : > { %v5671_v2 = vpop.permute.xlu0 %5670 }
0x139f   : > { %v5673_v61 = vpop.permute.xlu1 %5672  ;;  %v5674_v47 = vsel %vm1512_vm9, %v5669_v55, %v5671_v2  ;;  %v5661_v55 = vadd.f32 %v5653_v22, %v5641_v7 }
0x13a0   : > { %v5679_v40 = vadd.f32 %v5674_v47, %v5659_v48  ;;  %v5675_v35 = vsel %vm1512_vm9, %v5671_v2, %v5673_v61 }
0x13a1   : > { %v5680_v49 = vadd.f32 %v5675_v35, %v5660_v12  ;;  %v5681_v50 = vadd.f32 %v5673_v61, %v5661_v55 }
0x13a2   : > { %v5685_v19 = vpop.permute.xlu0 %5684 }
0x13a3   : > { %v5687_v23 = vpop.permute.xlu1 %5686  ;;  %v5692_v15 = vadd.f32 %v5685_v19, %v5679_v40 }
0x13a4   : > { %v5688_v13 = vsel %vm1427_vm8, %v5685_v19, %v5687_v23  ;;  %v5694_v57 = vadd.f32 %v5687_v23, %v5681_v50 }
0x13a5   : > { %v5693_v48 = vadd.f32 %v5688_v13, %v5680_v49 }
0x13a6   : > { %v5702_v46 = vpop.permute.xlu0 %5701 }
0x13a7   : > { %v5704_v60 = vpop.permute.xlu1 %5703  ;;  %v5712_v33 = vadd.f32 %v5702_v46, %v5692_v15 }
0x13a8   : > { %v5707_v18 = vsel %vm12389_vm15, %v5702_v46, %v5704_v60  ;;  %vm12397_vm15 = vmmov %vm12385_vm4 }
0x13a9   : > { %v5713_v0 = vadd.f32 %v5707_v18, %v5693_v48 }
0x13aa   : > { %v5706_v17 = vpop.permute.xlu0 %5705 }
0x13ab   : > { %v5722_v52 = vpop.permute.xlu1 %5721  ;;  %v5708_v32 = vsel %vm12390_vm2, %v5704_v60, %v5706_v17  ;;  %vm12398_vm2 = vmmov %vm12385_vm4 }
0x13ac   : > { %v5732_v36 = vadd.f32 %v5722_v52, %v5712_v33  ;;  %v5714_v29 = vadd.f32 %v5708_v32, %v5694_v57 }
0x13ae   : > { %v5724_v54 = vpop.permute.xlu0 %5723 }
0x13af   : > { %v5726_v14 = vpop.permute.xlu1 %5725  ;;  %v5727_v53 = vsel %vm1585_vm11, %v5722_v52, %v5724_v54 }
0x13b0   : > { %v5728_v2 = vsel %vm1585_vm11, %v5724_v54, %v5726_v14  ;;  %v5733_v59 = vadd.f32 %v5727_v53, %v5713_v0 }
0x13b1   : > { %v5734_v7 = vadd.f32 %v5728_v2, %v5714_v29 }
0x13b2   : > { %v5741_v28 = vpop.permute.xlu0 %5740 }
0x13b3   : > { %v5739_v47 = vpop.permute.xlu1 %5738 }
0x13b4   : > { %v5749_v40 = vadd.f32 %v5739_v47, %v5732_v36  ;;  %v5744_v8 = vsel %vm12391_vm0, %v5739_v47, %v5741_v28  ;;  %v5807_v47 = vld [vmem:[#allocation5 + $0xc] sm:$0xf]  ;;  %vm12399_vm0 = vmmov %vm12398_vm2 }
0x13b5   : > { %v5750_v60 = vadd.f32 %v5744_v8, %v5733_v59 }
0x13b6   : > { %v5759_v22 = vpop.permute.xlu0 %5758 }
0x13b7   : > { %v5743_v19 = vpop.permute.xlu1 %5742  ;;  %v5769_v46 = vadd.f32 %v5759_v22, %v5749_v40 }
0x13b8   : > { %v5745_v61 = vsel %vm12392_vm12, %v5741_v28, %v5743_v19  ;;  %vm12400_vm12 = vmmov %vm12399_vm0 }
0x13b9   : > { %v5751_v17 = vadd.f32 %v5745_v61, %v5734_v7  ;;  %v5778_v54 = vadd.f32 %v11139_v38, %v5769_v46  ;;  %v6476_v7 = vld [vmem:[%s12393_s5] sm:$0xff] }
0x13ba   : > { %v5763_v15 = vpop.permute.xlu0 %5762 }
0x13bb   : > { %v5761_v23 = vpop.permute.xlu1 %5760  ;;  %v5781_v13 = vmax.f32 %v5778_v54, 0.0 }
0x13bc   : > { %v5764_v35 = vsel %vm1633_vm13, %v5759_v22, %v5761_v23  ;;  %v5765_v52 = vsel %vm1633_vm13, %v5761_v23, %v5763_v15  ;;  %v6477_v22 = vld [vmem:[%s12393_s5 + $0x8] sm:$0xff]  ;;  %s12411_s5 = smov 124  }
0x13bd   : > { %v5770_v14 = vadd.f32 %v5764_v35, %v5750_v60  ;;  %v5771_v12 = vadd.f32 %v5765_v52, %v5751_v17 }
0x13bf   : > { %v5779_v55 = vadd.f32 %v11139_v38, %v5770_v14  ;;  %v5780_v33 = vadd.f32 %v11139_v38, %v5771_v12 }
0x13c1   : > { %v5782_v28 = vmax.f32 %v5779_v55, 0.0  ;;  %v5783_v49 = vmax.f32 %v5780_v33, 0.0 }
0x13c3   : > { %v8897_v50 = vpack.c.bf16 %v5782_v28, %v5781_v13  ;;  %v8898_v36 = vpack.c.bf16 %v5783_v49, %v5783_v49 }
0x13c5   : > { %5795 = vrot.lane.b32.xlu1 %v8897_v50, %s12290_s26  ;;  %5797 = vrot.lane.b32.xlu0 %v8898_v36, %s12290_s26  ;;  %v9317_v50 = vld [vmem:[%s12394_s6] sm:$0xff]   ;;  %v9318_v36 = vld [vmem:[%s12394_s6 + $0x8] sm:$0xff]  }
0x13c9   : > { %5812 = vrot.lane.b32.xlu0 %v5807_v47, %s12388_s3 }
0x1437   : > { %v5796_v18 = vpop.permute.xlu1 %5795  ;;  %v5798_v32 = vpop.permute.xlu0 %5797 }
0x1438   : > { %v5799_v48 = vrot.slane %v5796_v18, 4  ;;  %v5800_v57 = vrot.slane %v5798_v32, 4  ;;  %v9321_v32 = vld [vmem:[%s12394_s6 + $0x20] sm:$0xff]  }
0x143a   : > { %v5801_v40 = vsel %vm1671_vm14, %v5799_v48, %v5800_v57  ;;  %v9322_v48 = vld [vmem:[%s12394_s6 + $0x28] sm:$0xff]   ;;  %v9323_v57 = vld [vmem:[%s12394_s6 + $0x30] sm:$0xff]  }
0x143b   : > { %v5802_v38 = vsel %vm1616_vm6, %v5796_v18, %v5801_v40  ;;  %v5813_v53 = vpop.permute.xlu0 %5812  ;;  %v9320_v18 = vld [vmem:[%s12394_s6 + $0x18] sm:$0xff]  }
0x143c   : > { %5804 = vst [vmem:[#allocation5 + $0x4] sm:$0xff] %v5802_v38  ;;  %v5822_v2 = vmax.bf16 %v5813_v53, %v5807_v47  ;;  %5810 = vrot.lane.b32.xlu1 %v5802_v38, %s12388_s3  ;;  %v5815_v0 = vrot.slane %v5813_v53, 4  ;;  %v9319_v47 = vld [vmem:[%s12394_s6 + $0x10] sm:$0xff]   ;;  %v9324_v40 = vld [vmem:[%s12394_s6 + $0x38] sm:$0xff]  }
0x143e   : > { %5827 = vrot.lane.b32.xlu0 %v5822_v2, %s12282_s22 }
0x1442   : > { %6485 = vperm.xlu0 %9221, %v6477_v22  }
0x14ae   : > { %v5811_v29 = vpop.permute.xlu1 %5810 }
0x14af   : > { %v5814_v19 = vrot.slane %v5811_v29, 4 }
0x14b0   : > { %v5828_v46 = vpop.permute.xlu0 %5827 }
0x14b1   : > { %v5816_v8 = vsel %vm1671_vm14, %v5814_v19, %v5815_v0  ;;  %v5830_v60 = vrot.slane %v5828_v46, 4 }
0x14b2   : > { %v5817_v61 = vsel %vm1444_vm3, %v5811_v29, %v5816_v8 }
0x14b3   : > { %v5819_v59 = vmax.bf16 %v5817_v61, %v5802_v38  ;;  %v9325_v38 = vld [vmem:[%s12394_s6 + $0x40] sm:$0xff]   ;;  %s12415_s6 = smov 92  }
0x14b5   : > { %5825 = vrot.lane.b32.xlu1 %v5819_v59, %s12282_s22 }
0x14b9   : > { %6480 = vperm.xlu1 %9220, %v6476_v7  }
0x1527   : > { %v5826_v15 = vpop.permute.xlu1 %5825 }
0x1528   : > { %v5829_v17 = vrot.slane %v5826_v15, 4 }
0x152a   : > { %v5831_v23 = vsel %vm1671_vm14, %v5829_v17, %v5830_v60 }
0x152b   : > { %v5832_v35 = vsel %vm1512_vm9, %v5826_v15, %v5831_v23 }
0x152c   : > { %v5834_v52 = vmax.bf16 %v5832_v35, %v5819_v59 }
0x152e   : > { %5835 = vst [vmem:[#allocation6 + $0x4] sm:$0xff] %v5834_v52 }
0x1535   : > { %v5854_v54 = vld [vmem:[#allocation6] sm:$0xff]  ;;  %v5855_v14 = vld [vmem:[#allocation6 + $0x8] sm:$0xff] }
0x1536   : > { %v8771_v12 = vcombine.high %v5854_v54, %v5854_v54  ;;  %v8773_v55 = vcombine.high %v5855_v14, %v5855_v14  ;;  %v8770_v33 = vcombine.low %v5854_v54, %v5854_v54  ;;  %v8772_v13 = vcombine.low %v5855_v14, %v5855_v14 }
0x1538   : > { %8774 = vmatprep.subr.msk.bf16.mxu1 %vm1671_vm14, %v8771_v12  ;;  %8784 = vmatprep.subr.msk.bf16.mxu0 %vm1671_vm14, %v8773_v55  ;;  %v5939_v28 = vsel %vm1671_vm14, %v8770_v33, 0  ;;  %v5945_v49 = vsel %vm1671_vm14, %v8772_v13, 0 }
0x1539   : > { %5951 = vmatpush1.bf16.msra.mxu1 %v5939_v28  ;;  %6064 = vmatpush1.bf16.msra.mxu0 %v5945_v49 }
0x153a   : > { %8993 = vmatprep.subr.bf16.mxu0 %v12291_v10 }
0x153c   : > { %8775 = vmatmul.mubr.msk.bf16.vlgmr.msra.gmra.mrb[204].mxu1 %vm12385_vm4, %v9317_v50  ;;  %8785 = vmatmul.mubr.msk.bf16.vlgmr.msra.gmra.mrb[196].mxu0 %vm12395_vm10, %v9317_v50  ;;  %vm12401_vm4 = vmmov %vm12399_vm0 }
0x153d   : > { %5992 = vmatprep.mubr.bf16.mxu1 %v12260_v45  ;;  %6103 = vmatprep.mubr.bf16.mxu0 %v12260_v45  ;;  %vm12402_vm10 = vmmov %vm12399_vm0 }
0x1544   : > { %8776 = vmatmul.mubr.msk.bf16.gmra.mrb[208].mxu1 %vm12396_vm5, %v9318_v36  ;;  %8786 = vmatmul.mubr.msk.bf16.gmra.mrb[200].mxu0 %vm12397_vm15, %v9318_v36  ;;  %vm12403_vm5 = vmmov %vm12399_vm0 }
0x1545   : > { %6002 = vmatprep.mubr.bf16.mxu1 %v12260_v45  ;;  %6111 = vmatprep.mubr.bf16.mxu0 %v12260_v45  ;;  %vm12404_vm15 = vmmov %vm12399_vm0 }
0x154c   : > { %8777 = vmatmul.mubr.msk.bf16.gmra.mrb[212].mxu1 %vm12398_vm2, %v9319_v47  ;;  %8787 = vmatmul.mubr.msk.bf16.gmra.mrb[204].mxu0 %vm12399_vm0, %v9319_v47  ;;  %vm12405_vm2 = vmmov %vm12399_vm0 }
0x154d   : > { %6012 = vmatprep.mubr.bf16.mxu1 %v12260_v45  ;;  %6119 = vmatprep.mubr.bf16.mxu0 %v12260_v45 }
0x1554   : > { %8778 = vmatmul.mubr.msk.bf16.gmra.mrb[216].mxu1 %vm12400_vm12, %v9320_v18  ;;  %8788 = vmatmul.mubr.msk.bf16.gmra.mrb[208].mxu0 %vm12401_vm4, %v9320_v18  ;;  %vm12406_vm12 = vmmov %vm12399_vm0 }
0x1555   : > { %6022 = vmatprep.mubr.bf16.mxu1 %v12260_v45  ;;  %6127 = vmatprep.mubr.bf16.mxu0 %v12260_v45  ;;  %vm12407_vm4 = vmmov %vm12399_vm0 }
0x155c   : > { %8779 = vmatmul.mubr.msk.bf16.gmra.mrb[220].mxu1 %vm12402_vm10, %v9321_v32  ;;  %8789 = vmatmul.mubr.msk.bf16.gmra.mrb[212].mxu0 %vm12403_vm5, %v9321_v32  ;;  %vm12408_vm10 = vmmov %vm12399_vm0 }
0x155d   : > { %6030 = vmatprep.mubr.bf16.mxu1 %v12260_v45  ;;  %6135 = vmatprep.mubr.bf16.mxu0 %v12260_v45  ;;  %vm12409_vm5 = vmmov %vm12399_vm0 }
0x1564   : > { %8780 = vmatmul.mubr.msk.bf16.gmra.mrb[224].mxu1 %vm12404_vm15, %v9322_v48  ;;  %8790 = vmatmul.mubr.msk.bf16.gmra.mrb[216].mxu0 %vm12405_vm2, %v9322_v48  ;;  %vm12410_vm15 = vmmov %vm12399_vm0  ;;  %vm12427_vm2 = vcmask 1014784  }
0x1565   : > { %6038 = vmatprep.mubr.bf16.mxu1 %v12260_v45  ;;  %6145 = vmatprep.mubr.bf16.mxu0 %v12260_v45 }
0x156c   : > { %8781 = vmatmul.mubr.msk.bf16.gmra.mrb[228].mxu1 %vm12399_vm0, %v9323_v57  ;;  %8791 = vmatmul.mubr.msk.bf16.gmra.mrb[220].mxu0 %vm12406_vm12, %v9323_v57  ;;  %vm12429_vm0 = vmmov %vm12427_vm2 }
0x156d   : > { %6046 = vmatprep.mubr.bf16.mxu1 %v12260_v45  ;;  %6155 = vmatprep.mubr.bf16.mxu0 %v12260_v45  ;;  %vm12431_vm12 = vmmov %vm12429_vm0 }
0x1574   : > { %8782 = vmatmul.mubr.msk.bf16.gmra.mrb[232].mxu1 %vm12407_vm4, %v9324_v40  ;;  %8792 = vmatmul.mubr.msk.bf16.gmra.mrb[224].mxu0 %vm12408_vm10, %v9324_v40  ;;  %vm12432_vm4 = vmmov %vm12429_vm0  ;;  %vm12433_vm10 = vcmask 752640  }
0x1575   : > { %6054 = vmatprep.mubr.bf16.mxu1 %v12260_v45  ;;  %6165 = vmatprep.mubr.bf16.mxu0 %v12260_v45 }
0x157c   : > { %8783 = vmatmul.mubr.msk.bf16.gmra.mrb[236].mxu1 %vm12409_vm5, %v9325_v38  ;;  %8793 = vmatmul.mubr.msk.bf16.gmra.mrb[228].mxu0 %vm12410_vm15, %v9325_v38  ;;  %vm12434_vm5 = vcmask 523264   ;;  %vm12435_vm15 = vmmov %vm12433_vm10 }
0x157d   : > { %6644 = vmatprep.mubr.bf16.mxu1 %v12260_v45  ;;  %8995 = vmatprep.mubr.msk.bf16.mxu0 %vm12292_vm1, %v12291_v10 }
0x160f   : > { %v11230_v53 = vpop.f32.mrb[204].mxu1  ;;  %v11232_v2 = vpop.f32.mrb[196].mxu0 }
0x1610   : > { %v11234_v22 = vpop.f32.mrb[205].mxu1  ;;  %v6099_v0 = vpop.f32.mrb[197].mxu0  ;;  %v6176_v16 = vmul.f32 %v11230_v53, %v12426_v43 }
0x1611   : > { %v11236_v29 = vpop.f32.mrb[206].mxu1  ;;  %v11238_v19 = vpop.f32.mrb[198].mxu0  ;;  %v6177_v51 = vmul.f32 %v11234_v22, %v12428_v30  ;;  %v12430_v22 = vld [vmem:[#allocation71_spill] sm:$0xff] }
0x1612   : > { %v11240_v8 = vpop.f32.mrb[207].mxu1  ;;  %v6102_v61 = vpop.f32.mrb[199].mxu0  ;;  %v6179_v53 = vmul.f32 %v11236_v29, %v12426_v43 }
0x1617   : > { %v5994_v59 = vpop.f32.mrb[208].mxu1  ;;  %v6105_v7 = vpop.f32.mrb[200].mxu0 }
0x1618   : > { %6188 = vrot.lane.b32.xlu1 %v5994_v59, %s12369_s15  ;;  %v5996_v46 = vpop.f32.mrb[209].mxu1  ;;  %v6107_v15 = vpop.f32.mrb[201].mxu0 }
0x1619   : > { %6190 = vrot.lane.b32.xlu0 %v5996_v46, %s12369_s15  ;;  %v5998_v60 = vpop.f32.mrb[210].mxu1  ;;  %v6108_v17 = vpop.f32.mrb[202].mxu0 }
0x161a   : > { %v6000_v23 = vpop.f32.mrb[211].mxu1  ;;  %v6110_v35 = vpop.f32.mrb[203].mxu0 }
0x161c   : > { %6192 = vrot.lane.b32.xlu1 %v6105_v7, %s12369_s15 }
0x161d   : > { %6194 = vrot.lane.b32.xlu0 %v5998_v60, %s12369_s15 }
0x161f   : > { %v6004_v52 = vpop.f32.mrb[212].mxu1  ;;  %v6113_v54 = vpop.f32.mrb[204].mxu0 }
0x1620   : > { %v6006_v14 = vpop.f32.mrb[213].mxu1  ;;  %6196 = vrot.lane.b32.xlu1 %v6000_v23, %s12369_s15  ;;  %v6115_v12 = vpop.f32.mrb[205].mxu0  ;;  %v6216_v13 = vmul.f32 %v6004_v52, %v10043_v63  ;;  %v6218_v36 = vmul.f32 %v6113_v54, %v10041_v62 }
0x1621   : > { %v6008_v55 = vpop.f32.mrb[214].mxu1  ;;  %6198 = vrot.lane.b32.xlu0 %v6108_v17, %s12369_s15  ;;  %v6116_v33 = vpop.f32.mrb[206].mxu0  ;;  %v6217_v50 = vmul.f32 %v6006_v14, %v10048_v58  ;;  %v12412_v14 = vld [vmem:[#allocation60_spill] sm:$0xff] }
0x1622   : > { %v6010_v28 = vpop.f32.mrb[215].mxu1  ;;  %v6118_v49 = vpop.f32.mrb[207].mxu0  ;;  %v6219_v47 = vmul.f32 %v6008_v55, %v10043_v63  ;;  %v6221_v7 = vmul.f32 %v6116_v33, %v10041_v62 }
0x1623   : > { %v6220_v0 = vmul.f32 %v6010_v28, %v10048_v58 }
0x1624   : > { %6228 = vrot.lane.b32.xlu1 %v6216_v13, %s12411_s5 }
0x1625   : > { %6230 = vrot.lane.b32.xlu0 %v6217_v50, %s12411_s5 }
0x1627   : > { %v6014_v18 = vpop.f32.mrb[216].mxu1  ;;  %v6121_v32 = vpop.f32.mrb[208].mxu0 }
0x1628   : > { %v6016_v48 = vpop.f32.mrb[217].mxu1  ;;  %6232 = vrot.lane.b32.xlu1 %v6218_v36, %s12411_s5  ;;  %v6123_v57 = vpop.f32.mrb[209].mxu0  ;;  %v6256_v46 = vmul.f32 %v6014_v18, %v10058_v20  ;;  %v6258_v12 = vmul.f32 %v6121_v32, %v12412_v14 }
0x1629   : > { %v6018_v40 = vpop.f32.mrb[218].mxu1  ;;  %6234 = vrot.lane.b32.xlu0 %v6219_v47, %s12411_s5  ;;  %v6124_v38 = vpop.f32.mrb[210].mxu0  ;;  %v6257_v15 = vmul.f32 %v6016_v48, %v10068_v31 }
0x162a   : > { %v6020_v61 = vpop.f32.mrb[219].mxu1  ;;  %v6126_v59 = vpop.f32.mrb[211].mxu0  ;;  %v6259_v13 = vmul.f32 %v6018_v40, %v10058_v20  ;;  %v6261_v49 = vmul.f32 %v6124_v38, %v12412_v14 }
0x162b   : > { %v6260_v28 = vmul.f32 %v6020_v61, %v10068_v31 }
0x162c   : > { %6236 = vrot.lane.b32.xlu1 %v6220_v0, %s12411_s5 }
0x162d   : > { %6238 = vrot.lane.b32.xlu0 %v6221_v7, %s12411_s5 }
0x162f   : > { %v6024_v60 = vpop.f32.mrb[220].mxu1  ;;  %v6129_v17 = vpop.f32.mrb[212].mxu0 }
0x1630   : > { %6268 = vrot.lane.b32.xlu1 %v6256_v46, %s12370_s11  ;;  %v6025_v23 = vpop.f32.mrb[221].mxu1  ;;  %v6131_v35 = vpop.f32.mrb[213].mxu0 }
0x1631   : > { %6270 = vrot.lane.b32.xlu0 %v6257_v15, %s12370_s11  ;;  %v6027_v52 = vpop.f32.mrb[222].mxu1  ;;  %v6132_v54 = vpop.f32.mrb[214].mxu0  ;;  %v12413_v15 = vld [vmem:[#allocation62_spill] sm:$0xff] }
0x1632   : > { %v6028_v55 = vpop.f32.mrb[223].mxu1  ;;  %v6134_v33 = vpop.f32.mrb[215].mxu0 }
0x1634   : > { %6272 = vrot.lane.b32.xlu1 %v6258_v12, %s12370_s11  ;;  %v12414_v12 = vld [vmem:[#allocation63_spill] sm:$0xff] }
0x1635   : > { %6274 = vrot.lane.b32.xlu0 %v6259_v13, %s12370_s11 }
0x1637   : > { %v6032_v50 = vpop.f32.mrb[224].mxu1  ;;  %v6137_v36 = vpop.f32.mrb[216].mxu0 }
0x1638   : > { %v6033_v47 = vpop.f32.mrb[225].mxu1  ;;  %6276 = vrot.lane.b32.xlu1 %v6260_v28, %s12370_s11  ;;  %v6139_v18 = vpop.f32.mrb[217].mxu0  ;;  %v6323_v33 = vmul.f32 %v6137_v36, %v12414_v12 }
0x1639   : > { %v6035_v48 = vpop.f32.mrb[226].mxu1  ;;  %6278 = vrot.lane.b32.xlu0 %v6261_v49, %s12370_s11  ;;  %v6141_v32 = vpop.f32.mrb[218].mxu0  ;;  %v6322_v60 = vmul.f32 %v6033_v47, %v12413_v15 }
0x163a   : > { %v6036_v57 = vpop.f32.mrb[227].mxu1  ;;  %v6143_v40 = vpop.f32.mrb[219].mxu0  ;;  %v6326_v13 = vmul.f32 %v6141_v32, %v12414_v12 }
0x163b   : > { %v6325_v36 = vmul.f32 %v6036_v57, %v12413_v15 }
0x163c   : > { %6300 = vrot.lane.b32.xlu1 %v6025_v23, %s12371_s2 }
0x163d   : > { %6302 = vrot.lane.b32.xlu0 %v6129_v17, %s12371_s2  ;;  %v12416_v17 = vld [vmem:[#allocation61_spill] sm:$0xff] }
0x163e   : > { %v6324_v23 = vmul.f32 %v6139_v18, %v12416_v17  ;;  %v12417_v18 = vld [vmem:[#allocation65_spill] sm:$0xff] }
0x163f   : > { %v6040_v0 = vpop.f32.mrb[228].mxu1  ;;  %v6147_v61 = vpop.f32.mrb[220].mxu0 }
0x1640   : > { %v6041_v59 = vpop.f32.mrb[229].mxu1  ;;  %6304 = vrot.lane.b32.xlu1 %v6028_v55, %s12371_s2  ;;  %v6149_v38 = vpop.f32.mrb[221].mxu0 }
0x1641   : > { %v6043_v7 = vpop.f32.mrb[230].mxu1  ;;  %6306 = vrot.lane.b32.xlu0 %v6132_v54, %s12371_s2  ;;  %v6151_v46 = vpop.f32.mrb[222].mxu0  ;;  %v6362_v32 = vmul.f32 %v6041_v59, %v12417_v18 }
0x1642   : > { %v6044_v35 = vpop.f32.mrb[231].mxu1  ;;  %v6153_v52 = vpop.f32.mrb[223].mxu0  ;;  %v6327_v7 = vmul.f32 %v6143_v40, %v12416_v17  ;;  %v6364_v40 = vmul.f32 %v6149_v38, %v12420_v27  ;;  %v12422_v38 = vld [vmem:[#allocation68_spill] sm:$0xff] }
0x1643   : > { %v6367_v59 = vmul.f32 %v6153_v52, %v12420_v27 }
0x1644   : > { %6334 = vrot.lane.b32.xlu1 %v6322_v60, %s12415_s6  ;;  %v12418_v60 = vld [vmem:[#allocation66_spill] sm:$0xff] }
0x1645   : > { %6336 = vrot.lane.b32.xlu0 %v6323_v33, %s12415_s6  ;;  %v6363_v33 = vmul.f32 %v6147_v61, %v12418_v60  ;;  %v6365_v61 = vmul.f32 %v6044_v35, %v12417_v18  ;;  %v12423_v35 = vld [vmem:[#allocation69_spill] sm:$0xff] }
0x1647   : > { %v6048_v55 = vpop.f32.mrb[232].mxu1  ;;  %v6157_v28 = vpop.f32.mrb[224].mxu0 }
0x1648   : > { %6338 = vrot.lane.b32.xlu1 %v6324_v23, %s12415_s6  ;;  %v6049_v54 = vpop.f32.mrb[233].mxu1  ;;  %v6159_v49 = vpop.f32.mrb[225].mxu0 }
0x1649   : > { %6342 = vrot.lane.b32.xlu0 %v6326_v13, %s12415_s6  ;;  %v6051_v50 = vpop.f32.mrb[234].mxu1  ;;  %v6161_v47 = vpop.f32.mrb[226].mxu0 }
0x164a   : > { %v6052_v48 = vpop.f32.mrb[235].mxu1  ;;  %v6163_v0 = vpop.f32.mrb[227].mxu0 }
0x164c   : > { %6340 = vrot.lane.b32.xlu1 %v6325_v36, %s12415_s6 }
0x164d   : > { %6344 = vrot.lane.b32.xlu0 %v6327_v7, %s12415_s6  ;;  %v6366_v7 = vmul.f32 %v6151_v46, %v12418_v60 }
0x164f   : > { %v6056_v23 = vpop.f32.mrb[236].mxu1  ;;  %v6167_v55 = vpop.f32.mrb[228].mxu0 }
0x1650   : > { %v6057_v1 = vpop.f32.mrb[237].mxu1  ;;  %6374 = vrot.lane.b32.xlu1 %v6362_v32, %s12419_s7  ;;  %v6169_v13 = vpop.f32.mrb[229].mxu0  ;;  %v6437_v27 = vmul.f32 %v6167_v55, %v12423_v35 }
0x1651   : > { %v6059_v50 = vpop.f32.mrb[238].mxu1  ;;  %6376 = vrot.lane.b32.xlu0 %v6363_v33, %s12419_s7  ;;  %v6171_v57 = vpop.f32.mrb[230].mxu0  ;;  %v6436_v46 = vmul.f32 %v6057_v1, %v12422_v38 }
0x1652   : > { %v6060_v17 = vpop.f32.mrb[239].mxu1  ;;  %v6173_v36 = vpop.f32.mrb[231].mxu0 }
0x1653   : > { %v6439_v52 = vmul.f32 %v6060_v17, %v12422_v38  ;;  %v11318_v1 = vpop.permute.xlu1 %6480 }
0x1654   : > { %6378 = vrot.lane.b32.xlu1 %v6364_v40, %s12419_s7 }
0x1655   : > { %6382 = vrot.lane.b32.xlu0 %v6366_v7, %s12419_s7 }
0x1658   : > { %6380 = vrot.lane.b32.xlu1 %v6365_v61, %s12419_s7 }
0x1659   : > { %6384 = vrot.lane.b32.xlu0 %v6367_v59, %s12419_s7 }
0x165c   : > { %6408 = vrot.lane.b32.xlu1 %v6049_v54, %s12421_s8  ;;  %v12425_v54 = vld [vmem:[#allocation67_spill] sm:$0xff] }
0x165d   : > { %6410 = vrot.lane.b32.xlu0 %v6157_v28, %s12421_s8  ;;  %v6440_v28 = vmul.f32 %v6171_v57, %v12423_v35 }
0x1660   : > { %6412 = vrot.lane.b32.xlu1 %v6159_v49, %s12421_s8  ;;  %v6438_v49 = vmul.f32 %v6169_v13, %v12425_v54 }
0x1661   : > { %6416 = vrot.lane.b32.xlu0 %v6161_v47, %s12421_s8  ;;  %v6441_v47 = vmul.f32 %v6173_v36, %v12425_v54 }
0x1664   : > { %6414 = vrot.lane.b32.xlu1 %v6052_v48, %s12421_s8  ;;  %v11320_v48 = vpop.permute.xlu0 %6485 }
0x1665   : > { %6418 = vrot.lane.b32.xlu0 %v6163_v0, %s12421_s8 }
0x1668   : > { %6448 = vrot.lane.b32.xlu1 %v6436_v46, %s12424_s12 }
0x1669   : > { %6450 = vrot.lane.b32.xlu0 %v6437_v27, %s12424_s12 }
0x166c   : > { %6454 = vrot.lane.b32.xlu1 %v6439_v52, %s12424_s12 }
0x166d   : > { %6456 = vrot.lane.b32.xlu0 %v6440_v28, %s12424_s12 }
0x1670   : > { %6452 = vrot.lane.b32.xlu1 %v6438_v49, %s12424_s12 }
0x1671   : > { %6458 = vrot.lane.b32.xlu0 %v6441_v47, %s12424_s12 }
0x168a   : > { %v6189_v0 = vpop.permute.xlu1 %6188 }
0x168b   : > { %v6191_v32 = vpop.permute.xlu0 %6190 }
0x168c   : > { %v6200_v39 = vsel %vm1483_vm7, %v6189_v0, %v6191_v32 }
0x168d   : > { %v6210_v56 = vadd.f32 %v6200_v39, %v6176_v16  ;;  %v6178_v16 = vmul.f32 %v11232_v2, %v12430_v22  ;;  %v6180_v39 = vmul.f32 %v11240_v8, %v12428_v30 }
0x168e   : > { %v11322_v33 = vpop.permute.xlu1 %6192 }
0x168f   : > { %v6195_v23 = vpop.permute.xlu0 %6194  ;;  %v6201_v21 = vsel %vm1483_vm7, %v6191_v32, %v11322_v33 }
0x1690   : > { %v6211_v60 = vadd.f32 %v6201_v21, %v6177_v51 }
0x1692   : > { %v6197_v55 = vpop.permute.xlu1 %6196 }
0x1693   : > { %v11324_v50 = vpop.permute.xlu0 %6198  ;;  %v6202_v35 = vsel %vm1483_vm7, %v6195_v23, %v6197_v55 }
0x1694   : > { %v6203_v32 = vsel %vm1483_vm7, %v6197_v55, %v11324_v50 }
0x1696   : > { %v6229_v57 = vpop.permute.xlu1 %6228 }
0x1697   : > { %v6231_v13 = vpop.permute.xlu0 %6230 }
0x1698   : > { %v6240_v11 = vsel %vm12427_vm2, %v6229_v57, %v6231_v13  ;;  %vm12436_vm2 = vcmask 506880  }
0x1699   : > { %v6250_v57 = vadd.f32 %v6240_v11, %v6210_v56  ;;  %v6181_v56 = vmul.f32 %v11238_v19, %v12430_v22  ;;  %v6214_v11 = vadd.f32 %v6203_v32, %v6180_v39 }
0x169a   : > { %v11326_v40 = vpop.permute.xlu1 %6232 }
0x169b   : > { %v6235_v17 = vpop.permute.xlu0 %6234  ;;  %v6241_v0 = vsel %vm12429_vm0, %v6231_v13, %v11326_v40  ;;  %vm12437_vm0 = vmmov %vm12433_vm10 }
0x169c   : > { %v6251_v29 = vadd.f32 %v6241_v0, %v6211_v60 }
0x169e   : > { %v6237_v36 = vpop.permute.xlu1 %6236 }
0x169f   : > { %v11328_v7 = vpop.permute.xlu0 %6238  ;;  %v6242_v23 = vsel %vm12431_vm12, %v6235_v17, %v6237_v36  ;;  %vm12438_vm12 = vmmov %vm12434_vm5 }
0x16a0   : > { %v6243_v51 = vsel %vm12432_vm4, %v6237_v36, %v11328_v7  ;;  %v6212_v36 = vadd.f32 %v11322_v33, %v6178_v16  ;;  %vm12439_vm4 = vmmov %vm12437_vm0 }
0x16a1   : > { %v6254_v0 = vadd.f32 %v6243_v51, %v6214_v11 }
0x16a2   : > { %v6269_v61 = vpop.permute.xlu1 %6268  ;;  %v6252_v39 = vadd.f32 %v11326_v40, %v6212_v36 }
0x16a3   : > { %v6271_v59 = vpop.permute.xlu0 %6270 }
0x16a4   : > { %v6280_v38 = vsel %vm1585_vm11, %v6269_v61, %v6271_v59  ;;  %v6213_v61 = vadd.f32 %v6202_v35, %v6179_v53 }
0x16a5   : > { %v6290_v21 = vadd.f32 %v6280_v38, %v6250_v57  ;;  %v6215_v38 = vadd.f32 %v11324_v50, %v6181_v56 }
0x16a6   : > { %v11330_v46 = vpop.permute.xlu1 %6272  ;;  %v6253_v17 = vadd.f32 %v6242_v23, %v6213_v61 }
0x16a7   : > { %v6275_v27 = vpop.permute.xlu0 %6274  ;;  %v6281_v13 = vsel %vm1585_vm11, %v6271_v59, %v11330_v46 }
0x16a8   : > { %v6291_v30 = vadd.f32 %v6281_v13, %v6251_v29  ;;  %v6292_v29 = vadd.f32 %v11330_v46, %v6252_v39 }
0x16aa   : > { %v6277_v52 = vpop.permute.xlu1 %6276 }
0x16ab   : > { %v11332_v28 = vpop.permute.xlu0 %6278  ;;  %v6282_v2 = vsel %vm1585_vm11, %v6275_v27, %v6277_v52 }
0x16ac   : > { %v6283_v35 = vsel %vm1585_vm11, %v6277_v52, %v11332_v28  ;;  %v6293_v27 = vadd.f32 %v6282_v2, %v6253_v17  ;;  %v6255_v52 = vadd.f32 %v11328_v7, %v6215_v38 }
0x16ae   : > { %v6301_v54 = vpop.permute.xlu1 %6300  ;;  %v6295_v7 = vadd.f32 %v11332_v28, %v6255_v52 }
0x16af   : > { %v11334_v49 = vpop.permute.xlu0 %6302  ;;  %v6316_v60 = vadd.f32 %v6301_v54, %v6290_v21 }
0x16b0   : > { %v6308_v8 = vsel %vm1633_vm13, %v6301_v54, %v11334_v49  ;;  %v6294_v54 = vadd.f32 %v6283_v35, %v6254_v0 }
0x16b1   : > { %v6317_v53 = vadd.f32 %v6308_v8, %v6291_v30 }
0x16b2   : > { %v6305_v47 = vpop.permute.xlu1 %6304 }
0x16b3   : > { %v11336_v44 = vpop.permute.xlu0 %6306  ;;  %v6319_v50 = vadd.f32 %v6305_v47, %v6293_v27 }
0x16b4   : > { %v6309_v32 = vsel %vm1633_vm13, %v6305_v47, %v11336_v44  ;;  %v6318_v47 = vadd.f32 %v11334_v49, %v6292_v29  ;;  %v6321_v49 = vadd.f32 %v11336_v44, %v6295_v7 }
0x16b6   : > { %v6335_v42 = vpop.permute.xlu1 %6334 }
0x16b7   : > { %v11338_v3 = vpop.permute.xlu0 %6336  ;;  %v6356_v57 = vadd.f32 %v6335_v42, %v6316_v60 }
0x16b8   : > { %v6346_v19 = vsel %vm12433_vm10, %v6335_v42, %v11338_v3  ;;  %v6320_v42 = vadd.f32 %v6309_v32, %v6294_v54  ;;  %vm12440_vm10 = vmmov %vm12434_vm5 }
0x16b9   : > { %v6357_v23 = vadd.f32 %v6346_v19, %v6317_v53 }
0x16ba   : > { %v11340_v5 = vpop.permute.xlu1 %6338 }
0x16bb   : > { %v11342_v34 = vpop.permute.xlu0 %6342  ;;  %v6347_v11 = vsel %vm12437_vm0, %v11338_v3, %v11340_v5 }
0x16bc   : > { %v6358_v36 = vadd.f32 %v6347_v11, %v6318_v47 }
0x16be   : > { %v11344_v24 = vpop.permute.xlu1 %6340 }
0x16bf   : > { %v11346_v41 = vpop.permute.xlu0 %6344  ;;  %v6348_v13 = vsel %vm12435_vm15, %v11344_v24, %v11342_v34  ;;  %v6359_v51 = vadd.f32 %v11344_v24, %v6319_v50  ;;  %vm12442_vm15 = vcmask 490496  }
0x16c0   : > { %v6349_v28 = vsel %vm12439_vm4, %v11342_v34, %v11346_v41  ;;  %vm12446_vm4 = vmmov %vm12442_vm15 }
0x16c1   : > { %v6361_v38 = vadd.f32 %v6349_v28, %v6321_v49 }
0x16c2   : > { %v6375_v25 = vpop.permute.xlu1 %6374 }
0x16c3   : > { %v11348_v4 = vpop.permute.xlu0 %6376  ;;  %v6396_v30 = vadd.f32 %v6375_v25, %v6356_v57 }
0x16c4   : > { %v6386_v33 = vsel %vm12434_vm5, %v6375_v25, %v11348_v4  ;;  %v6360_v25 = vadd.f32 %v6348_v13, %v6320_v42  ;;  %vm12441_vm5 = vmmov %vm12436_vm2 }
0x16c5   : > { %v6397_v21 = vadd.f32 %v6386_v33, %v6357_v23  ;;  %vm12444_vm0 = vmmov %vm12441_vm5 }
0x16c6   : > { %v11350_v6 = vpop.permute.xlu1 %6378 }
0x16c7   : > { %v11352_v26 = vpop.permute.xlu0 %6382  ;;  %v6387_v5 = vsel %vm12440_vm10, %v11348_v4, %v11350_v6 }
0x16c8   : > { %v6398_v32 = vadd.f32 %v6387_v5, %v6358_v36  ;;  %v9327_v5 = vld [vmem:[%s12451_s21 + $0x8] sm:$0xff]   ;;  %v9334_v36 = vld [vmem:[%s12451_s21 + $0x40] sm:$0xff]  }
0x16ca   : > { %v11355_v37 = vpop.permute.xlu1 %6380 }
0x16cb   : > { %v11359_v9 = vpop.permute.xlu0 %6384  ;;  %v6388_v46 = vsel %vm12438_vm12, %v11355_v37, %v11352_v26  ;;  %v6399_v24 = vadd.f32 %v11355_v37, %v6359_v51  ;;  %vm12445_vm12 = vmmov %vm12444_vm0 }
0x16cc   : > { %v6400_v60 = vadd.f32 %v6388_v46, %v6360_v25  ;;  %v12452_v25 = vld [vmem:[#allocation73_spill] sm:$0xff]  ;;  %v12453_v46 = vld [vmem:[#allocation74_spill] sm:$0xff] }
0x16ce   : > { %v6409_v18 = vpop.permute.xlu1 %6408 }
0x16cf   : > { %v11374_v15 = vpop.permute.xlu0 %6410  ;;  %v6430_v56 = vadd.f32 %v6409_v18, %v6396_v30 }
0x16d0   : > { %v6420_v40 = vsel %vm12436_vm2, %v6409_v18, %v11374_v15  ;;  %vm12443_vm2 = vmmov %vm12440_vm10 }
0x16d1   : > { %v6431_v8 = vadd.f32 %v6420_v40, %v6397_v21  ;;  %v6389_v41 = vsel %vm12443_vm2, %v11352_v26, %v11359_v9  ;;  %vm12447_vm10 = vmmov %vm12446_vm4 }
0x16d2   : > { %v6413_v55 = vpop.permute.xlu1 %6412  ;;  %v6401_v57 = vadd.f32 %v6389_v41, %v6361_v38  ;;  %v9331_v41 = vld [vmem:[%s12451_s21 + $0x28] sm:$0xff]  }
0x16d3   : > { %v6417_v59 = vpop.permute.xlu0 %6416  ;;  %v6421_v44 = vsel %vm12444_vm0, %v11374_v15, %v6413_v55  ;;  %vm12457_vm0 = vcmask 130048  }
0x16d4   : > { %v6432_v54 = vadd.f32 %v6421_v44, %v6398_v32 }
0x16d6   : > { %v6415_v16 = vpop.permute.xlu1 %6414 }
0x16d7   : > { %v6419_v61 = vpop.permute.xlu0 %6418  ;;  %v6422_v3 = vsel %vm12441_vm5, %v6415_v16, %v6417_v59  ;;  %v6433_v34 = vadd.f32 %v6415_v16, %v6399_v24  ;;  %vm12448_vm5 = vmmov %vm12446_vm4 }
0x16d8   : > { %v6434_v19 = vadd.f32 %v6422_v3, %v6400_v60  ;;  %v6423_v6 = vsel %vm12445_vm12, %v6417_v59, %v6419_v61  ;;  %vm12458_vm12 = vmmov %vm12457_vm0  ;;  %v9328_v3 = vld [vmem:[%s12451_s21 + $0x10] sm:$0xff]   ;;  %v9330_v60 = vld [vmem:[%s12451_s21 + $0x20] sm:$0xff]  }
0x16d9   : > { %v6435_v33 = vadd.f32 %v6423_v6, %v6401_v57 }
0x16da   : > { %v6449_v2 = vpop.permute.xlu1 %6448 }
0x16db   : > { %v6470_v18 = vadd.f32 %v6449_v2, %v6430_v56  ;;  %v6451_v17 = vpop.permute.xlu0 %6450 }
0x16dc   : > { %v6460_v35 = vsel %vm12442_vm15, %v6449_v2, %v6451_v17  ;;  %v12454_v2 = vld [vmem:[#allocation75_spill] sm:$0xff]  ;;  %vm12455_vm15 = vcmask 277504  }
0x16dd   : > { %v6471_v37 = vadd.f32 %v6460_v35, %v6431_v8  ;;  %v6488_v4 = vadd.f32 %v11318_v1, %v6470_v18  ;;  %v9326_v18 = vld [vmem:[%s12451_s21] sm:$0xff]   ;;  %vm12456_vm2 = vmmov %vm12455_vm15  ;;  %v9329_v35 = vld [vmem:[%s12451_s21 + $0x18] sm:$0xff]  }
0x16de   : > { %v6455_v0 = vpop.permute.xlu1 %6454 }
0x16df   : > { %v6473_v27 = vadd.f32 %v6455_v0, %v6433_v34  ;;  %v6457_v53 = vpop.permute.xlu0 %6456  ;;  %v6489_v9 = vadd.f32 %v11318_v1, %v6471_v37  ;;  %v6494_v55 = vmax.f32 %v6488_v4, 0.0  ;;  %v9332_v34 = vld [vmem:[%s12451_s21 + $0x30] sm:$0xff]   ;;  %v9333_v37 = vld [vmem:[%s12451_s21 + $0x38] sm:$0xff]  }
0x16e0   : > { %v6462_v39 = vsel %vm12446_vm4, %v6455_v0, %v6457_v53  ;;  %vm12459_vm4 = vmmov %vm12457_vm0 }
0x16e1   : > { %v6491_v26 = vadd.f32 %v11320_v48, %v6473_v27  ;;  %v6474_v52 = vadd.f32 %v6462_v39, %v6434_v19  ;;  %v6495_v61 = vmax.f32 %v6489_v9, 0.0 }
0x16e2   : > { %v6453_v15 = vpop.permute.xlu1 %6452 }
0x16e3   : > { %v6497_v16 = vmax.f32 %v6491_v26, 0.0  ;;  %v6492_v59 = vadd.f32 %v11320_v48, %v6474_v52  ;;  %v6461_v50 = vsel %vm12447_vm10, %v6451_v17, %v6453_v15  ;;  %v6459_v23 = vpop.permute.xlu0 %6458  ;;  %vm12460_vm10 = vmmov %vm12457_vm0 }
0x16e4   : > { %v6472_v13 = vadd.f32 %v6461_v50, %v6432_v54  ;;  %v6463_v30 = vsel %vm12448_vm5, %v6457_v53, %v6459_v23  ;;  %vm12461_vm5 = vmmov %vm12457_vm0 }
0x16e5   : > { %v6498_v29 = vmax.f32 %v6492_v59, 0.0  ;;  %v6475_v42 = vadd.f32 %v6463_v30, %v6435_v33  ;;  %v6500_v40 = vpack.c.bf16 %v6497_v16, %v6494_v55 }
0x16e6   : > { %v6490_v7 = vadd.f32 %v11318_v1, %v6472_v13  ;;  %v7138_v1 = vld [vmem:[%s12449_s14] sm:$0xff] }
0x16e7   : > { %v6493_v51 = vadd.f32 %v11320_v48, %v6475_v42  ;;  %6506 = vrot.lane.b32.xlu1 %v6500_v40, %s12450_s19  ;;  %v6501_v21 = vpack.c.bf16 %v6498_v29, %v6495_v61  ;;  %v7139_v48 = vld [vmem:[%s12449_s14 + $0x8] sm:$0xff] }
0x16e8   : > { %v6496_v56 = vmax.f32 %v6490_v7, 0.0 }
0x16e9   : > { %v6499_v47 = vmax.f32 %v6493_v51, 0.0  ;;  %6508 = vrot.lane.b32.xlu0 %v6501_v21, %s12450_s19 }
0x16eb   : > { %v6502_v11 = vpack.c.bf16 %v6499_v47, %v6496_v56 }
0x16ed   : > { %7000 = vrot.lane.b32.xlu0 %v12452_v25, %s12415_s6  ;;  %6510 = vrot.lane.b32.xlu1 %v6502_v11, %s12450_s19 }
0x16f1   : > { %7040 = vrot.lane.b32.xlu0 %v12453_v46, %s12419_s7  ;;  %7006 = vrot.lane.b32.xlu1 %v12452_v25, %s12415_s6 }
0x16f5   : > { %7142 = vperm.xlu0 %9221, %v7138_v1   ;;  %7046 = vrot.lane.b32.xlu1 %v12453_v46, %s12419_s7 }
0x16f9   : > { %7147 = vperm.xlu1 %9220, %v7139_v48   ;;  %9228 = vrot.lane.b32.xlu0 %v12291_v10, %s12421_s8 }
0x16fd   : > { %7114 = vrot.lane.b32.xlu1 %v12454_v2, %s12424_s12 }
0x1759   : > { %v6507_v28 = vpop.permute.xlu1 %6506 }
0x175b   : > { %v6509_v24 = vpop.permute.xlu0 %6508 }
0x175c   : > { %v6512_v8 = vsel %vm12455_vm15, %v6507_v28, %v6509_v24  ;;  %vm12462_vm15 = vmmov %vm12457_vm0 }
0x175d   : > { %6612 = vmatprep.subr.bf16.mxu1 %v6512_v8 }
0x175e   : > { %6613 = vmatpush1.bf16.msra.mxu1 %v12260_v45 }
0x175f   : > { %v6511_v17 = vpop.permute.xlu1 %6510 }
0x1760   : > { %v6513_v49 = vsel %vm12456_vm2, %v6509_v24, %v6511_v17  ;;  %vm12463_vm2 = vmmov %vm12457_vm0 }
0x1761   : > { %8803 = vmatmul.mubr.msk.bf16.vlgmr.msra.gmra.mrb[240].mxu1 %vm12457_vm0, %v9326_v18  ;;  %8994 = vmatpush3.bf16.msra.mxu0 %v6513_v49 }
0x1762   : > { %6654 = vmatprep.mubr.bf16.mxu1 %v12260_v45  ;;  %9031 = vmatprep.subr.bf16.mxu0 %v12291_v10 }
0x1764   : > { %8996 = vmatmul.mubr.msk.bf16.vlgmr.msra.gmra.mrb[232].mxu0 %vm12458_vm12, %v9326_v18  ;;  %vm12464_vm12 = vmmov %vm12457_vm0 }
0x1765   : > { %8999 = vmatprep.mubr.msk.bf16.mxu0 %vm12292_vm1, %v12291_v10 }
0x1769   : > { %8804 = vmatmul.mubr.msk.bf16.gmra.mrb[244].mxu1 %vm12459_vm4, %v9327_v5  ;;  %vm12465_vm4 = vmmov %vm12457_vm0 }
0x176a   : > { %6664 = vmatprep.mubr.bf16.mxu1 %v12260_v45 }
0x176c   : > { %9000 = vmatmul.mubr.msk.bf16.gmra.mrb[236].mxu0 %vm12460_vm10, %v9327_v5  ;;  %vm12466_vm10 = vmmov %vm12457_vm0 }
0x176d   : > { %9003 = vmatprep.mubr.msk.bf16.mxu0 %vm12292_vm1, %v12291_v10 }
0x1771   : > { %8805 = vmatmul.mubr.msk.bf16.gmra.mrb[248].mxu1 %vm12461_vm5, %v9328_v3  ;;  %vm12467_vm5 = vmmov %vm12457_vm0 }
0x1772   : > { %6674 = vmatprep.mubr.bf16.mxu1 %v12260_v45 }
0x1774   : > { %9004 = vmatmul.mubr.msk.bf16.gmra.mrb[240].mxu0 %vm12462_vm15, %v9328_v3  ;;  %vm12468_vm15 = vmmov %vm12457_vm0 }
0x1775   : > { %9007 = vmatprep.mubr.msk.bf16.mxu0 %vm12292_vm1, %v12291_v10 }
0x1779   : > { %8806 = vmatmul.mubr.msk.bf16.gmra.mrb[252].mxu1 %vm12463_vm2, %v9329_v35  ;;  %vm12469_vm2 = vmmov %vm12457_vm0 }
0x177a   : > { %6684 = vmatprep.mubr.bf16.mxu1 %v12260_v45 }
0x177c   : > { %9008 = vmatmul.mubr.msk.bf16.gmra.mrb[244].mxu0 %vm12457_vm0, %v9329_v35 }
0x177d   : > { %9011 = vmatprep.mubr.msk.bf16.mxu0 %vm12292_vm1, %v12291_v10 }
0x1781   : > { %8807 = vmatmul.mubr.msk.bf16.gmra.mrb[0].mxu1 %vm12464_vm12, %v9330_v60  ;;  %vm12470_vm12 = vmmov %vm12457_vm0 }
0x1782   : > { %6692 = vmatprep.mubr.bf16.mxu1 %v12260_v45 }
0x1784   : > { %9012 = vmatmul.mubr.msk.bf16.gmra.mrb[248].mxu0 %vm12465_vm4, %v9330_v60  ;;  %vm12471_vm4 = vmmov %vm12457_vm0 }
0x1785   : > { %9015 = vmatprep.mubr.msk.bf16.mxu0 %vm12292_vm1, %v12291_v10 }
0x1789   : > { %8808 = vmatmul.mubr.msk.bf16.gmra.mrb[4].mxu1 %vm12466_vm10, %v9331_v41  ;;  %vm12472_vm10 = vmmov %vm12457_vm0 }
0x178a   : > { %6700 = vmatprep.mubr.bf16.mxu1 %v12260_v45 }
0x178c   : > { %9016 = vmatmul.mubr.msk.bf16.gmra.mrb[252].mxu0 %vm12467_vm5, %v9331_v41  ;;  %vm12479_vm5 = vcmask 1014784  }
0x178d   : > { %9019 = vmatprep.mubr.msk.bf16.mxu0 %vm12292_vm1, %v12291_v10 }
0x1791   : > { %8809 = vmatmul.mubr.msk.bf16.gmra.mrb[8].mxu1 %vm12468_vm15, %v9332_v34  ;;  %vm12480_vm15 = vmmov %vm12479_vm5 }
0x1792   : > { %6708 = vmatprep.mubr.bf16.mxu1 %v12260_v45 }
0x1794   : > { %9020 = vmatmul.mubr.msk.bf16.gmra.mrb[0].mxu0 %vm12469_vm2, %v9332_v34  ;;  %vm12481_vm2 = vmmov %vm12479_vm5 }
0x1795   : > { %9023 = vmatprep.mubr.msk.bf16.mxu0 %vm12292_vm1, %v12291_v10 }
0x1799   : > { %8810 = vmatmul.mubr.msk.bf16.gmra.mrb[12].mxu1 %vm12457_vm0, %v9333_v37  ;;  %vm12482_vm0 = vmmov %vm12481_vm2 }
0x179a   : > { %6716 = vmatprep.mubr.bf16.mxu1 %v12260_v45 }
0x179c   : > { %9024 = vmatmul.mubr.msk.bf16.gmra.mrb[4].mxu0 %vm12470_vm12, %v9333_v37  ;;  %vm12483_vm12 = vcmask 752640  }
0x179d   : > { %9027 = vmatprep.mubr.msk.bf16.mxu0 %vm12292_vm1, %v12291_v10 }
0x17a1   : > { %8811 = vmatmul.mubr.msk.bf16.gmra.mrb[16].mxu1 %vm12471_vm4, %v9334_v36  ;;  %vm12484_vm4 = vcmask 523264  }
0x17a2   : > { %7330 = vmatprep.mubr.bf16.mxu1 %v12260_v45 }
0x17a4   : > { %9028 = vmatmul.mubr.msk.bf16.gmra.mrb[8].mxu0 %vm12472_vm10, %v9334_v36  ;;  %vm12485_vm10 = vmmov %vm12483_vm12 }
0x17a5   : > { %9033 = vmatprep.mubr.msk.bf16.mxu0 %vm12292_vm1, %v12291_v10 }
0x1834   : > { %v11517_v38 = vpop.f32.mrb[240].mxu1 }
0x1835   : > { %v11519_v44 = vpop.f32.mrb[241].mxu1 }
0x1836   : > { %v11521_v0 = vpop.f32.mrb[242].mxu1 }
0x1837   : > { %v11523_v19 = vpop.f32.mrb[243].mxu1  ;;  %v11525_v6 = vpop.f32.mrb[232].mxu0 }
0x1838   : > { %v8997_v4 = vpop.f32.mrb[233].mxu0 }
0x1839   : > { %v11527_v27 = vpop.f32.mrb[234].mxu0 }
0x183a   : > { %v8998_v53 = vpop.f32.mrb[235].mxu0 }
0x183c   : > { %v6656_v32 = vpop.f32.mrb[244].mxu1 }
0x183d   : > { %v6658_v57 = vpop.f32.mrb[245].mxu1 }
0x183e   : > { %6852 = vrot.lane.b32.xlu1 %v6658_v57, %s12369_s15  ;;  %v6660_v39 = vpop.f32.mrb[246].mxu1 }
0x183f   : > { %v6767_v9 = vpop.f32.mrb[236].mxu0  ;;  %v6662_v26 = vpop.f32.mrb[247].mxu1 }
0x1840   : > { %6854 = vrot.lane.b32.xlu0 %v6767_v9, %s12369_s15  ;;  %v9001_v52 = vpop.f32.mrb[237].mxu0 }
0x1841   : > { %v6770_v54 = vpop.f32.mrb[238].mxu0 }
0x1842   : > { %v9002_v33 = vpop.f32.mrb[239].mxu0  ;;  %6860 = vrot.lane.b32.xlu1 %v6770_v54, %s12369_s15 }
0x1844   : > { %6850 = vrot.lane.b32.xlu0 %v6656_v32, %s12369_s15  ;;  %v6666_v15 = vpop.f32.mrb[248].mxu1 }
0x1845   : > { %v6668_v55 = vpop.f32.mrb[249].mxu1  ;;  %v6878_v51 = vmul.f32 %v6666_v15, %v10043_v63  ;;  %v12473_v15 = vld [vmem:[#allocation62_spill] sm:$0xff] }
0x1846   : > { %6856 = vrot.lane.b32.xlu1 %v6660_v39, %s12369_s15  ;;  %v6670_v16 = vpop.f32.mrb[250].mxu1  ;;  %v6879_v23 = vmul.f32 %v6668_v55, %v10048_v58 }
0x1847   : > { %v6672_v59 = vpop.f32.mrb[251].mxu1  ;;  %v6775_v50 = vpop.f32.mrb[240].mxu0  ;;  %v6881_v11 = vmul.f32 %v6670_v16, %v10043_v63 }
0x1848   : > { %v9005_v13 = vpop.f32.mrb[241].mxu0  ;;  %6858 = vrot.lane.b32.xlu0 %v6662_v26, %s12369_s15  ;;  %v6880_v61 = vmul.f32 %v6775_v50, %v10041_v62  ;;  %v6882_v1 = vmul.f32 %v6672_v59, %v10048_v58 }
0x1849   : > { %v6778_v30 = vpop.f32.mrb[242].mxu0 }
0x184a   : > { %v9006_v29 = vpop.f32.mrb[243].mxu0  ;;  %6892 = vrot.lane.b32.xlu1 %v6879_v23, %s12411_s5  ;;  %v6883_v42 = vmul.f32 %v6778_v30, %v10041_v62 }
0x184c   : > { %6894 = vrot.lane.b32.xlu0 %v6880_v61, %s12411_s5  ;;  %v6676_v40 = vpop.f32.mrb[252].mxu1 }
0x184d   : > { %v6678_v7 = vpop.f32.mrb[253].mxu1  ;;  %v6918_v3 = vmul.f32 %v6676_v40, %v10058_v20 }
0x184e   : > { %6900 = vrot.lane.b32.xlu1 %v6883_v42, %s12411_s5  ;;  %v6680_v21 = vpop.f32.mrb[254].mxu1  ;;  %v6919_v48 = vmul.f32 %v6678_v7, %v10068_v31  ;;  %v12474_v42 = vld [vmem:[#allocation66_spill] sm:$0xff] }
0x184f   : > { %v6682_v56 = vpop.f32.mrb[255].mxu1  ;;  %v6783_v47 = vpop.f32.mrb[244].mxu0  ;;  %v6921_v60 = vmul.f32 %v6680_v21, %v10058_v20  ;;  %v12475_v21 = vld [vmem:[#allocation65_spill] sm:$0xff] }
0x1850   : > { %v9009_v25 = vpop.f32.mrb[245].mxu0  ;;  %6890 = vrot.lane.b32.xlu0 %v6878_v51, %s12411_s5  ;;  %v6920_v8 = vmul.f32 %v6783_v47, %v12412_v14  ;;  %v6922_v37 = vmul.f32 %v6682_v56, %v10068_v31 }
0x1851   : > { %v6786_v46 = vpop.f32.mrb[246].mxu0 }
0x1852   : > { %6896 = vrot.lane.b32.xlu1 %v6881_v11, %s12411_s5  ;;  %v9010_v62 = vpop.f32.mrb[247].mxu0  ;;  %v6923_v49 = vmul.f32 %v6786_v46, %v12412_v14 }
0x1854   : > { %6898 = vrot.lane.b32.xlu0 %v6882_v1, %s12411_s5  ;;  %v6686_v28 = vpop.f32.mrb[0].mxu1  ;;  %s12507_s5 = sld [smem:[#allocation35_spill]] }
0x1855   : > { %v6687_v24 = vpop.f32.mrb[1].mxu1 }
0x1856   : > { %6932 = vrot.lane.b32.xlu1 %v6919_v48, %s12370_s11  ;;  %v6689_v63 = vpop.f32.mrb[2].mxu1 }
0x1857   : > { %v6690_v18 = vpop.f32.mrb[3].mxu1  ;;  %v6791_v17 = vpop.f32.mrb[248].mxu0  ;;  %v12476_v63 = vld [vmem:[#allocation68_spill] sm:$0xff] }
0x1858   : > { %6934 = vrot.lane.b32.xlu0 %v6920_v8, %s12370_s11  ;;  %v9013_v58 = vpop.f32.mrb[249].mxu0 }
0x1859   : > { %v6794_v5 = vpop.f32.mrb[250].mxu0 }
0x185a   : > { %6940 = vrot.lane.b32.xlu1 %v6923_v49, %s12370_s11  ;;  %v9014_v35 = vpop.f32.mrb[251].mxu0 }
0x185b   : > { %v11595_v35 = vpop.permute.xlu0 %7000 }
0x185c   : > { %6930 = vrot.lane.b32.xlu0 %v6918_v3, %s12370_s11  ;;  %v6694_v41 = vpop.f32.mrb[4].mxu1  ;;  %v11593_v3 = vpop.permute.xlu1 %7006 }
0x185d   : > { %v6695_v34 = vpop.f32.mrb[5].mxu1 }
0x185e   : > { %6936 = vrot.lane.b32.xlu1 %v6921_v60, %s12370_s11  ;;  %v6697_v14 = vpop.f32.mrb[6].mxu1  ;;  %v6984_v55 = vmul.f32 %v6695_v34, %v12473_v15 }
0x185f   : > { %v6698_v36 = vpop.f32.mrb[7].mxu1  ;;  %v6799_v4 = vpop.f32.mrb[252].mxu0 }
0x1860   : > { %v9017_v53 = vpop.f32.mrb[253].mxu0  ;;  %6938 = vrot.lane.b32.xlu0 %v6922_v37, %s12370_s11  ;;  %v6985_v52 = vmul.f32 %v6799_v4, %v12414_v12  ;;  %v6987_v59 = vmul.f32 %v6698_v36, %v12473_v15  ;;  %v11597_v60 = vpop.permute.xlu1 %7046 }
0x1861   : > { %v6803_v32 = vpop.f32.mrb[254].mxu0  ;;  %v11599_v41 = vpop.permute.xlu0 %7040 }
0x1862   : > { %6964 = vrot.lane.b32.xlu1 %v6791_v17, %s12371_s2  ;;  %v9018_v57 = vpop.f32.mrb[255].mxu0  ;;  %v6988_v13 = vmul.f32 %v6803_v32, %v12414_v12  ;;  %v12477_v17 = vld [vmem:[#allocation69_spill] sm:$0xff] }
0x1864   : > { %6962 = vrot.lane.b32.xlu0 %v6687_v24, %s12371_s2  ;;  %v6702_v20 = vpop.f32.mrb[8].mxu1  ;;  %v11601_v34 = vpop.permute.xlu1 %7147 }
0x1865   : > { %v6703_v39 = vpop.f32.mrb[9].mxu1  ;;  %v11603_v37 = vpop.permute.xlu0 %7142 }
0x1866   : > { %6968 = vrot.lane.b32.xlu1 %v6794_v5, %s12371_s2  ;;  %v6705_v9 = vpop.f32.mrb[10].mxu1  ;;  %v7024_v56 = vmul.f32 %v6703_v39, %v12475_v21 }
0x1867   : > { %v6706_v31 = vpop.f32.mrb[11].mxu1  ;;  %v6809_v26 = vpop.f32.mrb[0].mxu0 }
0x1868   : > { %v9021_v54 = vpop.f32.mrb[1].mxu0  ;;  %6966 = vrot.lane.b32.xlu0 %v6690_v18, %s12371_s2  ;;  %v7025_v40 = vmul.f32 %v6809_v26, %v12474_v42  ;;  %v7027_v11 = vmul.f32 %v6706_v31, %v12475_v21  ;;  %v11605_v14 = vpop.permute.xlu1 %7114 }
0x1869   : > { %v6813_v33 = vpop.f32.mrb[2].mxu0  ;;  %v11607_v36 = vpop.permute.xlu0 %9228 }
0x186a   : > { %6998 = vrot.lane.b32.xlu1 %v6985_v52, %s12415_s6  ;;  %v9022_v16 = vpop.f32.mrb[3].mxu0  ;;  %v7028_v46 = vmul.f32 %v6813_v33, %v12474_v42 }
0x186c   : > { %6996 = vrot.lane.b32.xlu0 %v6984_v55, %s12415_s6  ;;  %v6710_v50 = vpop.f32.mrb[12].mxu1 }
0x186d   : > { %v6711_v23 = vpop.f32.mrb[13].mxu1 }
0x186e   : > { %7002 = vrot.lane.b32.xlu1 %v6987_v59, %s12415_s6  ;;  %v6713_v30 = vpop.f32.mrb[14].mxu1 }
0x186f   : > { %v6714_v61 = vpop.f32.mrb[15].mxu1  ;;  %v6819_v29 = vpop.f32.mrb[4].mxu0 }
0x1870   : > { %7004 = vrot.lane.b32.xlu0 %v6988_v13, %s12415_s6  ;;  %v9025_v7 = vpop.f32.mrb[5].mxu0  ;;  %s12563_s6 = sld [smem:[#allocation37_spill]] }
0x1871   : > { %v6823_v51 = vpop.f32.mrb[6].mxu0 }
0x1872   : > { %7038 = vrot.lane.b32.xlu1 %v7025_v40, %s12419_s7  ;;  %v9026_v47 = vpop.f32.mrb[7].mxu0 }
0x1873   : > { %v6838_v47 = vmul.f32 %v11517_v38, %v12426_v43 }
0x1874   : > { %7036 = vrot.lane.b32.xlu0 %v7024_v56, %s12419_s7  ;;  %v6718_v12 = vpop.f32.mrb[16].mxu1 }
0x1875   : > { %v6719_v25 = vpop.f32.mrb[17].mxu1  ;;  %v12478_v12 = vld [vmem:[#allocation72_spill] sm:$0xff] }
0x1876   : > { %7042 = vrot.lane.b32.xlu1 %v7027_v11, %s12419_s7  ;;  %v6721_v1 = vpop.f32.mrb[18].mxu1  ;;  %v7098_v18 = vmul.f32 %v6719_v25, %v12476_v63  ;;  %v6839_v25 = vmul.f32 %v11519_v44, %v12478_v12  ;;  %v6842_v38 = vmul.f32 %v11523_v19, %v12478_v12 }
0x1877   : > { %v6722_v62 = vpop.f32.mrb[19].mxu1  ;;  %v6829_v48 = vpop.f32.mrb[8].mxu0 }
0x1878   : > { %v9029_v28 = vpop.f32.mrb[9].mxu0  ;;  %7044 = vrot.lane.b32.xlu0 %v7028_v46, %s12419_s7  ;;  %v7099_v49 = vmul.f32 %v6829_v48, %v12477_v17  ;;  %v7101_v5 = vmul.f32 %v6722_v62, %v12476_v63  ;;  %v9230_v46 = vunpack.i.l.bf16 %v11607_v36  ;;  %v6841_v48 = vmul.f32 %v11521_v0, %v12426_v43 }
0x1879   : > { %v6833_v24 = vpop.f32.mrb[10].mxu0  ;;  %v6840_v63 = vmul.f32 %v11525_v6, %v12430_v22 }
0x187a   : > { %7072 = vrot.lane.b32.xlu1 %v6819_v29, %s12421_s8  ;;  %v9030_v8 = vpop.f32.mrb[11].mxu0  ;;  %v7102_v58 = vmul.f32 %v6833_v24, %v12477_v17 }
0x187c   : > { %7070 = vrot.lane.b32.xlu0 %v6711_v23, %s12421_s8 }
0x187e   : > { %7076 = vrot.lane.b32.xlu1 %v6714_v61, %s12421_s8 }
0x1880   : > { %7078 = vrot.lane.b32.xlu0 %v6823_v51, %s12421_s8  ;;  %s12514_s8 = sld [smem:[#allocation34_spill]] }
0x1882   : > { %7110 = vrot.lane.b32.xlu1 %v7098_v18, %s12424_s12 }
0x1884   : > { %7112 = vrot.lane.b32.xlu0 %v7099_v49, %s12424_s12 }
0x1886   : > { %7118 = vrot.lane.b32.xlu1 %v7102_v58, %s12424_s12 }
0x1888   : > { %7116 = vrot.lane.b32.xlu0 %v7101_v5, %s12424_s12  ;;  %v6843_v5 = vmul.f32 %v11527_v27, %v12430_v22 }
0x188c   : > { %7120 = vrot.lane.b32.xlu0 %v12454_v2, %s12424_s12  ;;  %s12564_s12 = sld [smem:[#allocation36_spill]] }
0x18b0   : > { %v6853_v4 = vpop.permute.xlu1 %6852 }
0x18b2   : > { %v6855_v53 = vpop.permute.xlu0 %6854 }
0x18b3   : > { %v6863_v11 = vsel %vm1483_vm7, %v6853_v4, %v6855_v53 }
0x18b4   : > { %v6861_v32 = vpop.permute.xlu1 %6860  ;;  %v6873_v44 = vadd.f32 %v6863_v11, %v6839_v25 }
0x18b6   : > { %v6851_v2 = vpop.permute.xlu0 %6850 }
0x18b7   : > { %v6862_v21 = vsel %vm1483_vm7, %v6851_v2, %v6853_v4  ;;  %v6874_v4 = vadd.f32 %v6855_v53, %v6840_v63 }
0x18b8   : > { %v6857_v57 = vpop.permute.xlu1 %6856  ;;  %v6872_v28 = vadd.f32 %v6862_v21, %v6838_v47 }
0x18ba   : > { %v6859_v20 = vpop.permute.xlu0 %6858 }
0x18bb   : > { %v6864_v24 = vsel %vm1483_vm7, %v6857_v57, %v6859_v20  ;;  %v6865_v49 = vsel %vm1483_vm7, %v6859_v20, %v6861_v32  ;;  %v6877_v20 = vadd.f32 %v6861_v32, %v6843_v5 }
0x18bc   : > { %v6893_v39 = vpop.permute.xlu1 %6892  ;;  %v6875_v19 = vadd.f32 %v6864_v24, %v6841_v48  ;;  %v6876_v21 = vadd.f32 %v6865_v49, %v6842_v38 }
0x18be   : > { %v6895_v9 = vpop.permute.xlu0 %6894 }
0x18bf   : > { %v6903_v8 = vsel %vm12480_vm15, %v6893_v39, %v6895_v9  ;;  %vm12487_vm15 = vcmask 506880  }
0x18c0   : > { %v6901_v31 = vpop.permute.xlu1 %6900  ;;  %v6913_v2 = vadd.f32 %v6903_v8, %v6873_v44 }
0x18c1   : > { %v6917_v12 = vadd.f32 %v6901_v31, %v6877_v20 }
0x18c2   : > { %v6891_v26 = vpop.permute.xlu0 %6890 }
0x18c3   : > { %v6902_v1 = vsel %vm12479_vm5, %v6891_v26, %v6893_v39  ;;  %vm12486_vm5 = vmmov %vm12485_vm10 }
0x18c4   : > { %v6897_v52 = vpop.permute.xlu1 %6896  ;;  %v6912_v58 = vadd.f32 %v6902_v1, %v6872_v28 }
0x18c6   : > { %v6899_v54 = vpop.permute.xlu0 %6898 }
0x18c7   : > { %v6904_v43 = vsel %vm12481_vm2, %v6897_v52, %v6899_v54  ;;  %v6905_v6 = vsel %vm12482_vm0, %v6899_v54, %v6901_v31  ;;  %vm12488_vm2 = vmmov %vm12484_vm4 }
0x18c8   : > { %v6933_v33 = vpop.permute.xlu1 %6932  ;;  %v6915_v47 = vadd.f32 %v6904_v43, %v6875_v19  ;;  %v6916_v25 = vadd.f32 %v6905_v6, %v6876_v21  ;;  %vm12489_vm0 = vmmov %vm12488_vm2 }
0x18ca   : > { %v6935_v15 = vpop.permute.xlu0 %6934 }
0x18cb   : > { %v6943_v0 = vsel %vm1585_vm11, %v6933_v33, %v6935_v15 }
0x18cc   : > { %v11609_v55 = vpop.permute.xlu1 %6940  ;;  %v6953_v52 = vadd.f32 %v6943_v0, %v6913_v2 }
0x18ce   : > { %v6931_v16 = vpop.permute.xlu0 %6930 }
0x18cf   : > { %v6942_v18 = vsel %vm1585_vm11, %v6931_v16, %v6933_v33  ;;  %v6914_v33 = vadd.f32 %v6895_v9, %v6874_v4 }
0x18d0   : > { %v6937_v59 = vpop.permute.xlu1 %6936  ;;  %v6952_v39 = vadd.f32 %v6942_v18, %v6912_v58  ;;  %v6957_v18 = vadd.f32 %v11609_v55, %v6917_v12 }
0x18d2   : > { %v6939_v50 = vpop.permute.xlu0 %6938 }
0x18d3   : > { %v6944_v26 = vsel %vm1585_vm11, %v6937_v59, %v6939_v50  ;;  %v6945_v22 = vsel %vm1585_vm11, %v6939_v50, %v11609_v55  ;;  %v6954_v59 = vadd.f32 %v6935_v15, %v6914_v33 }
0x18d4   : > { %v6965_v23 = vpop.permute.xlu1 %6964  ;;  %v6955_v54 = vadd.f32 %v6944_v26, %v6915_v47  ;;  %v6956_v9 = vadd.f32 %v6945_v22, %v6916_v25 }
0x18d5   : > { %v6980_v31 = vadd.f32 %v6965_v23, %v6954_v59 }
0x18d6   : > { %v6963_v13 = vpop.permute.xlu0 %6962 }
0x18d7   : > { %v6970_v16 = vsel %vm1633_vm13, %v6963_v13, %v6965_v23  ;;  %v6978_v27 = vadd.f32 %v6963_v13, %v6952_v39 }
0x18d8   : > { %v11611_v30 = vpop.permute.xlu1 %6968  ;;  %v6979_v1 = vadd.f32 %v6970_v16, %v6953_v52 }
0x18da   : > { %v6967_v61 = vpop.permute.xlu0 %6966 }
0x18db   : > { %v6971_v32 = vsel %vm1633_vm13, %v6967_v61, %v11611_v30  ;;  %v6981_v8 = vadd.f32 %v6967_v61, %v6955_v54 }
0x18dc   : > { %v6999_v29 = vpop.permute.xlu1 %6998 }
0x18dd   : > { %v7009_v50 = vsel %vm12485_vm10, %v6999_v29, %v11595_v35 }
0x18de   : > { %v6997_v42 = vpop.permute.xlu0 %6996  ;;  %v7020_v0 = vadd.f32 %v7009_v50, %v6980_v31 }
0x18df   : > { %v7008_v53 = vsel %vm12483_vm12, %v6997_v42, %v6999_v29  ;;  %v7018_v28 = vadd.f32 %v6997_v42, %v6978_v27  ;;  %v6982_v42 = vadd.f32 %v6971_v32, %v6956_v9  ;;  %vm12490_vm12 = vmmov %vm12486_vm5 }
0x18e0   : > { %v7003_v40 = vpop.permute.xlu1 %7002  ;;  %v7019_v13 = vadd.f32 %v7008_v53, %v6979_v1 }
0x18e1   : > { %v7021_v49 = vadd.f32 %v7003_v40, %v6981_v8 }
0x18e2   : > { %v11613_v7 = vpop.permute.xlu0 %7004 }
0x18e3   : > { %v7010_v63 = vsel %vm12486_vm5, %v7003_v40, %v11613_v7  ;;  %v7011_v29 = vsel %vm12490_vm12, %v11613_v7, %v11593_v3  ;;  %vm12493_vm5 = vcmask 490496   ;;  %v9231_v3 = vunpack.i.h.bf16 %v11607_v36 }
0x18e4   : > { %v11615_v51 = vpop.permute.xlu1 %7038 }
0x18e5   : > { %v7049_v35 = vsel %vm12488_vm2, %v11615_v51, %v11599_v41  ;;  %vm12495_vm2 = vmmov %vm12493_vm5 }
0x18e6   : > { %v7037_v56 = vpop.permute.xlu0 %7036  ;;  %v7060_v6 = vadd.f32 %v7049_v35, %v7020_v0  ;;  %vm12497_vm12 = vmmov %vm12495_vm2  ;;  %v12505_v35 = vld [vmem:[#allocation78_spill] sm:$0xff] }
0x18e7   : > { %v7048_v24 = vsel %vm12484_vm4, %v7037_v56, %v11615_v51  ;;  %v7058_v44 = vadd.f32 %v7037_v56, %v7018_v28  ;;  %v7022_v56 = vadd.f32 %v7010_v63, %v6982_v42  ;;  %vm12491_vm4 = vmmov %vm12487_vm15  ;;  %v6983_v51 = vadd.f32 %v11611_v30, %v6957_v18  ;;  %v12501_v18 = vld [vmem:[#allocation76_spill] sm:$0xff] }
0x18e8   : > { %v7043_v62 = vpop.permute.xlu1 %7042  ;;  %v7059_v58 = vadd.f32 %v7048_v24, %v7019_v13  ;;  %vm12492_vm10 = vmmov %vm12491_vm4 }
0x18e9   : > { %v7061_v5 = vadd.f32 %v7043_v62, %v7021_v49 }
0x18ea   : > { %v11634_v17 = vpop.permute.xlu0 %7044 }
0x18eb   : > { %v7050_v23 = vsel %vm12489_vm0, %v7043_v62, %v11634_v17 }
0x18ec   : > { %v7073_v57 = vpop.permute.xlu1 %7072  ;;  %v7062_v39 = vadd.f32 %v7050_v23, %v7022_v56 }
0x18ed   : > { %v7083_v40 = vsel %vm12491_vm4, %v7073_v57, %v9230_v46 }
0x18ee   : > { %v7071_v11 = vpop.permute.xlu0 %7070  ;;  %v7094_v16 = vadd.f32 %v7083_v40, %v7060_v6  ;;  %v12512_v6 = vld [vmem:[#allocation81_spill] sm:$0xff] }
0x18ef   : > { %v7082_v15 = vsel %vm12487_vm15, %v7071_v11, %v7073_v57  ;;  %v7092_v61 = vadd.f32 %v7071_v11, %v7058_v44  ;;  %vm12494_vm15 = vmmov %vm12489_vm0  ;;  %v7023_v57 = vadd.f32 %v7011_v29, %v6983_v51 }
0x18f0   : > { %v7077_v48 = vpop.permute.xlu1 %7076  ;;  %v7093_v55 = vadd.f32 %v7082_v15, %v7059_v58  ;;  %v7051_v7 = vsel %vm12494_vm15, %v11634_v17, %v11597_v60  ;;  %vm12496_vm0 = vmmov %vm12491_vm4  ;;  %vm12502_vm15 = vcmp.ne.s16.totalorder %v12501_v18, 0 }
0x18f1   : > { %v7095_v62 = vadd.f32 %v7077_v48, %v7061_v5  ;;  %v7063_v33 = vadd.f32 %v7051_v7, %v7023_v57  ;;  %vm12498_vm4 = vmmov %vm12495_vm2  ;;  %v12517_v7 = vld [vmem:[#allocation80_spill] sm:$0xff] }
0x18f2   : > { %v7079_v38 = vpop.permute.xlu0 %7078 }
0x18f3   : > { %v7084_v19 = vsel %vm12492_vm10, %v7077_v48, %v7079_v38  ;;  %v7085_v30 = vsel %vm12496_vm0, %v7079_v38, %v9231_v3  ;;  %vm12499_vm10 = vcmask 277504   ;;  %vm12506_vm0 = vcmp.ne.s16.totalorder %v12505_v35, 0 }
0x18f4   : > { %v7111_v43 = vpop.permute.xlu1 %7110  ;;  %v7096_v20 = vadd.f32 %v7084_v19, %v7062_v39 }
0x18f5   : > { %v7132_v2 = vadd.f32 %v7111_v43, %v7092_v61 }
0x18f6   : > { %v7113_v4 = vpop.permute.xlu0 %7112 }
0x18f7   : > { %v7122_v41 = vsel %vm12493_vm5, %v7111_v43, %v7113_v4  ;;  %v7123_v46 = vsel %vm12495_vm2, %v7113_v4, %v11605_v14  ;;  %v7150_v52 = vadd.f32 %v11603_v37, %v7132_v2  ;;  %v7097_v14 = vadd.f32 %v7085_v30, %v7063_v33  ;;  %vm12500_vm5 = vmmov %vm12499_vm10  ;;  %v12503_v43 = vld [vmem:[#allocation77_spill] sm:$0xff]  ;;  %v12508_v4 = vld [vmem:[#allocation79_spill] sm:$0xff] }
0x18f8   : > { %v7133_v26 = vadd.f32 %v7122_v41, %v7093_v55  ;;  %v7119_v21 = vpop.permute.xlu1 %7118  ;;  %v7134_v22 = vadd.f32 %v7123_v46, %v7094_v16  ;;  %vm12504_vm2 = vcmp.ne.s16.totalorder %v12503_v43, 0  ;;  %v12510_v41 = vld [vmem:[#allocation82_spill] sm:$0xff]  ;;  %v12519_v46 = vld [vmem:[#allocation83_spill] sm:$0xff]  ;;  %v7812_v16 = vld [vmem:[%s12507_s5] sm:$0xff] }
0x18f9   : > { %v7156_v25 = vmax.f32 %v7150_v52, 0.0  ;;  %v7246_v33 = vld [vmem:[#allocation5 + $0x8] sm:$0xff] }
0x18fa   : > { %v7117_v47 = vpop.permute.xlu0 %7116  ;;  %v7151_v60 = vadd.f32 %v11603_v37, %v7133_v26  ;;  %v7152_v48 = vadd.f32 %v11603_v37, %v7134_v22  ;;  %v12515_v26 = vld [vmem:[#allocation84_spill] sm:$0xff] }
0x18fb   : > { %v7124_v11 = vsel %vm12497_vm12, %v7117_v47, %v7119_v21  ;;  %v7135_v36 = vadd.f32 %v7117_v47, %v7095_v62  ;;  %vm12509_vm12 = vcmp.ne.s16.totalorder %v12508_v4, 0  ;;  %v12541_v4 = vld [vmem:[#allocation45_spill] sm:$0xff] }
0x18fc   : > { %v7136_v17 = vadd.f32 %v7124_v11, %v7096_v20  ;;  %v7157_v59 = vmax.f32 %v7151_v60, 0.0  ;;  %v7158_v50 = vmax.f32 %v7152_v48, 0.0  ;;  %v7245_v20 = vld [vmem:[#allocation5] sm:$0xff] }
0x18fd   : > { %v7153_v27 = vadd.f32 %v11601_v34, %v7135_v36  ;;  %v8842_v52 = vcombine.high %v7245_v20, %v7245_v20  ;;  %v9336_v11 = vld [vmem:[%s12514_s8] sm:$0xff]   ;;  %v8841_v36 = vcombine.low %v7245_v20, %v7245_v20 }
0x18fe   : > { %v7154_v53 = vadd.f32 %v11601_v34, %v7136_v17  ;;  %v7121_v12 = vpop.permute.xlu0 %7120  ;;  %v8844_v17 = vcombine.high %v7246_v33, %v7246_v33 }
0x18ff   : > { %v7159_v54 = vmax.f32 %v7153_v27, 0.0  ;;  %v7125_v1 = vsel %vm12498_vm4, %v7119_v21, %v7121_v12  ;;  %vm12511_vm4 = vcmp.ne.s16.totalorder %v12510_v41, 0  ;;  %v8843_v27 = vcombine.low %v7246_v33, %v7246_v33  ;;  %v9340_v12 = vld [vmem:[%s12514_s8 + $0x8] sm:$0xff]  }
0x1900   : > { %v7160_v32 = vmax.f32 %v7154_v53, 0.0  ;;  %v7137_v28 = vadd.f32 %v7125_v1, %v7097_v14  ;;  %v7499_v14 = vsel %vm1671_vm14, %v8841_v36, 0  ;;  %v9343_v1 = vld [vmem:[%s12514_s8 + $0x20] ss:$0 sps:$4 sm:$0xff]  }
0x1901   : > { %v7162_v24 = vpack.c.bf16 %v7159_v54, %v7156_v25  ;;  %v7505_v53 = vsel %vm1671_vm14, %v8843_v27, 0  ;;  %v9341_v25 = vld [vmem:[%s12514_s8 + $0x10] sm:$0xff]   ;;  %v9342_v54 = vld [vmem:[%s12514_s8 + $0x18] sm:$0xff]  }
0x1902   : > { %v7163_v9 = vpack.c.bf16 %v7160_v32, %v7157_v59  ;;  %v7155_v8 = vadd.f32 %v11601_v34, %v7137_v28 }
0x1903   : > { %7168 = vrot.lane.b32.xlu1 %v7162_v24, %s12450_s19 }
0x1904   : > { %v7161_v13 = vmax.f32 %v7155_v8, 0.0  ;;  %7170 = vrot.lane.b32.xlu0 %v7163_v9, %s12450_s19 }
0x1906   : > { %v7164_v38 = vpack.c.bf16 %v7161_v13, %v7158_v50 }
0x1908   : > { %7172 = vrot.lane.b32.xlu1 %v7164_v38, %s12450_s19  ;;  %s12525_s19 = sld [smem:[#allocation33_spill]] }
0x190e   : > { %v9344_v48 = vld [vmem:[%s12525_s19] sm:$0xff]   ;;  %v9345_v59 = vld [vmem:[%s12525_s19 + $0x8] sm:$0xff]   ;;  %v9347_v32 = vld [vmem:[%s12525_s19 + $0x18] sm:$0xff]  }
0x190f   : > { %v9348_v28 = vld [vmem:[%s12525_s19 + $0x20] ss:$0 sps:$4 sm:$0xff]  }
0x1975   : > { %v7169_v31 = vpop.permute.xlu1 %7168 }
0x1976   : > { %v7171_v63 = vpop.permute.xlu0 %7170 }
0x1977   : > { %v7174_v37 = vsel %vm12499_vm10, %v7169_v31, %v7171_v63  ;;  %vm12513_vm10 = vcmp.ne.s16.totalorder %v12512_v6, 0 }
0x1978   : > { %7185 = vrot.lane.b32.xlu0 %v7174_v37, %s12388_s3 }
0x197a   : > { %v7173_v44 = vpop.permute.xlu1 %7172 }
0x197b   : > { %v7175_v15 = vsel %vm12500_vm5, %v7171_v63, %v7173_v44  ;;  %vm12516_vm5 = vcmp.ne.s16.totalorder %v12515_v26, 0 }
0x197c   : > { %7197 = vrot.lane.b32.xlu0 %v12260_v45, %s12388_s3  ;;  %7187 = vrot.lane.b32.xlu1 %v7175_v15, %s12388_s3 }
0x19ea   : > { %v7186_v34 = vpop.permute.xlu0 %7185 }
0x19eb   : > { %v7193_v42 = vsel %vm12502_vm15, 0, %v7186_v34  ;;  %vm12518_vm15 = vcmp.ne.s16.totalorder %v12517_v7, 0 }
0x19ec   : > { %7207 = vrot.lane.b32.xlu1 %v7193_v42, %s12282_s22 }
0x19ee   : > { %v7188_v49 = vpop.permute.xlu1 %7187  ;;  %v7198_v61 = vpop.permute.xlu0 %7197 }
0x19ef   : > { %v7189_v58 = vsel %vm1444_vm3, %v7186_v34, %v7188_v49  ;;  %v7195_v0 = vsel %vm12504_vm2, %v7175_v15, %v7188_v49  ;;  %v7199_v56 = vsel %vm1444_vm3, %v7198_v61, %v7186_v34  ;;  %v7203_v62 = vsel %vm12518_vm15, %v7175_v15, %v7188_v49 }
0x19f0   : > { %7211 = vrot.lane.b32.xlu1 %v7195_v0, %s12282_s22  ;;  %v7194_v23 = vsel %vm12506_vm0, %v7174_v37, %v7189_v58  ;;  %v7201_v40 = vsel %vm12509_vm12, 0, %v7199_v56  ;;  %v7202_v51 = vsel %vm12511_vm4, %v7174_v37, %v7189_v58  ;;  %vm12520_vm2 = vcmp.ne.s16.totalorder %v12519_v46, 0 }
0x19f1   : > { %7209 = vrot.lane.b32.xlu0 %v7194_v23, %s12282_s22  ;;  %vm12521_vm0 = vcmask 130048  }
0x19f2   : > { %vm12522_vm12 = vmmov %vm12521_vm0 }
0x19f3   : > { %vm12523_vm4 = vmmov %vm12521_vm0 }
0x19f4   : > { %vm12527_vm15 = vmmov %vm12521_vm0 }
0x1a5e   : > { %v7208_v29 = vpop.permute.xlu1 %7207 }
0x1a62   : > { %v7212_v5 = vpop.permute.xlu1 %7211 }
0x1a63   : > { %v7210_v55 = vpop.permute.xlu0 %7209  ;;  %v7220_v57 = vsel %vm12520_vm2, %v7203_v62, %v7212_v5  ;;  %vm12528_vm2 = vmmov %vm12521_vm0 }
0x1a64   : > { %v7213_v19 = vsel %vm1512_vm9, %v7208_v29, %v7210_v55  ;;  %v7214_v2 = vsel %vm1512_vm9, %v7210_v55, %v7212_v5 }
0x1a65   : > { %v7218_v39 = vsel %vm12513_vm10, %v7201_v40, %v7213_v19  ;;  %v7219_v3 = vsel %vm12516_vm5, %v7202_v51, %v7214_v2  ;;  %vm12524_vm10 = vmmov %vm12521_vm0  ;;  %v12542_v19 = vld [vmem:[#allocation44_spill] sm:$0xff] }
0x1a66   : > { %7224 = vrot.lane.b32.xlu0 %v7218_v39, %s12290_s26  ;;  %7226 = vrot.lane.b32.xlu1 %v7219_v3, %s12290_s26  ;;  %vm12526_vm5 = vmmov %vm12521_vm0  ;;  %v12543_v39 = vld [vmem:[#allocation42_spill] sm:$0xff] }
0x1a67   : > { %v12544_v3 = vld [vmem:[#allocation46_spill] sm:$0xff] }
0x1a6a   : > { %7228 = vrot.lane.b32.xlu0 %v7220_v57, %s12290_s26 }
0x1a6e   : > { %7815 = vperm.xlu0 %9221, %v7812_v16  }
0x1ad8   : > { %v7225_v21 = vpop.permute.xlu0 %7224  ;;  %v7227_v47 = vpop.permute.xlu1 %7226 }
0x1ad9   : > { %v7230_v30 = vsel %vm1616_vm6, %v7225_v21, %v7227_v47  ;;  %v12545_v21 = vld [vmem:[#allocation43_spill] sm:$0xff] }
0x1ada   : > { %7298 = vmatprep.subr.bf16.mxu1 %v7230_v30  ;;  %v12546_v30 = vld [vmem:[#allocation47_spill] sm:$0xff] }
0x1adb   : > { %7299 = vmatpush1.bf16.msra.mxu1 %v12260_v45 }
0x1adc   : > { %v7229_v22 = vpop.permute.xlu0 %7228  ;;  %8845 = vmatprep.subr.msk.bf16.mxu1 %vm1671_vm14, %v8842_v52 }
0x1add   : > { %v7231_v60 = vsel %vm1616_vm6, %v7227_v47, %v7229_v22 }
0x1ade   : > { %8826 = vmatmul.mubr.msk.bf16.vlgmr.msra.gmra.mrb[20].mxu1 %vm12521_vm0, %v9336_v11  ;;  %9032 = vmatpush3.bf16.msra.mxu0 %v7231_v60 }
0x1adf   : > { %7511 = vmatpush1.bf16.msra.mxu1 %v7499_v14  ;;  %8851 = vmatprep.subr.msk.bf16.mxu0 %vm1671_vm14, %v8844_v17 }
0x1ae0   : > { %7340 = vmatprep.mubr.bf16.mxu1 %v12260_v45 }
0x1ae1   : > { %9034 = vmatmul.mubr.msk.bf16.vlgmr.msra.gmra.mrb[12].mxu0 %vm12522_vm12, %v9336_v11  ;;  %vm12529_vm12 = vmmov %vm12521_vm0 }
0x1ae2   : > { %7587 = vmatpush1.bf16.msra.mxu0 %v7505_v53  ;;  %9037 = vmatprep.mubr.msk.bf16.mxu0 %vm12292_vm1, %v12291_v10 }
0x1ae6   : > { %8827 = vmatmul.mubr.msk.bf16.gmra.mrb[24].mxu1 %vm12523_vm4, %v9340_v12  ;;  %vm12530_vm4 = vmmov %vm12521_vm0 }
0x1ae7   : > { %7350 = vmatprep.mubr.bf16.mxu1 %v12260_v45 }
0x1ae9   : > { %9038 = vmatmul.mubr.msk.bf16.gmra.mrb[16].mxu0 %vm12524_vm10, %v9340_v12  ;;  %vm12531_vm10 = vcmask 64512  }
0x1aea   : > { %9041 = vmatprep.mubr.msk.bf16.mxu0 %vm12292_vm1, %v12291_v10 }
0x1aee   : > { %8828 = vmatmul.mubr.msk.bf16.gmra.mrb[28].mxu1 %vm12526_vm5, %v9341_v25  ;;  %vm12532_vm5 = vmmov %vm12531_vm10 }
0x1aef   : > { %7358 = vmatprep.mubr.bf16.mxu1 %v12260_v45 }
0x1af1   : > { %9042 = vmatmul.mubr.msk.bf16.gmra.mrb[20].mxu0 %vm12527_vm15, %v9341_v25  ;;  %v12547_v25 = vld [vmem:[#allocation50_spill] sm:$0xff] }
0x1af2   : > { %9045 = vmatprep.mubr.msk.bf16.mxu0 %vm12292_vm1, %v12291_v10 }
0x1af6   : > { %8829 = vmatmul.mubr.msk.bf16.gmra.mrb[32].mxu1 %vm12528_vm2, %v9342_v54 }
0x1af7   : > { %7366 = vmatprep.mubr.bf16.mxu1 %v12260_v45 }
0x1af9   : > { %9046 = vmatmul.mubr.msk.bf16.gmra.mrb[24].mxu0 %vm12521_vm0, %v9342_v54 }
0x1afa   : > { %9049 = vmatprep.mubr.msk.bf16.mxu0 %vm12292_vm1, %v12291_v10  ;;  %vm12533_vm1 = vmmov %vm12532_vm5  ;;  %v9346_v10 = vld [vmem:[%s12525_s19 + $0x10] sm:$0xff]  }
0x1afb   : > { %vm12534_vm15 = vmmov %vm12533_vm1 }
0x1afc   : > { %vm12535_vm2 = vmmov %vm12533_vm1 }
0x1afd   : > { %vm12536_vm0 = vmmov %vm12533_vm1 }
0x1afe   : > { %8830 = vmatmul.mubr.msk.bf16.gmra.mrb[36].mxu1 %vm12529_vm12, %v9343_v1  ;;  %vm12537_vm12 = vmmov %vm12536_vm0 }
0x1aff   : > { %7542 = vmatprep.mubr.bf16.mxu1 %v12260_v45 }
0x1b01   : > { %9050 = vmatmul.mubr.msk.bf16.gmra.mrb[28].mxu0 %vm12530_vm4, %v9343_v1  ;;  %vm12538_vm4 = vmmov %vm12536_vm0  ;;  %v12548_v1 = vld [vmem:[#allocation49_spill] sm:$0xff] }
0x1b02   : > { %7618 = vmatprep.mubr.bf16.mxu0 %v12260_v45 }
0x1b06   : > { %8846 = vmatmul.mubr.msk.bf16.vlgmr.msra.gmra.mrb[20].mxu1 %vm12531_vm10, %v9344_v48  ;;  %vm12539_vm10 = vmmov %vm12536_vm0 }
0x1b07   : > { %7552 = vmatprep.mubr.bf16.mxu1 %v12260_v45 }
0x1b09   : > { %8852 = vmatmul.mubr.msk.bf16.vlgmr.msra.gmra.mrb[12].mxu0 %vm12532_vm5, %v9344_v48  ;;  %vm12540_vm5 = vmmov %vm12536_vm0 }
0x1b0a   : > { %7626 = vmatprep.mubr.bf16.mxu0 %v12260_v45 }
0x1b0e   : > { %8847 = vmatmul.mubr.msk.bf16.gmra.mrb[24].mxu1 %vm12533_vm1, %v9345_v59  ;;  %vm12559_vm1 = vcmask 900096  }
0x1b0f   : > { %7562 = vmatprep.mubr.bf16.mxu1 %v12260_v45 }
0x1b11   : > { %8853 = vmatmul.mubr.msk.bf16.gmra.mrb[16].mxu0 %vm12534_vm15, %v9345_v59  ;;  %vm12560_vm15 = vmmov %vm12559_vm1 }
0x1b12   : > { %7634 = vmatprep.mubr.bf16.mxu0 %v12260_v45 }
0x1b16   : > { %8848 = vmatmul.mubr.msk.bf16.gmra.mrb[28].mxu1 %vm12535_vm2, %v9346_v10  ;;  %vm12561_vm2 = vcmask 777216  }
0x1b17   : > { %7570 = vmatprep.mubr.bf16.mxu1 %v12260_v45 }
0x1b19   : > { %8854 = vmatmul.mubr.msk.bf16.gmra.mrb[32].mxu0 %vm12536_vm0, %v9346_v10  ;;  %vm12562_vm0 = vmmov %vm12561_vm2 }
0x1b1a   : > { %7643 = vmatprep.mubr.bf16.mxu0 %v12260_v45 }
0x1b1e   : > { %8849 = vmatmul.mubr.msk.bf16.gmra.mrb[32].mxu1 %vm12537_vm12, %v9347_v32  ;;  %vm12565_vm12 = vmmov %vm12538_vm4 }
0x1b1f   : > { %7578 = vmatprep.mubr.bf16.mxu1 %v12260_v45 }
0x1b21   : > { %8855 = vmatmul.mubr.msk.bf16.gmra.mrb[36].mxu0 %vm12538_vm4, %v9347_v32 }
0x1b22   : > { %7653 = vmatprep.mubr.bf16.mxu0 %v12260_v45 }
0x1b26   : > { %8850 = vmatmul.mubr.msk.bf16.gmra.mrb[36].mxu1 %vm12539_vm10, %v9348_v28  ;;  %vm12566_vm10 = vmmov %vm12538_vm4 }
0x1b27   : > { %7948 = vmatprep.mubr.bf16.mxu1 %v12260_v45 }
0x1b29   : > { %8856 = vmatmul.mubr.msk.bf16.gmra.mrb[40].mxu0 %vm12540_vm5, %v9348_v28  ;;  %vm12567_vm5 = vmmov %vm12538_vm4 }
0x1b2a   : > { %8024 = vmatprep.mubr.bf16.mxu0 %v12260_v45 }
0x1bc4   : > { %v7424_v24 = vpop.f32.mrb[20].mxu0 }
0x1bc5   : > { %v9043_v9 = vpop.f32.mrb[21].mxu0 }
0x1bc6   : > { %v7427_v8 = vpop.f32.mrb[22].mxu0  ;;  %v12549_v9 = vld [vmem:[#allocation48_spill] sm:$0xff] }
0x1bc7   : > { %v9044_v50 = vpop.f32.mrb[23].mxu0 }
0x1bc8   : > { %v12550_v50 = vld [vmem:[#allocation52_spill] sm:$0xff] }
0x1bcc   : > { %v7433_v13 = vpop.f32.mrb[24].mxu0 }
0x1bcd   : > { %v9047_v38 = vpop.f32.mrb[25].mxu0 }
0x1bce   : > { %v7437_v31 = vpop.f32.mrb[26].mxu0 }
0x1bcf   : > { %v9048_v63 = vpop.f32.mrb[27].mxu0 }
0x1bd4   : > { %v11785_v37 = vpop.f32.mrb[28].mxu0 }
0x1bd5   : > { %v9051_v44 = vpop.f32.mrb[29].mxu0 }
0x1bd6   : > { %v7447_v15 = vpop.f32.mrb[30].mxu0 }
0x1bd7   : > { %v9052_v34 = vpop.f32.mrb[31].mxu0 }
0x1bd9   : > { %v11787_v18 = vpop.f32.mrb[20].mxu1 }
0x1bda   : > { %v11789_v42 = vpop.f32.mrb[21].mxu1 }
0x1bdb   : > { %v7548_v49 = vpop.f32.mrb[22].mxu1 }
0x1bdc   : > { %v7550_v58 = vpop.f32.mrb[23].mxu1  ;;  %v11791_v43 = vpop.f32.mrb[12].mxu0 }
0x1bdd   : > { %v7622_v0 = vpop.f32.mrb[13].mxu0  ;;  %7670 = vrot.lane.b32.xlu0 %v7550_v58, %s12388_s3 }
0x1bde   : > { %v7623_v35 = vpop.f32.mrb[14].mxu0 }
0x1bdf   : > { %7672 = vrot.lane.b32.xlu1 %v7623_v35, %s12388_s3  ;;  %v7625_v23 = vpop.f32.mrb[15].mxu0 }
0x1be1   : > { %v7554_v61 = vpop.f32.mrb[24].mxu1 }
0x1be2   : > { %v7556_v29 = vpop.f32.mrb[25].mxu1  ;;  %v7682_v26 = vmul.f32 %v7554_v61, %v12543_v39  ;;  %v12552_v61 = vld [vmem:[#allocation51_spill] sm:$0xff] }
0x1be3   : > { %7668 = vrot.lane.b32.xlu1 %v7548_v49, %s12388_s3  ;;  %v7558_v56 = vpop.f32.mrb[26].mxu1  ;;  %v7683_v40 = vmul.f32 %v7556_v29, %v12541_v4  ;;  %v12551_v49 = vld [vmem:[#allocation53_spill] sm:$0xff] }
0x1be4   : > { %v7560_v5 = vpop.f32.mrb[27].mxu1  ;;  %v7628_v55 = vpop.f32.mrb[16].mxu0  ;;  %v7702_v47 = vmul.f32 %v7558_v56, %v12545_v21  ;;  %v12553_v56 = vld [vmem:[#allocation54_spill] sm:$0xff] }
0x1be5   : > { %v7684_v2 = vmul.f32 %v7628_v55, %v12542_v19  ;;  %v7630_v41 = vpop.f32.mrb[17].mxu0  ;;  %v7703_v52 = vmul.f32 %v7560_v5, %v12546_v30 }
0x1be6   : > { %v7631_v51 = vpop.f32.mrb[18].mxu0  ;;  %v11832_v41 = vpop.permute.xlu0 %7815 }
0x1be7   : > { %v7633_v6 = vpop.f32.mrb[19].mxu0  ;;  %7692 = vrot.lane.b32.xlu0 %v7684_v2, %s12369_s15  ;;  %7690 = vrot.lane.b32.xlu1 %v7683_v40, %s12369_s15  ;;  %v7704_v7 = vmul.f32 %v7631_v51, %v12544_v3  ;;  %v12555_v40 = vld [vmem:[#allocation55_spill] sm:$0xff] }
0x1be9   : > { %v7564_v62 = vpop.f32.mrb[28].mxu1 }
0x1bea   : > { %v7565_v46 = vpop.f32.mrb[29].mxu1 }
0x1beb   : > { %7688 = vrot.lane.b32.xlu0 %v7682_v26, %s12369_s15  ;;  %7712 = vrot.lane.b32.xlu1 %v7704_v7, %s12282_s22  ;;  %v7567_v57 = vpop.f32.mrb[30].mxu1 }
0x1bec   : > { %v7568_v16 = vpop.f32.mrb[31].mxu1  ;;  %v7636_v20 = vpop.f32.mrb[32].mxu0 }
0x1bed   : > { %v7637_v11 = vadd.f32 %v7636_v20, %v7424_v24  ;;  %v7638_v36 = vpop.f32.mrb[33].mxu0 }
0x1bee   : > { %v7639_v33 = vpop.f32.mrb[34].mxu0 }
0x1bef   : > { %v7640_v22 = vadd.f32 %v7639_v33, %v7427_v8  ;;  %v7641_v60 = vpop.f32.mrb[35].mxu0  ;;  %7708 = vrot.lane.b32.xlu1 %v7702_v47, %s12282_s22  ;;  %7710 = vrot.lane.b32.xlu0 %v7703_v52, %s12282_s22  ;;  %v7735_v8 = vmul.f32 %v7568_v16, %v12549_v9 }
0x1bf0   : > { %v7737_v48 = vmul.f32 %v7641_v60, %v12548_v1 }
0x1bf1   : > { %v7572_v17 = vpop.f32.mrb[32].mxu1  ;;  %v7736_v54 = vmul.f32 %v7640_v22, %v12547_v25  ;;  %v12556_v22 = vld [vmem:[#allocation58_spill] sm:$0xff] }
0x1bf2   : > { %v7573_v27 = vpop.f32.mrb[33].mxu1  ;;  %v7662_v60 = vmul.f32 %v11787_v18, %v12556_v22 }
0x1bf3   : > { %7726 = vrot.lane.b32.xlu1 %v7637_v11, %s12278_s18  ;;  %7724 = vrot.lane.b32.xlu0 %v7565_v46, %s12278_s18  ;;  %v7575_v14 = vpop.f32.mrb[34].mxu1  ;;  %v7755_v29 = vmul.f32 %v7573_v27, %v12552_v61 }
0x1bf4   : > { %v7576_v53 = vpop.f32.mrb[35].mxu1  ;;  %v7645_v12 = vpop.f32.mrb[36].mxu0 }
0x1bf5   : > { %v7646_v59 = vadd.f32 %v7645_v12, %v7433_v13  ;;  %v7647_v10 = vpop.f32.mrb[37].mxu0 }
0x1bf6   : > { %v7649_v32 = vpop.f32.mrb[38].mxu0  ;;  %v7757_v38 = vmul.f32 %v7647_v10, %v12550_v50 }
0x1bf7   : > { %v7650_v28 = vadd.f32 %v7649_v32, %v7437_v31  ;;  %7743 = vrot.lane.b32.xlu1 %v7736_v54, %s12310_s16  ;;  %7745 = vrot.lane.b32.xlu0 %v7737_v48, %s12310_s16  ;;  %v7651_v24 = vpop.f32.mrb[39].mxu0  ;;  %v7756_v31 = vmul.f32 %v7646_v59, %v12551_v49  ;;  %v12557_v59 = vld [vmem:[#allocation59_spill] sm:$0xff]  ;;  %v12558_v32 = vld [vmem:[#allocation57_spill] sm:$0xff] }
0x1bf8   : > { %v7663_v10 = vmul.f32 %v11789_v42, %v12557_v59 }
0x1bf9   : > { %v7580_v63 = vpop.f32.mrb[36].mxu1 }
0x1bfa   : > { %v7581_v44 = vpop.f32.mrb[37].mxu1 }
0x1bfb   : > { %7765 = vrot.lane.b32.xlu1 %v7757_v38, %s12370_s11  ;;  %7741 = vrot.lane.b32.xlu0 %v7735_v8, %s12310_s16  ;;  %v7583_v15 = vpop.f32.mrb[38].mxu1  ;;  %v7792_v5 = vmul.f32 %v7581_v44, %v12553_v56 }
0x1bfc   : > { %v7584_v13 = vpop.f32.mrb[39].mxu1  ;;  %v7655_v34 = vpop.f32.mrb[40].mxu0 }
0x1bfd   : > { %v7656_v58 = vadd.f32 %v7655_v34, %v11785_v37  ;;  %v7657_v0 = vpop.f32.mrb[41].mxu0  ;;  %v12554_v37 = vld [vmem:[#allocation56_spill] sm:$0xff] }
0x1bfe   : > { %v7659_v35 = vpop.f32.mrb[42].mxu0  ;;  %v7794_v2 = vmul.f32 %v7657_v0, %v12555_v40 }
0x1bff   : > { %7782 = vrot.lane.b32.xlu1 %v7651_v24, %s12314_s10  ;;  %7763 = vrot.lane.b32.xlu0 %v7756_v31, %s12370_s11  ;;  %v7660_v23 = vpop.f32.mrb[43].mxu0  ;;  %v7793_v55 = vmul.f32 %v7656_v58, %v12554_v37 }
0x1c03   : > { %7780 = vrot.lane.b32.xlu0 %v7650_v28, %s12314_s10  ;;  %7761 = vrot.lane.b32.xlu1 %v7755_v29, %s12370_s11  ;;  %v7664_v28 = vmul.f32 %v11791_v43, %v12558_v32 }
0x1c07   : > { %7778 = vrot.lane.b32.xlu1 %v7576_v53, %s12314_s10  ;;  %7798 = vrot.lane.b32.xlu0 %v7792_v5, %s12371_s2 }
0x1c0b   : > { %7800 = vrot.lane.b32.xlu1 %v7793_v55, %s12371_s2  ;;  %7802 = vrot.lane.b32.xlu0 %v7794_v2, %s12371_s2 }
0x1c4f   : > { %v7671_v6 = vpop.permute.xlu0 %7670 }
0x1c51   : > { %v7673_v51 = vpop.permute.xlu1 %7672 }
0x1c52   : > { %v7675_v54 = vsel %vm1444_vm3, %v7671_v6, %v7673_v51  ;;  %v7681_v38 = vadd.f32 %v7673_v51, %v7664_v28 }
0x1c53   : > { %v7680_v18 = vadd.f32 %v7675_v54, %v7663_v10 }
0x1c55   : > { %v7669_v26 = vpop.permute.xlu1 %7668 }
0x1c56   : > { %v7674_v11 = vsel %vm1444_vm3, %v7669_v26, %v7671_v6 }
0x1c57   : > { %v7679_v27 = vadd.f32 %v7674_v11, %v7662_v60 }
0x1c59   : > { %v7693_v7 = vpop.permute.xlu0 %7692  ;;  %v7691_v62 = vpop.permute.xlu1 %7690 }
0x1c5a   : > { %v7695_v24 = vsel %vm1483_vm7, %v7691_v62, %v7693_v7  ;;  %v7701_v13 = vadd.f32 %v7693_v7, %v7681_v38 }
0x1c5b   : > { %v7700_v34 = vadd.f32 %v7695_v24, %v7680_v18 }
0x1c5d   : > { %v7689_v46 = vpop.permute.xlu0 %7688  ;;  %v7713_v57 = vpop.permute.xlu1 %7712 }
0x1c5e   : > { %v7694_v17 = vsel %vm1483_vm7, %v7689_v46, %v7691_v62  ;;  %v7721_v0 = vadd.f32 %v7713_v57, %v7701_v13 }
0x1c5f   : > { %v7699_v48 = vadd.f32 %v7694_v17, %v7679_v27 }
0x1c61   : > { %v7709_v16 = vpop.permute.xlu1 %7708  ;;  %v7711_v20 = vpop.permute.xlu0 %7710 }
0x1c62   : > { %v7714_v14 = vsel %vm1512_vm9, %v7709_v16, %v7711_v20  ;;  %v7715_v15 = vsel %vm1512_vm9, %v7711_v20, %v7713_v57 }
0x1c63   : > { %v7719_v8 = vadd.f32 %v7714_v14, %v7699_v48  ;;  %v7720_v35 = vadd.f32 %v7715_v15, %v7700_v34 }
0x1c65   : > { %v7727_v47 = vpop.permute.xlu1 %7726  ;;  %v7725_v52 = vpop.permute.xlu0 %7724 }
0x1c66   : > { %v7728_v31 = vsel %vm1427_vm8, %v7725_v52, %v7727_v47  ;;  %v7732_v58 = vadd.f32 %v7725_v52, %v7719_v8  ;;  %v7734_v55 = vadd.f32 %v7727_v47, %v7721_v0 }
0x1c67   : > { %v7733_v2 = vadd.f32 %v7728_v31, %v7720_v35 }
0x1c69   : > { %v7744_v36 = vpop.permute.xlu1 %7743  ;;  %v7746_v33 = vpop.permute.xlu0 %7745 }
0x1c6a   : > { %v7748_v43 = vsel %vm12559_vm1, %v7744_v36, %v7746_v33  ;;  %vm12568_vm1 = vmmov %vm12538_vm4 }
0x1c6b   : > { %v7754_v7 = vadd.f32 %v7748_v43, %v7734_v55 }
0x1c6d   : > { %v7766_v53 = vpop.permute.xlu1 %7765  ;;  %v7742_v12 = vpop.permute.xlu0 %7741 }
0x1c6e   : > { %v7747_v29 = vsel %vm12560_vm15, %v7742_v12, %v7744_v36  ;;  %v7752_v5 = vadd.f32 %v7742_v12, %v7732_v58  ;;  %vm12569_vm15 = vmmov %vm12568_vm1 }
0x1c6f   : > { %v7753_v62 = vadd.f32 %v7747_v29, %v7733_v2  ;;  %v9353_v2 = vld [vmem:[%s12564_s12] sm:$0xff]  }
0x1c71   : > { %v7783_v63 = vpop.permute.xlu1 %7782  ;;  %v7764_v44 = vpop.permute.xlu0 %7763 }
0x1c72   : > { %v7768_v51 = vsel %vm1585_vm11, %v7764_v44, %v7766_v53 }
0x1c73   : > { %v7774_v11 = vadd.f32 %v7768_v51, %v7754_v7  ;;  %v9354_v51 = vld [vmem:[%s12564_s12 + $0x8] sm:$0xff]   ;;  %v9357_v7 = vld [vmem:[%s12564_s12 + $0x20] ss:$0 sps:$4 sm:$0xff]  }
0x1c75   : > { %v7781_v42 = vpop.permute.xlu0 %7780  ;;  %v7762_v23 = vpop.permute.xlu1 %7761 }
0x1c76   : > { %v7767_v6 = vsel %vm1585_vm11, %v7762_v23, %v7764_v44  ;;  %v7772_v26 = vadd.f32 %v7762_v23, %v7752_v5  ;;  %v7785_v57 = vsel %vm12561_vm2, %v7781_v42, %v7783_v63  ;;  %v8218_v44 = vld [vmem:[%s12563_s6] sm:$0xff]  ;;  %vm12570_vm2 = vmmov %vm12568_vm1 }
0x1c77   : > { %v7773_v33 = vadd.f32 %v7767_v6, %v7753_v62  ;;  %v7791_v60 = vadd.f32 %v7785_v57, %v7774_v11  ;;  %v9355_v6 = vld [vmem:[%s12564_s12 + $0x10] sm:$0xff]  }
0x1c79   : > { %v7779_v46 = vpop.permute.xlu1 %7778  ;;  %v7799_v16 = vpop.permute.xlu0 %7798 }
0x1c7a   : > { %v7784_v20 = vsel %vm12562_vm0, %v7779_v46, %v7781_v42  ;;  %v7789_v52 = vadd.f32 %v7779_v46, %v7772_v26  ;;  %v9356_v26 = vld [vmem:[%s12564_s12 + $0x18] sm:$0xff]   ;;  %vm12571_vm0 = vmmov %vm12568_vm1 }
0x1c7b   : > { %v7790_v47 = vadd.f32 %v7784_v20, %v7773_v33 }
0x1c7c   : > { %v7809_v36 = vadd.f32 %v7799_v16, %v7789_v52 }
0x1c7d   : > { %v7801_v17 = vpop.permute.xlu1 %7800  ;;  %v7803_v27 = vpop.permute.xlu0 %7802 }
0x1c7e   : > { %v7804_v14 = vsel %vm1633_vm13, %v7799_v16, %v7801_v17  ;;  %v7805_v53 = vsel %vm1633_vm13, %v7801_v17, %v7803_v27  ;;  %v7818_v12 = vadd.f32 %v11832_v41, %v7809_v36 }
0x1c7f   : > { %v7810_v54 = vadd.f32 %v7804_v14, %v7790_v47  ;;  %v7811_v48 = vadd.f32 %v7805_v53, %v7791_v60 }
0x1c80   : > { %v7821_v24 = vmax.f32 %v7818_v12, 0.0 }
0x1c81   : > { %v7819_v10 = vadd.f32 %v11832_v41, %v7810_v54  ;;  %v7820_v28 = vadd.f32 %v11832_v41, %v7811_v48 }
0x1c83   : > { %v7822_v8 = vmax.f32 %v7819_v10, 0.0  ;;  %v7823_v18 = vmax.f32 %v7820_v28, 0.0 }
0x1c85   : > { %v8899_v38 = vpack.c.bf16 %v7822_v8, %v7821_v24  ;;  %v8900_v63 = vpack.c.bf16 %v7823_v18, %v7823_v18 }
0x1c87   : > { %7835 = vrot.lane.b32.xlu1 %v8899_v38, %s12290_s26  ;;  %7837 = vrot.lane.b32.xlu0 %v8900_v63, %s12290_s26 }
0x1c8b   : > { %8221 = vperm.xlu0 %9221, %v8218_v44  }
0x1cf9   : > { %v7836_v15 = vpop.permute.xlu1 %7835  ;;  %v7838_v13 = vpop.permute.xlu0 %7837 }
0x1cfa   : > { %v7839_v34 = vrot.slane %v7836_v15, 4  ;;  %v7840_v31 = vrot.slane %v7838_v13, 4 }
0x1cfc   : > { %v7841_v58 = vsel %vm1671_vm14, %v7839_v34, %v7840_v31 }
0x1cfd   : > { %v7842_v41 = vsel %vm1616_vm6, %v7836_v15, %v7841_v58 }
0x1cfe   : > { %7844 = vst [vmem:[#allocation10 + $0x4] sm:$0xff] %v7842_v41 }
0x1d05   : > { %v7854_v0 = vld [vmem:[#allocation10] sm:$0xff]  ;;  %v7855_v35 = vld [vmem:[#allocation10 + $0x8] sm:$0xff] }
0x1d06   : > { %v8865_v42 = vcombine.high %v7854_v0, %v7854_v0  ;;  %v8867_v23 = vcombine.high %v7855_v35, %v7855_v35  ;;  %v8864_v43 = vcombine.low %v7854_v0, %v7854_v0  ;;  %v8866_v29 = vcombine.low %v7855_v35, %v7855_v35 }
0x1d08   : > { %8868 = vmatprep.subr.msk.bf16.mxu1 %vm1671_vm14, %v8865_v42  ;;  %8874 = vmatprep.subr.msk.bf16.mxu0 %vm1671_vm14, %v8867_v23  ;;  %v7905_v5 = vsel %vm1671_vm14, %v8864_v43, 0  ;;  %v7911_v55 = vsel %vm1671_vm14, %v8866_v29, 0 }
0x1d09   : > { %7917 = vmatpush1.bf16.msra.mxu1 %v7905_v5  ;;  %7993 = vmatpush1.bf16.msra.mxu0 %v7911_v55 }
0x1d0c   : > { %8869 = vmatmul.mubr.msk.bf16.vlgmr.msra.gmra.mrb[40].mxu1 %vm12565_vm12, %v9353_v2  ;;  %8875 = vmatmul.mubr.msk.bf16.vlgmr.msra.gmra.mrb[44].mxu0 %vm12538_vm4, %v9353_v2  ;;  %vm12572_vm12 = vmmov %vm12571_vm0 }
0x1d0d   : > { %7958 = vmatprep.mubr.bf16.mxu1 %v12260_v45  ;;  %8032 = vmatprep.mubr.bf16.mxu0 %v12260_v45  ;;  %vm12573_vm4 = vmmov %vm12571_vm0 }
0x1d14   : > { %8870 = vmatmul.mubr.msk.bf16.gmra.mrb[44].mxu1 %vm12566_vm10, %v9354_v51  ;;  %8876 = vmatmul.mubr.msk.bf16.gmra.mrb[48].mxu0 %vm12567_vm5, %v9354_v51 }
0x1d15   : > { %7968 = vmatprep.mubr.bf16.mxu1 %v12260_v45  ;;  %8040 = vmatprep.mubr.bf16.mxu0 %v12260_v45 }
0x1d1c   : > { %8871 = vmatmul.mubr.msk.bf16.gmra.mrb[48].mxu1 %vm12568_vm1, %v9355_v6  ;;  %8877 = vmatmul.mubr.msk.bf16.gmra.mrb[52].mxu0 %vm12569_vm15, %v9355_v6  ;;  %v11935_v6 = vpop.permute.xlu0 %8221 }
0x1d1d   : > { %7976 = vmatprep.mubr.bf16.mxu1 %v12260_v45  ;;  %8049 = vmatprep.mubr.bf16.mxu0 %v12260_v45 }
0x1d24   : > { %8872 = vmatmul.mubr.msk.bf16.gmra.mrb[52].mxu1 %vm12570_vm2, %v9356_v26  ;;  %8878 = vmatmul.mubr.msk.bf16.gmra.mrb[56].mxu0 %vm12571_vm0, %v9356_v26 }
0x1d25   : > { %7984 = vmatprep.mubr.bf16.mxu1 %v12260_v45  ;;  %8059 = vmatprep.mubr.bf16.mxu0 %v12260_v45 }
0x1d2c   : > { %8873 = vmatmul.mubr.msk.bf16.gmra.mrb[56].mxu1 %vm12572_vm12, %v9357_v7  ;;  %8879 = vmatmul.mubr.msk.bf16.gmra.mrb[60].mxu0 %vm12573_vm4, %v9357_v7 }
0x1d2d   : > { %8292 = vmatprep.mubr.bf16.mxu1 %v12260_v45 }
0x1ddf   : > { %v11891_v62 = vpop.f32.mrb[40].mxu1  ;;  %v11893_v46 = vpop.f32.mrb[44].mxu0 }
0x1de0   : > { %v11895_v16 = vpop.f32.mrb[41].mxu1  ;;  %v8028_v57 = vpop.f32.mrb[45].mxu0 }
0x1de1   : > { %v7954_v20 = vpop.f32.mrb[42].mxu1  ;;  %v8029_v52 = vpop.f32.mrb[46].mxu0 }
0x1de2   : > { %8074 = vrot.lane.b32.xlu1 %v7954_v20, %s12388_s3  ;;  %v7956_v11 = vpop.f32.mrb[43].mxu1  ;;  %v8031_v33 = vpop.f32.mrb[47].mxu0 }
0x1de3   : > { %8076 = vrot.lane.b32.xlu0 %v7956_v11, %s12388_s3 }
0x1de6   : > { %8078 = vrot.lane.b32.xlu1 %v8029_v52, %s12388_s3 }
0x1de7   : > { %v7960_v36 = vpop.f32.mrb[44].mxu1  ;;  %v8034_v60 = vpop.f32.mrb[48].mxu0 }
0x1de8   : > { %v8088_v45 = vmul.f32 %v7960_v36, %v12543_v39  ;;  %v7962_v47 = vpop.f32.mrb[45].mxu1  ;;  %v8036_v17 = vpop.f32.mrb[49].mxu0  ;;  %v8090_v48 = vmul.f32 %v8034_v60, %v12542_v19 }
0x1de9   : > { %v8089_v27 = vmul.f32 %v7962_v47, %v12541_v4  ;;  %v7964_v14 = vpop.f32.mrb[46].mxu1  ;;  %v8037_v53 = vpop.f32.mrb[50].mxu0 }
0x1dea   : > { %8094 = vrot.lane.b32.xlu0 %v8088_v45, %s12369_s15  ;;  %v7966_v12 = vpop.f32.mrb[47].mxu1  ;;  %v8039_v54 = vpop.f32.mrb[51].mxu0  ;;  %v8108_v10 = vmul.f32 %v7964_v14, %v12545_v21  ;;  %v8110_v18 = vmul.f32 %v8037_v53, %v12544_v3 }
0x1deb   : > { %8096 = vrot.lane.b32.xlu1 %v8089_v27, %s12369_s15  ;;  %v8109_v4 = vmul.f32 %v7966_v12, %v12546_v30 }
0x1dee   : > { %8098 = vrot.lane.b32.xlu0 %v8090_v48, %s12369_s15 }
0x1def   : > { %v8042_v28 = vpop.f32.mrb[52].mxu0  ;;  %8114 = vrot.lane.b32.xlu1 %v8108_v10, %s12282_s22  ;;  %v7970_v39 = vpop.f32.mrb[48].mxu1 }
0x1df0   : > { %v7971_v24 = vpop.f32.mrb[49].mxu1  ;;  %v8044_v8 = vpop.f32.mrb[53].mxu0  ;;  %v8070_v39 = vmul.f32 %v11893_v46, %v12558_v32 }
0x1df1   : > { %v7973_v38 = vpop.f32.mrb[50].mxu1  ;;  %v8045_v63 = vpop.f32.mrb[54].mxu0 }
0x1df2   : > { %v8047_v44 = vpop.f32.mrb[55].mxu0  ;;  %8116 = vrot.lane.b32.xlu0 %v8109_v4, %s12282_s22  ;;  %v7974_v19 = vpop.f32.mrb[51].mxu1  ;;  %v8142_v3 = vmul.f32 %v8045_v63, %v12547_v25  ;;  %v8069_v4 = vmul.f32 %v11895_v16, %v12557_v59 }
0x1df3   : > { %8118 = vrot.lane.b32.xlu1 %v8110_v18, %s12282_s22  ;;  %v8141_v30 = vmul.f32 %v7974_v19, %v12549_v9  ;;  %v8143_v35 = vmul.f32 %v8047_v44, %v12548_v1  ;;  %s1124_s22 = scalar_lea.vmem %s9628_s13, %s9670_s0 }
0x1df6   : > { %8130 = vrot.lane.b32.xlu0 %v7971_v24, %s12278_s18 }
0x1df7   : > { %v8051_v21 = vpop.f32.mrb[56].mxu0  ;;  %8132 = vrot.lane.b32.xlu1 %v8042_v28, %s12278_s18  ;;  %v7978_v15 = vpop.f32.mrb[52].mxu1  ;;  %s12580_s18 = sld [smem:[#allocation12_spill]] }
0x1df8   : > { %v7979_v13 = vpop.f32.mrb[53].mxu1  ;;  %v8053_v34 = vpop.f32.mrb[57].mxu0  ;;  %v8162_v25 = vmul.f32 %v8051_v21, %v12551_v49 }
0x1df9   : > { %v7981_v31 = vpop.f32.mrb[54].mxu1  ;;  %v8055_v58 = vpop.f32.mrb[58].mxu0  ;;  %v8161_v42 = vmul.f32 %v7979_v13, %v12552_v61  ;;  %v8163_v5 = vmul.f32 %v8053_v34, %v12550_v50 }
0x1dfa   : > { %8147 = vrot.lane.b32.xlu0 %v8141_v30, %s12310_s16  ;;  %v8057_v41 = vpop.f32.mrb[59].mxu0  ;;  %v7982_v0 = vpop.f32.mrb[55].mxu1 }
0x1dfb   : > { %8149 = vrot.lane.b32.xlu1 %v8142_v3, %s12310_s16 }
0x1dfe   : > { %8151 = vrot.lane.b32.xlu0 %v8143_v35, %s12310_s16 }
0x1dff   : > { %v8061_v23 = vpop.f32.mrb[60].mxu0  ;;  %8167 = vrot.lane.b32.xlu1 %v8161_v42, %s12370_s11  ;;  %v7986_v9 = vpop.f32.mrb[56].mxu1 }
0x1e00   : > { %v7987_v43 = vpop.f32.mrb[57].mxu1  ;;  %v8063_v29 = vpop.f32.mrb[61].mxu0  ;;  %v8199_v49 = vmul.f32 %v8061_v23, %v12554_v37  ;;  %v8068_v37 = vmul.f32 %v11891_v62, %v12556_v22 }
0x1e01   : > { %v7989_v55 = vpop.f32.mrb[58].mxu1  ;;  %v8065_v2 = vpop.f32.mrb[62].mxu0  ;;  %v8198_v61 = vmul.f32 %v7987_v43, %v12553_v56  ;;  %v8200_v50 = vmul.f32 %v8063_v29, %v12555_v40 }
0x1e02   : > { %8169 = vrot.lane.b32.xlu0 %v8162_v25, %s12370_s11  ;;  %v7990_v51 = vpop.f32.mrb[59].mxu1  ;;  %v8066_v1 = vpop.f32.mrb[63].mxu0 }
0x1e03   : > { %8171 = vrot.lane.b32.xlu1 %v8163_v5, %s12370_s11  ;;  %s12578_s11 = sld [smem:[#allocation13_spill]] }
0x1e06   : > { %8186 = vrot.lane.b32.xlu0 %v8055_v58, %s12314_s10 }
0x1e07   : > { %8184 = vrot.lane.b32.xlu1 %v7982_v0, %s12314_s10 }
0x1e0a   : > { %8204 = vrot.lane.b32.xlu0 %v8198_v61, %s12371_s2 }
0x1e0b   : > { %8188 = vrot.lane.b32.xlu1 %v8057_v41, %s12314_s10 }
0x1e0e   : > { %8208 = vrot.lane.b32.xlu0 %v8200_v50, %s12371_s2 }
0x1e0f   : > { %8206 = vrot.lane.b32.xlu1 %v8199_v49, %s12371_s2 }
0x1e54   : > { %v8075_v26 = vpop.permute.xlu1 %8074 }
0x1e55   : > { %v8077_v7 = vpop.permute.xlu0 %8076 }
0x1e56   : > { %v8080_v40 = vsel %vm1444_vm3, %v8075_v26, %v8077_v7 }
0x1e57   : > { %v8085_v17 = vadd.f32 %v8080_v40, %v8068_v37  ;;  %v8346_v37 = vld [vmem:[%s12578_s11] sm:$0xf] }
0x1e58   : > { %v8079_v57 = vpop.permute.xlu1 %8078 }
0x1e59   : > { %v8081_v28 = vsel %vm1444_vm3, %v8077_v7, %v8079_v57  ;;  %v8087_v18 = vadd.f32 %v8079_v57, %v8070_v39  ;;  %vm12574_vm3 = vcmask 900096  }
0x1e5a   : > { %v8086_v8 = vadd.f32 %v8081_v28, %v8069_v4 }
0x1e5c   : > { %v8095_v20 = vpop.permute.xlu0 %8094 }
0x1e5d   : > { %v8097_v52 = vpop.permute.xlu1 %8096 }
0x1e5e   : > { %v8100_v47 = vsel %vm1483_vm7, %v8095_v20, %v8097_v52 }
0x1e5f   : > { %v8105_v12 = vadd.f32 %v8100_v47, %v8085_v17 }
0x1e60   : > { %v8099_v56 = vpop.permute.xlu0 %8098 }
0x1e61   : > { %v8115_v11 = vpop.permute.xlu1 %8114  ;;  %v8101_v22 = vsel %vm1483_vm7, %v8097_v52, %v8099_v56  ;;  %v8107_v21 = vadd.f32 %v8099_v56, %v8087_v18  ;;  %vm12575_vm7 = vmmov %vm12574_vm3 }
0x1e62   : > { %v8106_v19 = vadd.f32 %v8101_v22, %v8086_v8 }
0x1e64   : > { %v8117_v33 = vpop.permute.xlu0 %8116 }
0x1e65   : > { %v8119_v36 = vpop.permute.xlu1 %8118  ;;  %v8120_v14 = vsel %vm1512_vm9, %v8115_v11, %v8117_v33 }
0x1e66   : > { %v8125_v54 = vadd.f32 %v8120_v14, %v8105_v12  ;;  %v8121_v63 = vsel %vm1512_vm9, %v8117_v33, %v8119_v36  ;;  %v8127_v46 = vadd.f32 %v8119_v36, %v8107_v21  ;;  %v8230_v12 = vld [vmem:[%s9618_s4] sm:$0x3] }
0x1e67   : > { %v8126_v32 = vadd.f32 %v8121_v63, %v8106_v19 }
0x1e68   : > { %v8131_v60 = vpop.permute.xlu0 %8130 }
0x1e69   : > { %v8133_v45 = vpop.permute.xlu1 %8132  ;;  %v8138_v62 = vadd.f32 %v8131_v60, %v8125_v54 }
0x1e6a   : > { %v8134_v15 = vsel %vm1427_vm8, %v8131_v60, %v8133_v45  ;;  %v8140_v58 = vadd.f32 %v8133_v45, %v8127_v46  ;;  %vm12576_vm8 = vcmask 777216   ;;  %v8234_v45 = vld [vmem:[%s9623_s9] sm:$0xf] }
0x1e6b   : > { %v8139_v31 = vadd.f32 %v8134_v15, %v8126_v32  ;;  %vm12577_vm9 = vmmov %vm12576_vm8 }
0x1e6c   : > { %v8148_v27 = vpop.permute.xlu0 %8147 }
0x1e6d   : > { %v8150_v53 = vpop.permute.xlu1 %8149  ;;  %v8158_v44 = vadd.f32 %v8148_v27, %v8138_v62 }
0x1e6e   : > { %v8153_v59 = vsel %vm12574_vm3, %v8148_v27, %v8150_v53 }
0x1e6f   : > { %v8159_v42 = vadd.f32 %v8153_v59, %v8139_v31  ;;  %v9444_v59 = vmov 839922192  }
0x1e70   : > { %v8152_v48 = vpop.permute.xlu0 %8151 }
0x1e71   : > { %v8168_v10 = vpop.permute.xlu1 %8167  ;;  %v8154_v16 = vsel %vm12575_vm7, %v8150_v53, %v8152_v48 }
0x1e72   : > { %v8178_v30 = vadd.f32 %v8168_v10, %v8158_v44  ;;  %v8160_v23 = vadd.f32 %v8154_v16, %v8140_v58  ;;  %v8352_v16 = vunpack.c.l.s4 %v9444_v59 }
0x1e74   : > { %v8170_v24 = vpop.permute.xlu0 %8169 }
0x1e75   : > { %v8172_v38 = vpop.permute.xlu1 %8171  ;;  %v8173_v41 = vsel %vm1585_vm11, %v8168_v10, %v8170_v24 }
0x1e76   : > { %v8174_v0 = vsel %vm1585_vm11, %v8170_v24, %v8172_v38  ;;  %v8179_v5 = vadd.f32 %v8173_v41, %v8159_v42  ;;  %vm12579_vm11 = vmmov %vm12571_vm0 }
0x1e77   : > { %v8180_v55 = vadd.f32 %v8174_v0, %v8160_v23  ;;  %v8353_v23 = vunpack.c.0.s8 %v8352_v16 }
0x1e78   : > { %v8187_v13 = vpop.permute.xlu0 %8186 }
0x1e79   : > { %v8185_v34 = vpop.permute.xlu1 %8184 }
0x1e7a   : > { %v8195_v3 = vadd.f32 %v8185_v34, %v8178_v30  ;;  %v8190_v43 = vsel %vm12576_vm8, %v8185_v34, %v8187_v13 }
0x1e7b   : > { %v8196_v1 = vadd.f32 %v8190_v43, %v8179_v5  ;;  %v8533_v5 = vld [vmem:[%s9468_s17 + $0x6] ss:$8 sm:$0x3] }
0x1e7c   : > { %v8205_v35 = vpop.permute.xlu0 %8204 }
0x1e7d   : > { %v8215_v9 = vadd.f32 %v8205_v35, %v8195_v3  ;;  %v8189_v25 = vpop.permute.xlu1 %8188 }
0x1e7e   : > { %v8191_v29 = vsel %vm12577_vm9, %v8187_v13, %v8189_v25 }
0x1e7f   : > { %v8224_v2 = vadd.f32 %v11935_v6, %v8215_v9  ;;  %v8197_v50 = vadd.f32 %v8191_v29, %v8180_v55 }
0x1e80   : > { %v8209_v51 = vpop.permute.xlu0 %8208 }
0x1e81   : > { %v8227_v61 = vmax.f32 %v8224_v2, 0.0  ;;  %v8207_v49 = vpop.permute.xlu1 %8206  ;;  %v12581_v2 = vld [vmem:[#allocation38_spill] sm:$0xff] }
0x1e82   : > { %v8210_v26 = vsel %vm1633_vm13, %v8205_v35, %v8207_v49  ;;  %v8211_v7 = vsel %vm1633_vm13, %v8207_v49, %v8209_v51  ;;  %v8356_v51 = vsub.s32 %v8353_v23, %v12581_v2 }
0x1e83   : > { %v8231_v57 = vpack.c.bf16 %v8227_v61, %v8227_v61  ;;  %v8216_v20 = vadd.f32 %v8210_v26, %v8196_v1  ;;  %v8217_v52 = vadd.f32 %v8211_v7, %v8197_v50  ;;  %v12582_v50 = vld [vmem:[#allocation39_spill] sm:$0xff]  ;;  %v12583_v26 = vld [vmem:[#allocation40_spill] sm:$0xff] }
0x1e84   : > { %v8364_v49 = vrot.slane %v8533_v5, %v12582_v50  ;;  %v8368_v7 = vrot.slane %v8533_v5, %v12583_v26 }
0x1e85   : > { %v8225_v56 = vadd.f32 %v11935_v6, %v8216_v20  ;;  %v8226_v11 = vadd.f32 %v11935_v6, %v8217_v52  ;;  %8243 = vrot.lane.b32.xlu1 %v8231_v57, %s12290_s26 }
0x1e87   : > { %v8228_v33 = vmax.f32 %v8225_v56, 0.0  ;;  %v8229_v36 = vmax.f32 %v8226_v11, 0.0  ;;  %v8369_v11 = vcombine.low %v8364_v49, %v8368_v7 }
0x1e89   : > { %v8232_v60 = vpack.c.bf16 %v8228_v33, %v8228_v33  ;;  %v8233_v40 = vpack.c.bf16 %v8229_v36, %v8229_v36 }
0x1e8b   : > { %8245 = vrot.lane.b32.xlu0 %v8232_v60, %s12290_s26  ;;  %8247 = vrot.lane.b32.xlu1 %v8233_v40, %s12290_s26  ;;  %s1119_s26 = scalar_lea.vmem %s12580_s18, %s9670_s0  ;;  %s1127_s0 = scalar_lea.vmem %s9633_s20, %s12585_s1 }
0x1e8c   : > { %v8322_v58 = vld [vmem:[%s1119_s26] sm:$0xff] }
0x1e8d   : > { %v8332_v43 = vsub.f32 1.0, %v8322_v58 }
0x1e8f   : > { %8237 = vperm.xlu0 %9221, %v8234_v45   ;;  %8349 = vperm.xlu1 %9220, %v8346_v37  }
0x1ef7   : > { %v8244_v47 = vpop.permute.xlu1 %8243 }
0x1efd   : > { %v8248_v17 = vpop.permute.xlu1 %8247  ;;  %v8246_v27 = vpop.permute.xlu0 %8245 }
0x1efe   : > { %v8249_v6 = vsel %vm1616_vm6, %v8244_v47, %v8246_v27  ;;  %v8250_v14 = vsel %vm1616_vm6, %v8246_v27, %v8248_v17  ;;  %vm8387_vm6 = vcmask 0  }
0x1eff   : > { %v8255_v53 = vsel %vm1671_vm14, %v8249_v6, 0  ;;  %8880 = vmatprep.subr.msk.bf16.mxu1 %vm1671_vm14, %v8250_v14 }
0x1f00   : > { %8261 = vmatpush1.bf16.msra.mxu1 %v8255_v53 }
0x1f03   : > { %8881 = vmatmul.mubr.msk.bf16.vlgmr.msra.gmra.mrb[60].mxu1 %vm12579_vm11, %v8230_v12 }
0x1f0e   : > { %v8238_v54 = vpop.permute.xlu0 %8237  ;;  %v8350_v57 = vpop.permute.xlu1 %8349 }
0x1f0f   : > { %v8357_v52 = vrot.slane %v8350_v57, %v8356_v51 }
0x1fd6   : > { %v8294_v48 = vpop.f32.mrb[60].mxu1 }
0x1fd7   : > { %v8295_v10 = vadd.f32 %v8294_v48, %v8238_v54  ;;  %v8296_v28 = vpop.f32.mrb[61].mxu1 }
0x1fd8   : > { %v8297_v39 = vadd.f32 %v8296_v28, %v8238_v54  ;;  %v8298_v4 = vpop.f32.mrb[62].mxu1 }
0x1fd9   : > { %v8882_v22 = vmul.f32 -1.442695, %v8295_v10  ;;  %v8299_v62 = vpop.f32.mrb[63].mxu1 }
0x1fda   : > { %v8883_v24 = vmul.f32 -1.442695, %v8297_v39 }
0x1fdb   : > { %9358 = vpow2.f32 %v8882_v22 }
0x1fdc   : > { %9360 = vpow2.f32 %v8883_v24 }
0x1fe5   : > { %v9359_v8 = vpop.eup %9358 }
0x1fe6   : > { %v9361_v18 = vpop.eup %9360  ;;  %v8307_v38 = vadd.f32 1.0, %v9359_v8 }
0x1fe7   : > { %v8308_v63 = vadd.f32 1.0, %v9361_v18 }
0x1fe8   : > { %9362 = vrcp.f32 %v8307_v38 }
0x1fe9   : > { %9364 = vrcp.f32 %v8308_v63 }
0x1ff2   : > { %v9363_v44 = vpop.eup %9362 }
0x1ff3   : > { %v9365_v19 = vpop.eup %9364  ;;  %v8318_v21 = vmax.f32 %v9363_v44, 1e-07 }
0x1ff4   : > { %v8315_v15 = vcombine.low %v9363_v44, %v9365_v19  ;;  %v8319_v30 = vmax.f32 %v9365_v19, 1e-07 }
0x1ff5   : > { %v8320_v13 = vmin.f32 %v8318_v21, 0.9999999 }
0x1ff6   : > { %8317 = vst [vmem:[%s1124_s22] sm:$0xff] %v8315_v15  ;;  %v8321_v32 = vmin.f32 %v8319_v30, 0.9999999 }
0x1ff7   : > { %9366 = vlog2.f32 %v8320_v13  ;;  %v8333_v46 = vsub.f32 1.0, %v8320_v13 }
0x1ff8   : > { %9368 = vlog2.f32 %v8321_v32  ;;  %v8334_v34 = vsub.f32 1.0, %v8321_v32 }
0x1ff9   : > { %9370 = vlog2.f32 %v8333_v46 }
0x1ffa   : > { %9372 = vlog2.f32 %v8334_v34 }
0x2001   : > { %v9367_v3 = vpop.eup %9366 }
0x2002   : > { %v9369_v31 = vpop.eup %9368  ;;  %v8324_v41 = vmul.f32 0.6931472, %v9367_v3 }
0x2003   : > { %v9371_v0 = vpop.eup %9370  ;;  %v8326_v35 = vmul.f32 0.6931472, %v9369_v31 }
0x2004   : > { %v9373_v42 = vpop.eup %9372  ;;  %v8336_v9 = vmul.f32 0.6931472, %v9371_v0 }
0x2005   : > { %v8329_v25 = vcombine.low %v8324_v41, %v8326_v35  ;;  %v8338_v29 = vmul.f32 0.6931472, %v9373_v42 }
0x2007   : > { %v8341_v55 = vcombine.low %v8336_v9, %v8338_v29  ;;  %v8331_v1 = vmul.f32 %v8329_v25, %v8322_v58 }
0x2009   : > { %v8343_v61 = vmul.f32 %v8341_v55, %v8332_v43 }
0x200b   : > { %v8344_v20 = vadd.f32 %v8343_v61, %v8331_v1 }
0x200d   : > { %v8345_v56 = vsub.f32 0.0, %v8344_v20 }
0x200f   : > { %v8359_v33 = vmul.f32 %v8357_v52, %v8345_v56 }
0x2011   : > { %v8371_v36 = vmul.f32 %v8369_v11, %v8359_v33 }
0x2013   : > { %v8373_v60 = vcombine.high %v8371_v36, %v8371_v36  ;;  %v8375_v40 = vsel %vm1671_vm14, %v8371_v36, 0.0 }
0x2015   : > { %v8376_v45 = vsel %vm1671_vm14, %v8373_v60, 0.0 }
0x2016   : > { %v8377_v37 = vadd.f32 %v8376_v45, %v8375_v40 }
0x2018   : > { %8378 = vadd.xlane.f32.xlu0 %v8377_v37 }
0x20a5   : > { %v8379_v47 = vpop.xlane.xlu0 %8378 }
0x20a6   : > { %v8380_v17 = vsel %vm1671_vm14, %v8379_v47, 0.0 }
0x20a7   : > { %v8381_v27 = vrot.slane %v8380_v17, 4 }
0x20a9   : > { %v8382_v6 = vadd.f32 %v8381_v27, %v8380_v17 }
0x20ab   : > { %v8383_v14 = vrot.slane %v8382_v6, 2 }
0x20ad   : > { %v8384_v53 = vadd.f32 %v8383_v14, %v8382_v6 }
0x20af   : > { %v8385_v12 = vrot.slane %v8384_v53, 1 }
0x20b1   : > { %v8386_v54 = vadd.f32 %v8385_v12, %v8384_v53 }
0x20b3   : > { %8388 = vst.msk [vmem:[%s1127_s0] sm:$0x1] %vm8387_vm6, %v8386_v54 }
0x20b4 PF: > { %s84_s28 = sadd.s32 1, %s9380_s28  }
0x20b5   : > { %p81_p4 = scmp.ge.s32.totalorder %s84_s28, 4  }
0x20b7   :  { %83 = sbr.rel (!%p81_p4) target bundleno = 68 (0x44), region = 247 }

</bundles_post_ra>
